<compile_context>
chip_gen: v7x
topology: tpu7x:2x2x1
jax: 0.10.0
libtpu: 0.0.40
codegen_flags: <defaults>
</compile_context>

<pallas_src>
import jax
import jax.numpy as jnp
from jax import lax
from jax.experimental import pallas as pl
from jax.experimental.pallas import tpu as pltpu

BN_EPS = 1e-5


def _basic_block_kernel(x_ref, w1_ref, w2_ref, s1_ref, b1_ref, s2_ref, b2_ref,
                        out_ref, xpad_ref, mid_ref, patches_ref):
    # x_ref       : (1, H, W, C)      bf16 NHWC input block (one batch element)
    # w*_ref      : (9*C, C)          bf16 tap-major 3x3 weights
    # s*/b*       : (1, C)            f32 folded BN scale / bias
    # out_ref     : (1, H, W, C)      bf16 output block
    # xpad_ref    : (H+2, W+2, C)     bf16 padded conv1 input scratch
    # mid_ref     : (H+2, W+2, C)     bf16 padded conv2 input scratch
    # patches_ref : (H*W, 9*C)        bf16 persistent im2col buffer
    H, W, C = x_ref.shape[1], x_ref.shape[2], x_ref.shape[3]

    def zero_halo(pref):
        # Only the 1-wide frame needs zeroing; the interior is fully
        # overwritten below.  Redone every grid step so it stays correct on
        # every TensorCore under "parallel" batch sharding (per-core scratch
        # VMEM starts stale); it is only O(H+W) small stores.
        zrow = jnp.zeros((1, W + 2, C), jnp.bfloat16)
        zcol = jnp.zeros((H, 1, C), jnp.bfloat16)
        pref[0:1, :, :] = zrow
        pref[H + 1:H + 2, :, :] = zrow
        pref[1:H + 1, 0:1, :] = zcol
        pref[1:H + 1, W + 1:W + 2, :] = zcol

    def conv3x3(src_ref, w_ref):
        # im2col: each of the 9 tap slabs is a Ref-sliced (H, W, C) bf16 window
        # of the padded buffer, written directly into its lane-aligned column
        # band of the persistent patches scratch, then a single
        # (H*W, 9C) @ (9C, C) MXU matmul with f32 accumulation.
        for kh in range(3):
            for kw in range(3):
                t = kh * 3 + kw
                slab = src_ref[kh:kh + H, kw:kw + W, :]        # (H, W, C) bf16
                patches_ref[:, t * C:(t + 1) * C] = slab.reshape(H * W, C)
        return jnp.dot(patches_ref[...], w_ref[...],
                       preferred_element_type=jnp.float32)     # (H*W, C) f32

    # conv1 padded input: zero frame + bf16 interior straight from the input.
    zero_halo(xpad_ref)
    xpad_ref[1:H + 1, 1:W + 1, :] = x_ref[0]

    # conv1 -> bn1 (folded) -> relu (f32 math on the matmul result only).
    out1 = jnp.maximum(conv3x3(xpad_ref, w1_ref) * s1_ref[...] + b1_ref[...],
                       0.0)

    # conv2 padded input (halo zeroing deferred until after conv1's matmul so
    # it can overlap with the conv1 work instead of sitting on the critical
    # path before any MXU op).
    zero_halo(mid_ref)
    mid_ref[1:H + 1, 1:W + 1, :] = out1.reshape(H, W, C).astype(jnp.bfloat16)

    # conv2 -> bn2 (folded) -> + identity residual -> relu.  The residual is
    # re-read from the resident input block here rather than kept live across
    # both convs.
    out2 = conv3x3(mid_ref, w2_ref) * s2_ref[...] + b2_ref[...]
    residual = x_ref[0].reshape(H * W, C).astype(jnp.float32)
    out = jnp.maximum(out2 + residual, 0.0)

    # C is a multiple of 128 -> fully lane-dense (unmasked) bf16 stores.
    out_ref[0, :, :, :] = out.reshape(H, W, C).astype(out_ref.dtype)


def _fold_bn(gamma, beta, mean, var):
    scale = gamma / jnp.sqrt(var + BN_EPS)
    bias = beta - mean * scale
    return (scale.reshape(1, -1).astype(jnp.float32),
            bias.reshape(1, -1).astype(jnp.float32))


def prepare_params(params):
    """One-time (hoisted) parameter preparation for the kernel.

    Packs PyTorch-layout (Cout, Cin, 3, 3) conv weights into tap-major
    (9*Cin, Cout) bf16 matrices (row = (kh*3+kw)*Cin + cin, matching the
    kernel's im2col column order) and folds eval-mode BatchNorm into
    per-channel f32 scale/bias.  Call once, not per forward.
    """
    C = params["w1"].shape[0]

    def pack(w):
        return jnp.transpose(w, (2, 3, 1, 0)).reshape(9 * C, C).astype(
            jnp.bfloat16)

    s1, b1 = _fold_bn(params["gamma1"], params["beta1"],
                      params["mean1"], params["var1"])
    s2, b2 = _fold_bn(params["gamma2"], params["beta2"],
                      params["mean2"], params["var2"])
    return {"w1": pack(params["w1"]), "w2": pack(params["w2"]),
            "s1": s1, "b1": b1, "s2": s2, "b2": b2}


def basic_block_forward(x_nhwc, prep):
    """Pallas BasicBlock forward, NHWC/bf16 end-to-end.

    x_nhwc: (N, H, W, C) bfloat16.  Returns (N, H, W, C) bfloat16.
    """
    N, H, W, C = x_nhwc.shape
    assert x_nhwc.dtype == jnp.bfloat16, "kernel expects bf16 NHWC activations"
    assert C % 128 == 0, "channels must be lane-dense (multiple of 128)"

    # Weights / BN vectors have constant index_maps, so the Pallas pipeline
    # fetches them once and skips the re-DMA on subsequent grid steps.
    return pl.pallas_call(
        _basic_block_kernel,
        out_shape=jax.ShapeDtypeStruct((N, H, W, C), jnp.bfloat16),
        grid=(N,),
        in_specs=[
            pl.BlockSpec((1, H, W, C), lambda n: (n, 0, 0, 0)),   # x (bf16)
            pl.BlockSpec((9 * C, C), lambda n: (0, 0)),           # w1 (bf16)
            pl.BlockSpec((9 * C, C), lambda n: (0, 0)),           # w2 (bf16)
            pl.BlockSpec((1, C), lambda n: (0, 0)),               # s1 (f32)
            pl.BlockSpec((1, C), lambda n: (0, 0)),               # b1 (f32)
            pl.BlockSpec((1, C), lambda n: (0, 0)),               # s2 (f32)
            pl.BlockSpec((1, C), lambda n: (0, 0)),               # b2 (f32)
        ],
        out_specs=pl.BlockSpec((1, H, W, C), lambda n: (n, 0, 0, 0)),
        scratch_shapes=[
            pltpu.VMEM((H + 2, W + 2, C), jnp.bfloat16),   # padded conv1 input
            pltpu.VMEM((H + 2, W + 2, C), jnp.bfloat16),   # padded conv2 input
            pltpu.VMEM((H * W, 9 * C), jnp.bfloat16),      # im2col patches
        ],
        compiler_params=pltpu.CompilerParams(
            dimension_semantics=("parallel",),             # batch is independent
            vmem_limit_bytes=32 * 1024 * 1024),
    )(x_nhwc, prep["w1"], prep["w2"], prep["s1"], prep["b1"],
      prep["s2"], prep["b2"])


def _reference_forward(x_nchw, params):
    """Pure-JAX f32 reference mirroring the PyTorch module (eval-mode BN)."""
    def conv(x, w):
        return lax.conv_general_dilated(
            x, w, window_strides=(1, 1), padding=((1, 1), (1, 1)),
            dimension_numbers=("NCHW", "OIHW", "NCHW"),
            precision=lax.Precision.HIGHEST)

    def bn(x, g, b, m, v):
        return (x - m[None, :, None, None]) / jnp.sqrt(
            v[None, :, None, None] + BN_EPS) * g[None, :, None, None] \
            + b[None, :, None, None]

    residual = x_nchw
    out = conv(x_nchw, params["w1"])
    out = bn(out, params["gamma1"], params["beta1"],
             params["mean1"], params["var1"])
    out = jnp.maximum(out, 0.0)
    out = conv(out, params["w2"])
    out = bn(out, params["gamma2"], params["beta2"],
             params["mean2"], params["var2"])
    out = out + residual
    return jnp.maximum(out, 0.0)


def _make_params(key, planes):
    ks = jax.random.split(key, 10)
    w_std = (2.0 / (9 * planes)) ** 0.5   # He-style init scale
    return {
        "w1": jax.random.normal(ks[0], (planes, planes, 3, 3), jnp.float32) * w_std,
        "w2": jax.random.normal(ks[1], (planes, planes, 3, 3), jnp.float32) * w_std,
        "gamma1": jax.random.uniform(ks[2], (planes,), jnp.float32, 0.5, 1.5),
        "beta1": jax.random.normal(ks[3], (planes,), jnp.float32) * 0.1,
        "mean1": jax.random.normal(ks[4], (planes,), jnp.float32) * 0.1,
        "var1": jax.random.uniform(ks[5], (planes,), jnp.float32, 0.5, 1.5),
        "gamma2": jax.random.uniform(ks[6], (planes,), jnp.float32, 0.5, 1.5),
        "beta2": jax.random.normal(ks[7], (planes,), jnp.float32) * 0.1,
        "mean2": jax.random.normal(ks[8], (planes,), jnp.float32) * 0.1,
        "var2": jax.random.uniform(ks[9], (planes,), jnp.float32, 0.5, 1.5),
    }


if __name__ == "__main__":
    # inplanes == planes == 128 (a real BasicBlock width), stride=1, atrous=1.
    N, C, H, W = 2, 128, 16, 16

    key = jax.random.PRNGKey(0)
    k_x, k_p = jax.random.split(key)
    x_nchw = jax.random.normal(k_x, (N, C, H, W), jnp.float32)
    params = _make_params(k_p, C)

    # One-time parameter prep (weight repack + BN fold) hoisted out of the
    # forward; the layer itself is NHWC/bf16 end-to-end, so there are no
    # per-call NCHW<->NHWC transposes inside basic_block_forward.
    prep = prepare_params(params)
    x_nhwc = jnp.transpose(x_nchw, (0, 2, 3, 1)).astype(jnp.bfloat16)

    fwd = jax.jit(basic_block_forward)
    out_nhwc = jax.block_until_ready(fwd(x_nhwc, prep))

    ref_nchw = jax.block_until_ready(_reference_forward(x_nchw, params))
    out_nchw = jnp.transpose(out_nhwc.astype(jnp.float32), (0, 3, 1, 2))

    assert out_nchw.shape == ref_nchw.shape == (N, C, H, W)
    # Tolerance sized for bf16 MXU operands + bf16 activation storage (f32
    # accumulation and f32 BN/residual math) vs an f32 HIGHEST-precision
    # reference.
    max_err = float(jnp.max(jnp.abs(out_nchw - ref_nchw)))
    assert jnp.allclose(out_nchw, ref_nchw, atol=1e-1, rtol=5e-2), max_err

    print("KERNEL_OK")
</pallas_src>

<mosaic_0001>
module attributes {stable_mosaic.version = 11 : i64} {
  func.func @_basic_block_kernel(%arg0: i32, %arg1: memref<1x16x16x128xbf16, #tpu.memory_space<vmem>>, %arg2: memref<1152x128xbf16, #tpu.memory_space<vmem>>, %arg3: memref<1152x128xbf16, #tpu.memory_space<vmem>>, %arg4: memref<1x128xf32, #tpu.memory_space<vmem>>, %arg5: memref<1x128xf32, #tpu.memory_space<vmem>>, %arg6: memref<1x128xf32, #tpu.memory_space<vmem>>, %arg7: memref<1x128xf32, #tpu.memory_space<vmem>>, %arg8: memref<1x16x16x128xbf16, #tpu.memory_space<vmem>>, %arg9: memref<18x18x128xbf16, #tpu.memory_space<vmem>>, %arg10: memref<18x18x128xbf16, #tpu.memory_space<vmem>>, %arg11: memref<256x1152xbf16, #tpu.memory_space<vmem>>) attributes {dimension_semantics = [#tpu.dimension_semantics<parallel>], iteration_bounds = array<i64: 2>, scalar_prefetch = 0 : i64, scratch_operands = 3 : i64, tpu.core_type = #tpu.core_type<tc>, window_params = [{transform_indices = @transform_0, window_bounds = array<i64: 1, 16, 16, 128>}, {pipeline_mode = #tpu.pipeline_mode<synchronous>, transform_indices = @transform_1, window_bounds = array<i64: 1152, 128>}, {pipeline_mode = #tpu.pipeline_mode<synchronous>, transform_indices = @transform_2, window_bounds = array<i64: 1152, 128>}, {pipeline_mode = #tpu.pipeline_mode<synchronous>, transform_indices = @transform_3, window_bounds = array<i64: 1, 128>}, {pipeline_mode = #tpu.pipeline_mode<synchronous>, transform_indices = @transform_4, window_bounds = array<i64: 1, 128>}, {pipeline_mode = #tpu.pipeline_mode<synchronous>, transform_indices = @transform_5, window_bounds = array<i64: 1, 128>}, {pipeline_mode = #tpu.pipeline_mode<synchronous>, transform_indices = @transform_6, window_bounds = array<i64: 1, 128>}, {transform_indices = @transform_7, window_bounds = array<i64: 1, 16, 16, 128>}]} {
    %cst = arith.constant 0.000000e+00 : bf16
    %0 = vector.broadcast %cst : bf16 to vector<1x18x128xbf16>
    %cst_0 = arith.constant 0.000000e+00 : bf16
    %1 = vector.broadcast %cst_0 : bf16 to vector<16x1x128xbf16>
    %c0 = arith.constant 0 : index
    %c0_1 = arith.constant 0 : index
    %c0_2 = arith.constant 0 : index
    %2 = vector.load %arg9[%c0, %c0_1, %c0_2] : memref<18x18x128xbf16, #tpu.memory_space<vmem>>, vector<1x18x128xbf16>
    tpu.vector_store %arg9[%c0, %c0_1, %c0_2], %0 {strides = array<i32>} : memref<18x18x128xbf16, #tpu.memory_space<vmem>>, vector<1x18x128xbf16>,
    %c17 = arith.constant 17 : index
    %c0_3 = arith.constant 0 : index
    %c0_4 = arith.constant 0 : index
    %3 = vector.load %arg9[%c17, %c0_3, %c0_4] : memref<18x18x128xbf16, #tpu.memory_space<vmem>>, vector<1x18x128xbf16>
    tpu.vector_store %arg9[%c17, %c0_3, %c0_4], %0 {strides = array<i32>} : memref<18x18x128xbf16, #tpu.memory_space<vmem>>, vector<1x18x128xbf16>,
    %c1 = arith.constant 1 : index
    %c0_5 = arith.constant 0 : index
    %c0_6 = arith.constant 0 : index
    %4 = vector.load %arg9[%c1, %c0_5, %c0_6] : memref<18x18x128xbf16, #tpu.memory_space<vmem>>, vector<16x1x128xbf16>
    tpu.vector_store %arg9[%c1, %c0_5, %c0_6], %1 {strides = array<i32>} : memref<18x18x128xbf16, #tpu.memory_space<vmem>>, vector<16x1x128xbf16>,
    %c1_7 = arith.constant 1 : index
    %c17_8 = arith.constant 17 : index
    %c0_9 = arith.constant 0 : index
    %5 = vector.load %arg9[%c1_7, %c17_8, %c0_9] : memref<18x18x128xbf16, #tpu.memory_space<vmem>>, vector<16x1x128xbf16>
    tpu.vector_store %arg9[%c1_7, %c17_8, %c0_9], %1 {strides = array<i32>} : memref<18x18x128xbf16, #tpu.memory_space<vmem>>, vector<16x1x128xbf16>,
    %c0_10 = arith.constant 0 : index
    %c0_11 = arith.constant 0 : index
    %c0_12 = arith.constant 0 : index
    %c0_13 = arith.constant 0 : index
    %6 = vector.load %arg1[%c0_10, %c0_11, %c0_12, %c0_13] : memref<1x16x16x128xbf16, #tpu.memory_space<vmem>>, vector<1x16x16x128xbf16>
    %7 = vector.shape_cast %6 : vector<1x16x16x128xbf16> to vector<16x16x128xbf16>
    %c1_14 = arith.constant 1 : index
    %c1_15 = arith.constant 1 : index
    %c0_16 = arith.constant 0 : index
    %8 = vector.load %arg9[%c1_14, %c1_15, %c0_16] : memref<18x18x128xbf16, #tpu.memory_space<vmem>>, vector<16x16x128xbf16>
    tpu.vector_store %arg9[%c1_14, %c1_15, %c0_16], %7 {strides = array<i32>} : memref<18x18x128xbf16, #tpu.memory_space<vmem>>, vector<16x16x128xbf16>,
    %c0_17 = arith.constant 0 : index
    %c0_18 = arith.constant 0 : index
    %c0_19 = arith.constant 0 : index
    %9 = vector.load %arg9[%c0_17, %c0_18, %c0_19] : memref<18x18x128xbf16, #tpu.memory_space<vmem>>, vector<16x16x128xbf16>
    %10 = vector.shape_cast %9 : vector<16x16x128xbf16> to vector<256x128xbf16>
    %c0_20 = arith.constant 0 : index
    %c0_21 = arith.constant 0 : index
    %11 = vector.load %arg11[%c0_20, %c0_21] : memref<256x1152xbf16, #tpu.memory_space<vmem>>, vector<256x128xbf16>
    tpu.vector_store %arg11[%c0_20, %c0_21], %10 {strides = array<i32>} : memref<256x1152xbf16, #tpu.memory_space<vmem>>, vector<256x128xbf16>,
    %c0_22 = arith.constant 0 : index
    %c1_23 = arith.constant 1 : index
    %c0_24 = arith.constant 0 : index
    %12 = vector.load %arg9[%c0_22, %c1_23, %c0_24] : memref<18x18x128xbf16, #tpu.memory_space<vmem>>, vector<16x16x128xbf16>
    %13 = vector.shape_cast %12 : vector<16x16x128xbf16> to vector<256x128xbf16>
    %c0_25 = arith.constant 0 : index
    %c128 = arith.constant 128 : index
    %14 = vector.load %arg11[%c0_25, %c128] : memref<256x1152xbf16, #tpu.memory_space<vmem>>, vector<256x128xbf16>
    tpu.vector_store %arg11[%c0_25, %c128], %13 {strides = array<i32>} : memref<256x1152xbf16, #tpu.memory_space<vmem>>, vector<256x128xbf16>,
    %c0_26 = arith.constant 0 : index
    %c2 = arith.constant 2 : index
    %c0_27 = arith.constant 0 : index
    %15 = vector.load %arg9[%c0_26, %c2, %c0_27] : memref<18x18x128xbf16, #tpu.memory_space<vmem>>, vector<16x16x128xbf16>
    %16 = vector.shape_cast %15 : vector<16x16x128xbf16> to vector<256x128xbf16>
    %c0_28 = arith.constant 0 : index
    %c256 = arith.constant 256 : index
    %17 = vector.load %arg11[%c0_28, %c256] : memref<256x1152xbf16, #tpu.memory_space<vmem>>, vector<256x128xbf16>
    tpu.vector_store %arg11[%c0_28, %c256], %16 {strides = array<i32>} : memref<256x1152xbf16, #tpu.memory_space<vmem>>, vector<256x128xbf16>,
    %c1_29 = arith.constant 1 : index
    %c0_30 = arith.constant 0 : index
    %c0_31 = arith.constant 0 : index
    %18 = vector.load %arg9[%c1_29, %c0_30, %c0_31] : memref<18x18x128xbf16, #tpu.memory_space<vmem>>, vector<16x16x128xbf16>
    %19 = vector.shape_cast %18 : vector<16x16x128xbf16> to vector<256x128xbf16>
    %c0_32 = arith.constant 0 : index
    %c384 = arith.constant 384 : index
    %20 = vector.load %arg11[%c0_32, %c384] : memref<256x1152xbf16, #tpu.memory_space<vmem>>, vector<256x128xbf16>
    tpu.vector_store %arg11[%c0_32, %c384], %19 {strides = array<i32>} : memref<256x1152xbf16, #tpu.memory_space<vmem>>, vector<256x128xbf16>,
    %c1_33 = arith.constant 1 : index
    %c1_34 = arith.constant 1 : index
    %c0_35 = arith.constant 0 : index
    %21 = vector.load %arg9[%c1_33, %c1_34, %c0_35] : memref<18x18x128xbf16, #tpu.memory_space<vmem>>, vector<16x16x128xbf16>
    %22 = vector.shape_cast %21 : vector<16x16x128xbf16> to vector<256x128xbf16>
    %c0_36 = arith.constant 0 : index
    %c512 = arith.constant 512 : index
    %23 = vector.load %arg11[%c0_36, %c512] : memref<256x1152xbf16, #tpu.memory_space<vmem>>, vector<256x128xbf16>
    tpu.vector_store %arg11[%c0_36, %c512], %22 {strides = array<i32>} : memref<256x1152xbf16, #tpu.memory_space<vmem>>, vector<256x128xbf16>,
    %c1_37 = arith.constant 1 : index
    %c2_38 = arith.constant 2 : index
    %c0_39 = arith.constant 0 : index
    %24 = vector.load %arg9[%c1_37, %c2_38, %c0_39] : memref<18x18x128xbf16, #tpu.memory_space<vmem>>, vector<16x16x128xbf16>
    %25 = vector.shape_cast %24 : vector<16x16x128xbf16> to vector<256x128xbf16>
    %c0_40 = arith.constant 0 : index
    %c640 = arith.constant 640 : index
    %26 = vector.load %arg11[%c0_40, %c640] : memref<256x1152xbf16, #tpu.memory_space<vmem>>, vector<256x128xbf16>
    tpu.vector_store %arg11[%c0_40, %c640], %25 {strides = array<i32>} : memref<256x1152xbf16, #tpu.memory_space<vmem>>, vector<256x128xbf16>,
    %c2_41 = arith.constant 2 : index
    %c0_42 = arith.constant 0 : index
    %c0_43 = arith.constant 0 : index
    %27 = vector.load %arg9[%c2_41, %c0_42, %c0_43] : memref<18x18x128xbf16, #tpu.memory_space<vmem>>, vector<16x16x128xbf16>
    %28 = vector.shape_cast %27 : vector<16x16x128xbf16> to vector<256x128xbf16>
    %c0_44 = arith.constant 0 : index
    %c768 = arith.constant 768 : index
    %29 = vector.load %arg11[%c0_44, %c768] : memref<256x1152xbf16, #tpu.memory_space<vmem>>, vector<256x128xbf16>
    tpu.vector_store %arg11[%c0_44, %c768], %28 {strides = array<i32>} : memref<256x1152xbf16, #tpu.memory_space<vmem>>, vector<256x128xbf16>,
    %c2_45 = arith.constant 2 : index
    %c1_46 = arith.constant 1 : index
    %c0_47 = arith.constant 0 : index
    %30 = vector.load %arg9[%c2_45, %c1_46, %c0_47] : memref<18x18x128xbf16, #tpu.memory_space<vmem>>, vector<16x16x128xbf16>
    %31 = vector.shape_cast %30 : vector<16x16x128xbf16> to vector<256x128xbf16>
    %c0_48 = arith.constant 0 : index
    %c896 = arith.constant 896 : index
    %32 = vector.load %arg11[%c0_48, %c896] : memref<256x1152xbf16, #tpu.memory_space<vmem>>, vector<256x128xbf16>
    tpu.vector_store %arg11[%c0_48, %c896], %31 {strides = array<i32>} : memref<256x1152xbf16, #tpu.memory_space<vmem>>, vector<256x128xbf16>,
    %c2_49 = arith.constant 2 : index
    %c2_50 = arith.constant 2 : index
    %c0_51 = arith.constant 0 : index
    %33 = vector.load %arg9[%c2_49, %c2_50, %c0_51] : memref<18x18x128xbf16, #tpu.memory_space<vmem>>, vector<16x16x128xbf16>
    %34 = vector.shape_cast %33 : vector<16x16x128xbf16> to vector<256x128xbf16>
    %c0_52 = arith.constant 0 : index
    %c1024 = arith.constant 1024 : index
    %35 = vector.load %arg11[%c0_52, %c1024] : memref<256x1152xbf16, #tpu.memory_space<vmem>>, vector<256x128xbf16>
    tpu.vector_store %arg11[%c0_52, %c1024], %34 {strides = array<i32>} : memref<256x1152xbf16, #tpu.memory_space<vmem>>, vector<256x128xbf16>,
    %c0_53 = arith.constant 0 : index
    %c0_54 = arith.constant 0 : index
    %36 = vector.load %arg11[%c0_53, %c0_54] : memref<256x1152xbf16, #tpu.memory_space<vmem>>, vector<256x1152xbf16>
    %c0_55 = arith.constant 0 : index
    %c0_56 = arith.constant 0 : index
    %37 = vector.load %arg2[%c0_55, %c0_56] : memref<1152x128xbf16, #tpu.memory_space<vmem>>, vector<1152x128xbf16>
    %cst_57 = arith.constant dense<0.000000e+00> : vector<256x128xf32>
    %38 = tpu.matmul %36, %37, %cst_57 {dimension_numbers = #tpu.dot_dimension_numbers<[1], [0], [0], [1], [0, 0, 1, 1], [], []>} : vector<256x1152xbf16>, vector<1152x128xbf16>, vector<256x128xf32> -> vector<256x128xf32>
    %c0_58 = arith.constant 0 : index
    %c0_59 = arith.constant 0 : index
    %39 = vector.load %arg4[%c0_58, %c0_59] : memref<1x128xf32, #tpu.memory_space<vmem>>, vector<1x128xf32>
    %40 = vector.broadcast %39 : vector<1x128xf32> to vector<256x128xf32>
    %41 = arith.mulf %38, %40 : vector<256x128xf32>
    %c0_60 = arith.constant 0 : index
    %c0_61 = arith.constant 0 : index
    %42 = vector.load %arg5[%c0_60, %c0_61] : memref<1x128xf32, #tpu.memory_space<vmem>>, vector<1x128xf32>
    %43 = vector.broadcast %42 : vector<1x128xf32> to vector<256x128xf32>
    %44 = arith.addf %41, %43 : vector<256x128xf32>
    %cst_62 = arith.constant 0.000000e+00 : f32
    %45 = vector.broadcast %cst_62 : f32 to vector<256x128xf32>
    %46 = arith.maximumf %44, %45 : vector<256x128xf32>
    %cst_63 = arith.constant 0.000000e+00 : bf16
    %47 = vector.broadcast %cst_63 : bf16 to vector<1x18x128xbf16>
    %cst_64 = arith.constant 0.000000e+00 : bf16
    %48 = vector.broadcast %cst_64 : bf16 to vector<16x1x128xbf16>
    %c0_65 = arith.constant 0 : index
    %c0_66 = arith.constant 0 : index
    %c0_67 = arith.constant 0 : index
    %49 = vector.load %arg10[%c0_65, %c0_66, %c0_67] : memref<18x18x128xbf16, #tpu.memory_space<vmem>>, vector<1x18x128xbf16>
    tpu.vector_store %arg10[%c0_65, %c0_66, %c0_67], %47 {strides = array<i32>} : memref<18x18x128xbf16, #tpu.memory_space<vmem>>, vector<1x18x128xbf16>,
    %c17_68 = arith.constant 17 : index
    %c0_69 = arith.constant 0 : index
    %c0_70 = arith.constant 0 : index
    %50 = vector.load %arg10[%c17_68, %c0_69, %c0_70] : memref<18x18x128xbf16, #tpu.memory_space<vmem>>, vector<1x18x128xbf16>
    tpu.vector_store %arg10[%c17_68, %c0_69, %c0_70], %47 {strides = array<i32>} : memref<18x18x128xbf16, #tpu.memory_space<vmem>>, vector<1x18x128xbf16>,
    %c1_71 = arith.constant 1 : index
    %c0_72 = arith.constant 0 : index
    %c0_73 = arith.constant 0 : index
    %51 = vector.load %arg10[%c1_71, %c0_72, %c0_73] : memref<18x18x128xbf16, #tpu.memory_space<vmem>>, vector<16x1x128xbf16>
    tpu.vector_store %arg10[%c1_71, %c0_72, %c0_73], %48 {strides = array<i32>} : memref<18x18x128xbf16, #tpu.memory_space<vmem>>, vector<16x1x128xbf16>,
    %c1_74 = arith.constant 1 : index
    %c17_75 = arith.constant 17 : index
    %c0_76 = arith.constant 0 : index
    %52 = vector.load %arg10[%c1_74, %c17_75, %c0_76] : memref<18x18x128xbf16, #tpu.memory_space<vmem>>, vector<16x1x128xbf16>
    tpu.vector_store %arg10[%c1_74, %c17_75, %c0_76], %48 {strides = array<i32>} : memref<18x18x128xbf16, #tpu.memory_space<vmem>>, vector<16x1x128xbf16>,
    %53 = vector.shape_cast %46 : vector<256x128xf32> to vector<16x16x128xf32>
    %54 = arith.truncf %53 : vector<16x16x128xf32> to vector<16x16x128xbf16>
    %c1_77 = arith.constant 1 : index
    %c1_78 = arith.constant 1 : index
    %c0_79 = arith.constant 0 : index
    %55 = vector.load %arg10[%c1_77, %c1_78, %c0_79] : memref<18x18x128xbf16, #tpu.memory_space<vmem>>, vector<16x16x128xbf16>
    tpu.vector_store %arg10[%c1_77, %c1_78, %c0_79], %54 {strides = array<i32>} : memref<18x18x128xbf16, #tpu.memory_space<vmem>>, vector<16x16x128xbf16>,
    %c0_80 = arith.constant 0 : index
    %c0_81 = arith.constant 0 : index
    %c0_82 = arith.constant 0 : index
    %56 = vector.load %arg10[%c0_80, %c0_81, %c0_82] : memref<18x18x128xbf16, #tpu.memory_space<vmem>>, vector<16x16x128xbf16>
    %57 = vector.shape_cast %56 : vector<16x16x128xbf16> to vector<256x128xbf16>
    %c0_83 = arith.constant 0 : index
    %c0_84 = arith.constant 0 : index
    %58 = vector.load %arg11[%c0_83, %c0_84] : memref<256x1152xbf16, #tpu.memory_space<vmem>>, vector<256x128xbf16>
    tpu.vector_store %arg11[%c0_83, %c0_84], %57 {strides = array<i32>} : memref<256x1152xbf16, #tpu.memory_space<vmem>>, vector<256x128xbf16>,
    %c0_85 = arith.constant 0 : index
    %c1_86 = arith.constant 1 : index
    %c0_87 = arith.constant 0 : index
    %59 = vector.load %arg10[%c0_85, %c1_86, %c0_87] : memref<18x18x128xbf16, #tpu.memory_space<vmem>>, vector<16x16x128xbf16>
    %60 = vector.shape_cast %59 : vector<16x16x128xbf16> to vector<256x128xbf16>
    %c0_88 = arith.constant 0 : index
    %c128_89 = arith.constant 128 : index
    %61 = vector.load %arg11[%c0_88, %c128_89] : memref<256x1152xbf16, #tpu.memory_space<vmem>>, vector<256x128xbf16>
    tpu.vector_store %arg11[%c0_88, %c128_89], %60 {strides = array<i32>} : memref<256x1152xbf16, #tpu.memory_space<vmem>>, vector<256x128xbf16>,
    %c0_90 = arith.constant 0 : index
    %c2_91 = arith.constant 2 : index
    %c0_92 = arith.constant 0 : index
    %62 = vector.load %arg10[%c0_90, %c2_91, %c0_92] : memref<18x18x128xbf16, #tpu.memory_space<vmem>>, vector<16x16x128xbf16>
    %63 = vector.shape_cast %62 : vector<16x16x128xbf16> to vector<256x128xbf16>
    %c0_93 = arith.constant 0 : index
    %c256_94 = arith.constant 256 : index
    %64 = vector.load %arg11[%c0_93, %c256_94] : memref<256x1152xbf16, #tpu.memory_space<vmem>>, vector<256x128xbf16>
    tpu.vector_store %arg11[%c0_93, %c256_94], %63 {strides = array<i32>} : memref<256x1152xbf16, #tpu.memory_space<vmem>>, vector<256x128xbf16>,
    %c1_95 = arith.constant 1 : index
    %c0_96 = arith.constant 0 : index
    %c0_97 = arith.constant 0 : index
    %65 = vector.load %arg10[%c1_95, %c0_96, %c0_97] : memref<18x18x128xbf16, #tpu.memory_space<vmem>>, vector<16x16x128xbf16>
    %66 = vector.shape_cast %65 : vector<16x16x128xbf16> to vector<256x128xbf16>
    %c0_98 = arith.constant 0 : index
    %c384_99 = arith.constant 384 : index
    %67 = vector.load %arg11[%c0_98, %c384_99] : memref<256x1152xbf16, #tpu.memory_space<vmem>>, vector<256x128xbf16>
    tpu.vector_store %arg11[%c0_98, %c384_99], %66 {strides = array<i32>} : memref<256x1152xbf16, #tpu.memory_space<vmem>>, vector<256x128xbf16>,
    %c1_100 = arith.constant 1 : index
    %c1_101 = arith.constant 1 : index
    %c0_102 = arith.constant 0 : index
    %68 = vector.load %arg10[%c1_100, %c1_101, %c0_102] : memref<18x18x128xbf16, #tpu.memory_space<vmem>>, vector<16x16x128xbf16>
    %69 = vector.shape_cast %68 : vector<16x16x128xbf16> to vector<256x128xbf16>
    %c0_103 = arith.constant 0 : index
    %c512_104 = arith.constant 512 : index
    %70 = vector.load %arg11[%c0_103, %c512_104] : memref<256x1152xbf16, #tpu.memory_space<vmem>>, vector<256x128xbf16>
    tpu.vector_store %arg11[%c0_103, %c512_104], %69 {strides = array<i32>} : memref<256x1152xbf16, #tpu.memory_space<vmem>>, vector<256x128xbf16>,
    %c1_105 = arith.constant 1 : index
    %c2_106 = arith.constant 2 : index
    %c0_107 = arith.constant 0 : index
    %71 = vector.load %arg10[%c1_105, %c2_106, %c0_107] : memref<18x18x128xbf16, #tpu.memory_space<vmem>>, vector<16x16x128xbf16>
    %72 = vector.shape_cast %71 : vector<16x16x128xbf16> to vector<256x128xbf16>
    %c0_108 = arith.constant 0 : index
    %c640_109 = arith.constant 640 : index
    %73 = vector.load %arg11[%c0_108, %c640_109] : memref<256x1152xbf16, #tpu.memory_space<vmem>>, vector<256x128xbf16>
    tpu.vector_store %arg11[%c0_108, %c640_109], %72 {strides = array<i32>} : memref<256x1152xbf16, #tpu.memory_space<vmem>>, vector<256x128xbf16>,
    %c2_110 = arith.constant 2 : index
    %c0_111 = arith.constant 0 : index
    %c0_112 = arith.constant 0 : index
    %74 = vector.load %arg10[%c2_110, %c0_111, %c0_112] : memref<18x18x128xbf16, #tpu.memory_space<vmem>>, vector<16x16x128xbf16>
    %75 = vector.shape_cast %74 : vector<16x16x128xbf16> to vector<256x128xbf16>
    %c0_113 = arith.constant 0 : index
    %c768_114 = arith.constant 768 : index
    %76 = vector.load %arg11[%c0_113, %c768_114] : memref<256x1152xbf16, #tpu.memory_space<vmem>>, vector<256x128xbf16>
    tpu.vector_store %arg11[%c0_113, %c768_114], %75 {strides = array<i32>} : memref<256x1152xbf16, #tpu.memory_space<vmem>>, vector<256x128xbf16>,
    %c2_115 = arith.constant 2 : index
    %c1_116 = arith.constant 1 : index
    %c0_117 = arith.constant 0 : index
    %77 = vector.load %arg10[%c2_115, %c1_116, %c0_117] : memref<18x18x128xbf16, #tpu.memory_space<vmem>>, vector<16x16x128xbf16>
    %78 = vector.shape_cast %77 : vector<16x16x128xbf16> to vector<256x128xbf16>
    %c0_118 = arith.constant 0 : index
    %c896_119 = arith.constant 896 : index
    %79 = vector.load %arg11[%c0_118, %c896_119] : memref<256x1152xbf16, #tpu.memory_space<vmem>>, vector<256x128xbf16>
    tpu.vector_store %arg11[%c0_118, %c896_119], %78 {strides = array<i32>} : memref<256x1152xbf16, #tpu.memory_space<vmem>>, vector<256x128xbf16>,
    %c2_120 = arith.constant 2 : index
    %c2_121 = arith.constant 2 : index
    %c0_122 = arith.constant 0 : index
    %80 = vector.load %arg10[%c2_120, %c2_121, %c0_122] : memref<18x18x128xbf16, #tpu.memory_space<vmem>>, vector<16x16x128xbf16>
    %81 = vector.shape_cast %80 : vector<16x16x128xbf16> to vector<256x128xbf16>
    %c0_123 = arith.constant 0 : index
    %c1024_124 = arith.constant 1024 : index
    %82 = vector.load %arg11[%c0_123, %c1024_124] : memref<256x1152xbf16, #tpu.memory_space<vmem>>, vector<256x128xbf16>
    tpu.vector_store %arg11[%c0_123, %c1024_124], %81 {strides = array<i32>} : memref<256x1152xbf16, #tpu.memory_space<vmem>>, vector<256x128xbf16>,
    %c0_125 = arith.constant 0 : index
    %c0_126 = arith.constant 0 : index
    %83 = vector.load %arg11[%c0_125, %c0_126] : memref<256x1152xbf16, #tpu.memory_space<vmem>>, vector<256x1152xbf16>
    %c0_127 = arith.constant 0 : index
    %c0_128 = arith.constant 0 : index
    %84 = vector.load %arg3[%c0_127, %c0_128] : memref<1152x128xbf16, #tpu.memory_space<vmem>>, vector<1152x128xbf16>
    %cst_129 = arith.constant dense<0.000000e+00> : vector<256x128xf32>
    %85 = tpu.matmul %83, %84, %cst_129 {dimension_numbers = #tpu.dot_dimension_numbers<[1], [0], [0], [1], [0, 0, 1, 1], [], []>} : vector<256x1152xbf16>, vector<1152x128xbf16>, vector<256x128xf32> -> vector<256x128xf32>
    %c0_130 = arith.constant 0 : index
    %c0_131 = arith.constant 0 : index
    %86 = vector.load %arg6[%c0_130, %c0_131] : memref<1x128xf32, #tpu.memory_space<vmem>>, vector<1x128xf32>
    %87 = vector.broadcast %86 : vector<1x128xf32> to vector<256x128xf32>
    %88 = arith.mulf %85, %87 : vector<256x128xf32>
    %c0_132 = arith.constant 0 : index
    %c0_133 = arith.constant 0 : index
    %89 = vector.load %arg7[%c0_132, %c0_133] : memref<1x128xf32, #tpu.memory_space<vmem>>, vector<1x128xf32>
    %90 = vector.broadcast %89 : vector<1x128xf32> to vector<256x128xf32>
    %91 = arith.addf %88, %90 : vector<256x128xf32>
    %c0_134 = arith.constant 0 : index
    %c0_135 = arith.constant 0 : index
    %c0_136 = arith.constant 0 : index
    %c0_137 = arith.constant 0 : index
    %92 = vector.load %arg1[%c0_134, %c0_135, %c0_136, %c0_137] : memref<1x16x16x128xbf16, #tpu.memory_space<vmem>>, vector<1x16x16x128xbf16>
    %93 = vector.shape_cast %92 : vector<1x16x16x128xbf16> to vector<16x16x128xbf16>
    %94 = vector.shape_cast %93 : vector<16x16x128xbf16> to vector<256x128xbf16>
    %95 = arith.extf %94 : vector<256x128xbf16> to vector<256x128xf32>
    %96 = arith.addf %91, %95 : vector<256x128xf32>
    %cst_138 = arith.constant 0.000000e+00 : f32
    %97 = vector.broadcast %cst_138 : f32 to vector<256x128xf32>
    %98 = arith.maximumf %96, %97 : vector<256x128xf32>
    %99 = vector.shape_cast %98 : vector<256x128xf32> to vector<16x16x128xf32>
    %100 = arith.truncf %99 : vector<16x16x128xf32> to vector<16x16x128xbf16>
    %c0_139 = arith.constant 0 : index
    %c0_140 = arith.constant 0 : index
    %c0_141 = arith.constant 0 : index
    %c0_142 = arith.constant 0 : index
    %101 = vector.load %arg8[%c0_139, %c0_140, %c0_141, %c0_142] : memref<1x16x16x128xbf16, #tpu.memory_space<vmem>>, vector<1x16x16x128xbf16>
    %102 = vector.shape_cast %101 : vector<1x16x16x128xbf16> to vector<16x16x128xbf16>
    %103 = vector.shape_cast %100 : vector<16x16x128xbf16> to vector<1x16x16x128xbf16>
    tpu.vector_store %arg8[%c0_139, %c0_140, %c0_141, %c0_142], %103 {strides = array<i32>} : memref<1x16x16x128xbf16, #tpu.memory_space<vmem>>, vector<1x16x16x128xbf16>,
    return
  }
  func.func @transform_0(%arg0: i32) -> (i32, i32, i32, i32) {
    %c0_i32 = arith.constant 0 : i32
    %c0_i32_0 = arith.constant 0 : i32
    %c0_i32_1 = arith.constant 0 : i32
    %c0_i32_2 = arith.constant 0 : i32
    return %arg0, %c0_i32, %c0_i32_0, %c0_i32_1 : i32, i32, i32, i32
  }
  func.func @transform_1(%arg0: i32) -> (i32, i32) {
    %c0_i32 = arith.constant 0 : i32
    %c0_i32_0 = arith.constant 0 : i32
    %c0_i32_1 = arith.constant 0 : i32
    return %c0_i32, %c0_i32_0 : i32, i32
  }
  func.func @transform_2(%arg0: i32) -> (i32, i32) {
    %c0_i32 = arith.constant 0 : i32
    %c0_i32_0 = arith.constant 0 : i32
    %c0_i32_1 = arith.constant 0 : i32
    return %c0_i32, %c0_i32_0 : i32, i32
  }
  func.func @transform_3(%arg0: i32) -> (i32, i32) {
    %c0_i32 = arith.constant 0 : i32
    %c0_i32_0 = arith.constant 0 : i32
    %c0_i32_1 = arith.constant 0 : i32
    return %c0_i32, %c0_i32_0 : i32, i32
  }
  func.func @transform_4(%arg0: i32) -> (i32, i32) {
    %c0_i32 = arith.constant 0 : i32
    %c0_i32_0 = arith.constant 0 : i32
    %c0_i32_1 = arith.constant 0 : i32
    return %c0_i32, %c0_i32_0 : i32, i32
  }
  func.func @transform_5(%arg0: i32) -> (i32, i32) {
    %c0_i32 = arith.constant 0 : i32
    %c0_i32_0 = arith.constant 0 : i32
    %c0_i32_1 = arith.constant 0 : i32
    return %c0_i32, %c0_i32_0 : i32, i32
  }
  func.func @transform_6(%arg0: i32) -> (i32, i32) {
    %c0_i32 = arith.constant 0 : i32
    %c0_i32_0 = arith.constant 0 : i32
    %c0_i32_1 = arith.constant 0 : i32
    return %c0_i32, %c0_i32_0 : i32, i32
  }
  func.func @transform_7(%arg0: i32) -> (i32, i32, i32, i32) {
    %c0_i32 = arith.constant 0 : i32
    %c0_i32_0 = arith.constant 0 : i32
    %c0_i32_1 = arith.constant 0 : i32
    %c0_i32_2 = arith.constant 0 : i32
    return %arg0, %c0_i32, %c0_i32_0, %c0_i32_1 : i32, i32, i32, i32
  }
}

</mosaic_0001>

<bundles_post_ra>
// kernel: basic_block_forward.1
= control target key start
LH: loop header
LB: loop body
LE: loop exit
PB: predicated region body
PF: predicated region fallthrough
CT: control target
= control target key end

     0   :  { %12 = vsyncpa [#allocation6], 0  ;;  %s16337_s0 = inlined_call_operand.hbm [shape: bf16[2,16,16,128], index: 0, kind: input, shape index: {}]   ;;  %s16338_s1 = inlined_call_operand.hbm [shape: bf16[1152,128], index: 1, kind: input, shape index: {}]   ;;  %s16339_s2 = inlined_call_operand.hbm [shape: bf16[1152,128], index: 2, kind: input, shape index: {}]   ;;  %s16340_s3 = inlined_call_operand.vmem [shape: f32[1,128], index: 3, kind: input, shape index: {}]   ;;  %s16341_s4 = inlined_call_operand.vmem [shape: f32[1,128], index: 4, kind: input, shape index: {}]   ;;  %s16342_s5 = inlined_call_operand.vmem [shape: f32[1,128], index: 5, kind: input, shape index: {}]   ;;  %s16343_s6 = inlined_call_operand.vmem [shape: f32[1,128], index: 6, kind: input, shape index: {}]   ;;  %s16344_s7 = inlined_call_operand.hbm [shape: bf16[2,16,16,128], index: 7, kind: output, shape index: {}]  }
   0x1   :  { %14 = vsyncpa [#allocation6 + $0x1], 0 }
   0x2   :  { %15 = vsyncpa [#allocation9], 0 }
   0x3   :  { %16 = vsyncpa [#allocation7], 0 }
   0x4   :  { %18 = vsyncpa [#allocation7 + $0x1], 0  ;;  %s13257_s24 = smov 0   ;;  %s13259_s25 = smov 0  }
   0x5   :  { %s13261_s26 = smov 0   ;;  %s13263_s27 = smov 0  }
   0x6 LB: > { %s13278_s28 = sadd.s32 4294967295, %s13206_s27   ;;  %s10840_s29 = sadd.s32 4294967294, %s13206_s27   ;;  %s13206_s27 = sphi %s13263_s27, %s16497_s27   ;;  %s13202_s26 = sphi %s13261_s26, %s16496_s26   ;;  %s13198_s25 = sphi %s13259_s25, %s16495_s25   ;;  %s13194_s24 = sphi %s13257_s24, %s16494_s24  }
   0x7   : > { %p44_p0 = scmp.ne.s32.totalorder %s13198_s25, %s13194_s24  ;;  %p16345_p1 = scmp.eq.s32.totalorder %s13278_s28, 0 }
   0x8   : > { %p200_p3 = scmp.eq.s32.totalorder %s10840_s29, 1  ;;  %p10841_p5 = scmp.ge.s32.totalorder %s13206_s27, 1 }
   0x9   : > { %p13287_p4 = por %p16345_p1, %p44_p0  ;;  %p207_p7 = scmp.lt.s32.totalorder %s13206_s27, 3 }
   0xa   : > { %p13292_p6 = por %p200_p3, %p44_p0  ;;  %s13208_s10 = smov [#allocation8]  }
   0xb   : > { %s16360_s30 = scalar_select %p13287_p4, 1, 0 }
   0xc   : > { %s16361_s8 = scalar_select %p13292_p6, 1, 0 }
   0xd   : > { %p13297_p8 = pnand %p10841_p5, %p207_p7  ;;  %s219_s11 = sshll.u32 %s13208_s10, 4  ;;  %s13301_s11 = int_to_ptr.vmem [resolvable:$true] %s219_s11 }
   0xe   : > { %s13209_s13 = smov [#allocation10]   ;;  %s13050_s17 = scalar_lea.hbm %s16338_s1, 9216 }
   0xf   : > { %p12746_p9 = pneg %p13297_p8  ;;  %s232_s14 = sshll.u32 %s13209_s13, 4  ;;  %s13312_s14 = int_to_ptr.vmem [resolvable:$true] %s232_s14 }
  0x10   : > { %p13051_p12 = scmp.ne.s32.totalorder %s16338_s1, %s13050_s17  ;;  %p13057_p5 = scmp.lt.u32.totalorder %s13050_s17, %s16338_s1 }
  0x11   : > { %p13308_p11 = pnand %p12746_p9, %p16345_p1 }
  0x13   : > { %p13052_p13 = pneg %p13308_p11 }
  0x15   : > { %p13053_p0 = pnand %p13052_p13, %p13051_p12 }
  0x17   : > { %p13054_p3 = pneg %p13053_p0 }
  0x19   : > { %p13059_p7 = pnand %p13057_p5, %p13054_p3 }
  0x1b   : > { %13062 = shalt.err (!%p13059_p7)
}
  0x1c   : > { %s13063_s22 = scalar_lea.vmem %s13301_s11, 9216  ;;  %p13071_p2 = scmp.lt.s32.totalorder %s13301_s11, %s13301_s11 }
  0x1d   : > { %p13064_p9 = scmp.ne.s32.totalorder %s13301_s11, %s13063_s22  ;;  %p13072_p12 = scmp.lt.s32.totalorder %s13063_s22, %s13063_s22 }
  0x1f   : > { %p13066_p10 = pnand %p13064_p9, %p13052_p13  ;;  %p13073_p0 = por %p13072_p12, %p13071_p2 }
  0x21   : > { %p13067_p1 = pneg %p13066_p10 }
  0x23   : > { %p13074_p6 = pnand %p13073_p0, %p13067_p1 }
  0x25   : > { %13077 = shalt.err (!%p13074_p6)
}
  0x26   : > { %s16346_s23 = smov 64   ;;  %s13211_s29 = smov 4  }
  0x27   : > { %12749 = dma.hbm_to_vmem [thread:$0]  (!%p13308_p11), %s16338_s1, 9216, %s13301_s11, [#allocation9], %s16346_s23, %s16346_s23, %s13211_s29  }
  0x28   : > { %s13078_s17 = scalar_lea.hbm %s16339_s2, 9216 }
  0x29   : > { %p13079_p1 = scmp.ne.s32.totalorder %s16339_s2, %s13078_s17  ;;  %p13085_p10 = scmp.lt.u32.totalorder %s13078_s17, %s16339_s2 }
  0x2b   : > { %p13081_p2 = pnand %p13079_p1, %p13052_p13 }
  0x2d   : > { %p13082_p6 = pneg %p13081_p2 }
  0x2f   : > { %p13087_p3 = pnand %p13085_p10, %p13082_p6 }
  0x31   : > { %13090 = shalt.err (!%p13087_p3)
}
  0x32   : > { %s13091_s11 = scalar_lea.vmem %s13312_s14, 9216  ;;  %p13099_p12 = scmp.lt.s32.totalorder %s13312_s14, %s13312_s14 }
  0x33   : > { %p13092_p5 = scmp.ne.s32.totalorder %s13312_s14, %s13091_s11  ;;  %p13100_p0 = scmp.lt.s32.totalorder %s13091_s11, %s13091_s11 }
  0x35   : > { %p13094_p7 = pnand %p13092_p5, %p13052_p13  ;;  %p13101_p1 = por %p13100_p0, %p13099_p12 }
  0x37   : > { %p13095_p9 = pneg %p13094_p7 }
  0x39   : > { %p13102_p2 = pnand %p13101_p1, %p13095_p9 }
  0x3b   : > { %13105 = shalt.err (!%p13102_p2)
}
  0x3c   : > { %12752 = dma.hbm_to_vmem [thread:$0]  (!%p13308_p11), %s16339_s2, 9216, %s13312_s14, [#allocation9], %s16346_s23, %s16346_s23, %s13211_s29  }
  0x3d   : > { %s13373_s12 = sadd.s32 1, %s13206_s27   ;;  %s31_s13 = sadd.s32 1, %s13202_s26 }
  0x3e   : > { %s28_s15 = ssub.s32 %s13206_s27, %s13373_s12  ;;  %p38_p13 = scmp.ne.s32.totalorder %s13202_s26, %s13198_s25 }
  0x3f   : > { %p29_p6 = scmp.eq.s32.totalorder %s28_s15, 0  ;;  %p39_p10 = scmp.eq.s32.totalorder %s13206_s27, 0 }
  0x40   : > { %p16364_p3 = scmp.eq.s32.totalorder %s13278_s28, 1  ;;  %p12763_p7 = scmp.lt.s32.totalorder %s13206_s27, 2 }
  0x41   : > { %s13389_s17 = scalar_select %p29_p6, %s13202_s26, %s31_s13  }
  0x42   : > { %p13383_p5 = por %p16364_p3, %p38_p13  ;;  %p40_p9 = por %p39_p10, %p38_p13 }
  0x43   : > { %s258_s18 = sand.u32 1, %s13202_s26   ;;  %s11454_s14 = sshll.u32 %s13206_s27, 11 }
  0x44   : > { %s16365_s16 = scalar_select %p13383_p5, 1, 0 }
  0x45   : > { %s10845_s19 = sshll.u32 %s258_s18, 7  ;;  %s13396_s11 = scalar_lea.hbm %s16337_s0, %s11454_s14 }
  0x46   : > { %s262_s22 = scalar_lea.vmem [#allocation5], %s10845_s19  ;;  %p13400_p11 = pnand %p12763_p7, %p40_p9 }
  0x47   : > { %s269_s10 = sshll.u32 %s262_s22, 4  ;;  %s13404_s15 = scalar_lea.sflag [#allocation6], %s258_s18  ;;  %s13398_s10 = int_to_ptr.vmem [resolvable:$true] %s269_s10 }
  0x48   : > { %s13106_s23 = scalar_lea.hbm %s13396_s11, 2048  ;;  %p13108_p0 = pneg %p13400_p11 }
  0x49   : > { %p13107_p12 = scmp.ne.s32.totalorder %s13396_s11, %s13106_s23  ;;  %s13111_s20 = scalar_lea.hbm %s16337_s0, 4096 }
  0x4a   : > { %p13112_p13 = scmp.lt.u32.totalorder %s13396_s11, %s16337_s0  ;;  %p13113_p6 = scmp.lt.u32.totalorder %s13111_s20, %s13106_s23 }
  0x4b   : > { %p13109_p1 = pnand %p13108_p0, %p13107_p12  ;;  %p13115_p3 = scmp.lt.u32.totalorder %s13106_s23, %s13396_s11 }
  0x4c   : > { %p13114_p10 = por %p13113_p6, %p13112_p13 }
  0x4d   : > { %p13110_p2 = pneg %p13109_p1 }
  0x4e   : > { %p13116_p7 = por %p13115_p3, %p13114_p10 }
  0x50   : > { %p13117_p9 = pnand %p13116_p7, %p13110_p2 }
  0x52   : > { %13120 = shalt.err (!%p13117_p9)
}
  0x53   : > { %s13121_s18 = scalar_lea.vmem %s13398_s10, 2048  ;;  %s13212_s19 = smov [#allocation5]  }
  0x54   : > { %p13122_p12 = scmp.ne.s32.totalorder %s13398_s10, %s13121_s18  ;;  %s13126_s14 = sshll.u32 %s13212_s19, 4  ;;  %s13127_s14 = int_to_ptr.vmem [resolvable:$false] %s13126_s14 }
  0x55   : > { %s13128_s21 = scalar_lea.vmem %s13127_s14, 4096  ;;  %p13129_p4 = scmp.lt.s32.totalorder %s13398_s10, %s13127_s14 }
  0x56   : > { %p13124_p1 = pnand %p13122_p12, %p13108_p0  ;;  %p13130_p13 = scmp.lt.s32.totalorder %s13128_s21, %s13121_s18 }
  0x58   : > { %p13125_p5 = pneg %p13124_p1  ;;  %p13131_p6 = por %p13130_p13, %p13129_p4 }
  0x5a   : > { %p13132_p10 = pnand %p13131_p6, %p13125_p5 }
  0x5c   : > { %13135 = shalt.err (!%p13132_p10)
}
  0x5d   : > { %s16367_s23 = smov 64   ;;  %281 = sbr.rel (%p13297_p8) target bundleno = 1373 (0x55d), region = 48 }
  0x5e   : > { %12756 = dma.hbm_to_vmem [thread:$0]  (!%p13400_p11), %s13396_s11, 2048, %s13398_s10, %s13404_s15, %s16367_s23, %s16367_s23, %s13211_s29  }
  0x64   : > { %s13438_s20 = sand.u32 1, %s13198_s25   ;;  %p16368_p4 = scmp.ne.s32.totalorder %s16360_s30, 0 }
  0x65   : > { %s10849_s22 = sshll.u32 %s13438_s20, 7  ;;  %s284_s18 = scalar_lea.sflag [#allocation6], %s13438_s20 }
  0x66   : > { %s13444_s13 = scalar_lea.vmem [#allocation5], %s10849_s22 }
  0x67   : > { %13181 = dma.done.wait (%p16368_p4), %s284_s18, 2048  }
  0x68   : > { %13183 = vsyncadd (%p16368_p4), %s284_s18, 4294965248  ;;  %p16369_p5 = scmp.eq.s32.totalorder %s13278_s28, 0 }
  0x6a   : > { %13185 = dma.done.wait (%p16369_p5), [#allocation9], 18432   ;;  %p16370_p8 = pmov %p16369_p5 }
  0x6b   : > { %v13213_v0 = vmov 0   ;;  %v12806_v1 = vld [vmem:[#allocation8 + $0x40] sm:$0xff]   ;;  %v12810_v5 = vld [vmem:[#allocation8 + $0x48] sm:$0xff]   ;;  %v12814_v9 = vld [vmem:[#allocation8 + $0x50] sm:$0xff]   ;;  %vm336_vm0 = vsmask.f32 256 }
  0x6c   : > { %13187 = vsyncadd (%p16370_p8), [#allocation9], 4294948864  ;;  %327 = vst [vmem:[#allocation2] sm:$0xf] %v13213_v0  ;;  %v12807_v2 = vld [vmem:[#allocation8 + $0xc0] sm:$0xff]   ;;  %11694 = vmatprep.subr.bf16.mxu0 %v12806_v1  ;;  %v12811_v6 = vld [vmem:[#allocation8 + $0xc8] sm:$0xff]  }
  0x6d   : > { %328 = vst [vmem:[#allocation2 + $0x4] sm:$0xf] %v13213_v0  ;;  %329 = vst [vmem:[#allocation2 + $0x8] sm:$0x1] %v13213_v0  ;;  %v12808_v3 = vld [vmem:[#allocation8] sm:$0xff]   ;;  %11806 = vmatprep.subr.bf16.mxu1 %v12807_v2  ;;  %v12812_v7 = vld [vmem:[#allocation8 + $0x8] sm:$0xff]  }
  0x6e   : > { %331 = vst [vmem:[#allocation2 + $0xcc] sm:$0xf] %v13213_v0  ;;  %332 = vst [vmem:[#allocation2 + $0xd0] sm:$0xf] %v13213_v0  ;;  %v12809_v4 = vld [vmem:[#allocation8 + $0x80] sm:$0xff]   ;;  %11695 = vmatpush3.bf16.msra.mxu0 %v12808_v3  ;;  %v12813_v8 = vld [vmem:[#allocation8 + $0x88] sm:$0xff]  }
  0x6f   : > { %333 = vst [vmem:[#allocation2 + $0xd4] sm:$0x1] %v13213_v0  ;;  %5378 = vst [vmem:[#allocation3] sm:$0xf] %v13213_v0  ;;  %11807 = vmatpush3.bf16.msra.mxu1 %v12809_v4  ;;  %11696 = vmatprep.subr.bf16.mxu0 %v12810_v5  ;;  %v12815_v10 = vld [vmem:[#allocation8 + $0xd0] sm:$0xff]   ;;  %v12818_v13 = vld [vmem:[#allocation8 + $0x58] sm:$0xff]  }
  0x70   : > { %5379 = vst [vmem:[#allocation3 + $0x4] sm:$0xf] %v13213_v0  ;;  %5380 = vst [vmem:[#allocation3 + $0x8] sm:$0x1] %v13213_v0  ;;  %11808 = vmatprep.subr.bf16.mxu1 %v12811_v6  ;;  %v12816_v11 = vld [vmem:[#allocation8 + $0x10] sm:$0xff]   ;;  %v12819_v14 = vld [vmem:[#allocation8 + $0xd8] sm:$0xff]  }
  0x71   : > { %5382 = vst [vmem:[#allocation3 + $0xcc] sm:$0xf] %v13213_v0  ;;  %5383 = vst [vmem:[#allocation3 + $0xd0] sm:$0xf] %v13213_v0  ;;  %v12817_v12 = vld [vmem:[#allocation8 + $0x90] sm:$0xff]   ;;  %v12820_v15 = vld [vmem:[#allocation8 + $0x18] sm:$0xff]  }
  0x72   : > { %5384 = vst [vmem:[#allocation3 + $0xd4] sm:$0x1] %v13213_v0  ;;  %11697 = vmatpush3.bf16.msra.mxu0 %v12812_v7  ;;  %v12821_v16 = vld [vmem:[#allocation8 + $0x98] sm:$0xff]   ;;  %v12822_v17 = vld [vmem:[#allocation8 + $0x60] sm:$0xff]   ;;  %v12826_v21 = vld [vmem:[#allocation8 + $0x68] sm:$0xff]   ;;  %vm335_vm1 = vcmask 1040384  }
  0x73   : > { %11809 = vmatpush3.bf16.msra.mxu1 %v12813_v8  ;;  %11698 = vmatprep.subr.bf16.mxu0 %v12814_v9  ;;  %v12823_v18 = vld [vmem:[#allocation8 + $0xe0] sm:$0xff]   ;;  %v12827_v22 = vld [vmem:[#allocation8 + $0xe8] sm:$0xff]   ;;  %vm386_vm2 = vsmask.f32 7938  ;;  %vm13456_vm3 = vmand %vm335_vm1, %vm336_vm0  ;;  %v16371_v25 = vmov 0  ;;  %vm790_vm7 = vcmask 1043456  }
  0x74   : > { %11810 = vmatprep.subr.bf16.mxu1 %v12815_v10  ;;  %v12824_v19 = vld [vmem:[#allocation8 + $0x20] sm:$0xff]   ;;  %v12828_v23 = vld [vmem:[#allocation8 + $0x28] sm:$0xff]   ;;  %v16372_v25 = vsel %vm13456_vm3, 4294967295, %v16371_v25  ;;  %v12830_v26 = vld [vmem:[#allocation8 + $0x70] sm:$0xff]   ;;  %vm1096_vm4 = vsmask.f32 3328 }
  0x75   : > { %v12825_v20 = vld [vmem:[#allocation8 + $0xa0] sm:$0xff]   ;;  %v12829_v24 = vld [vmem:[#allocation8 + $0xa8] sm:$0xff]   ;;  %16373 = vst [vmem:[#allocation15_spill] sm:$0xff] %v16372_v25  ;;  %v12831_v27 = vld [vmem:[#allocation8 + $0xf0] sm:$0xff]   ;;  %vm1097_vm5 = vsmask.f32 7440 }
  0x76   : > { %11699 = vmatpush3.bf16.msra.mxu0 %v12816_v11  ;;  %v12832_v28 = vld [vmem:[#allocation8 + $0x30] sm:$0xff]   ;;  %vm468_vm6 = vsmask.f32 4368  ;;  %v12834_v30 = vld [vmem:[#allocation8 + $0x78] sm:$0xff]   ;;  %vm1659_vm8 = vcmask 1042432   ;;  %vm1660_vm9 = vcmask 1046532   ;;  %vm13462_vm10 = vmand %vm335_vm1, %vm386_vm2 }
  0x77   : > { %11811 = vmatpush3.bf16.msra.mxu1 %v12817_v12  ;;  %11700 = vmatprep.subr.bf16.mxu0 %v12818_v13  ;;  %v12833_v29 = vld [vmem:[#allocation8 + $0xb0] sm:$0xff]   ;;  %v12835_v31 = vld [vmem:[#allocation8 + $0xf8] sm:$0xff]   ;;  %v16374_v42 = vmov 0  ;;  %v388_v45 = vld [vmem:[#allocation2 + $0x14] sm:$0x1]  ;;  %v16379_v62 = vmov 0 }
  0x78   : > { %11812 = vmatprep.subr.bf16.mxu1 %v12819_v14  ;;  %v12836_v32 = vld [vmem:[#allocation8 + $0x38] sm:$0xff]   ;;  %v1048_v34 = vld [vmem:[#allocation2] sm:$0xf]  ;;  %v1049_v35 = vld [vmem:[#allocation2 + $0x4] sm:$0xf]  ;;  %v16375_v42 = vsel %vm13462_vm10, 4294967295, %v16374_v42 }
  0x79   : > { %v12837_v33 = vld [vmem:[#allocation8 + $0xb8] sm:$0xff]   ;;  %v1100_v37 = vshrl.u32 %v1048_v34, 16  ;;  %v1103_v38 = vshll.u32 %v1048_v34, 16  ;;  %v1109_v39 = vshll.u32 %v1049_v35, 16  ;;  %v1113_v40 = vshrl.u32 %v1049_v35, 16  ;;  %16376 = vst [vmem:[#allocation16_spill] sm:$0xff] %v16375_v42  ;;  %vm13474_vm11 = vmor %vm1096_vm4, %vm1097_vm5 }
  0x7a   : > { %11701 = vmatpush3.bf16.msra.mxu0 %v12820_v15  ;;  %v1050_v36 = vld [vmem:[#allocation2 + $0x8] sm:$0x1]  ;;  %v338_v41 = vld [vmem:[#allocation2 + $0xc] sm:$0x1]  ;;  %v436_v46 = vld [vmem:[%s13444_s13] sm:$0xf] }
  0x7b   : > { %11813 = vmatpush3.bf16.msra.mxu1 %v12821_v16  ;;  %11702 = vmatprep.subr.bf16.mxu0 %v12822_v17  ;;  %v1119_v43 = vshll.u32 %v1050_v36, 16  ;;  %v339_v44 = vsel %vm13456_vm3, 0, %v338_v41  ;;  %v1102_v47 = vrot.slane %v1100_v37, 4  ;;  %v1105_v48 = vrot.slane %v1103_v38, 5  ;;  %v437_v51 = vld [vmem:[%s13444_s13 + $0x4] sm:$0xf]  ;;  %vm13480_vm12 = vmor %vm336_vm0, %vm468_vm6 }
  0x7c   : > { %11814 = vmatprep.subr.bf16.mxu1 %v12823_v18  ;;  %v1111_v49 = vrot.slane %v1109_v39, 5  ;;  %v1115_v50 = vrot.slane %v1113_v40, 4  ;;  %340 = vst [vmem:[#allocation2 + $0xc] sm:$0x1] %v339_v44  ;;  %v389_v53 = vsel %vm13462_vm10, 0, %v388_v45  ;;  %v471_v54 = vshrl.u32 %v436_v46, 16  ;;  %vm13486_vm13 = vmand %vm790_vm7, %vm386_vm2 }
  0x7d   : > { %v1121_v52 = vrot.slane %v1119_v43, 5  ;;  %v474_v55 = vshll.u32 %v436_v46, 16  ;;  %v1106_v57 = vor.u32 %v1105_v48, %v1102_v47  ;;  %390 = vst [vmem:[#allocation2 + $0x14] sm:$0x1] %v389_v53  ;;  %v479_v59 = vshrl.u32 %v437_v51, 16  ;;  %v12840_v61 = vld [vmem:[#allocation8 + $0x140] sm:$0xff]   ;;  %vm13492_vm14 = vmor %vm1659_vm8, %vm1660_vm9 }
  0x7e   : > { %11703 = vmatpush3.bf16.msra.mxu0 %v12824_v19  ;;  %v1116_v58 = vor.u32 %v1115_v50, %v1111_v49  ;;  %v482_v60 = vshll.u32 %v437_v51, 16  ;;  %v16380_v62 = vsel %vm13480_vm12, 4294967295, %v16379_v62  ;;  %v473_v63 = vrot.slane %v471_v54, 7  ;;  %v1563_v0 = vld [vmem:[#allocation2] sm:$0xe]  ;;  %v12841_v18 = vld [vmem:[#allocation8 + $0x100] sm:$0xff]  }
  0x7f   : > { %11815 = vmatpush3.bf16.msra.mxu1 %v12825_v20  ;;  %11704 = vmatprep.subr.bf16.mxu0 %v12826_v21  ;;  %16381 = vst [vmem:[#allocation17_spill] sm:$0xff] %v16380_v62  ;;  %v1564_v1 = vld [vmem:[#allocation2 + $0x4] sm:$0xf]  ;;  %v1107_v2 = vrot.slane %v1106_v57, 4  ;;  %v481_v4 = vrot.slane %v479_v59, 7  ;;  %v16382_v5 = vmov 0 }
  0x80   : > { %11816 = vmatprep.subr.bf16.mxu1 %v12827_v22  ;;  %v1117_v3 = vrot.slane %v1116_v58, 4  ;;  %v16383_v5 = vsel %vm13486_vm13, 4294967295, %v16382_v5  ;;  %v1565_v6 = vld [vmem:[#allocation2 + $0x8] sm:$0x1]  ;;  %v10885_v7 = vrot.slane %v1563_v0, 9  ;;  %v476_v8 = vor.u32 %v474_v55, %v473_v63  ;;  %v12839_v10 = vld [vmem:[#allocation2] sm:$0xff]  }
  0x81   : > { %16384 = vst [vmem:[#allocation18_spill] sm:$0xff] %v16383_v5  ;;  %v477_v9 = vrot.slane %v473_v63, 4  ;;  %v1664_v12 = vrot.slane %v1564_v1, 5  ;;  %v1667_v13 = vrot.slane %v1565_v6, 5  ;;  %v1112_v14 = vsel %vm13474_vm11, %v1107_v2, %v1111_v49  ;;  %v12846_v22 = vld [vmem:[#allocation8 + $0x148] sm:$0xff]   ;;  %v12852_v49 = vld [vmem:[#allocation8 + $0x150] sm:$0xff]  }
  0x82   : > { %11705 = vmatpush3.bf16.msra.mxu0 %v12828_v23  ;;  %v1122_v15 = vsel %vm13474_vm11, %v1117_v3, %v1121_v52  ;;  %v484_v16 = vor.u32 %v482_v60, %v481_v4  ;;  %v486_v17 = vrot.slane %v481_v4, 4  ;;  %v391_v38 = vld [vmem:[#allocation2 + $0x20] sm:$0x1]  ;;  %v344_v39 = vld [vmem:[#allocation2 + $0x24] sm:$0x1]  ;;  %v12858_v63 = vld [vmem:[#allocation8 + $0x158] sm:$0xff]  }
  0x83   : > { %11817 = vmatpush3.bf16.msra.mxu1 %v12829_v24  ;;  %11706 = vmatprep.subr.bf16.mxu0 %v12830_v26  ;;  %v10869_v19 = vcombine.low %v1112_v14, %v1122_v15  ;;  %v792_v20 = vld [vmem:[#allocation2 + $0xc] sm:$0xf]  ;;  %v1666_v21 = vrot.slane %v1664_v12, 4  ;;  %v341_v26 = vld [vmem:[#allocation2 + $0x18] sm:$0x1]  ;;  %v392_v43 = vsel %vm13462_vm10, 0, %v391_v38 }
  0x84   : > { %11818 = vmatprep.subr.bf16.mxu1 %v12831_v27  ;;  %v485_v23 = vsel %vm13480_vm12, %v477_v9, %v484_v16  ;;  %v793_v24 = vsel %vm13486_vm13, %v476_v8, %v792_v20  ;;  %v438_v27 = vld [vmem:[%s13444_s13 + $0x8] sm:$0xf]  ;;  %v345_v44 = vsel %vm13456_vm3, 0, %v344_v39  ;;  %v440_v45 = vld [vmem:[%s13444_s13 + $0x10] sm:$0xf]  ;;  %v12859_v8 = vld [vmem:[#allocation8 + $0x118] sm:$0xff]  }
  0x85   : > { %4495 = vmatprep.mubr.bf16.mxu0 %v10869_v19  ;;  %794 = vst [vmem:[#allocation2 + $0xc] sm:$0xf] %v793_v24  ;;  %795 = vst [vmem:[#allocation2 + $0x10] sm:$0xf] %v485_v23  ;;  %v1668_v35 = vsel %vm13492_vm14, %v1666_v21, %v1667_v13  ;;  %v491_v41 = vshll.u32 %v438_v27, 16  ;;  %v505_v48 = vshrl.u32 %v440_v45, 16 }
  0x86   : > { %11707 = vmatpush3.bf16.msra.mxu0 %v12832_v28  ;;  %v439_v28 = vld [vmem:[%s13444_s13 + $0xc] sm:$0xf]  ;;  %393 = vst [vmem:[#allocation2 + $0x20] sm:$0x1] %v392_v43  ;;  %346 = vst [vmem:[#allocation2 + $0x24] sm:$0x1] %v345_v44 }
  0x87   : > { %11819 = vmatpush3.bf16.msra.mxu1 %v12833_v29  ;;  %11708 = vmatprep.subr.bf16.mxu0 %v12834_v30  ;;  %v796_v29 = vld [vmem:[#allocation2 + $0x14] sm:$0x1]  ;;  %v1665_v30 = vsel %vm13492_vm14, %v10885_v7, %v1664_v12  ;;  %v496_v36 = vshrl.u32 %v439_v28, 16  ;;  %v499_v37 = vshll.u32 %v439_v28, 16  ;;  %v441_v47 = vld [vmem:[%s13444_s13 + $0x14] sm:$0xf] }
  0x88   : > { %11820 = vmatprep.subr.bf16.mxu1 %v12835_v31  ;;  %v342_v31 = vsel %vm13456_vm3, 0, %v341_v26  ;;  %v797_v34 = vsel %vm13456_vm3, %v486_v17, %v796_v29  ;;  %v513_v51 = vshrl.u32 %v441_v47, 16  ;;  %v516_v52 = vshll.u32 %v441_v47, 16  ;;  %v12853_v57 = vld [vmem:[#allocation8 + $0x110] sm:$0xff]   ;;  %v394_v15 = vld [vmem:[#allocation2 + $0x2c] sm:$0x1] }
  0x89   : > { %343 = vst [vmem:[#allocation2 + $0x18] sm:$0x1] %v342_v31  ;;  %798 = vst [vmem:[#allocation2 + $0x14] sm:$0x1] %v797_v34  ;;  %v13519_v46 = vrot.slane %v496_v36, 7  ;;  %v10901_v53 = vcombine.low %v1665_v30, %v1668_v35  ;;  %v507_v55 = vrot.slane %v505_v48, 7 }
  0x8a   : > { %11709 = vmatpush3.bf16.msra.mxu0 %v12836_v32  ;;  %v488_v32 = vshrl.u32 %v438_v27, 16  ;;  %v508_v60 = vshll.u32 %v440_v45, 16  ;;  %v12864_v20 = vld [vmem:[#allocation8 + $0x160] sm:$0xff]   ;;  %v395_v39 = vsel %vm13462_vm10, 0, %v394_v15  ;;  %s16182_s9 = scalar_lea.vmem [#allocation11], %s10849_s22  ;;  %s11519_s22 = sshll.u32 %s13278_s28, 11 }
  0x8b   : > { %11821 = vmatpush3.bf16.msra.mxu1 %v12837_v33  ;;  %11918 = vmatprep.subr.bf16.mxu0 %v12840_v61  ;;  %v12847_v33 = vld [vmem:[#allocation8 + $0x108] sm:$0xff]   ;;  %v501_v54 = vor.u32 %v499_v37, %v13519_v46  ;;  %v503_v59 = vrot.slane %v13519_v46, 4  ;;  %v13524_v61 = vrot.slane %v513_v51, 7  ;;  %v511_v2 = vrot.slane %v507_v55, 4  ;;  %396 = vst [vmem:[#allocation2 + $0x2c] sm:$0x1] %v395_v39  ;;  %s16289_s10 = scalar_lea.hbm %s16344_s7, %s11519_s22 }
  0x8c   : > { %v490_v40 = vrot.slane %v488_v32, 7  ;;  %v12838_v0 = vld [vmem:[#allocation2 + $0xc] sm:$0xff]   ;;  %v12870_v46 = vld [vmem:[#allocation8 + $0x168] sm:$0xff]   ;;  %s10735_s28 = scalar_lea.sflag [#allocation7], %s13438_s20  ;;  %p16491_p0 = scmp.ne.s32.totalorder %s16365_s16, 0 }
  0x8d   : > { %4496 = vmatmul.mubr.bf16.vlgmr.msra.gmra.mrb[0].mxu0 %v12839_v10  ;;  %v1051_v3 = vld [vmem:[#allocation2 + $0xc] sm:$0xf]  ;;  %v1052_v4 = vld [vmem:[#allocation2 + $0x10] sm:$0xf]  ;;  %v518_v7 = vor.u32 %v516_v52, %v13524_v61  ;;  %4656 = vmatprep.mubr.bf16.mxu1 %v12838_v0  ;;  %v803_v35 = vld [vmem:[#allocation2 + $0x20] sm:$0x1] }
  0x8e   : > { %11919 = vmatpush3.bf16.msra.mxu0 %v12841_v18  ;;  %v494_v50 = vrot.slane %v490_v40, 4  ;;  %v493_v58 = vor.u32 %v491_v41, %v490_v40  ;;  %v1124_v10 = vshrl.u32 %v1051_v3, 16  ;;  %v1127_v12 = vshll.u32 %v1051_v3, 16  ;;  %4657 = vmatmul.mubr.bf16.vlgmr.msra.gmra.mrb[0].mxu1 %v10901_v53  ;;  %v1566_v26 = vld [vmem:[#allocation2 + $0xc] sm:$0xe]  ;;  %v12865_v40 = vld [vmem:[#allocation8 + $0x120] sm:$0xff]  }
  0x8f   : > { %11920 = vmatprep.subr.bf16.mxu0 %v12846_v22  ;;  %v1133_v13 = vshll.u32 %v1052_v4, 16  ;;  %v1137_v14 = vshrl.u32 %v1052_v4, 16  ;;  %v510_v18 = vor.u32 %v508_v60, %v507_v55  ;;  %v519_v19 = vsel %vm13480_vm12, %v511_v2, %v518_v7  ;;  %v1567_v28 = vld [vmem:[#allocation2 + $0x10] sm:$0xf]  ;;  %v806_v36 = vld [vmem:[#allocation2 + $0x24] sm:$0xf] }
  0x90   : > { %v502_v1 = vsel %vm13480_vm12, %v494_v50, %v501_v54  ;;  %v799_v6 = vld [vmem:[#allocation2 + $0x18] sm:$0xf]  ;;  %v1053_v9 = vld [vmem:[#allocation2 + $0x14] sm:$0x1]  ;;  %v1126_v21 = vrot.slane %v1124_v10, 4  ;;  %v1129_v22 = vrot.slane %v1127_v12, 5  ;;  %v804_v37 = vsel %vm13456_vm3, %v503_v59, %v803_v35 }
  0x91   : > { %802 = vst [vmem:[#allocation2 + $0x1c] sm:$0xf] %v502_v1  ;;  %v1143_v16 = vshll.u32 %v1053_v9, 16  ;;  %v800_v17 = vsel %vm13486_vm13, %v493_v58, %v799_v6  ;;  %v1135_v23 = vrot.slane %v1133_v13, 5  ;;  %v1139_v24 = vrot.slane %v1137_v14, 4  ;;  %v12843_v47 = vld [vmem:[#allocation2 + $0xc] sm:$0xff]  }
  0x92   : > { %11921 = vmatpush3.bf16.msra.mxu0 %v12847_v33  ;;  %801 = vst [vmem:[#allocation2 + $0x18] sm:$0xf] %v800_v17  ;;  %809 = vst [vmem:[#allocation2 + $0x28] sm:$0xf] %v519_v19  ;;  %v1568_v29 = vld [vmem:[#allocation2 + $0x14] sm:$0x1]  ;;  %v1130_v31 = vor.u32 %v1129_v22, %v1126_v21  ;;  %v807_v38 = vsel %vm13486_vm13, %v510_v18, %v806_v36 }
  0x93   : > { %11922 = vmatprep.subr.bf16.mxu0 %v12852_v49  ;;  %v1145_v27 = vrot.slane %v1143_v16, 5  ;;  %v10886_v30 = vrot.slane %v1566_v26, 9  ;;  %v1140_v32 = vor.u32 %v1139_v24, %v1135_v23  ;;  %v1671_v33 = vrot.slane %v1567_v28, 5  ;;  %805 = vst [vmem:[#allocation2 + $0x20] sm:$0x1] %v804_v37  ;;  %v12871_v55 = vld [vmem:[#allocation8 + $0x128] sm:$0xff]  }
  0x94   : > { %v1674_v34 = vrot.slane %v1568_v29, 5  ;;  %v1131_v41 = vrot.slane %v1130_v31, 4  ;;  %808 = vst [vmem:[#allocation2 + $0x24] sm:$0xf] %v807_v38  ;;  %v347_v54 = vld [vmem:[#allocation2 + $0x30] sm:$0x1] }
  0x95   : > { %v1141_v43 = vrot.slane %v1140_v32, 4  ;;  %v1672_v44 = vsel %vm13492_vm14, %v10886_v30, %v1671_v33  ;;  %v1673_v45 = vrot.slane %v1671_v33, 4  ;;  %v520_v3 = vrot.slane %v13524_v61, 4  ;;  %v442_v14 = vld [vmem:[%s13444_s13 + $0x18] sm:$0xf]  ;;  %s13214_s19 = smov [#allocation11]  }
  0x96   : > { %11923 = vmatpush3.bf16.msra.mxu0 %v12853_v57  ;;  %v1136_v49 = vsel %vm13474_vm11, %v1131_v41, %v1135_v23  ;;  %v348_v13 = vsel %vm13456_vm3, 0, %v347_v54  ;;  %v810_v22 = vld [vmem:[#allocation2 + $0x2c] sm:$0x1]  ;;  %v522_v39 = vshrl.u32 %v442_v14, 16  ;;  %v350_v54 = vld [vmem:[#allocation2 + $0x3c] sm:$0x1] }
  0x97   : > { %11924 = vmatprep.subr.bf16.mxu0 %v12858_v63  ;;  %v1146_v50 = vsel %vm13474_vm11, %v1141_v43, %v1145_v27  ;;  %v1675_v51 = vsel %vm13492_vm14, %v1673_v45, %v1674_v34  ;;  %349 = vst [vmem:[#allocation2 + $0x30] sm:$0x1] %v348_v13  ;;  %v811_v27 = vsel %vm13456_vm3, %v520_v3, %v810_v22  ;;  %v443_v30 = vld [vmem:[%s13444_s13 + $0x1c] sm:$0xf]  ;;  %s13140_s14 = sshll.u32 %s13214_s19, 4  ;;  %s13141_s14 = int_to_ptr.vmem [resolvable:$false] %s13140_s14 }
  0x98   : > { %v1055_v48 = vld [vmem:[#allocation2 + $0x1c] sm:$0xf]  ;;  %v10870_v57 = vcombine.low %v1136_v49, %v1146_v50  ;;  %v10902_v59 = vcombine.low %v1672_v44, %v1675_v51  ;;  %812 = vst [vmem:[#allocation2 + $0x2c] sm:$0x1] %v811_v27  ;;  %s13142_s21 = scalar_lea.vmem %s13141_s14, 4096 }
  0x99   : > { %v1157_v52 = vshll.u32 %v1055_v48, 16  ;;  %v1570_v53 = vld [vmem:[#allocation2 + $0x1c] sm:$0xf]  ;;  %v1054_v60 = vld [vmem:[#allocation2 + $0x18] sm:$0xf]  ;;  %v1161_v63 = vshrl.u32 %v1055_v48, 16 }
  0x9a   : > { %11925 = vmatpush3.bf16.msra.mxu0 %v12859_v8  ;;  %v12842_v58 = vld [vmem:[#allocation2 + $0x18] sm:$0xff]   ;;  %v1148_v0 = vshrl.u32 %v1054_v60, 16  ;;  %v1151_v1 = vshll.u32 %v1054_v60, 16  ;;  %4503 = vmatprep.mubr.bf16.mxu0 %v10870_v57  ;;  %v1678_v7 = vrot.slane %v1570_v53, 5  ;;  %v1058_v12 = vld [vmem:[#allocation2 + $0x28] sm:$0xf] }
  0x9b   : > { %11926 = vmatprep.subr.bf16.mxu0 %v12864_v20  ;;  %v1159_v2 = vrot.slane %v1157_v52, 5  ;;  %4664 = vmatprep.mubr.bf16.mxu1 %v12842_v58  ;;  %v1163_v4 = vrot.slane %v1161_v63, 4  ;;  %v1569_v6 = vld [vmem:[#allocation2 + $0x18] sm:$0xe]  ;;  %v1056_v15 = vld [vmem:[#allocation2 + $0x20] sm:$0x1] }
  0x9c   : > { %4504 = vmatmul.mubr.bf16.gmra.mrb[4].mxu0 %v12843_v47  ;;  %4665 = vmatmul.mubr.bf16.gmra.mrb[4].mxu1 %v10902_v59  ;;  %v1150_v8 = vrot.slane %v1148_v0, 4  ;;  %v1153_v9 = vrot.slane %v1151_v1, 5  ;;  %v10887_v10 = vrot.slane %v1569_v6, 9  ;;  %v12844_v17 = vld [vmem:[#allocation2 + $0x24] sm:$0xff]   ;;  %v1680_v61 = vrot.slane %v1678_v7, 4  ;;  %v12845_v33 = vld [vmem:[#allocation2 + $0x18] sm:$0xff]  }
  0x9d   : > { %v1164_v16 = vor.u32 %v1163_v4, %v1159_v2  ;;  %v1167_v19 = vshll.u32 %v1056_v15, 16  ;;  %v1571_v20 = vld [vmem:[#allocation2 + $0x20] sm:$0x1]  ;;  %v1181_v23 = vshll.u32 %v1058_v12, 16  ;;  %4672 = vmatprep.mubr.bf16.mxu1 %v12844_v17  ;;  %v1057_v28 = vld [vmem:[#allocation2 + $0x24] sm:$0xf] }
  0x9e   : > { %11927 = vmatpush3.bf16.msra.mxu0 %v12865_v40  ;;  %v1154_v18 = vor.u32 %v1153_v9, %v1150_v8  ;;  %v1679_v21 = vsel %vm13492_vm14, %v10887_v10, %v1678_v7  ;;  %v1681_v26 = vrot.slane %v1571_v20, 5  ;;  %v1185_v29 = vshrl.u32 %v1058_v12, 16  ;;  %v12876_v40 = vld [vmem:[#allocation8 + $0x170] sm:$0xff]   ;;  %v13566_v47 = vld [vmem:[#allocation2 + $0x28] sm:$0xf]  ;;  %v12878_v6 = vld [vmem:[#allocation8 + $0x1c0] sm:$0xff]  }
  0x9f   : > { %11928 = vmatprep.subr.bf16.mxu0 %v12870_v46  ;;  %v1165_v24 = vrot.slane %v1164_v16, 4  ;;  %v1169_v32 = vrot.slane %v1167_v19, 5  ;;  %v1172_v34 = vshrl.u32 %v1057_v28, 16  ;;  %v1175_v35 = vshll.u32 %v1057_v28, 16  ;;  %v13564_v46 = vld [vmem:[#allocation2 + $0x24] sm:$0xe]  ;;  %12030 = vmatprep.subr.bf16.mxu1 %v12878_v6 }
  0xa0   : > { %v1155_v31 = vrot.slane %v1154_v18, 4  ;;  %v1682_v36 = vsel %vm13492_vm14, %v1680_v61, %v1681_v26  ;;  %v13558_v37 = vrot.slane %v1181_v23, 5  ;;  %v1187_v38 = vrot.slane %v1185_v29, 4  ;;  %v12877_v48 = vld [vmem:[#allocation8 + $0x130] sm:$0xff]   ;;  %v397_v53 = vld [vmem:[#allocation2 + $0x38] sm:$0x1] }
  0xa1   : > { %v1170_v43 = vsel %vm13474_vm11, %v1165_v24, %v1169_v32  ;;  %v10903_v44 = vcombine.low %v1679_v21, %v1682_v36  ;;  %v1174_v45 = vrot.slane %v1172_v34, 4  ;;  %v1177_v50 = vrot.slane %v1175_v35, 5  ;;  %v813_v59 = vld [vmem:[#allocation2 + $0x30] sm:$0xf]  ;;  %v445_v4 = vld [vmem:[%s13444_s13 + $0x24] sm:$0xf] }
  0xa2   : > { %11929 = vmatpush3.bf16.msra.mxu0 %v12871_v55  ;;  %v1160_v41 = vsel %vm13474_vm11, %v1155_v31, %v1159_v2  ;;  %v1188_v51 = vor.u32 %v1187_v38, %v13558_v37  ;;  %v524_v52 = vrot.slane %v522_v39, 7  ;;  %v525_v55 = vshll.u32 %v442_v14, 16  ;;  %v444_v63 = vld [vmem:[%s13444_s13 + $0x20] sm:$0xf]  ;;  %v1059_v13 = vld [vmem:[#allocation2 + $0x2c] sm:$0x1] }
  0xa3   : > { %v10871_v49 = vcombine.low %v1160_v41, %v1170_v43  ;;  %11930 = vmatprep.subr.bf16.mxu0 %v12876_v40  ;;  %v530_v57 = vshrl.u32 %v443_v30, 16  ;;  %v533_v58 = vshll.u32 %v443_v30, 16  ;;  %v10888_v60 = vrot.slane %v13564_v46, 9  ;;  %v12879_v12 = vld [vmem:[#allocation8 + $0x180] sm:$0xff]   ;;  %v1574_v15 = vld [vmem:[#allocation2 + $0x2c] sm:$0x1] }
  0xa4   : > { %4673 = vmatmul.mubr.bf16.gmra.mrb[8].mxu1 %v10903_v44  ;;  %v1178_v0 = vor.u32 %v1177_v50, %v1174_v45  ;;  %v1189_v1 = vrot.slane %v1188_v51, 4  ;;  %v528_v2 = vrot.slane %v524_v52, 4  ;;  %v1685_v3 = vrot.slane %v13566_v47, 5  ;;  %v12880_v24 = vld [vmem:[#allocation8 + $0x1c8] sm:$0xff]   ;;  %v400_v30 = vld [vmem:[#allocation2 + $0x44] sm:$0x1] }
  0xa5   : > { %4511 = vmatprep.mubr.bf16.mxu0 %v10871_v49  ;;  %v527_v7 = vor.u32 %v525_v55, %v524_v52  ;;  %v532_v8 = vrot.slane %v530_v57, 7  ;;  %v398_v9 = vsel %vm13462_vm10, 0, %v397_v53  ;;  %v351_v10 = vsel %vm13456_vm3, 0, %v350_v54  ;;  %12031 = vmatpush3.bf16.msra.mxu1 %v12879_v12  ;;  %v12882_v31 = vld [vmem:[#allocation8 + $0x188] sm:$0xff]   ;;  %v353_v34 = vld [vmem:[#allocation2 + $0x48] sm:$0x1] }
  0xa6   : > { %11931 = vmatpush3.bf16.msra.mxu0 %v12877_v48  ;;  %v1179_v14 = vrot.slane %v1178_v0, 4  ;;  %v1687_v16 = vrot.slane %v1685_v3, 4  ;;  %399 = vst [vmem:[#allocation2 + $0x38] sm:$0x1] %v398_v9  ;;  %352 = vst [vmem:[#allocation2 + $0x3c] sm:$0x1] %v351_v10  ;;  %12032 = vmatprep.subr.bf16.mxu1 %v12880_v24  ;;  %v1686_v46 = vsel %vm13492_vm14, %v10888_v60, %v1685_v3 }
  0xa7   : > { %4512 = vmatmul.mubr.bf16.gmra.mrb[8].mxu0 %v12845_v33  ;;  %v1191_v17 = vshll.u32 %v1059_v13, 16  ;;  %v535_v61 = vor.u32 %v533_v58, %v532_v8  ;;  %v537_v18 = vrot.slane %v532_v8, 4  ;;  %v814_v19 = vsel %vm13486_vm13, %v527_v7, %v813_v59  ;;  %v446_v35 = vld [vmem:[%s13444_s13 + $0x28] sm:$0xf]  ;;  %v13592_v40 = vld [vmem:[%s13444_s13 + $0x2c] sm:$0xf] }
  0xa8   : > { %v1184_v20 = vsel %vm13474_vm11, %v1179_v14, %v13558_v37  ;;  %815 = vst [vmem:[#allocation2 + $0x30] sm:$0xf] %v814_v19  ;;  %v1688_v21 = vrot.slane %v1574_v15, 5  ;;  %v539_v22 = vshrl.u32 %v444_v63, 16  ;;  %v542_v23 = vshll.u32 %v444_v63, 16  ;;  %v12849_v37 = vld [vmem:[#allocation2 + $0x24] sm:$0xff]  }
  0xa9   : > { %v1193_v26 = vrot.slane %v1191_v17, 5  ;;  %v536_v27 = vsel %vm13480_vm12, %v528_v2, %v535_v61  ;;  %v547_v28 = vshrl.u32 %v445_v4, 16  ;;  %v550_v29 = vshll.u32 %v445_v4, 16  ;;  %12033 = vmatpush3.bf16.msra.mxu1 %v12882_v31 }
  0xaa   : > { %816 = vst [vmem:[#allocation2 + $0x34] sm:$0xf] %v536_v27  ;;  %v541_v32 = vrot.slane %v539_v22, 7  ;;  %v401_v33 = vsel %vm13462_vm10, 0, %v400_v30  ;;  %v354_v39 = vsel %vm13456_vm3, 0, %v353_v34  ;;  %v556_v45 = vshrl.u32 %v446_v35, 16 }
  0xab   : > { %v1194_v36 = vsel %vm13474_vm11, %v1189_v1, %v1193_v26  ;;  %v549_v38 = vrot.slane %v547_v28, 7  ;;  %402 = vst [vmem:[#allocation2 + $0x44] sm:$0x1] %v401_v33  ;;  %355 = vst [vmem:[#allocation2 + $0x48] sm:$0x1] %v354_v39  ;;  %v1689_v47 = vsel %vm13492_vm14, %v1687_v16, %v1688_v21  ;;  %v559_v51 = vshll.u32 %v446_v35, 16 }
  0xac   : > { %v10872_v41 = vcombine.low %v1184_v20, %v1194_v36  ;;  %v544_v43 = vor.u32 %v542_v23, %v541_v32  ;;  %v545_v44 = vrot.slane %v541_v32, 4  ;;  %v13602_v54 = vrot.slane %v556_v45, 7  ;;  %v12884_v1 = vld [vmem:[#allocation8 + $0x1d0] sm:$0xff]  }
  0xad   : > { %v817_v48 = vld [vmem:[#allocation2 + $0x38] sm:$0x1]  ;;  %v552_v49 = vor.u32 %v550_v29, %v549_v38  ;;  %v820_v50 = vld [vmem:[#allocation2 + $0x3c] sm:$0xf]  ;;  %v564_v55 = vshrl.u32 %v13592_v40, 16  ;;  %v10904_v59 = vcombine.low %v1686_v46, %v1689_v47  ;;  %v554_v4 = vrot.slane %v549_v38, 4  ;;  %12034 = vmatprep.subr.bf16.mxu1 %v12884_v1 }
  0xae   : > { %4519 = vmatprep.mubr.bf16.mxu0 %v10872_v41  ;;  %v818_v52 = vsel %vm13456_vm3, %v537_v18, %v817_v48  ;;  %v821_v53 = vsel %vm13486_vm13, %v544_v43, %v820_v50  ;;  %v561_v6 = vor.u32 %v559_v51, %v13602_v54  ;;  %v12885_v20 = vld [vmem:[#allocation8 + $0x190] sm:$0xff]   ;;  %v562_v22 = vrot.slane %v13602_v54, 4  ;;  %v403_v51 = vld [vmem:[#allocation2 + $0x50] sm:$0x1]  ;;  %v12886_v1 = vld [vmem:[#allocation8 + $0x1d8] sm:$0xff]  }
  0xaf   : > { %4520 = vmatmul.mubr.bf16.gmra.mrb[12].mxu0 %v12849_v37  ;;  %819 = vst [vmem:[#allocation2 + $0x38] sm:$0x1] %v818_v52  ;;  %v1060_v57 = vld [vmem:[#allocation2 + $0x30] sm:$0xf]  ;;  %v553_v58 = vsel %vm13480_vm12, %v545_v44, %v552_v49  ;;  %822 = vst [vmem:[#allocation2 + $0x3c] sm:$0xf] %v821_v53  ;;  %12035 = vmatpush3.bf16.msra.mxu1 %v12885_v20 }
  0xb0   : > { %v1196_v60 = vshrl.u32 %v1060_v57, 16  ;;  %v1199_v63 = vshll.u32 %v1060_v57, 16  ;;  %823 = vst [vmem:[#allocation2 + $0x40] sm:$0xf] %v553_v58  ;;  %v1575_v0 = vld [vmem:[#allocation2 + $0x30] sm:$0xe]  ;;  %12036 = vmatprep.subr.bf16.mxu1 %v12886_v1 }
  0xb1   : > { %v12848_v2 = vld [vmem:[#allocation2 + $0x30] sm:$0xff]   ;;  %v10889_v13 = vrot.slane %v1575_v0, 9  ;;  %v13608_v15 = vrot.slane %v564_v55, 7  ;;  %v567_v23 = vshll.u32 %v13592_v40, 16 }
  0xb2   : > { %v1061_v3 = vld [vmem:[#allocation2 + $0x34] sm:$0xf]  ;;  %v1198_v7 = vrot.slane %v1196_v60, 4  ;;  %v1201_v8 = vrot.slane %v1199_v63, 5  ;;  %4680 = vmatprep.mubr.bf16.mxu1 %v12848_v2  ;;  %v824_v14 = vld [vmem:[#allocation2 + $0x44] sm:$0x1] }
  0xb3   : > { %v1205_v9 = vshll.u32 %v1061_v3, 16  ;;  %v1209_v10 = vshrl.u32 %v1061_v3, 16  ;;  %v1576_v12 = vld [vmem:[#allocation2 + $0x34] sm:$0xf]  ;;  %4681 = vmatmul.mubr.bf16.gmra.mrb[12].mxu1 %v10904_v59  ;;  %v827_v19 = vld [vmem:[#allocation2 + $0x48] sm:$0xf]  ;;  %v825_v21 = vsel %vm13456_vm3, %v554_v4, %v824_v14  ;;  %v569_v33 = vor.u32 %v567_v23, %v13608_v15 }
  0xb4   : > { %v1202_v16 = vor.u32 %v1201_v8, %v1198_v7  ;;  %v1692_v18 = vrot.slane %v1576_v12, 5  ;;  %v828_v24 = vsel %vm13486_vm13, %v561_v6, %v827_v19  ;;  %826 = vst [vmem:[#allocation2 + $0x44] sm:$0x1] %v825_v21  ;;  %v12851_v41 = vld [vmem:[#allocation2 + $0x30] sm:$0xff]   ;;  %v571_v49 = vrot.slane %v13608_v15, 4 }
  0xb5   : > { %v1207_v17 = vrot.slane %v1205_v9, 5  ;;  %v1211_v61 = vrot.slane %v1209_v10, 4  ;;  %829 = vst [vmem:[#allocation2 + $0x48] sm:$0xf] %v828_v24  ;;  %v570_v48 = vsel %vm13480_vm12, %v562_v22, %v569_v33  ;;  %v356_v0 = vld [vmem:[#allocation2 + $0x54] sm:$0x1] }
  0xb6   : > { %v1062_v26 = vld [vmem:[#allocation2 + $0x38] sm:$0x1]  ;;  %v1203_v27 = vrot.slane %v1202_v16, 4  ;;  %v1694_v29 = vrot.slane %v1692_v18, 4  ;;  %v1693_v36 = vsel %vm13492_vm14, %v10889_v13, %v1692_v18  ;;  %v1063_v38 = vld [vmem:[#allocation2 + $0x3c] sm:$0xf] }
  0xb7   : > { %v1212_v28 = vor.u32 %v1211_v61, %v1207_v17  ;;  %v1215_v30 = vshll.u32 %v1062_v26, 16  ;;  %v12850_v31 = vld [vmem:[#allocation2 + $0x3c] sm:$0xff]   ;;  %v1577_v32 = vld [vmem:[#allocation2 + $0x38] sm:$0x1]  ;;  %v1220_v43 = vshrl.u32 %v1063_v38, 16  ;;  %v1223_v44 = vshll.u32 %v1063_v38, 16 }
  0xb8   : > { %v1208_v34 = vsel %vm13474_vm11, %v1203_v27, %v1207_v17  ;;  %v1695_v37 = vrot.slane %v1577_v32, 5  ;;  %v1064_v39 = vld [vmem:[#allocation2 + $0x40] sm:$0xf]  ;;  %4688 = vmatprep.mubr.bf16.mxu1 %v12850_v31  ;;  %v1578_v50 = vld [vmem:[#allocation2 + $0x3c] sm:$0xe]  ;;  %v12888_v13 = vld [vmem:[#allocation8 + $0x198] sm:$0xff]  }
  0xb9   : > { %v1213_v35 = vrot.slane %v1212_v28, 4  ;;  %v1217_v40 = vrot.slane %v1215_v30, 5  ;;  %v1229_v45 = vshll.u32 %v1064_v39, 16  ;;  %v1233_v47 = vshrl.u32 %v1064_v39, 16  ;;  %830 = vst [vmem:[#allocation2 + $0x4c] sm:$0xf] %v570_v48  ;;  %12037 = vmatpush3.bf16.msra.mxu1 %v12888_v13 }
  0xba   : > { %v1696_v46 = vsel %vm13492_vm14, %v1694_v29, %v1695_v37  ;;  %v1222_v54 = vrot.slane %v1220_v43, 4  ;;  %v1225_v55 = vrot.slane %v1223_v44, 5  ;;  %v1579_v57 = vld [vmem:[#allocation2 + $0x40] sm:$0xf]  ;;  %v10890_v63 = vrot.slane %v1578_v50, 9  ;;  %v12890_v22 = vld [vmem:[#allocation8 + $0x178] sm:$0xff]  }
  0xbb   : > { %v1218_v52 = vsel %vm13474_vm11, %v1213_v35, %v1217_v40  ;;  %v10905_v53 = vcombine.low %v1693_v36, %v1696_v46  ;;  %v1231_v59 = vrot.slane %v1229_v45, 5  ;;  %v1235_v60 = vrot.slane %v1233_v47, 4  ;;  %v1065_v2 = vld [vmem:[#allocation2 + $0x44] sm:$0x1]  ;;  %v448_v6 = vld [vmem:[%s13444_s13 + $0x30] sm:$0xf]  ;;  %11932 = vmatprep.subr.bf16.mxu0 %v12890_v22 }
  0xbc   : > { %v10873_v58 = vcombine.low %v1208_v34, %v1218_v52  ;;  %v1226_v3 = vor.u32 %v1225_v55, %v1222_v54  ;;  %v1580_v4 = vld [vmem:[#allocation2 + $0x44] sm:$0x1]  ;;  %v1239_v8 = vshll.u32 %v1065_v2, 16  ;;  %v1699_v9 = vrot.slane %v1579_v57, 5  ;;  %v1066_v12 = vld [vmem:[#allocation2 + $0x48] sm:$0xf] }
  0xbd   : > { %4689 = vmatmul.mubr.bf16.gmra.mrb[16].mxu1 %v10905_v53  ;;  %v1236_v7 = vor.u32 %v1235_v60, %v1231_v59  ;;  %v1702_v10 = vrot.slane %v1580_v4, 5  ;;  %v404_v16 = vsel %vm13462_vm10, 0, %v403_v51  ;;  %v1244_v17 = vshrl.u32 %v1066_v12, 16  ;;  %v449_v28 = vld [vmem:[%s13444_s13 + $0x34] sm:$0xf]  ;;  %v12891_v29 = vld [vmem:[#allocation8 + $0x138] sm:$0xff]  }
  0xbe   : > { %4527 = vmatprep.mubr.bf16.mxu0 %v10873_v58  ;;  %v1227_v14 = vrot.slane %v1226_v3, 4  ;;  %v1247_v61 = vshll.u32 %v1066_v12, 16  ;;  %v1241_v19 = vrot.slane %v1239_v8, 5  ;;  %v1700_v20 = vsel %vm13492_vm14, %v10890_v63, %v1699_v9  ;;  %405 = vst [vmem:[#allocation2 + $0x50] sm:$0x1] %v404_v16  ;;  %v12855_v37 = vld [vmem:[#allocation2 + $0x3c] sm:$0xff]   ;;  %11933 = vmatpush3.bf16.msra.mxu0 %v12891_v29 }
  0xbf   : > { %4528 = vmatmul.mubr.bf16.gmra.mrb[16].mxu0 %v12851_v41  ;;  %v1237_v18 = vrot.slane %v1236_v7, 4  ;;  %v1701_v21 = vrot.slane %v1699_v9, 4  ;;  %v1246_v24 = vrot.slane %v1244_v17, 4  ;;  %v357_v27 = vsel %vm13456_vm3, 0, %v356_v0  ;;  %v406_v35 = vld [vmem:[#allocation2 + $0x5c] sm:$0x1] }
  0xc0   : > { %v1232_v23 = vsel %vm13474_vm11, %v1227_v14, %v1231_v59  ;;  %v1249_v26 = vrot.slane %v1247_v61, 5  ;;  %v12854_v31 = vld [vmem:[#allocation2 + $0x48] sm:$0xff]   ;;  %358 = vst [vmem:[#allocation2 + $0x54] sm:$0x1] %v357_v27  ;;  %v573_v34 = vshrl.u32 %v448_v6, 16  ;;  %v576_v46 = vshll.u32 %v448_v6, 16 }
  0xc1   : > { %v1242_v30 = vsel %vm13474_vm11, %v1237_v18, %v1241_v19  ;;  %v1703_v32 = vsel %vm13492_vm14, %v1701_v21, %v1702_v10  ;;  %v1067_v33 = vld [vmem:[#allocation2 + $0x4c] sm:$0xf]  ;;  %v13642_v41 = vld [vmem:[#allocation2 + $0x48] sm:$0xe]  ;;  %v359_v43 = vld [vmem:[#allocation2 + $0x60] sm:$0x1]  ;;  %4696 = vmatprep.mubr.bf16.mxu1 %v12854_v31 }
  0xc2   : > { %v10874_v36 = vcombine.low %v1232_v23, %v1242_v30  ;;  %v10906_v38 = vcombine.low %v1700_v20, %v1703_v32  ;;  %v1250_v39 = vor.u32 %v1249_v26, %v1246_v24  ;;  %v1253_v40 = vshll.u32 %v1067_v33, 16  ;;  %v13644_v48 = vld [vmem:[#allocation2 + $0x4c] sm:$0xf]  ;;  %v450_v52 = vld [vmem:[%s13444_s13 + $0x38] sm:$0xf]  ;;  %v12892_v60 = vld [vmem:[#allocation8 + $0x1e0] sm:$0xff]  }
  0xc3   : > { %v1257_v44 = vshrl.u32 %v1067_v33, 16  ;;  %v575_v45 = vrot.slane %v573_v34, 7  ;;  %v581_v47 = vshrl.u32 %v449_v28, 16  ;;  %v584_v51 = vshll.u32 %v449_v28, 16  ;;  %v451_v53 = vld [vmem:[%s13444_s13 + $0x3c] sm:$0xf]  ;;  %12038 = vmatprep.subr.bf16.mxu1 %v12892_v60 }
  0xc4   : > { %4535 = vmatprep.mubr.bf16.mxu0 %v10874_v36  ;;  %v13646_v50 = vrot.slane %v1253_v40, 5  ;;  %v409_v59 = vld [vmem:[#allocation2 + $0x68] sm:$0x1]  ;;  %v13654_v0 = vrot.slane %v1250_v39, 4  ;;  %v407_v1 = vsel %vm13462_vm10, 0, %v406_v35  ;;  %v360_v2 = vsel %vm13456_vm3, 0, %v359_v43 }
  0xc5   : > { %4697 = vmatmul.mubr.bf16.gmra.mrb[20].mxu1 %v10906_v38  ;;  %v13650_v54 = vrot.slane %v1257_v44, 4  ;;  %v578_v55 = vor.u32 %v576_v46, %v575_v45  ;;  %v579_v57 = vrot.slane %v575_v45, 4  ;;  %v13652_v58 = vrot.slane %v581_v47, 7  ;;  %v831_v63 = vld [vmem:[#allocation2 + $0x50] sm:$0x1]  ;;  %v12894_v10 = vld [vmem:[#allocation8 + $0x1e8] sm:$0xff]  }
  0xc6   : > { %v12893_v3 = vld [vmem:[#allocation8 + $0x1a0] sm:$0xff]   ;;  %v832_v4 = vsel %vm13456_vm3, %v571_v49, %v831_v63  ;;  %v10891_v7 = vrot.slane %v13642_v41, 9  ;;  %408 = vst [vmem:[#allocation2 + $0x5c] sm:$0x1] %v407_v1  ;;  %361 = vst [vmem:[#allocation2 + $0x60] sm:$0x1] %v360_v2  ;;  %v1256_v60 = vsel %vm13474_vm11, %v13654_v0, %v13646_v50 }
  0xc7   : > { %4536 = vmatmul.mubr.bf16.gmra.mrb[20].mxu0 %v12855_v37  ;;  %v586_v6 = vor.u32 %v584_v51, %v13652_v58  ;;  %v362_v8 = vld [vmem:[#allocation2 + $0x6c] sm:$0x1]  ;;  %v13667_v9 = vld [vmem:[%s13444_s13 + $0x40] sm:$0xf]  ;;  %833 = vst [vmem:[#allocation2 + $0x50] sm:$0x1] %v832_v4  ;;  %12039 = vmatpush3.bf16.msra.mxu1 %v12893_v3  ;;  %v1260_v16 = vor.u32 %v13650_v54, %v13646_v50 }
  0xc8   : > { %v834_v12 = vld [vmem:[#allocation2 + $0x54] sm:$0xf]  ;;  %v1706_v13 = vrot.slane %v13644_v48, 5  ;;  %v590_v15 = vshrl.u32 %v450_v52, 16  ;;  %v593_v14 = vshll.u32 %v450_v52, 16  ;;  %v12896_v49 = vld [vmem:[#allocation8 + $0x1a8] sm:$0xff]   ;;  %12040 = vmatprep.subr.bf16.mxu1 %v12894_v10 }
  0xc9   : > { %v587_v17 = vsel %vm13480_vm12, %v579_v57, %v586_v6  ;;  %v835_v61 = vsel %vm13486_vm13, %v578_v55, %v834_v12  ;;  %v598_v18 = vshrl.u32 %v451_v53, 16  ;;  %v453_v19 = vld [vmem:[%s13444_s13 + $0x44] sm:$0xf]  ;;  %v601_v21 = vshll.u32 %v451_v53, 16  ;;  %v365_v37 = vld [vmem:[#allocation2 + $0x78] sm:$0x1] }
  0xca   : > { %836 = vst [vmem:[#allocation2 + $0x54] sm:$0xf] %v835_v61  ;;  %837 = vst [vmem:[#allocation2 + $0x58] sm:$0xf] %v587_v17  ;;  %v592_v20 = vrot.slane %v590_v15, 7  ;;  %v410_v22 = vsel %vm13462_vm10, 0, %v409_v59  ;;  %v1707_v39 = vsel %vm13492_vm14, %v10891_v7, %v1706_v13 }
  0xcb   : > { %v363_v23 = vsel %vm13456_vm3, 0, %v362_v8  ;;  %v588_v24 = vrot.slane %v13652_v58, 4  ;;  %v13682_v26 = vrot.slane %v598_v18, 7  ;;  %411 = vst [vmem:[#allocation2 + $0x68] sm:$0x1] %v410_v22  ;;  %v607_v27 = vshrl.u32 %v13667_v9, 16  ;;  %12041 = vmatpush3.bf16.msra.mxu1 %v12896_v49 }
  0xcc   : > { %364 = vst [vmem:[#allocation2 + $0x6c] sm:$0x1] %v363_v23  ;;  %v615_v28 = vshrl.u32 %v453_v19, 16  ;;  %v595_v29 = vor.u32 %v593_v14, %v592_v20  ;;  %v596_v30 = vrot.slane %v592_v20, 4  ;;  %v618_v31 = vshll.u32 %v453_v19, 16  ;;  %v12898_v38 = vld [vmem:[#allocation8 + $0x1f0] sm:$0xff]  }
  0xcd   : > { %v412_v32 = vld [vmem:[#allocation2 + $0x74] sm:$0x1]  ;;  %v1708_v33 = vrot.slane %v1706_v13, 4  ;;  %v603_v34 = vor.u32 %v601_v21, %v13682_v26  ;;  %v13686_v35 = vrot.slane %v607_v27, 7  ;;  %v838_v40 = vld [vmem:[#allocation2 + $0x5c] sm:$0x1]  ;;  %12042 = vmatprep.subr.bf16.mxu1 %v12898_v38 }
  0xce   : > { %v13688_v36 = vrot.slane %v615_v28, 7  ;;  %v841_v41 = vld [vmem:[#allocation2 + $0x60] sm:$0xf]  ;;  %v413_v43 = vsel %vm13462_vm10, 0, %v412_v32  ;;  %v366_v44 = vsel %vm13456_vm3, 0, %v365_v37  ;;  %v1261_v46 = vrot.slane %v1260_v16, 4 }
  0xcf   : > { %v1068_v45 = vld [vmem:[#allocation2 + $0x50] sm:$0x1]  ;;  %v839_v48 = vsel %vm13456_vm3, %v588_v24, %v838_v40  ;;  %v604_v51 = vsel %vm13480_vm12, %v596_v30, %v603_v34  ;;  %v842_v52 = vsel %vm13486_vm13, %v595_v29, %v841_v41  ;;  %414 = vst [vmem:[#allocation2 + $0x74] sm:$0x1] %v413_v43  ;;  %367 = vst [vmem:[#allocation2 + $0x78] sm:$0x1] %v366_v44 }
  0xd0   : > { %v1583_v47 = vld [vmem:[#allocation2 + $0x50] sm:$0x1]  ;;  %v1263_v53 = vshll.u32 %v1068_v45, 16  ;;  %840 = vst [vmem:[#allocation2 + $0x5c] sm:$0x1] %v839_v48  ;;  %v613_v55 = vrot.slane %v13686_v35, 4  ;;  %v620_v57 = vor.u32 %v618_v31, %v13688_v36 }
  0xd1   : > { %v1709_v54 = vrot.slane %v1583_v47, 5  ;;  %843 = vst [vmem:[#allocation2 + $0x60] sm:$0xf] %v842_v52  ;;  %844 = vst [vmem:[#allocation2 + $0x64] sm:$0xf] %v604_v51  ;;  %v12899_v59 = vld [vmem:[#allocation8 + $0x1b0] sm:$0xff]  }
  0xd2   : > { %v13705_v58 = vld [vmem:[%s13444_s13 + $0x48] sm:$0xf]  ;;  %v610_v1 = vshll.u32 %v13667_v9, 16  ;;  %v1265_v2 = vrot.slane %v1263_v53, 5  ;;  %v12857_v3 = vld [vmem:[#allocation2 + $0x48] sm:$0xff]   ;;  %v605_v8 = vrot.slane %v13682_v26, 4  ;;  %v621_v10 = vsel %vm13480_vm12, %v613_v55, %v620_v57  ;;  %12043 = vmatpush3.bf16.msra.mxu1 %v12899_v59 }
  0xd3   : > { %v12856_v63 = vld [vmem:[#allocation2 + $0x54] sm:$0xff]   ;;  %v1710_v4 = vsel %vm13492_vm14, %v1708_v33, %v1709_v54  ;;  %851 = vst [vmem:[#allocation2 + $0x70] sm:$0xf] %v621_v10  ;;  %v12900_v9 = vld [vmem:[#allocation8 + $0x1f8] sm:$0xff]   ;;  %v624_v16 = vshrl.u32 %v13705_v58, 16  ;;  %v622_v27 = vrot.slane %v13688_v36, 4 }
  0xd4   : > { %v1069_v6 = vld [vmem:[#allocation2 + $0x54] sm:$0xf]  ;;  %v1070_v7 = vld [vmem:[#allocation2 + $0x58] sm:$0xf]  ;;  %4704 = vmatprep.mubr.bf16.mxu1 %v12856_v63  ;;  %v10907_v12 = vcombine.low %v1707_v39, %v1710_v4  ;;  %v1266_v15 = vsel %vm13474_vm11, %v1261_v46, %v1265_v2  ;;  %12044 = vmatprep.subr.bf16.mxu1 %v12900_v9  ;;  %v12901_v21 = vld [vmem:[#allocation8 + $0x1b8] sm:$0xff]   ;;  %v612_v44 = vor.u32 %v610_v1, %v13686_v35 }
  0xd5   : > { %v1268_v13 = vshrl.u32 %v1069_v6, 16  ;;  %v1271_v50 = vshll.u32 %v1069_v6, 16  ;;  %v1277_v0 = vshll.u32 %v1070_v7, 16  ;;  %v1281_v14 = vshrl.u32 %v1070_v7, 16  ;;  %v1584_v49 = vld [vmem:[#allocation2 + $0x54] sm:$0xe] }
  0xd6   : > { %v10875_v17 = vcombine.low %v1256_v60, %v1266_v15  ;;  %4705 = vmatmul.mubr.bf16.gmra.mrb[24].mxu1 %v10907_v12  ;;  %v1585_v20 = vld [vmem:[#allocation2 + $0x58] sm:$0xf]  ;;  %v10892_v23 = vrot.slane %v1584_v49, 9  ;;  %v845_v26 = vld [vmem:[#allocation2 + $0x68] sm:$0x1]  ;;  %v13723_v38 = vrot.slane %v624_v16, 7 }
  0xd7   : > { %v1270_v61 = vrot.slane %v1268_v13, 4  ;;  %v1273_v18 = vrot.slane %v1271_v50, 5  ;;  %v1279_v19 = vrot.slane %v1277_v0, 5  ;;  %v1283_v22 = vrot.slane %v1281_v14, 4  ;;  %v1071_v28 = vld [vmem:[#allocation2 + $0x5c] sm:$0x1]  ;;  %12045 = vmatpush3.bf16.msra.mxu1 %v12901_v21 }
  0xd8   : > { %v1713_v24 = vrot.slane %v1585_v20, 5  ;;  %4543 = vmatprep.mubr.bf16.mxu0 %v10875_v17  ;;  %v846_v30 = vsel %vm13456_vm3, %v605_v8, %v845_v26  ;;  %v1287_v32 = vshll.u32 %v1071_v28, 16  ;;  %v12860_v33 = vld [vmem:[#allocation2 + $0x60] sm:$0xff]   ;;  %v1586_v34 = vld [vmem:[#allocation2 + $0x5c] sm:$0x1]  ;;  %v12861_v47 = vld [vmem:[#allocation2 + $0x54] sm:$0xff]  }
  0xd9   : > { %v1274_v29 = vor.u32 %v1273_v18, %v1270_v61  ;;  %4544 = vmatmul.mubr.bf16.gmra.mrb[24].mxu0 %v12857_v3  ;;  %v1284_v31 = vor.u32 %v1283_v22, %v1279_v19  ;;  %847 = vst [vmem:[#allocation2 + $0x68] sm:$0x1] %v846_v30  ;;  %v1716_v40 = vrot.slane %v1586_v34, 5  ;;  %v1072_v41 = vld [vmem:[#allocation2 + $0x60] sm:$0xf]  ;;  %4712 = vmatprep.mubr.bf16.mxu1 %v12860_v33  ;;  %v12902_v21 = vld [vmem:[#allocation8 + $0x200] sm:$0xff]  }
  0xda   : > { %v1715_v37 = vrot.slane %v1713_v24, 4  ;;  %v1714_v36 = vsel %vm13492_vm14, %v10892_v23, %v1713_v24  ;;  %v1073_v43 = vld [vmem:[#allocation2 + $0x64] sm:$0xf]  ;;  %v1289_v46 = vrot.slane %v1287_v32, 5  ;;  %v1292_v48 = vshrl.u32 %v1072_v41, 16  ;;  %12638 = vmatprep.subr.bf16.mxu0 %v12902_v21 }
  0xdb   : > { %v1275_v39 = vrot.slane %v1274_v29, 4  ;;  %v1285_v45 = vrot.slane %v1284_v31, 4  ;;  %v1295_v51 = vshll.u32 %v1072_v41, 16  ;;  %v848_v52 = vld [vmem:[#allocation2 + $0x6c] sm:$0xf]  ;;  %v1301_v55 = vshll.u32 %v1073_v43, 16 }
  0xdc   : > { %v1717_v54 = vsel %vm13492_vm14, %v1715_v37, %v1716_v40  ;;  %v1305_v57 = vshrl.u32 %v1073_v43, 16  ;;  %v1294_v35 = vrot.slane %v1292_v48, 4  ;;  %v1587_v1 = vld [vmem:[#allocation2 + $0x60] sm:$0xe]  ;;  %v849_v6 = vsel %vm13486_vm13, %v612_v44, %v848_v52  ;;  %v1588_v7 = vld [vmem:[#allocation2 + $0x64] sm:$0xf] }
  0xdd   : > { %v1280_v53 = vsel %vm13474_vm11, %v1275_v39, %v1279_v19  ;;  %v1290_v59 = vsel %vm13474_vm11, %v1285_v45, %v1289_v46  ;;  %v10908_v60 = vcombine.low %v1714_v36, %v1717_v54  ;;  %v1297_v63 = vrot.slane %v1295_v51, 5  ;;  %v852_v8 = vld [vmem:[#allocation2 + $0x74] sm:$0x1]  ;;  %850 = vst [vmem:[#allocation2 + $0x6c] sm:$0xf] %v849_v6  ;;  %v12863_v40 = vld [vmem:[#allocation2 + $0x60] sm:$0xff]  }
  0xde   : > { %v10876_v2 = vcombine.low %v1280_v53, %v1290_v59  ;;  %v1303_v3 = vrot.slane %v1301_v55, 5  ;;  %v1307_v4 = vrot.slane %v1305_v57, 4  ;;  %v10893_v12 = vrot.slane %v1587_v1, 9  ;;  %v1076_v0 = vld [vmem:[#allocation2 + $0x70] sm:$0xf] }
  0xdf   : > { %4713 = vmatmul.mubr.bf16.gmra.mrb[28].mxu1 %v10908_v60  ;;  %v1298_v10 = vor.u32 %v1297_v63, %v1294_v35  ;;  %v1720_v13 = vrot.slane %v1588_v7, 5  ;;  %v853_v50 = vsel %vm13456_vm3, %v622_v27, %v852_v8  ;;  %v455_v9 = vld [vmem:[%s13444_s13 + $0x4c] sm:$0xf]  ;;  %v1325_v16 = vshll.u32 %v1076_v0, 16  ;;  %v1591_v27 = vld [vmem:[#allocation2 + $0x70] sm:$0xf] }
  0xe0   : > { %4551 = vmatprep.mubr.bf16.mxu0 %v10876_v2  ;;  %v1074_v15 = vld [vmem:[#allocation2 + $0x68] sm:$0x1]  ;;  %v1308_v14 = vor.u32 %v1307_v4, %v1303_v3  ;;  %854 = vst [vmem:[#allocation2 + $0x74] sm:$0x1] %v853_v50  ;;  %v1329_v17 = vshrl.u32 %v1076_v0, 16  ;;  %v627_v30 = vshll.u32 %v13705_v58, 16 }
  0xe1   : > { %v1589_v49 = vld [vmem:[#allocation2 + $0x68] sm:$0x1]  ;;  %4552 = vmatmul.mubr.bf16.gmra.mrb[28].mxu0 %v12861_v47  ;;  %v1299_v61 = vrot.slane %v1298_v10, 4  ;;  %v1311_v18 = vshll.u32 %v1074_v15, 16  ;;  %v1721_v19 = vsel %vm13492_vm14, %v10893_v12, %v1720_v13  ;;  %v1722_v20 = vrot.slane %v1720_v13, 4 }
  0xe2   : > { %v1309_v22 = vrot.slane %v1308_v14, 4  ;;  %v1723_v23 = vrot.slane %v1589_v49, 5  ;;  %v13741_v24 = vrot.slane %v1325_v16, 5  ;;  %v1331_v26 = vrot.slane %v1329_v17, 4  ;;  %v855_v39 = vld [vmem:[#allocation2 + $0x78] sm:$0xf] }
  0xe3   : > { %v1304_v28 = vsel %vm13474_vm11, %v1299_v61, %v1303_v3  ;;  %v1313_v29 = vrot.slane %v1311_v18, 5  ;;  %v630_v31 = vrot.slane %v13723_v38, 4  ;;  %v632_v34 = vshrl.u32 %v455_v9, 16  ;;  %v415_v44 = vld [vmem:[#allocation2 + $0x80] sm:$0x1] }
  0xe4   : > { %v1724_v32 = vsel %vm13492_vm14, %v1722_v20, %v1723_v23  ;;  %v1332_v33 = vor.u32 %v1331_v26, %v13741_v24  ;;  %v635_v37 = vshll.u32 %v455_v9, 16  ;;  %v629_v43 = vor.u32 %v627_v30, %v13723_v38  ;;  %v12862_v46 = vld [vmem:[#allocation2 + $0x6c] sm:$0xff]   ;;  %v368_v51 = vld [vmem:[#allocation2 + $0x84] sm:$0x1]  ;;  %v456_v52 = vld [vmem:[%s13444_s13 + $0x50] sm:$0xf] }
  0xe5   : > { %v1314_v36 = vsel %vm13474_vm11, %v1309_v22, %v1313_v29  ;;  %v10909_v41 = vcombine.low %v1721_v19, %v1724_v32  ;;  %v1727_v58 = vrot.slane %v1591_v27, 5  ;;  %v1075_v47 = vld [vmem:[#allocation2 + $0x6c] sm:$0xf]  ;;  %v13754_v57 = vrot.slane %v632_v34, 7  ;;  %4720 = vmatprep.mubr.bf16.mxu1 %v12862_v46  ;;  %v457_v4 = vld [vmem:[%s13444_s13 + $0x54] sm:$0xf] }
  0xe6   : > { %v10877_v45 = vcombine.low %v1304_v28, %v1314_v36  ;;  %v1333_v48 = vrot.slane %v1332_v33, 4  ;;  %v1316_v54 = vshrl.u32 %v1075_v47, 16  ;;  %v1319_v55 = vshll.u32 %v1075_v47, 16  ;;  %v1590_v60 = vld [vmem:[#allocation2 + $0x6c] sm:$0xe] }
  0xe7   : > { %v1077_v53 = vld [vmem:[#allocation2 + $0x74] sm:$0x1]  ;;  %v856_v59 = vsel %vm13486_vm13, %v629_v43, %v855_v39  ;;  %v1729_v35 = vrot.slane %v1727_v58, 4  ;;  %4721 = vmatmul.mubr.bf16.gmra.mrb[32].mxu1 %v10909_v41  ;;  %v637_v2 = vor.u32 %v635_v37, %v13754_v57  ;;  %v10894_v7 = vrot.slane %v1590_v60, 9  ;;  %v418_v16 = vld [vmem:[#allocation2 + $0x8c] sm:$0x1] }
  0xe8   : > { %4559 = vmatprep.mubr.bf16.mxu0 %v10877_v45  ;;  %v1335_v38 = vshll.u32 %v1077_v53, 16  ;;  %857 = vst [vmem:[#allocation2 + $0x78] sm:$0xf] %v856_v59  ;;  %v1318_v63 = vrot.slane %v1316_v54, 4  ;;  %v1321_v1 = vrot.slane %v1319_v55, 5  ;;  %v416_v10 = vsel %vm13462_vm10, 0, %v415_v44 }
  0xe9   : > { %4560 = vmatmul.mubr.bf16.gmra.mrb[32].mxu0 %v12863_v40  ;;  %v1592_v3 = vld [vmem:[#allocation2 + $0x74] sm:$0x1]  ;;  %v638_v13 = vsel %vm13480_vm12, %v630_v31, %v637_v2  ;;  %417 = vst [vmem:[#allocation2 + $0x80] sm:$0x1] %v416_v10  ;;  %v369_v50 = vsel %vm13456_vm3, 0, %v368_v51  ;;  %v641_v0 = vshrl.u32 %v456_v52, 16  ;;  %v1728_v14 = vsel %vm13492_vm14, %v10894_v7, %v1727_v58 }
  0xea   : > { %v1337_v6 = vrot.slane %v1335_v38, 5  ;;  %v1730_v8 = vrot.slane %v1592_v3, 5  ;;  %v1322_v12 = vor.u32 %v1321_v1, %v1318_v63  ;;  %v639_v15 = vrot.slane %v13754_v57, 4  ;;  %858 = vst [vmem:[#allocation2 + $0x7c] sm:$0xf] %v638_v13  ;;  %v12867_v18 = vld [vmem:[#allocation2 + $0x6c] sm:$0xff]  }
  0xeb   : > { %370 = vst [vmem:[#allocation2 + $0x84] sm:$0x1] %v369_v50  ;;  %v371_v17 = vld [vmem:[#allocation2 + $0x90] sm:$0x1]  ;;  %v643_v19 = vrot.slane %v641_v0, 7  ;;  %v644_v20 = vshll.u32 %v456_v52, 16 }
  0xec   : > { %v1338_v9 = vsel %vm13474_vm11, %v1333_v48, %v1337_v6  ;;  %v1731_v49 = vsel %vm13492_vm14, %v1729_v35, %v1730_v8  ;;  %v1323_v61 = vrot.slane %v1322_v12, 4  ;;  %v649_v21 = vshrl.u32 %v457_v4, 16  ;;  %v458_v22 = vld [vmem:[%s13444_s13 + $0x58] sm:$0xf]  ;;  %v459_v28 = vld [vmem:[%s13444_s13 + $0x5c] sm:$0xf] }
  0xed   : > { %v652_v23 = vshll.u32 %v457_v4, 16  ;;  %v419_v26 = vsel %vm13462_vm10, 0, %v418_v16  ;;  %v372_v27 = vsel %vm13456_vm3, 0, %v371_v17  ;;  %v658_v29 = vshrl.u32 %v458_v22, 16  ;;  %v421_v44 = vld [vmem:[#allocation2 + $0x98] sm:$0x1] }
  0xee   : > { %v1328_v30 = vsel %vm13474_vm11, %v1323_v61, %v13741_v24  ;;  %v647_v32 = vrot.slane %v643_v19, 4  ;;  %v651_v33 = vrot.slane %v649_v21, 7  ;;  %420 = vst [vmem:[#allocation2 + $0x8c] sm:$0x1] %v419_v26  ;;  %373 = vst [vmem:[#allocation2 + $0x90] sm:$0x1] %v372_v27  ;;  %v10910_v37 = vcombine.low %v1728_v14, %v1731_v49 }
  0xef   : > { %v1078_v31 = vld [vmem:[#allocation2 + $0x78] sm:$0xf]  ;;  %v10878_v34 = vcombine.low %v1328_v30, %v1338_v9  ;;  %v646_v40 = vor.u32 %v644_v20, %v643_v19  ;;  %v660_v58 = vrot.slane %v658_v29, 7  ;;  %v661_v24 = vshll.u32 %v458_v22, 16  ;;  %v374_v14 = vld [vmem:[#allocation2 + $0x9c] sm:$0x1] }
  0xf0   : > { %v1340_v39 = vshrl.u32 %v1078_v31, 16  ;;  %v1343_v36 = vshll.u32 %v1078_v31, 16  ;;  %v654_v41 = vor.u32 %v652_v23, %v651_v33  ;;  %v656_v43 = vrot.slane %v651_v33, 4  ;;  %v859_v45 = vld [vmem:[#allocation2 + $0x80] sm:$0x1] }
  0xf1   : > { %4567 = vmatprep.mubr.bf16.mxu0 %v10878_v34  ;;  %v1593_v48 = vld [vmem:[#allocation2 + $0x78] sm:$0xe]  ;;  %v666_v51 = vshrl.u32 %v459_v28, 16  ;;  %v860_v53 = vsel %vm13456_vm3, %v639_v15, %v859_v45  ;;  %v1079_v54 = vld [vmem:[#allocation2 + $0x7c] sm:$0xf]  ;;  %v664_v57 = vrot.slane %v660_v58, 4  ;;  %v663_v63 = vor.u32 %v661_v24, %v660_v58 }
  0xf2   : > { %v1342_v46 = vrot.slane %v1340_v39, 4  ;;  %v1345_v47 = vrot.slane %v1343_v36, 5  ;;  %v12866_v52 = vld [vmem:[#allocation2 + $0x78] sm:$0xff]   ;;  %4568 = vmatmul.mubr.bf16.gmra.mrb[36].mxu0 %v12867_v18  ;;  %v655_v55 = vsel %vm13480_vm12, %v647_v32, %v654_v41  ;;  %861 = vst [vmem:[#allocation2 + $0x80] sm:$0x1] %v860_v53  ;;  %v1349_v38 = vshll.u32 %v1079_v54, 16 }
  0xf3   : > { %v1353_v60 = vshrl.u32 %v1079_v54, 16  ;;  %v862_v35 = vld [vmem:[#allocation2 + $0x84] sm:$0xf]  ;;  %865 = vst [vmem:[#allocation2 + $0x88] sm:$0xf] %v655_v55  ;;  %4728 = vmatprep.mubr.bf16.mxu1 %v12866_v52  ;;  %v13788_v3 = vrot.slane %v666_v51, 7 }
  0xf4   : > { %v1346_v59 = vor.u32 %v1345_v47, %v1342_v46  ;;  %v863_v1 = vsel %vm13486_vm13, %v646_v40, %v862_v35  ;;  %v1594_v2 = vld [vmem:[#allocation2 + $0x7c] sm:$0xf]  ;;  %v669_v4 = vshll.u32 %v459_v28, 16  ;;  %v422_v6 = vsel %vm13462_vm10, 0, %v421_v44  ;;  %4729 = vmatmul.mubr.bf16.gmra.mrb[36].mxu1 %v10910_v37  ;;  %v13797_v61 = vld [vmem:[%s13444_s13 + $0x60] sm:$0xf] }
  0xf5   : > { %v1351_v7 = vrot.slane %v1349_v38, 5  ;;  %v1355_v8 = vrot.slane %v1353_v60, 4  ;;  %864 = vst [vmem:[#allocation2 + $0x84] sm:$0xf] %v863_v1  ;;  %v1734_v10 = vrot.slane %v1594_v2, 5  ;;  %v10895_v50 = vrot.slane %v1593_v48, 9 }
  0xf6   : > { %v866_v12 = vld [vmem:[#allocation2 + $0x8c] sm:$0x1]  ;;  %423 = vst [vmem:[#allocation2 + $0x98] sm:$0x1] %v422_v6  ;;  %v1347_v13 = vrot.slane %v1346_v59, 4  ;;  %v671_v9 = vor.u32 %v669_v4, %v13788_v3  ;;  %v673_v17 = vrot.slane %v13788_v3, 4 }
  0xf7   : > { %v867_v0 = vsel %vm13456_vm3, %v656_v43, %v866_v12  ;;  %v869_v15 = vld [vmem:[#allocation2 + $0x90] sm:$0xf]  ;;  %v1356_v49 = vor.u32 %v1355_v8, %v1351_v7  ;;  %v1736_v16 = vrot.slane %v1734_v10, 4  ;;  %v13800_v18 = vld [vmem:[%s13444_s13 + $0x64] sm:$0xf]  ;;  %v375_v21 = vsel %vm13456_vm3, 0, %v374_v14 }
  0xf8   : > { %868 = vst [vmem:[#allocation2 + $0x8c] sm:$0x1] %v867_v0  ;;  %v672_v19 = vsel %vm13480_vm12, %v664_v57, %v671_v9  ;;  %v870_v20 = vsel %vm13486_vm13, %v663_v63, %v869_v15  ;;  %v675_v22 = vshrl.u32 %v13797_v61, 16  ;;  %376 = vst [vmem:[#allocation2 + $0x9c] sm:$0x1] %v375_v21  ;;  %v678_v26 = vshll.u32 %v13797_v61, 16 }
  0xf9   : > { %v1357_v23 = vrot.slane %v1356_v49, 4  ;;  %871 = vst [vmem:[#allocation2 + $0x90] sm:$0xf] %v870_v20  ;;  %872 = vst [vmem:[#allocation2 + $0x94] sm:$0xf] %v672_v19  ;;  %v683_v27 = vshrl.u32 %v13800_v18, 16  ;;  %v1735_v32 = vsel %vm13492_vm14, %v10895_v50, %v1734_v10  ;;  %v1352_v37 = vsel %vm13474_vm11, %v1347_v13, %v1351_v7 }
  0xfa   : > { %v686_v28 = vshll.u32 %v13800_v18, 16  ;;  %v1080_v29 = vld [vmem:[#allocation2 + $0x80] sm:$0x1]  ;;  %v1082_v34 = vld [vmem:[#allocation2 + $0x88] sm:$0xf]  ;;  %v12869_v52 = vld [vmem:[#allocation2 + $0x78] sm:$0xff]  }
  0xfb   : > { %v1595_v30 = vld [vmem:[#allocation2 + $0x80] sm:$0x1]  ;;  %v1359_v31 = vshll.u32 %v1080_v29, 16  ;;  %v1373_v40 = vshll.u32 %v1082_v34, 16  ;;  %v1377_v48 = vshrl.u32 %v1082_v34, 16  ;;  %v677_v10 = vrot.slane %v675_v22, 7 }
  0xfc   : > { %v1737_v33 = vrot.slane %v1595_v30, 5  ;;  %v12868_v39 = vld [vmem:[#allocation2 + $0x84] sm:$0xff]  }
  0xfd   : > { %v1081_v36 = vld [vmem:[#allocation2 + $0x84] sm:$0xf]  ;;  %v1361_v41 = vrot.slane %v1359_v31, 5  ;;  %4736 = vmatprep.mubr.bf16.mxu1 %v12868_v39  ;;  %v1375_v47 = vrot.slane %v1373_v40, 5  ;;  %v1597_v57 = vld [vmem:[#allocation2 + $0x88] sm:$0xf]  ;;  %v680_v22 = vor.u32 %v678_v26, %v677_v10 }
  0xfe   : > { %v1738_v43 = vsel %vm13492_vm14, %v1736_v16, %v1737_v33  ;;  %v1364_v58 = vshrl.u32 %v1081_v36, 16  ;;  %v1367_v44 = vshll.u32 %v1081_v36, 16  ;;  %v1596_v24 = vld [vmem:[#allocation2 + $0x84] sm:$0xe]  ;;  %v1379_v38 = vrot.slane %v1377_v48, 4 }
  0xff   : > { %v10911_v45 = vcombine.low %v1735_v32, %v1738_v43  ;;  %v1083_v46 = vld [vmem:[#allocation2 + $0x8c] sm:$0x1]  ;;  %v1362_v51 = vsel %vm13474_vm11, %v1357_v23, %v1361_v41  ;;  %v10896_v2 = vrot.slane %v1596_v24, 9  ;;  %v1741_v3 = vrot.slane %v1597_v57, 5  ;;  %v873_v7 = vld [vmem:[#allocation2 + $0x98] sm:$0x1] }
 0x100   : > { %v1366_v53 = vrot.slane %v1364_v58, 4  ;;  %v1369_v54 = vrot.slane %v1367_v44, 5  ;;  %v1383_v55 = vshll.u32 %v1083_v46, 16  ;;  %v10879_v59 = vcombine.low %v1352_v37, %v1362_v51  ;;  %v12872_v60 = vld [vmem:[#allocation2 + $0x90] sm:$0xff]   ;;  %v1598_v1 = vld [vmem:[#allocation2 + $0x8c] sm:$0x1] }
 0x101   : > { %4737 = vmatmul.mubr.bf16.gmra.mrb[40].mxu1 %v10911_v45  ;;  %v1380_v4 = vor.u32 %v1379_v38, %v1375_v47  ;;  %v1744_v6 = vrot.slane %v1598_v1, 5  ;;  %v1084_v8 = vld [vmem:[#allocation2 + $0x90] sm:$0xf]  ;;  %v1742_v13 = vsel %vm13492_vm14, %v10896_v2, %v1741_v3  ;;  %v1743_v50 = vrot.slane %v1741_v3, 4  ;;  %v1085_v9 = vld [vmem:[#allocation2 + $0x94] sm:$0xf] }
 0x102   : > { %v1370_v35 = vor.u32 %v1369_v54, %v1366_v53  ;;  %v1385_v63 = vrot.slane %v1383_v55, 5  ;;  %4575 = vmatprep.mubr.bf16.mxu0 %v10879_v59  ;;  %4744 = vmatprep.mubr.bf16.mxu1 %v12872_v60  ;;  %v874_v0 = vsel %vm13456_vm3, %v673_v17, %v873_v7  ;;  %v1388_v14 = vshrl.u32 %v1084_v8, 16  ;;  %v12873_v19 = vld [vmem:[#allocation2 + $0x84] sm:$0xff]   ;;  %v876_v23 = vld [vmem:[#allocation2 + $0x9c] sm:$0xf] }
 0x103   : > { %4576 = vmatmul.mubr.bf16.gmra.mrb[40].mxu0 %v12869_v52  ;;  %v1381_v15 = vrot.slane %v1380_v4, 4  ;;  %875 = vst [vmem:[#allocation2 + $0x98] sm:$0x1] %v874_v0  ;;  %v1391_v49 = vshll.u32 %v1084_v8, 16  ;;  %v1397_v16 = vshll.u32 %v1085_v9, 16  ;;  %v1745_v20 = vsel %vm13492_vm14, %v1743_v50, %v1744_v6  ;;  %v12875_v6 = vld [vmem:[#allocation2 + $0x90] sm:$0xff]  }
 0x104   : > { %v1371_v12 = vrot.slane %v1370_v35, 4  ;;  %v1401_v21 = vshrl.u32 %v1085_v9, 16  ;;  %v10912_v17 = vcombine.low %v1742_v13, %v1745_v20  ;;  %v1390_v30 = vrot.slane %v1388_v14, 4  ;;  %v1600_v32 = vld [vmem:[#allocation2 + $0x94] sm:$0xf] }
 0x105   : > { %v1386_v29 = vsel %vm13474_vm11, %v1381_v15, %v1385_v63  ;;  %v1393_v31 = vrot.slane %v1391_v49, 5  ;;  %v1399_v34 = vrot.slane %v1397_v16, 5  ;;  %v1599_v39 = vld [vmem:[#allocation2 + $0x90] sm:$0xe]  ;;  %v681_v40 = vrot.slane %v677_v10, 4 }
 0x106   : > { %v1376_v61 = vsel %vm13474_vm11, %v1371_v12, %v1375_v47  ;;  %v1403_v37 = vrot.slane %v1401_v21, 4  ;;  %v685_v41 = vrot.slane %v683_v27, 7  ;;  %v877_v26 = vsel %vm13486_vm13, %v680_v22, %v876_v23  ;;  %v424_v47 = vld [vmem:[#allocation2 + $0xa4] sm:$0x1]  ;;  %v377_v55 = vld [vmem:[#allocation2 + $0xa8] sm:$0x1] }
 0x107   : > { %v10880_v33 = vcombine.low %v1376_v61, %v1386_v29  ;;  %v1394_v36 = vor.u32 %v1393_v31, %v1390_v30  ;;  %878 = vst [vmem:[#allocation2 + $0x9c] sm:$0xf] %v877_v26  ;;  %v1748_v58 = vrot.slane %v1600_v32, 5  ;;  %v10897_v46 = vrot.slane %v1599_v39, 9  ;;  %v462_v57 = vld [vmem:[%s13444_s13 + $0x68] sm:$0xf] }
 0x108   : > { %v1404_v43 = vor.u32 %v1403_v37, %v1399_v34  ;;  %v688_v45 = vor.u32 %v686_v28, %v685_v41  ;;  %v425_v18 = vsel %vm13462_vm10, 0, %v424_v47  ;;  %v378_v28 = vsel %vm13456_vm3, 0, %v377_v55  ;;  %v463_v38 = vld [vmem:[%s13444_s13 + $0x6c] sm:$0xf]  ;;  %v380_v26 = vld [vmem:[#allocation2 + $0xb4] sm:$0x1] }
 0x109   : > { %4745 = vmatmul.mubr.bf16.gmra.mrb[44].mxu1 %v10912_v17  ;;  %4583 = vmatprep.mubr.bf16.mxu0 %v10880_v33  ;;  %v1395_v44 = vrot.slane %v1394_v36, 4  ;;  %v1750_v27 = vrot.slane %v1748_v58, 4  ;;  %v692_v60 = vshrl.u32 %v462_v57, 16  ;;  %426 = vst [vmem:[#allocation2 + $0xa4] sm:$0x1] %v425_v18  ;;  %v695_v63 = vshll.u32 %v462_v57, 16 }
 0x10a   : > { %v1086_v48 = vld [vmem:[#allocation2 + $0x98] sm:$0x1]  ;;  %v1405_v24 = vrot.slane %v1404_v43, 4  ;;  %v689_v53 = vsel %vm13480_vm12, %v681_v40, %v688_v45  ;;  %379 = vst [vmem:[#allocation2 + $0xa8] sm:$0x1] %v378_v28  ;;  %v700_v1 = vshrl.u32 %v463_v38, 16  ;;  %v1749_v7 = vsel %vm13492_vm14, %v10897_v46, %v1748_v58 }
 0x10b   : > { %4584 = vmatmul.mubr.bf16.gmra.mrb[44].mxu0 %v12873_v19  ;;  %v1601_v51 = vld [vmem:[#allocation2 + $0x98] sm:$0x1]  ;;  %v1407_v52 = vshll.u32 %v1086_v48, 16  ;;  %v1400_v59 = vsel %vm13474_vm11, %v1395_v44, %v1399_v34  ;;  %879 = vst [vmem:[#allocation2 + $0xa0] sm:$0xf] %v689_v53  ;;  %v703_v2 = vshll.u32 %v463_v38, 16 }
 0x10c   : > { %v1751_v54 = vrot.slane %v1601_v51, 5  ;;  %v694_v3 = vrot.slane %v692_v60, 7  ;;  %v13852_v12 = vrot.slane %v700_v1, 7  ;;  %v690_v9 = vrot.slane %v685_v41, 4  ;;  %v427_v41 = vld [vmem:[#allocation2 + $0xb0] sm:$0x1] }
 0x10d   : > { %v1409_v35 = vrot.slane %v1407_v52, 5  ;;  %v464_v44 = vld [vmem:[%s13444_s13 + $0x70] sm:$0xf]  ;;  %v465_v45 = vld [vmem:[%s13444_s13 + $0x74] sm:$0xf]  ;;  %v428_v47 = vsel %vm13462_vm10, 0, %v427_v41 }
 0x10e   : > { %v1752_v8 = vsel %vm13492_vm14, %v1750_v27, %v1751_v54  ;;  %v1087_v10 = vld [vmem:[#allocation2 + $0x9c] sm:$0xf]  ;;  %v697_v15 = vor.u32 %v695_v63, %v694_v3  ;;  %v698_v14 = vrot.slane %v694_v3, 4  ;;  %v705_v49 = vor.u32 %v703_v2, %v13852_v12  ;;  %429 = vst [vmem:[#allocation2 + $0xb0] sm:$0x1] %v428_v47 }
 0x10f   : > { %v1410_v4 = vsel %vm13474_vm11, %v1405_v24, %v1409_v35  ;;  %v1412_v50 = vshrl.u32 %v1087_v10, 16  ;;  %v1415_v0 = vshll.u32 %v1087_v10, 16  ;;  %v10913_v16 = vcombine.low %v1749_v7, %v1752_v8  ;;  %v1602_v33 = vld [vmem:[#allocation2 + $0x9c] sm:$0xe]  ;;  %v2974_v62 = vld [vmem:[#allocation2 + $0x94] sm:$0xf] }
 0x110   : > { %v10881_v13 = vcombine.low %v1400_v59, %v1410_v4  ;;  %v706_v22 = vsel %vm13480_vm12, %v698_v14, %v705_v49  ;;  %v880_v23 = vld [vmem:[#allocation2 + $0xa4] sm:$0x1]  ;;  %v707_v58 = vrot.slane %v13852_v12, 4  ;;  %v10898_v46 = vrot.slane %v1602_v33, 9  ;;  %v2543_v25 = vld [vmem:[#allocation2 + $0x90] sm:$0xe] }
 0x111   : > { %v1414_v61 = vrot.slane %v1412_v50, 4  ;;  %v1417_v19 = vrot.slane %v1415_v0, 5  ;;  %v883_v30 = vld [vmem:[#allocation2 + $0xa8] sm:$0xf]  ;;  %886 = vst [vmem:[#allocation2 + $0xac] sm:$0xf] %v706_v22  ;;  %v881_v31 = vsel %vm13456_vm3, %v690_v9, %v880_v23 }
 0x112   : > { %4591 = vmatprep.mubr.bf16.mxu0 %v10881_v13  ;;  %v12874_v20 = vld [vmem:[#allocation2 + $0x9c] sm:$0xff]   ;;  %v884_v32 = vsel %vm13486_vm13, %v697_v15, %v883_v30  ;;  %882 = vst [vmem:[#allocation2 + $0xa4] sm:$0x1] %v881_v31  ;;  %v381_v48 = vsel %vm13456_vm3, 0, %v380_v26  ;;  %v709_v24 = vshrl.u32 %v464_v44, 16  ;;  %v712_v27 = vshll.u32 %v464_v44, 16 }
 0x113   : > { %4592 = vmatmul.mubr.bf16.gmra.mrb[48].mxu0 %v12875_v6  ;;  %v1088_v21 = vld [vmem:[#allocation2 + $0xa0] sm:$0xf]  ;;  %4752 = vmatprep.mubr.bf16.mxu1 %v12874_v20  ;;  %v1418_v37 = vor.u32 %v1417_v19, %v1414_v61  ;;  %885 = vst [vmem:[#allocation2 + $0xa8] sm:$0xf] %v884_v32  ;;  %382 = vst [vmem:[#allocation2 + $0xb4] sm:$0x1] %v381_v48 }
 0x114   : > { %v1421_v29 = vshll.u32 %v1088_v21, 16  ;;  %v1425_v17 = vshrl.u32 %v1088_v21, 16  ;;  %v1603_v34 = vld [vmem:[#allocation2 + $0xa0] sm:$0xf]  ;;  %4753 = vmatmul.mubr.bf16.gmra.mrb[48].mxu1 %v10913_v16  ;;  %v717_v52 = vshrl.u32 %v465_v45, 16  ;;  %v720_v53 = vshll.u32 %v465_v45, 16 }
 0x115   : > { %v1755_v40 = vrot.slane %v1603_v34, 5  ;;  %v1419_v51 = vrot.slane %v1418_v37, 4  ;;  %v711_v57 = vrot.slane %v709_v24, 7  ;;  %v12883_v15 = vld [vmem:[#allocation2 + $0x9c] sm:$0xff]   ;;  %v887_v61 = vld [vmem:[#allocation2 + $0xb0] sm:$0x1] }
 0x116   : > { %v1423_v39 = vrot.slane %v1421_v29, 5  ;;  %v1427_v36 = vrot.slane %v1425_v17, 4  ;;  %v13868_v38 = vrot.slane %v717_v52, 7  ;;  %v888_v17 = vsel %vm13456_vm3, %v707_v58, %v887_v61  ;;  %v430_v26 = vld [vmem:[#allocation2 + $0xbc] sm:$0x1] }
 0x117   : > { %v1757_v54 = vrot.slane %v1755_v40, 4  ;;  %v1756_v63 = vsel %vm13492_vm14, %v10898_v46, %v1755_v40  ;;  %v715_v1 = vrot.slane %v711_v57, 4  ;;  %v714_v7 = vor.u32 %v712_v27, %v711_v57  ;;  %889 = vst [vmem:[#allocation2 + $0xb0] sm:$0x1] %v888_v17  ;;  %v466_v58 = vld [vmem:[%s13444_s13 + $0x78] sm:$0xf] }
 0x118   : > { %v1428_v43 = vor.u32 %v1427_v36, %v1423_v39  ;;  %v1091_v55 = vld [vmem:[#allocation2 + $0xac] sm:$0xf]  ;;  %v722_v8 = vor.u32 %v720_v53, %v13868_v38  ;;  %v1424_v0 = vsel %vm13474_vm11, %v1419_v51, %v1423_v39  ;;  %v724_v34 = vrot.slane %v13868_v38, 4 }
 0x119   : > { %v1445_v18 = vshll.u32 %v1091_v55, 16  ;;  %v1449_v28 = vshrl.u32 %v1091_v55, 16  ;;  %v1089_v60 = vld [vmem:[#allocation2 + $0xa4] sm:$0x1]  ;;  %v1606_v31 = vld [vmem:[#allocation2 + $0xac] sm:$0xf] }
 0x11a   : > { %v1429_v59 = vrot.slane %v1428_v43, 4  ;;  %v12881_v35 = vld [vmem:[#allocation2 + $0xa8] sm:$0xff]   ;;  %v1431_v2 = vshll.u32 %v1089_v60, 16  ;;  %v1604_v3 = vld [vmem:[#allocation2 + $0xa4] sm:$0x1]  ;;  %v723_v14 = vsel %vm13480_vm12, %v715_v1, %v722_v8  ;;  %v1762_v37 = vrot.slane %v1606_v31, 5 }
 0x11b   : > { %v1090_v4 = vld [vmem:[#allocation2 + $0xa8] sm:$0xf]  ;;  %v13872_v6 = vrot.slane %v1445_v18, 5  ;;  %4760 = vmatprep.mubr.bf16.mxu1 %v12881_v35  ;;  %v1758_v10 = vrot.slane %v1604_v3, 5  ;;  %v1451_v50 = vrot.slane %v1449_v28, 4  ;;  %v431_v44 = vsel %vm13462_vm10, 0, %v430_v26 }
 0x11c   : > { %v1436_v12 = vshrl.u32 %v1090_v4, 16  ;;  %v1439_v13 = vshll.u32 %v1090_v4, 16  ;;  %v1433_v9 = vrot.slane %v1431_v2, 5  ;;  %v1605_v49 = vld [vmem:[#allocation2 + $0xa8] sm:$0xe]  ;;  %v1764_v41 = vrot.slane %v1762_v37, 4 }
 0x11d   : > { %v1759_v16 = vsel %vm13492_vm14, %v1757_v54, %v1758_v10  ;;  %v1452_v21 = vor.u32 %v1451_v50, %v13872_v6  ;;  %v890_v22 = vld [vmem:[#allocation2 + $0xb4] sm:$0xf]  ;;  %893 = vst [vmem:[#allocation2 + $0xb8] sm:$0xf] %v723_v14  ;;  %v10899_v36 = vrot.slane %v1605_v49, 9  ;;  %v726_v51 = vshrl.u32 %v466_v58, 16 }
 0x11e   : > { %v1438_v19 = vrot.slane %v1436_v12, 4  ;;  %v1441_v20 = vrot.slane %v1439_v13, 5  ;;  %v1434_v23 = vsel %vm13474_vm11, %v1429_v59, %v1433_v9  ;;  %v10914_v29 = vcombine.low %v1756_v63, %v1759_v16  ;;  %v383_v43 = vld [vmem:[#allocation2 + $0xc0] sm:$0x1]  ;;  %432 = vst [vmem:[#allocation2 + $0xbc] sm:$0x1] %v431_v44 }
 0x11f   : > { %v891_v30 = vsel %vm13486_vm13, %v714_v7, %v890_v22  ;;  %v10882_v32 = vcombine.low %v1424_v0, %v1434_v23  ;;  %v1453_v39 = vrot.slane %v1452_v21, 4  ;;  %v384_v46 = vsel %vm13456_vm3, 0, %v383_v43  ;;  %v467_v24 = vld [vmem:[%s13444_s13 + $0x7c] sm:$0xf]  ;;  %v1092_v52 = vld [vmem:[#allocation2 + $0xb0] sm:$0x1] }
 0x120   : > { %v1442_v33 = vor.u32 %v1441_v20, %v1438_v19  ;;  %892 = vst [vmem:[#allocation2 + $0xb4] sm:$0xf] %v891_v30  ;;  %4761 = vmatmul.mubr.bf16.gmra.mrb[52].mxu1 %v10914_v29  ;;  %385 = vst [vmem:[#allocation2 + $0xc0] sm:$0x1] %v384_v46  ;;  %v729_v27 = vshll.u32 %v466_v58, 16  ;;  %v734_v54 = vshrl.u32 %v467_v24, 16  ;;  %v1763_v18 = vsel %vm13492_vm14, %v10899_v36, %v1762_v37 }
 0x121   : > { %4599 = vmatprep.mubr.bf16.mxu0 %v10882_v32  ;;  %v1455_v57 = vshll.u32 %v1092_v52, 16  ;;  %v1607_v59 = vld [vmem:[#allocation2 + $0xb0] sm:$0x1]  ;;  %v728_v3 = vrot.slane %v726_v51, 7  ;;  %v737_v7 = vshll.u32 %v467_v24, 16  ;;  %v12889_v50 = vld [vmem:[#allocation2 + $0xa8] sm:$0xff]  }
 0x122   : > { %4600 = vmatmul.mubr.bf16.gmra.mrb[52].mxu0 %v12883_v15  ;;  %v1443_v40 = vrot.slane %v1442_v33, 4  ;;  %v1765_v60 = vrot.slane %v1607_v59, 5  ;;  %v13902_v4 = vrot.slane %v734_v54, 7  ;;  %v2510_v32 = vld [vmem:[#allocation2 + $0xc] sm:$0xe]  ;;  %v3241_v5 = vshll.u32 %v2974_v62, 16 }
 0x123   : > { %v1457_v2 = vrot.slane %v1455_v57, 5  ;;  %v731_v9 = vor.u32 %v729_v27, %v728_v3  ;;  %v732_v15 = vrot.slane %v728_v3, 4  ;;  %v2511_v37 = vld [vmem:[#allocation2 + $0x10] sm:$0xf]  ;;  %v10949_v36 = vrot.slane %v2510_v32, 9 }
 0x124   : > { %v1094_v45 = vld [vmem:[#allocation2 + $0xb8] sm:$0xf]  ;;  %v1448_v55 = vsel %vm13474_vm11, %v1443_v40, %v13872_v6  ;;  %16387 = vst [vmem:[#allocation19_spill] sm:$0xff] %v13902_v4  ;;  %v1766_v6 = vsel %vm13492_vm14, %v1764_v41, %v1765_v60  ;;  %v739_v19 = vor.u32 %v737_v7, %v13902_v4  ;;  %v1998_v41 = vld [vmem:[#allocation2 + $0xc] sm:$0xf]  ;;  %v3243_v4 = vrot.slane %v3241_v5, 5 }
 0x125   : > { %v1469_v47 = vshll.u32 %v1094_v45, 16  ;;  %v1473_v48 = vshrl.u32 %v1094_v45, 16  ;;  %v1458_v13 = vsel %vm13474_vm11, %v1453_v39, %v1457_v2  ;;  %v10915_v0 = vcombine.low %v1763_v18, %v1766_v6  ;;  %v894_v16 = vld [vmem:[#allocation2 + $0xbc] sm:$0x1]  ;;  %v1609_v21 = vld [vmem:[#allocation2 + $0xb8] sm:$0xf] }
 0x126   : > { %v10883_v49 = vcombine.low %v1448_v55, %v1458_v13  ;;  %v895_v22 = vsel %vm13456_vm3, %v724_v34, %v894_v16  ;;  %v740_v30 = vsel %vm13480_vm12, %v732_v15, %v739_v19  ;;  %v1769_v33 = vrot.slane %v1609_v21, 5  ;;  %v2512_v39 = vld [vmem:[#allocation2 + $0x14] sm:$0x1]  ;;  %v1999_v26 = vld [vmem:[#allocation2 + $0x10] sm:$0xf] }
 0x127   : > { %v12887_v53 = vld [vmem:[#allocation2 + $0xb4] sm:$0xff]   ;;  %v13900_v38 = vrot.slane %v1469_v47, 5  ;;  %v1475_v1 = vrot.slane %v1473_v48, 4  ;;  %v897_v20 = vld [vmem:[#allocation2 + $0xc0] sm:$0xf]  ;;  %v2608_v34 = vrot.slane %v2511_v37, 5 }
 0x128   : > { %v1093_v28 = vld [vmem:[#allocation2 + $0xb4] sm:$0xf]  ;;  %4768 = vmatprep.mubr.bf16.mxu1 %v12887_v53  ;;  %v898_v29 = vsel %vm13486_vm13, %v731_v9, %v897_v20  ;;  %4607 = vmatprep.mubr.bf16.mxu0 %v10883_v49  ;;  %896 = vst [vmem:[#allocation2 + $0xbc] sm:$0x1] %v895_v22  ;;  %900 = vst [vmem:[#allocation2 + $0xc4] sm:$0xf] %v740_v30 }
 0x129   : > { %v1460_v35 = vshrl.u32 %v1093_v28, 16  ;;  %v1463_v63 = vshll.u32 %v1093_v28, 16  ;;  %v1476_v12 = vor.u32 %v1475_v1, %v13900_v38  ;;  %v1608_v14 = vld [vmem:[#allocation2 + $0xb4] sm:$0xe]  ;;  %4769 = vmatmul.mubr.bf16.gmra.mrb[56].mxu1 %v10915_v0  ;;  %899 = vst [vmem:[#allocation2 + $0xc0] sm:$0xf] %v898_v29  ;;  %v2609_v54 = vsel %vm13492_vm14, %v10949_v36, %v2608_v34 }
 0x12a   : > { %v10900_v31 = vrot.slane %v1608_v14, 9  ;;  %4608 = vmatmul.mubr.bf16.gmra.mrb[56].mxu0 %v12889_v50  ;;  %v2611_v40 = vrot.slane %v2512_v39, 5  ;;  %v2000_v43 = vld [vmem:[#allocation2 + $0x14] sm:$0x1]  ;;  %v2610_v44 = vrot.slane %v2608_v34, 4  ;;  %v2047_v45 = vshrl.u32 %v1998_v41, 16 }
 0x12b   : > { %v1462_v8 = vrot.slane %v1460_v35, 4  ;;  %v1465_v10 = vrot.slane %v1463_v63, 5  ;;  %v1477_v23 = vrot.slane %v1476_v12, 4  ;;  %v2050_v46 = vshll.u32 %v1998_v41, 16  ;;  %v2943_v3 = vld [vmem:[#allocation2 + $0x18] sm:$0xf] }
 0x12c   : > { %v1771_v47 = vrot.slane %v1769_v33, 4  ;;  %v2056_v48 = vshll.u32 %v1999_v26, 16  ;;  %v2060_v24 = vshrl.u32 %v1999_v26, 16  ;;  %v2066_v51 = vshll.u32 %v2000_v43, 16  ;;  %v12897_v14 = vld [vmem:[#allocation2 + $0xb4] sm:$0xff]  }
 0x12d   : > { %v1466_v61 = vor.u32 %v1465_v10, %v1462_v8  ;;  %v2612_v55 = vsel %vm13492_vm14, %v2610_v44, %v2611_v40  ;;  %v1770_v18 = vsel %vm13492_vm14, %v10900_v31, %v1769_v33  ;;  %v2049_v60 = vrot.slane %v2047_v45, 4  ;;  %v2944_v8 = vld [vmem:[#allocation2 + $0x1c] sm:$0xf]  ;;  %v2945_v10 = vld [vmem:[#allocation2 + $0x20] sm:$0x1] }
 0x12e   : > { %v2052_v35 = vrot.slane %v2050_v46, 5  ;;  %v2058_v63 = vrot.slane %v2056_v48, 5  ;;  %v2062_v1 = vrot.slane %v2060_v24, 4  ;;  %v2068_v2 = vrot.slane %v2066_v51, 5  ;;  %v2513_v19 = vld [vmem:[#allocation2 + $0x18] sm:$0xe] }
 0x12f   : > { %v1467_v17 = vrot.slane %v1466_v61, 4  ;;  %v1095_v27 = vld [vmem:[#allocation2 + $0xbc] sm:$0x1]  ;;  %v10965_v6 = vcombine.low %v2609_v54, %v2612_v55  ;;  %v2992_v12 = vshrl.u32 %v2943_v3, 16  ;;  %v2995_v9 = vshll.u32 %v2943_v3, 16 }
 0x130   : > { %v1610_v53 = vld [vmem:[#allocation2 + $0xbc] sm:$0x1]  ;;  %v1479_v57 = vshll.u32 %v1095_v27, 16  ;;  %v12895_v59 = vld [vmem:[#allocation2 + $0xc0] sm:$0xff]   ;;  %v2053_v50 = vor.u32 %v2052_v35, %v2049_v60  ;;  %v2063_v0 = vor.u32 %v2062_v1, %v2058_v63  ;;  %v3001_v16 = vshll.u32 %v2944_v8, 16 }
 0x131   : > { %v1472_v52 = vsel %vm13474_vm11, %v1467_v17, %v13900_v38  ;;  %v1772_v28 = vrot.slane %v1610_v53, 5  ;;  %4776 = vmatprep.mubr.bf16.mxu1 %v12895_v59  ;;  %v2994_v49 = vrot.slane %v2992_v12, 4  ;;  %v3005_v61 = vshrl.u32 %v2944_v8, 16  ;;  %v2514_v17 = vld [vmem:[#allocation2 + $0x1c] sm:$0xf] }
 0x132   : > { %v1481_v38 = vrot.slane %v1479_v57, 5  ;;  %v2054_v21 = vrot.slane %v2053_v50, 4  ;;  %v2064_v22 = vrot.slane %v2063_v0, 4  ;;  %v2997_v29 = vrot.slane %v2995_v9, 5  ;;  %v2515_v33 = vld [vmem:[#allocation2 + $0x20] sm:$0x1] }
 0x133   : > { %v1773_v7 = vsel %vm13492_vm14, %v1771_v47, %v1772_v28  ;;  %v3003_v30 = vrot.slane %v3001_v16, 5  ;;  %v3007_v31 = vrot.slane %v3005_v61, 4  ;;  %v3011_v32 = vshll.u32 %v2945_v10, 16  ;;  %v2001_v40 = vld [vmem:[#allocation2 + $0x18] sm:$0xf] }
 0x134   : > { %v10916_v13 = vcombine.low %v1770_v18, %v1773_v7  ;;  %v1482_v15 = vsel %vm13474_vm11, %v1477_v23, %v1481_v38  ;;  %v10950_v37 = vrot.slane %v2513_v19, 9  ;;  %v2059_v23 = vsel %vm13474_vm11, %v2054_v21, %v2058_v63  ;;  %v2002_v41 = vld [vmem:[#allocation2 + $0x1c] sm:$0xf]  ;;  %v2003_v46 = vld [vmem:[#allocation2 + $0x20] sm:$0x1] }
 0x135   : > { %v10884_v20 = vcombine.low %v1472_v52, %v1482_v15  ;;  %v2069_v39 = vsel %vm13474_vm11, %v2064_v22, %v2068_v2  ;;  %v2998_v36 = vor.u32 %v2997_v29, %v2994_v49  ;;  %v2615_v34 = vrot.slane %v2514_v17, 5  ;;  %v2946_v27 = vld [vmem:[#allocation2 + $0x24] sm:$0xf]  ;;  %v12903_v53 = vld [vmem:[#allocation2 + $0x18] sm:$0xff]   ;;  %v2947_v59 = vld [vmem:[#allocation2 + $0x28] sm:$0xf] }
 0x136   : > { %4777 = vmatmul.mubr.bf16.gmra.mrb[60].mxu1 %v10916_v13  ;;  %v10933_v26 = vcombine.low %v2059_v23, %v2069_v39  ;;  %v3008_v43 = vor.u32 %v3007_v31, %v3003_v30  ;;  %v3013_v44 = vrot.slane %v3011_v32, 5  ;;  %v2618_v45 = vrot.slane %v2515_v33, 5  ;;  %v2948_v38 = vld [vmem:[#allocation2 + $0x2c] sm:$0x1]  ;;  %v2516_v7 = vld [vmem:[#allocation2 + $0x24] sm:$0xe] }
 0x137   : > { %4615 = vmatprep.mubr.bf16.mxu0 %v10884_v20  ;;  %v2999_v47 = vrot.slane %v2998_v36, 4  ;;  %v2616_v48 = vsel %vm13492_vm14, %v10950_v37, %v2615_v34  ;;  %v2617_v24 = vrot.slane %v2615_v34, 4  ;;  %v2071_v51 = vshrl.u32 %v2001_v40, 16  ;;  %v2517_v13 = vld [vmem:[#allocation2 + $0x28] sm:$0xf]  ;;  %v12905_v49 = vld [vmem:[#allocation8 + $0x208] sm:$0xff]  }
 0x138   : > { %4616 = vmatmul.mubr.bf16.gmra.mrb[60].mxu0 %v12897_v14  ;;  %v3009_v52 = vrot.slane %v3008_v43, 4  ;;  %v2074_v54 = vshll.u32 %v2001_v40, 16  ;;  %v2080_v55 = vshll.u32 %v2002_v41, 16  ;;  %v2084_v57 = vshrl.u32 %v2002_v41, 16  ;;  %v2518_v14 = vld [vmem:[#allocation2 + $0x2c] sm:$0x1] }
 0x139   : > { %4817 = vmatprep.mubr.bf16.mxu0 %v10965_v6  ;;  %v3004_v18 = vsel %vm13474_vm11, %v2999_v47, %v3003_v30  ;;  %v2619_v28 = vsel %vm13492_vm14, %v2617_v24, %v2618_v45  ;;  %v2073_v60 = vrot.slane %v2071_v51, 4  ;;  %v2090_v35 = vshll.u32 %v2003_v46, 16  ;;  %v2004_v21 = vld [vmem:[#allocation2 + $0x24] sm:$0xf]  ;;  %v2005_v31 = vld [vmem:[#allocation2 + $0x28] sm:$0xf] }
 0x13a   : > { %v3014_v63 = vsel %vm13474_vm11, %v3009_v52, %v3013_v44  ;;  %v10966_v1 = vcombine.low %v2616_v48, %v2619_v28  ;;  %v2076_v2 = vrot.slane %v2074_v54, 5  ;;  %v2082_v3 = vrot.slane %v2080_v55, 5  ;;  %v13046_v32 = vld [vmem:[#allocation8 + $0x200] sm:$0xff]   ;;  %v2006_v41 = vld [vmem:[#allocation2 + $0x2c] sm:$0x1]  ;;  %v12908_v43 = vld [vmem:[#allocation8 + $0x210] sm:$0xff]  }
 0x13b   : > { %v10997_v6 = vcombine.low %v3004_v18, %v3014_v63  ;;  %v2086_v8 = vrot.slane %v2084_v57, 4  ;;  %v2092_v10 = vrot.slane %v2090_v35, 5  ;;  %v3016_v12 = vshrl.u32 %v2946_v27, 16  ;;  %v2949_v48 = vld [vmem:[#allocation2 + $0x30] sm:$0xf] }
 0x13c   : > { %v2077_v50 = vor.u32 %v2076_v2, %v2073_v60  ;;  %v3019_v0 = vshll.u32 %v2946_v27, 16  ;;  %v3025_v9 = vshll.u32 %v2947_v59, 16  ;;  %v3029_v15 = vshrl.u32 %v2947_v59, 16  ;;  %v2950_v24 = vld [vmem:[#allocation2 + $0x34] sm:$0xf]  ;;  %v12904_v60 = vld [vmem:[#allocation2 + $0x24] sm:$0xff]  }
 0x13d   : > { %4978 = vmatprep.mubr.bf16.mxu1 %v10997_v6  ;;  %v2087_v16 = vor.u32 %v2086_v8, %v2082_v3  ;;  %v3018_v61 = vrot.slane %v3016_v12, 4  ;;  %v3035_v19 = vshll.u32 %v2948_v38, 16  ;;  %v10951_v20 = vrot.slane %v2516_v7, 9  ;;  %v12911_v2 = vld [vmem:[#allocation8 + $0x218] sm:$0xff]   ;;  %v2519_v8 = vld [vmem:[#allocation2 + $0x30] sm:$0xe] }
 0x13e   : > { %4979 = vmatmul.mubr.bf16.vlgmr.msra.gmra.mrb[64].mxu1 %v12903_v53  ;;  %v2078_v22 = vrot.slane %v2077_v50, 4  ;;  %v3021_v29 = vrot.slane %v3019_v0, 5  ;;  %v3027_v17 = vrot.slane %v3025_v9, 5  ;;  %v3031_v30 = vrot.slane %v3029_v15, 4  ;;  %v2521_v9 = vld [vmem:[#allocation2 + $0x38] sm:$0x1] }
 0x13f   : > { %v2088_v33 = vrot.slane %v2087_v16, 4  ;;  %v3037_v37 = vrot.slane %v3035_v19, 5  ;;  %v2622_v23 = vrot.slane %v2517_v13, 5  ;;  %v2625_v39 = vrot.slane %v2518_v14, 5 }
 0x140   : > { %4818 = vmatmul.mubr.bf16.vlgmr.msra.gmra.mrb[64].mxu0 %v10933_v26  ;;  %v2083_v36 = vsel %vm13474_vm11, %v2078_v22, %v2082_v3  ;;  %v3022_v34 = vor.u32 %v3021_v29, %v3018_v61  ;;  %v3032_v40 = vor.u32 %v3031_v30, %v3027_v17  ;;  %v2095_v26 = vshrl.u32 %v2004_v21, 16  ;;  %v2007_v61 = vld [vmem:[#allocation2 + $0x30] sm:$0xf]  ;;  %v2008_v29 = vld [vmem:[#allocation2 + $0x34] sm:$0xf] }
 0x141   : > { %12639 = vmatpush3.bf16.msra.mxu0 %v13046_v32  ;;  %4825 = vmatprep.mubr.bf16.mxu0 %v10966_v1  ;;  %v2093_v44 = vsel %vm13474_vm11, %v2088_v33, %v2092_v10  ;;  %v2623_v45 = vsel %vm13492_vm14, %v10951_v20, %v2622_v23  ;;  %v2624_v46 = vrot.slane %v2622_v23, 4  ;;  %v2098_v47 = vshll.u32 %v2004_v21, 16  ;;  %v2951_v1 = vld [vmem:[#allocation2 + $0x38] sm:$0x1]  ;;  %v2520_v10 = vld [vmem:[#allocation2 + $0x34] sm:$0xf] }
 0x142   : > { %12640 = vmatprep.subr.bf16.mxu0 %v12905_v49  ;;  %v10934_v51 = vcombine.low %v2083_v36, %v2093_v44  ;;  %v3023_v27 = vrot.slane %v3022_v34, 4  ;;  %v3033_v52 = vrot.slane %v3032_v40, 4  ;;  %v2097_v53 = vrot.slane %v2095_v26, 4  ;;  %v12914_v33 = vld [vmem:[#allocation8 + $0x220] sm:$0xff]   ;;  %v2009_v36 = vld [vmem:[#allocation2 + $0x38] sm:$0x1] }
 0x143   : > { %v2626_v54 = vsel %vm13492_vm14, %v2624_v46, %v2625_v39  ;;  %v2100_v55 = vrot.slane %v2098_v47, 5  ;;  %v2104_v57 = vshll.u32 %v2005_v31, 16  ;;  %v2108_v59 = vshrl.u32 %v2005_v31, 16 }
 0x144   : > { %v3028_v18 = vsel %vm13474_vm11, %v3023_v27, %v3027_v17  ;;  %v3038_v28 = vsel %vm13474_vm11, %v3033_v52, %v3037_v37  ;;  %v10967_v35 = vcombine.low %v2623_v45, %v2626_v54  ;;  %v2114_v63 = vshll.u32 %v2006_v41, 16  ;;  %v12906_v27 = vld [vmem:[#allocation2 + $0x30] sm:$0xff]  }
 0x145   : > { %12641 = vmatpush3.bf16.msra.mxu0 %v12905_v49  ;;  %v10998_v3 = vcombine.low %v3028_v18, %v3038_v28  ;;  %v2101_v38 = vor.u32 %v2100_v55, %v2097_v53  ;;  %v2106_v7 = vrot.slane %v2104_v57, 5  ;;  %v2110_v6 = vrot.slane %v2108_v59, 4  ;;  %v2953_v55 = vld [vmem:[#allocation2 + $0x40] sm:$0xf] }
 0x146   : > { %12642 = vmatprep.subr.bf16.mxu0 %v12908_v43  ;;  %v2116_v12 = vrot.slane %v2114_v63, 5  ;;  %v3040_v13 = vshrl.u32 %v2949_v48, 16  ;;  %v3043_v50 = vshll.u32 %v2949_v48, 16  ;;  %v3049_v0 = vshll.u32 %v2950_v24, 16  ;;  %v2952_v48 = vld [vmem:[#allocation2 + $0x3c] sm:$0xf] }
 0x147   : > { %4986 = vmatprep.mubr.bf16.mxu1 %v10998_v3  ;;  %v2102_v15 = vrot.slane %v2101_v38, 4  ;;  %v2111_v14 = vor.u32 %v2110_v6, %v2106_v7  ;;  %v3053_v49 = vshrl.u32 %v2950_v24, 16  ;;  %v3059_v16 = vshll.u32 %v2951_v1, 16  ;;  %v12917_v24 = vld [vmem:[#allocation8 + $0x228] sm:$0xff]   ;;  %v2523_v38 = vld [vmem:[#allocation2 + $0x40] sm:$0xf] }
 0x148   : > { %4826 = vmatmul.mubr.bf16.gmra.mrb[68].mxu0 %v10934_v51  ;;  %4987 = vmatmul.mubr.bf16.gmra.mrb[68].mxu1 %v12904_v60  ;;  %v3042_v19 = vrot.slane %v3040_v13, 4  ;;  %v3045_v20 = vrot.slane %v3043_v50, 5  ;;  %v3051_v21 = vrot.slane %v3049_v0, 5  ;;  %v10952_v22 = vrot.slane %v2519_v8, 9  ;;  %v2954_v60 = vld [vmem:[#allocation2 + $0x44] sm:$0x1] }
 0x149   : > { %4833 = vmatprep.mubr.bf16.mxu0 %v10967_v35  ;;  %12643 = vmatpush3.bf16.msra.mxu0 %v12908_v43  ;;  %v2107_v17 = vsel %vm13474_vm11, %v2102_v15, %v2106_v7  ;;  %v2112_v30 = vrot.slane %v2111_v14, 4  ;;  %v3055_v31 = vrot.slane %v3053_v49, 4  ;;  %v3061_v32 = vrot.slane %v3059_v16, 5  ;;  %v2522_v35 = vld [vmem:[#allocation2 + $0x3c] sm:$0xe]  ;;  %v12920_v6 = vld [vmem:[#allocation8 + $0x230] sm:$0xff]  }
 0x14a   : > { %12644 = vmatprep.subr.bf16.mxu0 %v12911_v2  ;;  %v3046_v37 = vor.u32 %v3045_v20, %v3042_v19  ;;  %v2629_v23 = vrot.slane %v2520_v10, 5  ;;  %v2632_v39 = vrot.slane %v2521_v9, 5  ;;  %v2119_v34 = vshrl.u32 %v2007_v61, 16  ;;  %v2524_v49 = vld [vmem:[#allocation2 + $0x44] sm:$0x1] }
 0x14b   : > { %v2117_v40 = vsel %vm13474_vm11, %v2112_v30, %v2116_v12  ;;  %v3056_v41 = vor.u32 %v3055_v31, %v3051_v21  ;;  %v2122_v26 = vshll.u32 %v2007_v61, 16  ;;  %v2128_v44 = vshll.u32 %v2008_v29, 16 }
 0x14c   : > { %v10935_v43 = vcombine.low %v2107_v17, %v2117_v40  ;;  %v3047_v45 = vrot.slane %v3046_v37, 4  ;;  %v2630_v46 = vsel %vm13492_vm14, %v10952_v22, %v2629_v23  ;;  %v2631_v47 = vrot.slane %v2629_v23, 4 }
 0x14d   : > { %12645 = vmatpush3.bf16.msra.mxu0 %v12911_v2  ;;  %v3057_v51 = vrot.slane %v3056_v41, 4  ;;  %v2121_v52 = vrot.slane %v2119_v34, 4  ;;  %v2124_v53 = vrot.slane %v2122_v26, 5  ;;  %v13960_v54 = vrot.slane %v2128_v44, 5  ;;  %v2012_v34 = vld [vmem:[#allocation2 + $0x44] sm:$0x1] }
 0x14e   : > { %12646 = vmatprep.subr.bf16.mxu0 %v12914_v33  ;;  %v3052_v57 = vsel %vm13474_vm11, %v3047_v45, %v3051_v21  ;;  %v2633_v59 = vsel %vm13492_vm14, %v2631_v47, %v2632_v39  ;;  %v2132_v18 = vshrl.u32 %v2008_v29, 16  ;;  %v2138_v28 = vshll.u32 %v2009_v36, 16  ;;  %v2010_v21 = vld [vmem:[#allocation2 + $0x3c] sm:$0xf] }
 0x14f   : > { %v3062_v63 = vsel %vm13474_vm11, %v3057_v51, %v3061_v32  ;;  %v10968_v1 = vcombine.low %v2630_v46, %v2633_v59  ;;  %v2125_v2 = vor.u32 %v2124_v53, %v2121_v52  ;;  %v3064_v3 = vshrl.u32 %v2952_v48, 16  ;;  %v2011_v32 = vld [vmem:[#allocation2 + $0x40] sm:$0xf]  ;;  %v2955_v51 = vld [vmem:[#allocation2 + $0x48] sm:$0xf] }
 0x150   : > { %4834 = vmatmul.mubr.bf16.gmra.mrb[72].mxu0 %v10935_v43  ;;  %v10999_v8 = vcombine.low %v3052_v57, %v3062_v63  ;;  %v2134_v10 = vrot.slane %v2132_v18, 4  ;;  %v2140_v12 = vrot.slane %v2138_v28, 5  ;;  %v3067_v13 = vshll.u32 %v2952_v48, 16  ;;  %v12923_v43 = vld [vmem:[#allocation8 + $0x238] sm:$0xff]   ;;  %v12907_v59 = vld [vmem:[#allocation2 + $0x3c] sm:$0xff]  }
 0x151   : > { %12647 = vmatpush3.bf16.msra.mxu0 %v12914_v33  ;;  %4841 = vmatprep.mubr.bf16.mxu0 %v10968_v1  ;;  %v2126_v0 = vrot.slane %v2125_v2, 4  ;;  %v3066_v9 = vrot.slane %v3064_v3, 4  ;;  %v3073_v15 = vshll.u32 %v2953_v55, 16  ;;  %v3077_v14 = vshrl.u32 %v2953_v55, 16  ;;  %v2956_v55 = vld [vmem:[#allocation2 + $0x4c] sm:$0xf] }
 0x152   : > { %12648 = vmatprep.subr.bf16.mxu0 %v12917_v24  ;;  %4994 = vmatprep.mubr.bf16.mxu1 %v10999_v8  ;;  %v2135_v16 = vor.u32 %v2134_v10, %v13960_v54  ;;  %v3069_v61 = vrot.slane %v3067_v13, 5  ;;  %v3083_v19 = vshll.u32 %v2954_v60, 16  ;;  %v10953_v20 = vrot.slane %v2522_v35, 9  ;;  %v2957_v35 = vld [vmem:[#allocation2 + $0x50] sm:$0x1] }
 0x153   : > { %4995 = vmatmul.mubr.bf16.gmra.mrb[72].mxu1 %v12906_v27  ;;  %v2131_v29 = vsel %vm13474_vm11, %v2126_v0, %v13960_v54  ;;  %v3075_v17 = vrot.slane %v3073_v15, 5  ;;  %v3079_v30 = vrot.slane %v3077_v14, 4  ;;  %v2636_v31 = vrot.slane %v2523_v38, 5  ;;  %v2525_v38 = vld [vmem:[#allocation2 + $0x48] sm:$0xe] }
 0x154   : > { %v2136_v37 = vrot.slane %v2135_v16, 4  ;;  %v3070_v23 = vor.u32 %v3069_v61, %v3066_v9  ;;  %v3085_v39 = vrot.slane %v3083_v19, 5  ;;  %v2639_v36 = vrot.slane %v2524_v49, 5  ;;  %v2526_v9 = vld [vmem:[#allocation2 + $0x4c] sm:$0xf] }
 0x155   : > { %12649 = vmatpush3.bf16.msra.mxu0 %v12917_v24  ;;  %v3080_v40 = vor.u32 %v3079_v30, %v3075_v17  ;;  %v2637_v41 = vsel %vm13492_vm14, %v10953_v20, %v2636_v31  ;;  %v2638_v26 = vrot.slane %v2636_v31, 4  ;;  %v2143_v44 = vshrl.u32 %v2010_v21, 16  ;;  %v2527_v15 = vld [vmem:[#allocation2 + $0x50] sm:$0x1]  ;;  %v2013_v61 = vld [vmem:[#allocation2 + $0x48] sm:$0xf] }
 0x156   : > { %12650 = vmatprep.subr.bf16.mxu0 %v12920_v6  ;;  %v2141_v45 = vsel %vm13474_vm11, %v2136_v37, %v2140_v12  ;;  %v3071_v46 = vrot.slane %v3070_v23, 4  ;;  %v2146_v47 = vshll.u32 %v2010_v21, 16  ;;  %v2152_v48 = vshll.u32 %v2011_v32, 16  ;;  %v2014_v37 = vld [vmem:[#allocation2 + $0x4c] sm:$0xf] }
 0x157   : > { %v10936_v52 = vcombine.low %v2131_v29, %v2141_v45  ;;  %v3081_v53 = vrot.slane %v3080_v40, 4  ;;  %v2640_v24 = vsel %vm13492_vm14, %v2638_v26, %v2639_v36  ;;  %v2145_v54 = vrot.slane %v2143_v44, 4  ;;  %v2015_v45 = vld [vmem:[#allocation2 + $0x50] sm:$0x1] }
 0x158   : > { %v3076_v57 = vsel %vm13474_vm11, %v3071_v46, %v3075_v17  ;;  %v10969_v18 = vcombine.low %v2637_v41, %v2640_v24  ;;  %v2148_v28 = vrot.slane %v2146_v47, 5  ;;  %v2154_v60 = vrot.slane %v2152_v48, 5 }
 0x159   : > { %12651 = vmatpush3.bf16.msra.mxu0 %v12920_v6  ;;  %v3086_v63 = vsel %vm13474_vm11, %v3081_v53, %v3085_v39  ;;  %v2156_v1 = vshrl.u32 %v2011_v32, 16  ;;  %v2162_v2 = vshll.u32 %v2012_v34, 16  ;;  %v3088_v3 = vshrl.u32 %v2955_v51, 16 }
 0x15a   : > { %4842 = vmatmul.mubr.bf16.gmra.mrb[76].mxu0 %v10936_v52  ;;  %12652 = vmatprep.subr.bf16.mxu0 %v12923_v43  ;;  %v11000_v10 = vcombine.low %v3076_v57, %v3086_v63  ;;  %v2149_v12 = vor.u32 %v2148_v28, %v2145_v54  ;;  %v3091_v13 = vshll.u32 %v2955_v51, 16  ;;  %v3097_v0 = vshll.u32 %v2956_v55, 16  ;;  %v2958_v52 = vld [vmem:[#allocation2 + $0x54] sm:$0xf]  ;;  %v12909_v54 = vld [vmem:[#allocation2 + $0x48] sm:$0xff]  }
 0x15b   : > { %4849 = vmatprep.mubr.bf16.mxu0 %v10969_v18  ;;  %v2158_v14 = vrot.slane %v2156_v1, 4  ;;  %v2164_v6 = vrot.slane %v2162_v2, 5  ;;  %v3090_v49 = vrot.slane %v3088_v3, 4  ;;  %v3101_v16 = vshrl.u32 %v2956_v55, 16  ;;  %v2960_v63 = vld [vmem:[#allocation2 + $0x5c] sm:$0x1] }
 0x15c   : > { %5002 = vmatprep.mubr.bf16.mxu1 %v11000_v10  ;;  %v2150_v19 = vrot.slane %v2149_v12, 4  ;;  %v3093_v20 = vrot.slane %v3091_v13, 5  ;;  %v3099_v21 = vrot.slane %v3097_v0, 5  ;;  %v3107_v29 = vshll.u32 %v2957_v35, 16  ;;  %v2959_v35 = vld [vmem:[#allocation2 + $0x58] sm:$0xf] }
 0x15d   : > { %12653 = vmatpush3.bf16.msra.mxu0 %v12923_v43  ;;  %5003 = vmatmul.mubr.bf16.gmra.mrb[76].mxu1 %v12907_v59  ;;  %v2159_v17 = vor.u32 %v2158_v14, %v2154_v60  ;;  %v3103_v30 = vrot.slane %v3101_v16, 4  ;;  %v10954_v31 = vrot.slane %v2525_v38, 9  ;;  %v2643_v32 = vrot.slane %v2526_v9, 5  ;;  %v2528_v12 = vld [vmem:[#allocation2 + $0x54] sm:$0xe] }
 0x15e   : > { %v2155_v39 = vsel %vm13474_vm11, %v2150_v19, %v2154_v60  ;;  %v3094_v36 = vor.u32 %v3093_v20, %v3090_v49  ;;  %v3109_v34 = vrot.slane %v3107_v29, 5  ;;  %v2646_v40 = vrot.slane %v2527_v15, 5  ;;  %v2529_v20 = vld [vmem:[#allocation2 + $0x58] sm:$0xf] }
 0x15f   : > { %v2160_v41 = vrot.slane %v2159_v17, 4  ;;  %v3104_v26 = vor.u32 %v3103_v30, %v3099_v21  ;;  %v2644_v44 = vsel %vm13492_vm14, %v10954_v31, %v2643_v32  ;;  %v2645_v43 = vrot.slane %v2643_v32, 4  ;;  %v2530_v31 = vld [vmem:[#allocation2 + $0x5c] sm:$0x1] }
 0x160   : > { %v13968_v7 = vpop.f32.mrb[0].mxu0  ;;  %v3095_v46 = vrot.slane %v3094_v36, 4  ;;  %v2167_v47 = vshrl.u32 %v2013_v61, 16  ;;  %v2170_v48 = vshll.u32 %v2013_v61, 16  ;;  %v2176_v51 = vshll.u32 %v2014_v37, 16 }
 0x161   : > { %v13970_v50 = vpop.f32.mrb[1].mxu0  ;;  %v13984_v27 = vpop.f32.mrb[0].mxu1  ;;  %v2165_v53 = vsel %vm13474_vm11, %v2160_v41, %v2164_v6  ;;  %v3105_v24 = vrot.slane %v3104_v26, 4  ;;  %v2647_v55 = vsel %vm13492_vm14, %v2645_v43, %v2646_v40  ;;  %v2180_v57 = vshrl.u32 %v2014_v37, 16  ;;  %v2017_v43 = vld [vmem:[#allocation2 + $0x58] sm:$0xf] }
 0x162   : > { %v13973_v22 = vpop.f32.mrb[2].mxu0  ;;  %v13992_v8 = vpop.f32.mrb[1].mxu1  ;;  %v10937_v59 = vcombine.low %v2155_v39, %v2165_v53  ;;  %v3100_v18 = vsel %vm13474_vm11, %v3095_v46, %v3099_v21  ;;  %v10970_v28 = vcombine.low %v2644_v44, %v2647_v55  ;;  %v2169_v60 = vrot.slane %v2167_v47, 4 }
 0x163   : > { %v13978_v33 = vpop.f32.mrb[3].mxu0  ;;  %v13994_v23 = vpop.f32.mrb[2].mxu1  ;;  %v3110_v2 = vsel %vm13474_vm11, %v3105_v24, %v3109_v34  ;;  %v2172_v3 = vrot.slane %v2170_v48, 5  ;;  %v2178_v38 = vrot.slane %v2176_v51, 5  ;;  %v2182_v10 = vrot.slane %v2180_v57, 4 }
 0x164   : > { %v14006_v1 = vpop.f32.mrb[3].mxu1  ;;  %4850 = vmatmul.mubr.bf16.gmra.mrb[80].mxu0 %v10937_v59  ;;  %v11001_v0 = vcombine.low %v3100_v18, %v3110_v2  ;;  %v2186_v9 = vshll.u32 %v2015_v45, 16  ;;  %v3112_v15 = vshrl.u32 %v2958_v52, 16  ;;  %v3115_v14 = vshll.u32 %v2958_v52, 16  ;;  %v2016_v34 = vld [vmem:[#allocation2 + $0x54] sm:$0xf] }
 0x165   : > { %4857 = vmatprep.mubr.bf16.mxu0 %v10970_v28  ;;  %v2173_v49 = vor.u32 %v2172_v3, %v2169_v60  ;;  %v2183_v16 = vor.u32 %v2182_v10, %v2178_v38  ;;  %v3121_v61 = vshll.u32 %v2959_v35, 16  ;;  %v3125_v19 = vshrl.u32 %v2959_v35, 16  ;;  %v2018_v52 = vld [vmem:[#allocation2 + $0x5c] sm:$0x1]  ;;  %v2961_v59 = vld [vmem:[#allocation2 + $0x60] sm:$0xf] }
 0x166   : > { %5010 = vmatprep.mubr.bf16.mxu1 %v11001_v0  ;;  %v2188_v21 = vrot.slane %v2186_v9, 5  ;;  %v3114_v29 = vrot.slane %v3112_v15, 4  ;;  %v3117_v17 = vrot.slane %v3115_v14, 5  ;;  %v3131_v30 = vshll.u32 %v2960_v63, 16  ;;  %v12910_v28 = vld [vmem:[#allocation2 + $0x54] sm:$0xff]  }
 0x167   : > { %5011 = vmatmul.mubr.bf16.gmra.mrb[80].mxu1 %v12909_v54  ;;  %v2174_v32 = vrot.slane %v2173_v49, 4  ;;  %v2184_v37 = vrot.slane %v2183_v16, 4  ;;  %v3123_v39 = vrot.slane %v3121_v61, 5  ;;  %v3127_v36 = vrot.slane %v3125_v19, 4  ;;  %v2962_v2 = vld [vmem:[#allocation2 + $0x64] sm:$0xf] }
 0x168   : > { %v3118_v40 = vor.u32 %v3117_v17, %v3114_v29  ;;  %v3133_v41 = vrot.slane %v3131_v30, 5  ;;  %v10955_v26 = vrot.slane %v2528_v12, 9  ;;  %v2650_v44 = vrot.slane %v2529_v20, 5  ;;  %v2963_v49 = vld [vmem:[#allocation2 + $0x68] sm:$0x1] }
 0x169   : > { %v2179_v46 = vsel %vm13474_vm11, %v2174_v32, %v2178_v38  ;;  %v2189_v47 = vsel %vm13474_vm11, %v2184_v37, %v2188_v21  ;;  %v3128_v48 = vor.u32 %v3127_v36, %v3123_v39  ;;  %v2653_v51 = vrot.slane %v2530_v31, 5  ;;  %v2531_v16 = vld [vmem:[#allocation2 + $0x60] sm:$0xe]  ;;  %v2532_v29 = vld [vmem:[#allocation2 + $0x64] sm:$0xf] }
 0x16a   : > { %v10938_v24 = vcombine.low %v2179_v46, %v2189_v47  ;;  %v3119_v54 = vrot.slane %v3118_v40, 4  ;;  %v2651_v55 = vsel %vm13492_vm14, %v10955_v26, %v2650_v44  ;;  %v2652_v57 = vrot.slane %v2650_v44, 4  ;;  %v2019_v44 = vld [vmem:[#allocation2 + $0x60] sm:$0xf] }
 0x16b   : > { %v3129_v18 = vrot.slane %v3128_v48, 4  ;;  %v2191_v60 = vshrl.u32 %v2016_v34, 16  ;;  %v2194_v35 = vshll.u32 %v2016_v34, 16  ;;  %v2200_v63 = vshll.u32 %v2017_v43, 16 }
 0x16c   : > { %4858 = vmatmul.mubr.bf16.gmra.mrb[84].mxu0 %v10938_v24  ;;  %v3124_v3 = vsel %vm13474_vm11, %v3119_v54, %v3123_v39  ;;  %v2654_v38 = vsel %vm13492_vm14, %v2652_v57, %v2653_v51  ;;  %v2204_v10 = vshrl.u32 %v2017_v43, 16  ;;  %v2210_v12 = vshll.u32 %v2018_v52, 16  ;;  %v2533_v39 = vld [vmem:[#allocation2 + $0x68] sm:$0x1] }
 0x16d   : > { %v3134_v0 = vsel %vm13474_vm11, %v3129_v18, %v3133_v41  ;;  %v10971_v9 = vcombine.low %v2651_v55, %v2654_v38  ;;  %v2193_v15 = vrot.slane %v2191_v60, 4  ;;  %v2196_v14 = vrot.slane %v2194_v35, 5  ;;  %v2020_v60 = vld [vmem:[#allocation2 + $0x64] sm:$0xf]  ;;  %v2021_v38 = vld [vmem:[#allocation2 + $0x68] sm:$0x1] }
 0x16e   : > { %v11002_v61 = vcombine.low %v3124_v3, %v3134_v0  ;;  %v2202_v19 = vrot.slane %v2200_v63, 5  ;;  %v2206_v20 = vrot.slane %v2204_v10, 4  ;;  %v2212_v21 = vrot.slane %v2210_v12, 5  ;;  %v2964_v10 = vld [vmem:[#allocation2 + $0x6c] sm:$0xf] }
 0x16f   : > { %v14010_v13 = vpop.f32.mrb[4].mxu0  ;;  %v14012_v6 = vpop.f32.mrb[4].mxu1  ;;  %4865 = vmatprep.mubr.bf16.mxu0 %v10971_v9  ;;  %v2197_v30 = vor.u32 %v2196_v14, %v2193_v15  ;;  %v3136_v31 = vshrl.u32 %v2961_v59, 16  ;;  %v3139_v32 = vshll.u32 %v2961_v59, 16  ;;  %v3145_v37 = vshll.u32 %v2962_v2, 16 }
 0x170   : > { %v14014_v45 = vpop.f32.mrb[5].mxu0  ;;  %v14020_v53 = vpop.f32.mrb[5].mxu1  ;;  %5018 = vmatprep.mubr.bf16.mxu1 %v11002_v61  ;;  %v2207_v34 = vor.u32 %v2206_v20, %v2202_v19  ;;  %v3149_v40 = vshrl.u32 %v2962_v2, 16  ;;  %v3155_v41 = vshll.u32 %v2963_v49, 16  ;;  %v10956_v26 = vrot.slane %v2531_v16, 9  ;;  %v12912_v61 = vld [vmem:[#allocation2 + $0x60] sm:$0xff]  }
 0x171   : > { %v14030_v17 = vpop.f32.mrb[6].mxu0  ;;  %v14032_v36 = vpop.f32.mrb[6].mxu1  ;;  %5019 = vmatmul.mubr.bf16.gmra.mrb[84].mxu1 %v12910_v28  ;;  %v2198_v46 = vrot.slane %v2197_v30, 4  ;;  %v3138_v47 = vrot.slane %v3136_v31, 4  ;;  %v3141_v48 = vrot.slane %v3139_v32, 5  ;;  %v3147_v51 = vrot.slane %v3145_v37, 5 }
 0x172   : > { %v14034_v43 = vpop.f32.mrb[7].mxu0  ;;  %v2208_v52 = vrot.slane %v2207_v34, 4  ;;  %v3151_v24 = vrot.slane %v3149_v40, 4  ;;  %v3157_v54 = vrot.slane %v3155_v41, 5  ;;  %v2657_v55 = vrot.slane %v2532_v29, 5  ;;  %v14042_v12 = vpop.f32.mrb[7].mxu1 }
 0x173   : > { %v2203_v57 = vsel %vm13474_vm11, %v2198_v46, %v2202_v19  ;;  %v3142_v59 = vor.u32 %v3141_v48, %v3138_v47  ;;  %v2660_v18 = vrot.slane %v2533_v39, 5  ;;  %v2215_v35 = vshrl.u32 %v2019_v44, 16  ;;  %v2965_v39 = vld [vmem:[#allocation2 + $0x70] sm:$0xf]  ;;  %v2966_v34 = vld [vmem:[#allocation2 + $0x74] sm:$0x1] }
 0x174   : > { %v2213_v63 = vsel %vm13474_vm11, %v2208_v52, %v2212_v21  ;;  %v3152_v2 = vor.u32 %v3151_v24, %v3147_v51  ;;  %v2658_v28 = vsel %vm13492_vm14, %v10956_v26, %v2657_v55  ;;  %v2659_v3 = vrot.slane %v2657_v55, 4  ;;  %v2534_v46 = vld [vmem:[#allocation2 + $0x6c] sm:$0xe] }
 0x175   : > { %v10939_v0 = vcombine.low %v2203_v57, %v2213_v63  ;;  %v3143_v9 = vrot.slane %v3142_v59, 4  ;;  %v2217_v15 = vrot.slane %v2215_v35, 4  ;;  %v2218_v14 = vshll.u32 %v2019_v44, 16  ;;  %v2536_v35 = vld [vmem:[#allocation2 + $0x74] sm:$0x1] }
 0x176   : > { %v3153_v16 = vrot.slane %v3152_v2, 4  ;;  %v2661_v19 = vsel %vm13492_vm14, %v2659_v3, %v2660_v18  ;;  %v2224_v20 = vshll.u32 %v2020_v60, 16  ;;  %v2228_v21 = vshrl.u32 %v2020_v60, 16 }
 0x177   : > { %v14048_v29 = vpop.f32.mrb[8].mxu1  ;;  %4866 = vmatmul.mubr.bf16.gmra.mrb[88].mxu0 %v10939_v0  ;;  %v3148_v30 = vsel %vm13474_vm11, %v3143_v9, %v3147_v51  ;;  %v10972_v31 = vcombine.low %v2658_v28, %v2661_v19  ;;  %v2220_v32 = vrot.slane %v2218_v14, 5  ;;  %v2234_v37 = vshll.u32 %v2021_v38, 16  ;;  %v2535_v51 = vld [vmem:[#allocation2 + $0x70] sm:$0xf] }
 0x178   : > { %v3158_v40 = vsel %vm13474_vm11, %v3153_v16, %v3157_v54  ;;  %v2226_v41 = vrot.slane %v2224_v20, 5  ;;  %v2230_v26 = vrot.slane %v2228_v21, 4  ;;  %v3160_v44 = vshrl.u32 %v2964_v10, 16  ;;  %v14056_v63 = vpop.f32.mrb[9].mxu1  ;;  %v2022_v14 = vld [vmem:[#allocation2 + $0x6c] sm:$0xf] }
 0x179   : > { %v11003_v48 = vcombine.low %v3148_v30, %v3158_v40  ;;  %4873 = vmatprep.mubr.bf16.mxu0 %v10972_v31  ;;  %v2221_v52 = vor.u32 %v2220_v32, %v2217_v15  ;;  %v2236_v24 = vrot.slane %v2234_v37, 5  ;;  %v3163_v55 = vshll.u32 %v2964_v10, 16  ;;  %v2023_v21 = vld [vmem:[#allocation2 + $0x70] sm:$0xf]  ;;  %v2024_v37 = vld [vmem:[#allocation2 + $0x74] sm:$0x1] }
 0x17a   : > { %v14044_v49 = vpop.f32.mrb[8].mxu0  ;;  %v2231_v57 = vor.u32 %v2230_v26, %v2226_v41  ;;  %v3162_v59 = vrot.slane %v3160_v44, 4  ;;  %v3169_v18 = vshll.u32 %v2965_v39, 16  ;;  %v3173_v60 = vshrl.u32 %v2965_v39, 16 }
 0x17b   : > { %v14054_v47 = vpop.f32.mrb[9].mxu0  ;;  %5026 = vmatprep.mubr.bf16.mxu1 %v11003_v48  ;;  %v2222_v54 = vrot.slane %v2221_v52, 4  ;;  %v3165_v2 = vrot.slane %v3163_v55, 5  ;;  %v3179_v28 = vshll.u32 %v2966_v34, 16  ;;  %v10957_v3 = vrot.slane %v2534_v46, 9  ;;  %v14066_v46 = vpop.f32.mrb[10].mxu1 }
 0x17c   : > { %5027 = vmatmul.mubr.bf16.gmra.mrb[88].mxu1 %v12912_v61  ;;  %v2232_v38 = vrot.slane %v2231_v57, 4  ;;  %v3171_v0 = vrot.slane %v3169_v18, 5  ;;  %v3175_v9 = vrot.slane %v3173_v60, 4  ;;  %v2664_v15 = vrot.slane %v2535_v51, 5  ;;  %v14064_v39 = vpop.f32.mrb[10].mxu0  ;;  %v12913_v52 = vld [vmem:[#allocation2 + $0x6c] sm:$0xff]  }
 0x17d   : > { %v2227_v10 = vsel %vm13474_vm11, %v2222_v54, %v2226_v41  ;;  %v3166_v16 = vor.u32 %v3165_v2, %v3162_v59  ;;  %v3181_v19 = vrot.slane %v3179_v28, 5  ;;  %v2667_v20 = vrot.slane %v2536_v35, 5  ;;  %v2967_v41 = vld [vmem:[#allocation2 + $0x78] sm:$0xf]  ;;  %v2968_v57 = vld [vmem:[#allocation2 + $0x7c] sm:$0xf] }
 0x17e   : > { %v2237_v30 = vsel %vm13474_vm11, %v2232_v38, %v2236_v24  ;;  %v3176_v31 = vor.u32 %v3175_v9, %v3171_v0  ;;  %v2665_v32 = vsel %vm13492_vm14, %v10957_v3, %v2664_v15  ;;  %v2666_v61 = vrot.slane %v2664_v15, 4  ;;  %v14070_v59 = vpop.f32.mrb[11].mxu0  ;;  %v2969_v2 = vld [vmem:[#allocation2 + $0x80] sm:$0x1]  ;;  %v2537_v28 = vld [vmem:[#allocation2 + $0x78] sm:$0xe] }
 0x17f   : > { %v10940_v34 = vcombine.low %v2227_v10, %v2237_v30  ;;  %v3167_v40 = vrot.slane %v3166_v16, 4  ;;  %v2239_v26 = vshrl.u32 %v2022_v14, 16  ;;  %v2242_v44 = vshll.u32 %v2022_v14, 16  ;;  %v2538_v14 = vld [vmem:[#allocation2 + $0x7c] sm:$0xf]  ;;  %v14076_v10 = vpop.f32.mrb[11].mxu1 }
 0x180   : > { %v3177_v48 = vrot.slane %v3176_v31, 4  ;;  %v2668_v24 = vsel %vm13492_vm14, %v2666_v61, %v2667_v20  ;;  %v2248_v55 = vshll.u32 %v2023_v21, 16  ;;  %v2252_v51 = vshrl.u32 %v2023_v21, 16 }
 0x181   : > { %4874 = vmatmul.mubr.bf16.gmra.mrb[92].mxu0 %v10940_v34  ;;  %v3172_v18 = vsel %vm13474_vm11, %v3167_v40, %v3171_v0  ;;  %v10973_v60 = vcombine.low %v2665_v32, %v2668_v24  ;;  %v2241_v35 = vrot.slane %v2239_v26, 4  ;;  %v2244_v54 = vrot.slane %v2242_v44, 5  ;;  %v2539_v34 = vld [vmem:[#allocation2 + $0x80] sm:$0x1] }
 0x182   : > { %v3182_v3 = vsel %vm13474_vm11, %v3177_v48, %v3181_v19  ;;  %v2250_v38 = vrot.slane %v2248_v55, 5  ;;  %v2254_v9 = vrot.slane %v2252_v51, 4  ;;  %v2258_v15 = vshll.u32 %v2024_v37, 16  ;;  %v14078_v40 = vpop.f32.mrb[12].mxu0  ;;  %v2025_v48 = vld [vmem:[#allocation2 + $0x78] sm:$0xf] }
 0x183   : > { %v11004_v16 = vcombine.low %v3172_v18, %v3182_v3  ;;  %4881 = vmatprep.mubr.bf16.mxu0 %v10973_v60  ;;  %v2245_v20 = vor.u32 %v2244_v54, %v2241_v35  ;;  %v3184_v21 = vshrl.u32 %v2967_v41, 16  ;;  %v3187_v30 = vshll.u32 %v2967_v41, 16  ;;  %v2026_v60 = vld [vmem:[#allocation2 + $0x7c] sm:$0xf] }
 0x184   : > { %v2255_v0 = vor.u32 %v2254_v9, %v2250_v38  ;;  %v2260_v31 = vrot.slane %v2258_v15, 5  ;;  %v3193_v32 = vshll.u32 %v2968_v57, 16  ;;  %v3197_v61 = vshrl.u32 %v2968_v57, 16 }
 0x185   : > { %5034 = vmatprep.mubr.bf16.mxu1 %v11004_v16  ;;  %v2246_v19 = vrot.slane %v2245_v20, 4  ;;  %v3186_v26 = vrot.slane %v3184_v21, 4  ;;  %v3189_v44 = vrot.slane %v3187_v30, 5  ;;  %v3203_v37 = vshll.u32 %v2969_v2, 16  ;;  %v2027_v16 = vld [vmem:[#allocation2 + $0x80] sm:$0x1] }
 0x186   : > { %5035 = vmatmul.mubr.bf16.gmra.mrb[92].mxu1 %v12913_v52  ;;  %v2256_v24 = vrot.slane %v2255_v0, 4  ;;  %v3195_v55 = vrot.slane %v3193_v32, 5  ;;  %v3199_v51 = vrot.slane %v3197_v61, 4  ;;  %v10958_v18 = vrot.slane %v2537_v28, 9  ;;  %v2970_v30 = vld [vmem:[#allocation2 + $0x84] sm:$0xf] }
 0x187   : > { %v2251_v41 = vsel %vm13474_vm11, %v2246_v19, %v2250_v38  ;;  %v3190_v35 = vor.u32 %v3189_v44, %v3186_v26  ;;  %v3205_v57 = vrot.slane %v3203_v37, 5  ;;  %v2671_v54 = vrot.slane %v2538_v14, 5  ;;  %v12915_v32 = vld [vmem:[#allocation2 + $0x78] sm:$0xff]   ;;  %v2971_v14 = vld [vmem:[#allocation2 + $0x88] sm:$0xf] }
 0x188   : > { %v2261_v3 = vsel %vm13474_vm11, %v2256_v24, %v2260_v31  ;;  %v3200_v9 = vor.u32 %v3199_v51, %v3195_v55  ;;  %v2674_v15 = vrot.slane %v2539_v34, 5  ;;  %v2263_v2 = vshrl.u32 %v2025_v48, 16  ;;  %v2972_v37 = vld [vmem:[#allocation2 + $0x8c] sm:$0x1]  ;;  %v2540_v24 = vld [vmem:[#allocation2 + $0x84] sm:$0xe] }
 0x189   : > { %v10941_v20 = vcombine.low %v2251_v41, %v2261_v3  ;;  %v3191_v52 = vrot.slane %v3190_v35, 4  ;;  %v2672_v21 = vsel %vm13492_vm14, %v10958_v18, %v2671_v54  ;;  %v2673_v28 = vrot.slane %v2671_v54, 4  ;;  %v2542_v54 = vld [vmem:[#allocation2 + $0x8c] sm:$0x1] }
 0x18a   : > { %v3201_v0 = vrot.slane %v3200_v9, 4  ;;  %v2265_v38 = vrot.slane %v2263_v2, 4  ;;  %v2266_v61 = vshll.u32 %v2025_v48, 16  ;;  %v2272_v19 = vshll.u32 %v2026_v60, 16  ;;  %v2541_v48 = vld [vmem:[#allocation2 + $0x88] sm:$0xf] }
 0x18b   : > { %4882 = vmatmul.mubr.bf16.gmra.mrb[96].mxu0 %v10941_v20  ;;  %v3196_v31 = vsel %vm13474_vm11, %v3191_v52, %v3195_v55  ;;  %v2675_v34 = vsel %vm13492_vm14, %v2673_v28, %v2674_v15  ;;  %v2276_v26 = vshrl.u32 %v2026_v60, 16  ;;  %v2282_v44 = vshll.u32 %v2027_v16, 16  ;;  %v14092_v55 = vpop.f32.mrb[12].mxu1  ;;  %v14094_v28 = vpop.f32.mrb[13].mxu0 }
 0x18c   : > { %v3206_v51 = vsel %vm13474_vm11, %v3201_v0, %v3205_v57  ;;  %v10974_v18 = vcombine.low %v2672_v21, %v2675_v34  ;;  %v2268_v41 = vrot.slane %v2266_v61, 5  ;;  %v2274_v35 = vrot.slane %v2272_v19, 5  ;;  %v2028_v19 = vld [vmem:[#allocation2 + $0x84] sm:$0xf]  ;;  %v14096_v34 = vpop.f32.mrb[13].mxu1  ;;  %v14100_v58 = vpop.f32.mrb[14].mxu0 }
 0x18d   : > { %v11005_v3 = vcombine.low %v3196_v31, %v3206_v51  ;;  %v2278_v9 = vrot.slane %v2276_v26, 4  ;;  %v2284_v2 = vrot.slane %v2282_v44, 5  ;;  %v3208_v20 = vshrl.u32 %v2970_v30, 16 }
 0x18e   : > { %4889 = vmatprep.mubr.bf16.mxu0 %v10974_v18  ;;  %v2269_v15 = vor.u32 %v2268_v41, %v2265_v38  ;;  %v3211_v60 = vshll.u32 %v2970_v30, 16  ;;  %v3217_v16 = vshll.u32 %v2971_v14, 16  ;;  %v3221_v52 = vshrl.u32 %v2971_v14, 16 }
 0x18f   : > { %5042 = vmatprep.mubr.bf16.mxu1 %v11005_v3  ;;  %v2279_v57 = vor.u32 %v2278_v9, %v2274_v35  ;;  %v3210_v21 = vrot.slane %v3208_v20, 4  ;;  %v3227_v0 = vshll.u32 %v2972_v37, 16  ;;  %v10959_v61 = vrot.slane %v2540_v24, 9  ;;  %v2029_v20 = vld [vmem:[#allocation2 + $0x88] sm:$0xf] }
 0x190   : > { %5043 = vmatmul.mubr.bf16.gmra.mrb[96].mxu1 %v12915_v32  ;;  %v2270_v31 = vrot.slane %v2269_v15, 4  ;;  %v3213_v26 = vrot.slane %v3211_v60, 5  ;;  %v3219_v44 = vrot.slane %v3217_v16, 5  ;;  %v3223_v51 = vrot.slane %v3221_v52, 4  ;;  %v2030_v37 = vld [vmem:[#allocation2 + $0x8c] sm:$0x1] }
 0x191   : > { %v2280_v18 = vrot.slane %v2279_v57, 4  ;;  %v3229_v38 = vrot.slane %v3227_v0, 5  ;;  %v2678_v30 = vrot.slane %v2541_v48, 5  ;;  %v2681_v41 = vrot.slane %v2542_v54, 5  ;;  %v2973_v48 = vld [vmem:[#allocation2 + $0x90] sm:$0xf] }
 0x192   : > { %v2275_v14 = vsel %vm13474_vm11, %v2270_v31, %v2274_v35  ;;  %v3214_v3 = vor.u32 %v3213_v26, %v3210_v21  ;;  %v3224_v9 = vor.u32 %v3223_v51, %v3219_v44  ;;  %v2287_v24 = vshrl.u32 %v2028_v19, 16  ;;  %v14106_v21 = vpop.f32.mrb[14].mxu1 }
 0x193   : > { %v2285_v32 = vsel %vm13474_vm11, %v2280_v18, %v2284_v2  ;;  %v2679_v15 = vsel %vm13492_vm14, %v10959_v61, %v2678_v30  ;;  %v2680_v60 = vrot.slane %v2678_v30, 4  ;;  %v2290_v16 = vshll.u32 %v2028_v19, 16  ;;  %v14110_v2 = vpop.f32.mrb[15].mxu0  ;;  %v12916_v18 = vld [vmem:[#allocation2 + $0x84] sm:$0xff]  }
 0x194   : > { %v10942_v54 = vcombine.low %v2275_v14, %v2285_v32  ;;  %v3215_v52 = vrot.slane %v3214_v3, 4  ;;  %v3225_v57 = vrot.slane %v3224_v9, 4  ;;  %v2289_v35 = vrot.slane %v2287_v24, 4  ;;  %v2975_v3 = vld [vmem:[#allocation2 + $0x98] sm:$0x1]  ;;  %v14116_v9 = vpop.f32.mrb[15].mxu1 }
 0x195   : > { %v2682_v0 = vsel %vm13492_vm14, %v2680_v60, %v2681_v41  ;;  %v2292_v31 = vrot.slane %v2290_v16, 5  ;;  %v2296_v26 = vshll.u32 %v2029_v20, 16  ;;  %v2300_v51 = vshrl.u32 %v2029_v20, 16 }
 0x196   : > { %4890 = vmatmul.mubr.bf16.gmra.mrb[100].mxu0 %v10942_v54  ;;  %v3220_v61 = vsel %vm13474_vm11, %v3215_v52, %v3219_v44  ;;  %v3230_v19 = vsel %vm13474_vm11, %v3225_v57, %v3229_v38  ;;  %v10975_v30 = vcombine.low %v2679_v15, %v2682_v0  ;;  %v2306_v14 = vshll.u32 %v2030_v37, 16  ;;  %v2544_v15 = vld [vmem:[#allocation2 + $0x94] sm:$0xf] }
 0x197   : > { %v11006_v41 = vcombine.low %v3220_v61, %v3230_v19  ;;  %v2293_v24 = vor.u32 %v2292_v31, %v2289_v35  ;;  %v2298_v32 = vrot.slane %v2296_v26, 5  ;;  %v2302_v20 = vrot.slane %v2300_v51, 4  ;;  %v2545_v31 = vld [vmem:[#allocation2 + $0x98] sm:$0x1]  ;;  %v14122_v26 = vpop.f32.mrb[16].mxu0 }
 0x198   : > { %4897 = vmatprep.mubr.bf16.mxu0 %v10975_v30  ;;  %v2308_v60 = vrot.slane %v2306_v14, 5  ;;  %v3232_v16 = vshrl.u32 %v2973_v48, 16  ;;  %v3235_v54 = vshll.u32 %v2973_v48, 16  ;;  %v3245_v38 = vshrl.u32 %v2974_v62, 16  ;;  %v2031_v62 = vld [vmem:[#allocation2 + $0x90] sm:$0xf] }
 0x199   : > { %5050 = vmatprep.mubr.bf16.mxu1 %v11006_v41  ;;  %v2294_v44 = vrot.slane %v2293_v24, 4  ;;  %v2303_v52 = vor.u32 %v2302_v20, %v2298_v32  ;;  %v3251_v57 = vshll.u32 %v2975_v3, 16  ;;  %v14120_v35 = vadd.f32 %v13970_v50, %v13968_v7  ;;  %v14126_v30 = vpop.f32.mrb[16].mxu1  ;;  %v2033_v20 = vld [vmem:[#allocation2 + $0x98] sm:$0x1] }
 0x19a   : > { %5051 = vmatmul.mubr.bf16.gmra.mrb[100].mxu1 %v12916_v18  ;;  %v3234_v37 = vrot.slane %v3232_v16, 4  ;;  %v3237_v0 = vrot.slane %v3235_v54, 5  ;;  %v3247_v61 = vrot.slane %v3245_v38, 4  ;;  %v14130_v5 = vadd.f32 %v13992_v8, %v13984_v27  ;;  %v14146_v38 = vpop.f32.mrb[17].mxu1 }
 0x19b   : > { %16388 = vst [vmem:[#allocation20_spill] sm:$0xff] %v14120_v35  ;;  %v2299_v48 = vsel %vm13474_vm11, %v2294_v44, %v2298_v32  ;;  %v2304_v51 = vrot.slane %v2303_v52, 4  ;;  %v3253_v19 = vrot.slane %v3251_v57, 5  ;;  %v14134_v7 = vadd.f32 %v13978_v33, %v13973_v22  ;;  %v2032_v32 = vld [vmem:[#allocation2 + $0x94] sm:$0xf]  ;;  %v14142_v44 = vpop.f32.mrb[17].mxu0 }
 0x19c   : > { %v3238_v18 = vor.u32 %v3237_v0, %v3234_v37  ;;  %16389 = vst [vmem:[#allocation21_spill] sm:$0xff] %v14130_v5  ;;  %v14138_v50 = vadd.f32 %v14006_v1, %v13994_v23  ;;  %v3248_v3 = vor.u32 %v3247_v61, %v3243_v4  ;;  %v10960_v41 = vrot.slane %v2543_v25, 9  ;;  %v12918_v33 = vld [vmem:[#allocation2 + $0x90] sm:$0xff]   ;;  %v2976_v37 = vld [vmem:[#allocation2 + $0x9c] sm:$0xf]  ;;  %v14150_v0 = vpop.f32.mrb[18].mxu0 }
 0x19d   : > { %16390 = vst [vmem:[#allocation22_spill] sm:$0xff] %v14134_v7  ;;  %v2309_v14 = vsel %vm13474_vm11, %v2304_v51, %v2308_v60  ;;  %v2685_v24 = vrot.slane %v2544_v15, 5  ;;  %v2688_v27 = vrot.slane %v2545_v31, 5  ;;  %v2311_v8 = vshrl.u32 %v2031_v62, 16 }
 0x19e   : > { %16391 = vst [vmem:[#allocation23_spill] sm:$0xff] %v14138_v50  ;;  %v10943_v16 = vcombine.low %v2299_v48, %v2309_v14  ;;  %v3239_v54 = vrot.slane %v3238_v18, 4  ;;  %v3249_v22 = vrot.slane %v3248_v3, 4  ;;  %v2314_v52 = vshll.u32 %v2031_v62, 16  ;;  %v2977_v62 = vld [vmem:[#allocation2 + $0xa0] sm:$0xf] }
 0x19f   : > { %v2686_v23 = vsel %vm13492_vm14, %v10960_v41, %v2685_v24  ;;  %v2687_v1 = vrot.slane %v2685_v24, 4  ;;  %v2313_v60 = vrot.slane %v2311_v8, 4  ;;  %v2320_v57 = vshll.u32 %v2032_v32, 16  ;;  %v2978_v18 = vld [vmem:[#allocation2 + $0xa4] sm:$0x1]  ;;  %v14156_v50 = vpop.f32.mrb[18].mxu1 }
 0x1a0   : > { %4898 = vmatmul.mubr.bf16.gmra.mrb[104].mxu0 %v10943_v16  ;;  %v3244_v25 = vsel %vm13474_vm11, %v3239_v54, %v3243_v4  ;;  %v2324_v15 = vshrl.u32 %v2032_v32, 16  ;;  %v3254_v31 = vsel %vm13474_vm11, %v3249_v22, %v3253_v19  ;;  %v2316_v51 = vrot.slane %v2314_v52, 5  ;;  %v2546_v8 = vld [vmem:[#allocation2 + $0x9c] sm:$0xe]  ;;  %v14158_v52 = vpop.f32.mrb[19].mxu0 }
 0x1a1   : > { %v2689_v48 = vsel %vm13492_vm14, %v2687_v1, %v2688_v27  ;;  %v2330_v61 = vshll.u32 %v2033_v20, 16  ;;  %v11007_v14 = vcombine.low %v3244_v25, %v3254_v31  ;;  %v2322_v41 = vrot.slane %v2320_v57, 5  ;;  %v2547_v20 = vld [vmem:[#allocation2 + $0xa0] sm:$0xf] }
 0x1a2   : > { %v10976_v3 = vcombine.low %v2686_v23, %v2689_v48  ;;  %v2326_v4 = vrot.slane %v2324_v15, 4  ;;  %v2317_v24 = vor.u32 %v2316_v51, %v2313_v60  ;;  %v3256_v32 = vshrl.u32 %v2976_v37, 16  ;;  %v14164_v15 = vpop.f32.mrb[19].mxu1 }
 0x1a3   : > { %v2332_v16 = vrot.slane %v2330_v61, 5  ;;  %v3259_v54 = vshll.u32 %v2976_v37, 16  ;;  %5058 = vmatprep.mubr.bf16.mxu1 %v11007_v14  ;;  %v3265_v22 = vshll.u32 %v2977_v62, 16  ;;  %v3269_v27 = vshrl.u32 %v2977_v62, 16  ;;  %v2548_v61 = vld [vmem:[#allocation2 + $0xa4] sm:$0x1] }
 0x1a4   : > { %4905 = vmatprep.mubr.bf16.mxu0 %v10976_v3  ;;  %v2327_v19 = vor.u32 %v2326_v4, %v2322_v41  ;;  %v3275_v1 = vshll.u32 %v2978_v18, 16  ;;  %5059 = vmatmul.mubr.bf16.gmra.mrb[104].mxu1 %v12918_v33  ;;  %v2318_v23 = vrot.slane %v2317_v24, 4  ;;  %v3258_v25 = vrot.slane %v3256_v32, 4 }
 0x1a5   : > { %v3261_v57 = vrot.slane %v3259_v54, 5  ;;  %v14162_v60 = vadd.f32 %v14014_v45, %v14010_v13  ;;  %v3267_v31 = vrot.slane %v3265_v22, 5  ;;  %v3271_v48 = vrot.slane %v3269_v27, 4  ;;  %v2034_v13 = vld [vmem:[#allocation2 + $0x9c] sm:$0xf] }
 0x1a6   : > { %v2328_v37 = vrot.slane %v2327_v19, 4  ;;  %v3277_v51 = vrot.slane %v3275_v1, 5  ;;  %v2323_v62 = vsel %vm13474_vm11, %v2318_v23, %v2322_v41  ;;  %v14170_v33 = vadd.f32 %v14020_v53, %v14012_v6  ;;  %v2035_v45 = vld [vmem:[#allocation2 + $0xa0] sm:$0xf]  ;;  %v14182_v53 = vpop.f32.mrb[20].mxu0 }
 0x1a7   : > { %16392 = vst [vmem:[#allocation24_spill] sm:$0xff] %v14162_v60  ;;  %v3262_v18 = vor.u32 %v3261_v57, %v3258_v25  ;;  %v14174_v14 = vadd.f32 %v14034_v43, %v14030_v17  ;;  %v3272_v4 = vor.u32 %v3271_v48, %v3267_v31  ;;  %v14180_v24 = vadd.f32 %v14042_v12, %v14032_v36  ;;  %v2036_v17 = vld [vmem:[#allocation2 + $0xa4] sm:$0x1]  ;;  %v12919_v23 = vld [vmem:[#allocation2 + $0x9c] sm:$0xff]   ;;  %v2979_v25 = vld [vmem:[#allocation2 + $0xa8] sm:$0xf] }
 0x1a8   : > { %16393 = vst [vmem:[#allocation25_spill] sm:$0xff] %v14170_v33  ;;  %v2333_v3 = vsel %vm13474_vm11, %v2328_v37, %v2332_v16  ;;  %v10961_v41 = vrot.slane %v2546_v8, 9  ;;  %v2692_v19 = vrot.slane %v2547_v20, 5  ;;  %v2695_v6 = vrot.slane %v2548_v61, 5  ;;  %v2980_v61 = vld [vmem:[#allocation2 + $0xac] sm:$0xf] }
 0x1a9   : > { %16394 = vst [vmem:[#allocation26_spill] sm:$0xff] %v14174_v14  ;;  %16395 = vst [vmem:[#allocation27_spill] sm:$0xff] %v14180_v24  ;;  %v10944_v32 = vcombine.low %v2323_v62, %v2333_v3  ;;  %v3263_v54 = vrot.slane %v3262_v18, 4  ;;  %v3273_v22 = vrot.slane %v3272_v4, 4  ;;  %v2335_v43 = vshrl.u32 %v2034_v13, 16  ;;  %v14190_v62 = vpop.f32.mrb[20].mxu1 }
 0x1aa   : > { %v2338_v27 = vshll.u32 %v2034_v13, 16  ;;  %v2344_v1 = vshll.u32 %v2035_v45, 16  ;;  %v2693_v36 = vsel %vm13492_vm14, %v10961_v41, %v2692_v19  ;;  %v2694_v12 = vrot.slane %v2692_v19, 4  ;;  %v2981_v4 = vld [vmem:[#allocation2 + $0xb0] sm:$0x1]  ;;  %v14194_v19 = vpop.f32.mrb[21].mxu0 }
 0x1ab   : > { %4906 = vmatmul.mubr.bf16.gmra.mrb[108].mxu0 %v10944_v32  ;;  %v3268_v16 = vsel %vm13474_vm11, %v3263_v54, %v3267_v31  ;;  %v2348_v8 = vshrl.u32 %v2035_v45, 16  ;;  %v3278_v20 = vsel %vm13474_vm11, %v3273_v22, %v3277_v51  ;;  %v2337_v57 = vrot.slane %v2335_v43, 4  ;;  %v14196_v51 = vpop.f32.mrb[21].mxu1  ;;  %v2984_v14 = vld [vmem:[#allocation2 + $0xbc] sm:$0x1] }
 0x1ac   : > { %v2340_v37 = vrot.slane %v2338_v27, 5  ;;  %v2346_v48 = vrot.slane %v2344_v1, 5  ;;  %v11008_v18 = vcombine.low %v3268_v16, %v3278_v20  ;;  %v2696_v31 = vsel %vm13492_vm14, %v2694_v12, %v2695_v6  ;;  %v2549_v16 = vld [vmem:[#allocation2 + $0xa8] sm:$0xe]  ;;  %v14198_v20 = vpop.f32.mrb[22].mxu0  ;;  %v14200_v6 = vpop.f32.mrb[22].mxu1 }
 0x1ad   : > { %v2350_v13 = vrot.slane %v2348_v8, 4  ;;  %v2354_v3 = vshll.u32 %v2036_v17, 16  ;;  %v10977_v41 = vcombine.low %v2693_v36, %v2696_v31  ;;  %v3280_v45 = vshrl.u32 %v2979_v25, 16 }
 0x1ae   : > { %v2341_v32 = vor.u32 %v2340_v37, %v2337_v57  ;;  %v3283_v54 = vshll.u32 %v2979_v25, 16  ;;  %5066 = vmatprep.mubr.bf16.mxu1 %v11008_v18  ;;  %v3289_v27 = vshll.u32 %v2980_v61, 16  ;;  %v3293_v1 = vshrl.u32 %v2980_v61, 16  ;;  %v14202_v25 = vpop.f32.mrb[23].mxu0  ;;  %v14204_v57 = vpop.f32.mrb[23].mxu1 }
 0x1af   : > { %v2351_v22 = vor.u32 %v2350_v13, %v2346_v48  ;;  %v2356_v43 = vrot.slane %v2354_v3, 5  ;;  %5067 = vmatmul.mubr.bf16.gmra.mrb[108].mxu1 %v12919_v23  ;;  %4913 = vmatprep.mubr.bf16.mxu0 %v10977_v41  ;;  %v3282_v36 = vrot.slane %v3280_v45, 4  ;;  %v3299_v8 = vshll.u32 %v2981_v4, 16  ;;  %v2550_v13 = vld [vmem:[#allocation2 + $0xac] sm:$0xf]  ;;  %v14210_v3 = vpop.f32.mrb[24].mxu0 }
 0x1b0   : > { %v2342_v17 = vrot.slane %v2341_v32, 4  ;;  %v3285_v12 = vrot.slane %v3283_v54, 5  ;;  %v3291_v18 = vrot.slane %v3289_v27, 5  ;;  %v3295_v31 = vrot.slane %v3293_v1, 4  ;;  %v2551_v45 = vld [vmem:[#allocation2 + $0xb0] sm:$0x1] }
 0x1b1   : > { %v2352_v37 = vrot.slane %v2351_v22, 4  ;;  %v14208_v61 = vadd.f32 %v14054_v47, %v14044_v49  ;;  %v3301_v32 = vrot.slane %v3299_v8, 5  ;;  %v14216_v4 = vadd.f32 %v14056_v63, %v14048_v29  ;;  %v2037_v54 = vld [vmem:[#allocation2 + $0xa8] sm:$0xf]  ;;  %v14218_v22 = vpop.f32.mrb[24].mxu1  ;;  %v14230_v8 = vpop.f32.mrb[25].mxu0 }
 0x1b2   : > { %v2347_v23 = vsel %vm13474_vm11, %v2342_v17, %v2346_v48  ;;  %v3286_v41 = vor.u32 %v3285_v12, %v3282_v36  ;;  %v3296_v47 = vor.u32 %v3295_v31, %v3291_v18  ;;  %v14224_v27 = vadd.f32 %v14070_v59, %v14064_v39  ;;  %v2038_v1 = vld [vmem:[#allocation2 + $0xac] sm:$0xf]  ;;  %v2039_v17 = vld [vmem:[#allocation2 + $0xb0] sm:$0x1]  ;;  %v14234_v59 = vpop.f32.mrb[26].mxu0 }
 0x1b3   : > { %16396 = vst [vmem:[#allocation28_spill] sm:$0xff] %v14208_v61  ;;  %16397 = vst [vmem:[#allocation29_spill] sm:$0xff] %v14216_v4  ;;  %v2357_v49 = vsel %vm13474_vm11, %v2352_v37, %v2356_v43  ;;  %v14228_v48 = vadd.f32 %v14076_v10, %v14066_v46  ;;  %v10962_v36 = vrot.slane %v2549_v16, 9  ;;  %v2699_v12 = vrot.slane %v2550_v13, 5  ;;  %v14232_v4 = vpop.f32.mrb[25].mxu1  ;;  %v12921_v37 = vld [vmem:[#allocation2 + $0xa8] sm:$0xff]  }
 0x1b4   : > { %16398 = vst [vmem:[#allocation30_spill] sm:$0xff] %v14224_v27  ;;  %v10945_v29 = vcombine.low %v2347_v23, %v2357_v49  ;;  %v3287_v63 = vrot.slane %v3286_v41, 4  ;;  %v3297_v43 = vrot.slane %v3296_v47, 4  ;;  %v2702_v31 = vrot.slane %v2551_v45, 5  ;;  %v14236_v27 = vpop.f32.mrb[26].mxu1  ;;  %v14242_v41 = vpop.f32.mrb[27].mxu0 }
 0x1b5   : > { %16399 = vst [vmem:[#allocation31_spill] sm:$0xff] %v14228_v48  ;;  %v2359_v61 = vshrl.u32 %v2037_v54, 16  ;;  %v2362_v39 = vshll.u32 %v2037_v54, 16  ;;  %v2700_v10 = vsel %vm13492_vm14, %v10962_v36, %v2699_v12  ;;  %v2701_v16 = vrot.slane %v2699_v12, 4  ;;  %v2982_v23 = vld [vmem:[#allocation2 + $0xb4] sm:$0xf] }
 0x1b6   : > { %4914 = vmatmul.mubr.bf16.gmra.mrb[112].mxu0 %v10945_v29  ;;  %v3292_v46 = vsel %vm13474_vm11, %v3287_v63, %v3291_v18  ;;  %v2368_v13 = vshll.u32 %v2038_v1, 16  ;;  %v14244_v49 = vpop.f32.mrb[27].mxu1  ;;  %v3302_v45 = vsel %vm13474_vm11, %v3297_v43, %v3301_v32  ;;  %v2372_v48 = vshrl.u32 %v2038_v1, 16  ;;  %v2983_v29 = vld [vmem:[#allocation2 + $0xb8] sm:$0xf]  ;;  %v14248_v24 = vpop.f32.mrb[28].mxu0 }
 0x1b7   : > { %16400 = vst [vmem:[#allocation32_spill] sm:$0xff] %v14244_v49  ;;  %v2361_v54 = vrot.slane %v2359_v61, 4  ;;  %v2364_v47 = vrot.slane %v2362_v39, 5  ;;  %v11009_v18 = vcombine.low %v3292_v46, %v3302_v45  ;;  %v2703_v63 = vsel %vm13492_vm14, %v2701_v16, %v2702_v31  ;;  %v2552_v1 = vld [vmem:[#allocation2 + $0xb4] sm:$0xe]  ;;  %v14254_v46 = vpop.f32.mrb[28].mxu1 }
 0x1b8   : > { %v2370_v36 = vrot.slane %v2368_v13, 5  ;;  %v2378_v12 = vshll.u32 %v2039_v17, 16  ;;  %v10978_v33 = vcombine.low %v2700_v10, %v2703_v63  ;;  %v2374_v7 = vrot.slane %v2372_v48, 4  ;;  %v2553_v39 = vld [vmem:[#allocation2 + $0xb8] sm:$0xf]  ;;  %v14256_v45 = vpop.f32.mrb[29].mxu0 }
 0x1b9   : > { %v2365_v60 = vor.u32 %v2364_v47, %v2361_v54  ;;  %v3304_v5 = vshrl.u32 %v2982_v23, 16  ;;  %5074 = vmatprep.mubr.bf16.mxu1 %v11009_v18  ;;  %v3307_v32 = vshll.u32 %v2982_v23, 16  ;;  %v3313_v61 = vshll.u32 %v2983_v29, 16  ;;  %v14252_v49 = vld [vmem:[#allocation2 + $0xbc] sm:$0x1]  ;;  %v14258_v16 = vpop.f32.mrb[29].mxu1 }
 0x1ba   : > { %v2380_v35 = vrot.slane %v2378_v12, 5  ;;  %v3317_v43 = vshrl.u32 %v2983_v29, 16  ;;  %5075 = vmatmul.mubr.bf16.gmra.mrb[112].mxu1 %v12921_v37  ;;  %4921 = vmatprep.mubr.bf16.mxu0 %v10978_v33  ;;  %v2375_v31 = vor.u32 %v2374_v7, %v2370_v36  ;;  %v3323_v48 = vshll.u32 %v2984_v14, 16  ;;  %v14260_v13 = vpop.f32.mrb[30].mxu0  ;;  %v12926_v23 = vld [vmem:[#allocation10 + $0x40] sm:$0xff]   ;;  %v14266_v63 = vpop.f32.mrb[30].mxu1 }
 0x1bb   : > { %v2366_v17 = vrot.slane %v2365_v60, 4  ;;  %v3306_v10 = vrot.slane %v3304_v5, 4  ;;  %v3309_v54 = vrot.slane %v3307_v32, 5  ;;  %v3315_v47 = vrot.slane %v3313_v61, 5  ;;  %v14268_v37 = vpop.f32.mrb[31].mxu0  ;;  %v12927_v60 = vld [vmem:[#allocation10] sm:$0xff]   ;;  %12166 = vmatprep.subr.bf16.mxu1 %v12926_v23 }
 0x1bc   : > { %v3319_v29 = vrot.slane %v3317_v43, 4  ;;  %v14264_v18 = vadd.f32 %v14094_v28, %v14078_v40  ;;  %v2376_v7 = vrot.slane %v2375_v31, 4  ;;  %v3325_v33 = vrot.slane %v3323_v48, 5  ;;  %v2040_v12 = vld [vmem:[#allocation2 + $0xb4] sm:$0xf]  ;;  %v14276_v32 = vpop.f32.mrb[31].mxu1  ;;  %12167 = vmatpush3.bf16.msra.mxu1 %v12927_v60 }
 0x1bd   : > { %v2371_v5 = vsel %vm13474_vm11, %v2366_v17, %v2370_v36  ;;  %v14274_v14 = vadd.f32 %v14096_v34, %v14092_v55  ;;  %v14278_v61 = vpop.f32.mrb[32].mxu0  ;;  %v3310_v40 = vor.u32 %v3309_v54, %v3306_v10  ;;  %v14282_v43 = vadd.f32 %v14110_v2, %v14100_v58  ;;  %v2041_v17 = vld [vmem:[#allocation2 + $0xb8] sm:$0xf]  ;;  %v2042_v23 = vld [vmem:[#allocation2 + $0xbc] sm:$0x1]  ;;  %v14291_v54 = vpop.f32.mrb[32].mxu1 }
 0x1be   : > { %16401 = vst [vmem:[#allocation33_spill] sm:$0xff] %v14264_v18  ;;  %v3320_v28 = vor.u32 %v3319_v29, %v3315_v47  ;;  %v14286_v36 = vadd.f32 %v14116_v9, %v14106_v21  ;;  %v2381_v55 = vsel %vm13474_vm11, %v2376_v7, %v2380_v35  ;;  %v10963_v34 = vrot.slane %v2552_v1, 9  ;;  %v433_v10 = vld [vmem:[#allocation2 + $0xc8] sm:$0x1]  ;;  %16405 = vst [vmem:[#allocation37_spill] sm:$0xff] %v14291_v54  ;;  %v14293_v21 = vpop.f32.mrb[33].mxu0 }
 0x1bf   : > { %16402 = vst [vmem:[#allocation34_spill] sm:$0xff] %v14274_v14  ;;  %16403 = vst [vmem:[#allocation35_spill] sm:$0xff] %v14282_v43  ;;  %v2706_v31 = vrot.slane %v2553_v39, 5  ;;  %v2709_v48 = vrot.slane %v14252_v49, 5  ;;  %v10946_v29 = vcombine.low %v2371_v5, %v2381_v55  ;;  %v3311_v58 = vrot.slane %v3310_v40, 4  ;;  %v12922_v9 = vld [vmem:[#allocation2 + $0xb4] sm:$0xff]  }
 0x1c0   : > { %16404 = vst [vmem:[#allocation36_spill] sm:$0xff] %v14286_v36  ;;  %v3321_v2 = vrot.slane %v3320_v28, 4  ;;  %v2383_v43 = vshrl.u32 %v2040_v12, 16  ;;  %v2985_v14 = vld [vmem:[#allocation2 + $0xc0] sm:$0xf]  ;;  %v2386_v1 = vshll.u32 %v2040_v12, 16 }
 0x1c1   : > { %v2707_v60 = vsel %vm13492_vm14, %v10963_v34, %v2706_v31  ;;  %v2708_v35 = vrot.slane %v2706_v31, 4  ;;  %v2392_v39 = vshll.u32 %v2041_v17, 16  ;;  %v14297_v7 = vpop.f32.mrb[33].mxu1  ;;  %v14299_v49 = vpop.f32.mrb[34].mxu0  ;;  %4922 = vmatmul.mubr.bf16.gmra.mrb[116].mxu0 %v10946_v29  ;;  %v3316_v5 = vsel %vm13474_vm11, %v3311_v58, %v3315_v47  ;;  %v2986_v36 = vld [vmem:[#allocation2 + $0xc4] sm:$0xf] }
 0x1c2   : > { %16406 = vst [vmem:[#allocation38_spill] sm:$0xff] %v14297_v7  ;;  %16407 = vst [vmem:[#allocation39_spill] sm:$0xff] %v14299_v49  ;;  %v3326_v40 = vsel %vm13474_vm11, %v3321_v2, %v3325_v33  ;;  %v2385_v28 = vrot.slane %v2383_v43, 4  ;;  %v2396_v55 = vshrl.u32 %v2041_v17, 16  ;;  %v14305_v18 = vpop.f32.mrb[34].mxu1  ;;  %v14307_v34 = vpop.f32.mrb[35].mxu0 }
 0x1c3   : > { %v11010_v12 = vcombine.low %v3316_v5, %v3326_v40  ;;  %v2710_v31 = vsel %vm13492_vm14, %v2708_v35, %v2709_v48  ;;  %v2388_v7 = vrot.slane %v2386_v1, 5  ;;  %v2394_v49 = vrot.slane %v2392_v39, 5  ;;  %v14311_v29 = vpop.f32.mrb[35].mxu1  ;;  %v2555_v35 = vld [vmem:[#allocation2 + $0xc0] sm:$0xe] }
 0x1c4   : > { %v10979_v47 = vcombine.low %v2707_v60, %v2710_v31  ;;  %v2398_v58 = vrot.slane %v2396_v55, 4  ;;  %v2402_v33 = vshll.u32 %v2042_v23, 16  ;;  %v434_v43 = vsel %vm13462_vm10, 0, %v433_v10  ;;  %v2556_v10 = vld [vmem:[#allocation2 + $0xc4] sm:$0xf] }
 0x1c5   : > { %v14313_v54 = vpop.f32.mrb[36].mxu0  ;;  %5082 = vmatprep.mubr.bf16.mxu1 %v11010_v12  ;;  %v2389_v2 = vor.u32 %v2388_v7, %v2385_v28  ;;  %435 = vst [vmem:[#allocation2 + $0xc8] sm:$0x1] %v434_v43  ;;  %v3328_v5 = vshrl.u32 %v2985_v14, 16  ;;  %v3331_v40 = vshll.u32 %v2985_v14, 16  ;;  %v3337_v48 = vshll.u32 %v2986_v36, 16 }
 0x1c6   : > { %v14319_v1 = vpop.f32.mrb[37].mxu0  ;;  %5083 = vmatmul.mubr.bf16.gmra.mrb[116].mxu1 %v12922_v9  ;;  %4929 = vmatprep.mubr.bf16.mxu0 %v10979_v47  ;;  %v2399_v39 = vor.u32 %v2398_v58, %v2394_v49  ;;  %v2404_v60 = vrot.slane %v2402_v33, 5  ;;  %v3341_v55 = vshrl.u32 %v2986_v36, 16  ;;  %v14323_v23 = vadd.f32 %v14142_v44, %v14122_v26  ;;  %v2043_v31 = vld [vmem:[#allocation2 + $0xc0] sm:$0xf] }
 0x1c7   : > { %v14317_v17 = vpop.f32.mrb[36].mxu1  ;;  %v2390_v12 = vrot.slane %v2389_v2, 4  ;;  %v3330_v7 = vrot.slane %v3328_v5, 4  ;;  %v3333_v28 = vrot.slane %v3331_v40, 5  ;;  %v14325_v43 = vrot.slane %v3337_v48, 5  ;;  %v14329_v42 = vpop.f32.mrb[38].mxu0 }
 0x1c8   : > { %16408 = vst [vmem:[#allocation40_spill] sm:$0xff] %v14323_v23  ;;  %v14327_v14 = vpop.f32.mrb[37].mxu1  ;;  %v2400_v9 = vrot.slane %v2399_v39, 4  ;;  %v3343_v47 = vrot.slane %v3341_v55, 4  ;;  %v14333_v36 = vadd.f32 %v14146_v38, %v14126_v30  ;;  %v14337_v26 = vadd.f32 %v14158_v52, %v14150_v0  ;;  %v2044_v44 = vld [vmem:[#allocation2 + $0xc4] sm:$0xf] }
 0x1c9   : > { %v14339_v58 = vpop.f32.mrb[38].mxu1  ;;  %v14341_v33 = vpop.f32.mrb[39].mxu0  ;;  %v2395_v2 = vsel %vm13474_vm11, %v2390_v12, %v2394_v49  ;;  %v3334_v5 = vor.u32 %v3333_v28, %v3330_v7  ;;  %v14347_v40 = vadd.f32 %v14164_v15, %v14156_v50  ;;  %v10964_v48 = vrot.slane %v2555_v35, 9  ;;  %v2988_v55 = vld [vmem:[#allocation2 + $0xcc] sm:$0xf] }
 0x1ca   : > { %16409 = vst [vmem:[#allocation41_spill] sm:$0xff] %v14333_v36  ;;  %16410 = vst [vmem:[#allocation42_spill] sm:$0xff] %v14337_v26  ;;  %v14349_v30 = vpop.f32.mrb[39].mxu1  ;;  %v2405_v38 = vsel %vm13474_vm11, %v2400_v9, %v2404_v60  ;;  %v3344_v0 = vor.u32 %v3343_v47, %v14325_v43  ;;  %v2713_v52 = vrot.slane %v2556_v10, 5  ;;  %v2407_v39 = vshrl.u32 %v2043_v31, 16  ;;  %v16417_v9 = vld [vmem:[#allocation19_spill] sm:$0xff] }
 0x1cb   : > { %16411 = vst [vmem:[#allocation43_spill] sm:$0xff] %v14339_v58  ;;  %16412 = vst [vmem:[#allocation44_spill] sm:$0xff] %v14341_v33  ;;  %v2989_v26 = vld [vmem:[#allocation2 + $0xd0] sm:$0xf]  ;;  %v10947_v36 = vcombine.low %v2395_v2, %v2405_v38  ;;  %v2410_v23 = vshll.u32 %v2043_v31, 16  ;;  %v2416_v49 = vshll.u32 %v2044_v44, 16 }
 0x1cc   : > { %16413 = vst [vmem:[#allocation45_spill] sm:$0xff] %v14347_v40  ;;  %16414 = vst [vmem:[#allocation46_spill] sm:$0xff] %v14349_v30  ;;  %v2990_v12 = vld [vmem:[#allocation2 + $0xd4] sm:$0x1]  ;;  %v901_v50 = vld [vmem:[#allocation2 + $0xc8] sm:$0x1]  ;;  %v14362_v60 = vsel %vm13492_vm14, %v10964_v48, %v2713_v52 }
 0x1cd   : > { %v14356_v15 = vrot.slane %v3334_v5, 4  ;;  %v14358_v35 = vrot.slane %v3344_v0, 4  ;;  %v2409_v28 = vrot.slane %v2407_v39, 4  ;;  %4930 = vmatmul.mubr.bf16.gmra.mrb[120].mxu0 %v10947_v36  ;;  %v16418_v47 = vrot.slane %v16417_v9, 4  ;;  %v3455_v36 = vld [vmem:[#allocation2 + $0x18] sm:$0xe] }
 0x1ce   : > { %v14370_v38 = vrot.slane %v2713_v52, 4  ;;  %v2412_v40 = vrot.slane %v2410_v23, 5  ;;  %v14372_v5 = vrot.slane %v2416_v49, 5  ;;  %v2420_v48 = vshrl.u32 %v2044_v44, 16  ;;  %v3456_v49 = vld [vmem:[#allocation2 + $0x1c] sm:$0xf] }
 0x1cf   : > { %v902_v2 = vsel %vm13456_vm3, %v16418_v47, %v901_v50  ;;  %v3352_v39 = vshrl.u32 %v2988_v55, 16  ;;  %v3355_v30 = vshll.u32 %v2988_v55, 16  ;;  %v3365_v52 = vshrl.u32 %v2989_v26, 16  ;;  %v3457_v33 = vld [vmem:[#allocation2 + $0x20] sm:$0x1] }
 0x1d0   : > { %903 = vst [vmem:[#allocation2 + $0xc8] sm:$0x1] %v902_v2  ;;  %v2413_v50 = vor.u32 %v2412_v40, %v2409_v28  ;;  %v3371_v47 = vshll.u32 %v2990_v12, 16  ;;  %v14384_v23 = vadd.f32 %v14194_v19, %v14182_v53  ;;  %v2422_v44 = vrot.slane %v2420_v48, 4  ;;  %v14400_v19 = vld [vmem:[#allocation2 + $0x24] sm:$0xe] }
 0x1d1   : > { %v3354_v55 = vrot.slane %v3352_v39, 4  ;;  %v3367_v12 = vrot.slane %v3365_v52, 4  ;;  %v14398_v53 = vadd.f32 %v14196_v51, %v14190_v62  ;;  %v14407_v48 = vadd.f32 %v14202_v25, %v14198_v20 }
 0x1d2   : > { %16422 = vst [vmem:[#allocation50_spill] sm:$0xff] %v14384_v23  ;;  %v14394_v40 = vrot.slane %v2413_v50, 4  ;;  %v3373_v50 = vrot.slane %v3371_v47, 5  ;;  %v11013_v52 = vrot.slane %v3455_v36, 9  ;;  %v14434_v47 = vadd.f32 %v14230_v8, %v14210_v3 }
 0x1d3   : > { %16423 = vst [vmem:[#allocation51_spill] sm:$0xff] %v14398_v53  ;;  %16424 = vst [vmem:[#allocation52_spill] sm:$0xff] %v14407_v48  ;;  %v3553_v53 = vrot.slane %v3456_v49, 5  ;;  %v14442_v49 = vadd.f32 %v14242_v41, %v14234_v59 }
 0x1d4   : > { %v14364_v10 = vpop.f32.mrb[40].mxu1  ;;  %v2419_v36 = vsel %vm13474_vm11, %v14394_v40, %v14372_v5 }
 0x1d5   : > { %16416 = vst [vmem:[#allocation48_spill] sm:$0xff] %v14364_v10  ;;  %v3361_v10 = vshll.u32 %v2989_v26, 16  ;;  %v3340_v26 = vsel %vm13474_vm11, %v14356_v15, %v14325_v43  ;;  %v14411_v43 = vadd.f32 %v14204_v57, %v14200_v6  ;;  %v14413_v15 = vld [vmem:[#allocation2 + $0x28] sm:$0xf]  ;;  %16429 = vst [vmem:[#allocation57_spill] sm:$0xff] %v14442_v49  ;;  %v3554_v6 = vsel %vm13492_vm14, %v11013_v52, %v3553_v53 }
 0x1d6   : > { %v14354_v7 = vpop.f32.mrb[40].mxu0  ;;  %v3555_v40 = vrot.slane %v3553_v53, 4  ;;  %v3462_v52 = vld [vmem:[#allocation2 + $0x34] sm:$0xf] }
 0x1d7   : > { %16415 = vst [vmem:[#allocation47_spill] sm:$0xff] %v14354_v7  ;;  %v14374_v0 = vpop.f32.mrb[41].mxu0  ;;  %v14376_v7 = vpop.f32.mrb[41].mxu1  ;;  %16425 = vst [vmem:[#allocation53_spill] sm:$0xff] %v14411_v43  ;;  %v2987_v48 = vld [vmem:[#allocation2 + $0xc8] sm:$0x1] }
 0x1d8   : > { %16420 = vst [vmem:[#allocation19_spill] sm:$0xff] %v14374_v0  ;;  %16421 = vst [vmem:[#allocation49_spill] sm:$0xff] %v14376_v7  ;;  %v14378_v58 = vpop.f32.mrb[42].mxu0  ;;  %v14380_v9 = vpop.f32.mrb[42].mxu1  ;;  %v3357_v7 = vrot.slane %v3355_v30, 5  ;;  %v3363_v0 = vrot.slane %v3361_v10, 5  ;;  %v2423_v30 = vor.u32 %v2422_v44, %v14372_v5 }
 0x1d9   : > { %v14386_v31 = vpop.f32.mrb[43].mxu0  ;;  %v14388_v2 = vpop.f32.mrb[43].mxu1  ;;  %v2557_v23 = vld [vmem:[#allocation2 + $0xc8] sm:$0x1] }
 0x1da   : > { %v3358_v10 = vor.u32 %v3357_v7, %v3354_v55  ;;  %v3368_v51 = vor.u32 %v3367_v12, %v3363_v0  ;;  %v2424_v20 = vrot.slane %v2423_v30, 4  ;;  %v3556_v55 = vrot.slane %v3457_v33, 5 }
 0x1db   : > { %v14438_v33 = vadd.f32 %v14232_v4, %v14218_v22  ;;  %v3347_v12 = vshll.u32 %v2987_v48, 16  ;;  %v2716_v30 = vrot.slane %v2557_v23, 5  ;;  %v3560_v4 = vrot.slane %v14413_v15, 5  ;;  %v16430_v23 = vld [vmem:[#allocation32_spill] sm:$0xff] }
 0x1dc   : > { %v14415_v39 = vpop.f32.mrb[44].mxu1  ;;  %v3359_v25 = vrot.slane %v3358_v10, 4  ;;  %v3369_v8 = vrot.slane %v3368_v51, 4  ;;  %v14456_v48 = vadd.f32 %v16430_v23, %v14236_v27  ;;  %v3557_v53 = vsel %vm13492_vm14, %v3555_v40, %v3556_v55  ;;  %v3463_v51 = vld [vmem:[#allocation2 + $0x38] sm:$0x1]  ;;  %v12924_v27 = vld [vmem:[#allocation2 + $0xc0] sm:$0xff]  }
 0x1dd   : > { %16426 = vst [vmem:[#allocation54_spill] sm:$0xff] %v14415_v39  ;;  %v14419_v44 = vpop.f32.mrb[45].mxu1  ;;  %v2045_v39 = vld [vmem:[#allocation2 + $0xc8] sm:$0x1]  ;;  %16428 = vst [vmem:[#allocation56_spill] sm:$0xff] %v14438_v33  ;;  %v3349_v22 = vrot.slane %v3347_v12, 5  ;;  %v2717_v59 = vsel %vm13492_vm14, %v14370_v38, %v2716_v30 }
 0x1de   : > { %v14402_v28 = vpop.f32.mrb[44].mxu0  ;;  %v14424_v57 = vpop.f32.mrb[46].mxu1  ;;  %v2426_v10 = vshll.u32 %v2045_v39, 16  ;;  %v3364_v3 = vsel %vm13474_vm11, %v3359_v25, %v3363_v0  ;;  %16431 = vst [vmem:[#allocation32_spill] sm:$0xff] %v14456_v48  ;;  %v3461_v39 = vld [vmem:[#allocation2 + $0x30] sm:$0xe]  ;;  %v10980_v49 = vcombine.low %v14362_v60, %v2717_v59  ;;  %v3374_v0 = vsel %vm13474_vm11, %v3369_v8, %v3373_v50 }
 0x1df   : > { %v14417_v62 = vpop.f32.mrb[45].mxu0  ;;  %16427 = vst [vmem:[#allocation55_spill] sm:$0xff] %v14424_v57  ;;  %v3460_v57 = vld [vmem:[#allocation2 + $0x2c] sm:$0x1]  ;;  %v14446_v5 = vpop.f32.mrb[47].mxu1  ;;  %v3350_v38 = vsel %vm13474_vm11, %v14358_v35, %v3349_v22  ;;  %v11012_v30 = vcombine.low %v3364_v3, %v3374_v0  ;;  %v11029_v60 = vcombine.low %v3554_v6, %v3557_v53  ;;  %v12928_v8 = vld [vmem:[#allocation10 + $0x48] sm:$0xff]  }
 0x1e0   : > { %v14421_v7 = vpop.f32.mrb[46].mxu0  ;;  %v2428_v41 = vrot.slane %v2426_v10, 5  ;;  %v3563_v15 = vrot.slane %v3460_v57, 5  ;;  %v14463_v25 = vld [vmem:[#allocation2 + $0x40] sm:$0xf]  ;;  %v11011_v55 = vcombine.low %v3340_v26, %v3350_v38  ;;  %4937 = vmatprep.mubr.bf16.mxu0 %v10980_v49  ;;  %v3562_v40 = vrot.slane %v3560_v4, 4  ;;  %12168 = vmatprep.subr.bf16.mxu1 %v12928_v8 }
 0x1e1   : > { %v14426_v43 = vpop.f32.mrb[47].mxu0  ;;  %v14470_v10 = vld [vmem:[#allocation2 + $0x3c] sm:$0xe]  ;;  %v11015_v59 = vrot.slane %v3461_v39, 9  ;;  %v3466_v23 = vld [vmem:[#allocation2 + $0x44] sm:$0x1]  ;;  %v14481_v26 = vadd.f32 %v14256_v45, %v14248_v24 }
 0x1e2   : > { %v2429_v12 = vsel %vm13474_vm11, %v2424_v20, %v2428_v41  ;;  %v12929_v35 = vld [vmem:[#allocation10 + $0x8] sm:$0xff]   ;;  %v3567_v22 = vrot.slane %v3462_v52, 5  ;;  %v3570_v33 = vrot.slane %v3463_v51, 5  ;;  %v3574_v20 = vrot.slane %v14463_v25, 5  ;;  %v3467_v3 = vld [vmem:[#allocation2 + $0x48] sm:$0xe]  ;;  %5090 = vmatprep.mubr.bf16.mxu1 %v11011_v55 }
 0x1e3   : > { %v10948_v57 = vcombine.low %v2419_v36, %v2429_v12  ;;  %v14485_v36 = vadd.f32 %v14258_v16, %v14254_v46  ;;  %v3468_v49 = vld [vmem:[#allocation2 + $0x4c] sm:$0xf]  ;;  %v3469_v41 = vld [vmem:[#allocation2 + $0x50] sm:$0x1]  ;;  %5091 = vmatmul.mubr.bf16.gmra.mrb[120].mxu1 %v12924_v27  ;;  %v16432_v0 = vrot.slane %v14400_v19, 9  ;;  %v3564_v24 = vsel %vm13492_vm14, %v3562_v40, %v3563_v15 }
 0x1e4   : > { %v3569_v45 = vrot.slane %v3567_v22, 4  ;;  %5098 = vmatprep.mubr.bf16.mxu1 %v11012_v30  ;;  %v3568_v46 = vsel %vm13492_vm14, %v11015_v59, %v3567_v22  ;;  %v11016_v16 = vrot.slane %v14470_v10, 9  ;;  %v14504_v25 = vadd.f32 %v14268_v37, %v14260_v13  ;;  %12169 = vmatpush3.bf16.msra.mxu1 %v12929_v35  ;;  %v12925_v15 = vld [vmem:[#allocation2 + $0xcc] sm:$0xff]   ;;  %v3470_v10 = vld [vmem:[#allocation2 + $0x54] sm:$0xe]  ;;  %v12930_v59 = vld [vmem:[#allocation10 + $0x50] sm:$0xff]  }
 0x1e5   : > { %4938 = vmatmul.mubr.bf16.gmra.mrb[124].mxu0 %v10948_v57  ;;  %v3561_v53 = vsel %vm13492_vm14, %v16432_v0, %v3560_v4  ;;  %v14508_v19 = vadd.f32 %v14276_v32, %v14266_v63  ;;  %v3471_v4 = vld [vmem:[#allocation2 + $0x58] sm:$0xf]  ;;  %v3576_v12 = vrot.slane %v3574_v20, 4  ;;  %v3577_v30 = vrot.slane %v3466_v23, 5  ;;  %v3472_v57 = vld [vmem:[#allocation2 + $0x5c] sm:$0x1]  ;;  %12170 = vmatprep.subr.bf16.mxu1 %v12930_v59 }
 0x1e6   : > { %v14472_v50 = vpop.f32.mrb[48].mxu0  ;;  %12654 = vmatprep.mubr.bf16.mxu0 %v11029_v60  ;;  %v3571_v27 = vsel %vm13492_vm14, %v3569_v45, %v3570_v33  ;;  %v3581_v60 = vrot.slane %v3468_v49, 5  ;;  %v11030_v13 = vcombine.low %v3561_v53, %v3564_v24  ;;  %v11017_v37 = vrot.slane %v3467_v3, 9  ;;  %v16433_v22 = vld [vmem:[#allocation37_spill] sm:$0xff]  ;;  %v16434_v0 = vld [vmem:[#allocation38_spill] sm:$0xff]  ;;  %v16435_v45 = vld [vmem:[#allocation39_spill] sm:$0xff] }
 0x1e7   : > { %v14474_v48 = vpop.f32.mrb[49].mxu0  ;;  %v14487_v39 = vpop.f32.mrb[48].mxu1  ;;  %v3584_v55 = vrot.slane %v3469_v41, 5  ;;  %v11031_v63 = vcombine.low %v3568_v46, %v3571_v27  ;;  %v3588_v32 = vrot.slane %v3471_v4, 5  ;;  %v11760_v40 = vadd.f32 %v14293_v21, %v14278_v61  ;;  %v12931_v49 = vld [vmem:[#allocation10 + $0x10] sm:$0xff]  }
 0x1e8   : > { %v14477_v6 = vpop.f32.mrb[50].mxu0  ;;  %v14497_v51 = vpop.f32.mrb[49].mxu1  ;;  %v3583_v35 = vrot.slane %v3581_v60, 4  ;;  %v11872_v33 = vadd.f32 %v16434_v0, %v16433_v22  ;;  %v11763_v23 = vadd.f32 %v14307_v34, %v16435_v45  ;;  %v11875_v53 = vadd.f32 %v14311_v29, %v14305_v18  ;;  %v3474_v3 = vld [vmem:[#allocation2 + $0x64] sm:$0xf]  ;;  %12171 = vmatpush3.bf16.msra.mxu1 %v12931_v49 }
 0x1e9   : > { %v14489_v52 = vpop.f32.mrb[51].mxu0  ;;  %v14510_v38 = vpop.f32.mrb[50].mxu1  ;;  %v3575_v41 = vsel %vm13492_vm14, %v11016_v16, %v3574_v20  ;;  %v11018_v24 = vrot.slane %v3470_v10, 9  ;;  %v3578_v21 = vsel %vm13492_vm14, %v3576_v12, %v3577_v30  ;;  %v3582_v34 = vsel %vm13492_vm14, %v11017_v37, %v3581_v60  ;;  %v3473_v29 = vld [vmem:[#allocation2 + $0x60] sm:$0xe]  ;;  %v16436_v30 = vld [vmem:[#allocation44_spill] sm:$0xff] }
 0x1ea   : > { %v14514_v8 = vpop.f32.mrb[51].mxu1  ;;  %v14526_v61 = vadd.f32 %v11872_v33, %v11760_v40  ;;  %v3591_v46 = vrot.slane %v3472_v57, 5  ;;  %v14532_v18 = vadd.f32 %v11875_v53, %v11763_v23  ;;  %v3475_v4 = vld [vmem:[#allocation2 + $0x68] sm:$0x1]  ;;  %v3585_v20 = vsel %vm13492_vm14, %v3583_v35, %v3584_v55  ;;  %v14536_v10 = vld [vmem:[#allocation2 + $0x70] sm:$0xf] }
 0x1eb   : > { %5099 = vmatmul.mubr.bf16.gmra.mrb[124].mxu1 %v12925_v15  ;;  %v3590_v16 = vrot.slane %v3588_v32, 4  ;;  %v3595_v27 = vrot.slane %v3474_v3, 5  ;;  %v11766_v15 = vadd.f32 %v14319_v1, %v14313_v54  ;;  %v11878_v12 = vadd.f32 %v14327_v14, %v14317_v17  ;;  %v16437_v37 = vld [vmem:[#allocation43_spill] sm:$0xff]  ;;  %v16438_v57 = vld [vmem:[#allocation46_spill] sm:$0xff]  ;;  %v14546_v55 = vld [vmem:[#allocation2 + $0x7c] sm:$0xf] }
 0x1ec   : > { %v11769_v60 = vadd.f32 %v16436_v30, %v14329_v42  ;;  %v11032_v40 = vcombine.low %v3575_v41, %v3578_v21  ;;  %v3478_v59 = vld [vmem:[#allocation2 + $0x74] sm:$0x1]  ;;  %v11033_v35 = vcombine.low %v3582_v34, %v3585_v20  ;;  %v3602_v22 = vrot.slane %v14536_v10, 5  ;;  %v3479_v1 = vld [vmem:[#allocation2 + $0x78] sm:$0xe] }
 0x1ed   : > { %12655 = vmatmul.mubr.bf16.vlgmr.msra.gmra.mrb[128].mxu0 %v11030_v13  ;;  %v3476_v13 = vld [vmem:[#allocation2 + $0x6c] sm:$0xe]  ;;  %v14549_v0 = vadd.f32 %v11878_v12, %v11766_v15  ;;  %v11019_v33 = vrot.slane %v3473_v29, 9  ;;  %v3597_v17 = vrot.slane %v3595_v27, 4  ;;  %v3598_v14 = vrot.slane %v3475_v4, 5  ;;  %v16439_v3 = vld [vmem:[#allocation47_spill] sm:$0xff] }
 0x1ee   : > { %12658 = vmatprep.mubr.bf16.mxu0 %v11031_v63  ;;  %v11881_v63 = vadd.f32 %v16438_v57, %v16437_v37  ;;  %v3481_v45 = vld [vmem:[#allocation2 + $0x80] sm:$0x1]  ;;  %v3589_v23 = vsel %vm13492_vm14, %v11018_v24, %v3588_v32  ;;  %v3592_v49 = vsel %vm13492_vm14, %v3590_v16, %v3591_v46  ;;  %v14559_v53 = vld [vmem:[#allocation2 + $0x88] sm:$0xf]  ;;  %v16440_v41 = vld [vmem:[#allocation19_spill] sm:$0xff]  ;;  %v11020_v29 = vrot.slane %v3476_v13, 9 }
 0x1ef   : > { %v11772_v21 = vadd.f32 %v16440_v41, %v16439_v3  ;;  %v14563_v34 = vld [vmem:[#allocation2 + $0x94] sm:$0xf]  ;;  %v3609_v4 = vrot.slane %v14546_v55, 5  ;;  %v16441_v10 = vld [vmem:[#allocation48_spill] sm:$0xff]  ;;  %v16442_v15 = vld [vmem:[#allocation49_spill] sm:$0xff]  ;;  %v11775_v32 = vadd.f32 %v14386_v31, %v14378_v58  ;;  %v3604_v16 = vrot.slane %v3602_v22, 4 }
 0x1f0   : > { %v14551_v54 = vadd.f32 %v11881_v63, %v11769_v60  ;;  %v11884_v12 = vadd.f32 %v16442_v15, %v16441_v10  ;;  %v3605_v30 = vrot.slane %v3478_v59, 5  ;;  %v11887_v60 = vadd.f32 %v14388_v2, %v14380_v9  ;;  %v3482_v63 = vld [vmem:[#allocation2 + $0x84] sm:$0xe]  ;;  %v14592_v2 = vld [vmem:[#allocation2 + $0x90] sm:$0xe] }
 0x1f1   : > { %v3596_v57 = vsel %vm13492_vm14, %v11019_v33, %v3595_v27  ;;  %v3599_v58 = vsel %vm13492_vm14, %v3597_v17, %v3598_v14  ;;  %v11021_v31 = vrot.slane %v3479_v1, 9  ;;  %v11034_v59 = vcombine.low %v3589_v23, %v3592_v49  ;;  %v14594_v41 = vld [vmem:[#allocation2 + $0x98] sm:$0x1]  ;;  %v14600_v17 = vld [vmem:[#allocation2 + $0xa0] sm:$0xf]  ;;  %v16443_v49 = vld [vmem:[#allocation54_spill] sm:$0xff] }
 0x1f2   : > { %v14586_v55 = vadd.f32 %v11884_v12, %v11772_v21  ;;  %v3612_v3 = vrot.slane %v3481_v45, 5  ;;  %v14590_v9 = vadd.f32 %v11887_v60, %v11775_v32  ;;  %v3611_v27 = vrot.slane %v3609_v4, 4  ;;  %v14604_v45 = vld [vmem:[#allocation2 + $0x9c] sm:$0xe]  ;;  %v16444_v12 = vld [vmem:[#allocation55_spill] sm:$0xff] }
 0x1f3   : > { %v14553_v42 = vpop.f32.mrb[52].mxu1  ;;  %v3616_v33 = vrot.slane %v14559_v53, 5  ;;  %v11778_v14 = vadd.f32 %v14417_v62, %v14402_v28  ;;  %v11035_v23 = vcombine.low %v3596_v57, %v3599_v58  ;;  %v11890_v21 = vadd.f32 %v14419_v44, %v16443_v49  ;;  %v14616_v1 = vld [vmem:[#allocation2 + $0xa4] sm:$0x1]  ;;  %v14618_v28 = vld [vmem:[#allocation2 + $0xac] sm:$0xf] }
 0x1f4   : > { %v14565_v20 = vpop.f32.mrb[53].mxu1  ;;  %v11781_v15 = vadd.f32 %v14426_v43, %v14421_v7  ;;  %v11893_v32 = vadd.f32 %v14446_v5, %v16444_v12  ;;  %v3603_v53 = vsel %vm13492_vm14, %v11020_v29, %v3602_v22  ;;  %v3606_v60 = vsel %vm13492_vm14, %v3604_v16, %v3605_v30  ;;  %v14624_v43 = vld [vmem:[#allocation2 + $0xb8] sm:$0xf]  ;;  %v14630_v16 = vld [vmem:[#allocation2 + $0xa8] sm:$0xe] }
 0x1f5   : > { %12659 = vmatmul.mubr.bf16.gmra.mrb[132].mxu0 %v11032_v40  ;;  %v14572_v24 = vpop.f32.mrb[52].mxu0  ;;  %v14574_v46 = vpop.f32.mrb[54].mxu1  ;;  %v3484_v40 = vld [vmem:[#allocation2 + $0x8c] sm:$0x1]  ;;  %v11022_v62 = vrot.slane %v3482_v63, 9  ;;  %v14620_v58 = vadd.f32 %v11890_v21, %v11778_v14  ;;  %v3610_v7 = vsel %vm13492_vm14, %v11021_v31, %v3609_v4  ;;  %v3618_v5 = vrot.slane %v3616_v33, 4 }
 0x1f6   : > { %12662 = vmatprep.mubr.bf16.mxu0 %v11033_v35  ;;  %v14578_v37 = vpop.f32.mrb[53].mxu0  ;;  %v14580_v13 = vpop.f32.mrb[55].mxu1  ;;  %v3619_v57 = vrot.slane %v3484_v40, 5  ;;  %v14622_v44 = vadd.f32 %v11893_v32, %v11781_v15  ;;  %v11023_v22 = vrot.slane %v14592_v2, 9  ;;  %v3626_v29 = vrot.slane %v14594_v41, 5 }
 0x1f7   : > { %v14588_v35 = vpop.f32.mrb[54].mxu0  ;;  %v3613_v30 = vsel %vm13492_vm14, %v3611_v27, %v3612_v3  ;;  %v16445_v63 = vrot.slane %v14563_v34, 5  ;;  %v3630_v14 = vrot.slane %v14600_v17, 5  ;;  %v14639_v49 = vld [vmem:[#allocation2 + $0xb4] sm:$0xe]  ;;  %v11784_v31 = vadd.f32 %v14474_v48, %v14472_v50  ;;  %v12932_v27 = vld [vmem:[#allocation10 + $0x58] sm:$0xff]  }
 0x1f8   : > { %v14596_v10 = vpop.f32.mrb[55].mxu0  ;;  %v14641_v4 = vld [vmem:[#allocation2 + $0xbc] sm:$0x1]  ;;  %v11024_v2 = vrot.slane %v14604_v45, 9  ;;  %v11896_v41 = vadd.f32 %v14497_v51, %v14487_v39  ;;  %v11787_v3 = vadd.f32 %v14489_v52, %v14477_v6  ;;  %v3633_v21 = vrot.slane %v14616_v1, 5  ;;  %12172 = vmatprep.subr.bf16.mxu1 %v12932_v27 }
 0x1f9   : > { %v3625_v40 = vrot.slane %v16445_v63, 4  ;;  %v16359_v15 = vrot.slane %v14618_v28, 5  ;;  %v11899_v12 = vadd.f32 %v14514_v8, %v14510_v38  ;;  %v12933_v63 = vld [vmem:[#allocation10 + $0x18] sm:$0xff]   ;;  %v11037_v48 = vcombine.low %v3610_v7, %v3613_v30  ;;  %v16447_v30 = vld [vmem:[#allocation20_spill] sm:$0xff] }
 0x1fa   : > { %v3617_v50 = vsel %vm13492_vm14, %v11022_v62, %v3616_v33  ;;  %v16358_v39 = vrot.slane %v14624_v43, 5  ;;  %v14657_v51 = vadd.f32 %v11896_v41, %v11784_v31  ;;  %v3620_v52 = vsel %vm13492_vm14, %v3618_v5, %v3619_v57  ;;  %12173 = vmatpush3.bf16.msra.mxu1 %v12933_v63  ;;  %v3500_v45 = vld [vmem:[#allocation2 + $0xcc] sm:$0xe] }
 0x1fb   : > { %v11025_v38 = vrot.slane %v14630_v16, 9  ;;  %v14664_v8 = vadd.f32 %v11899_v12, %v11787_v3  ;;  %v11790_v31 = vadd.f32 %v14578_v37, %v14572_v24  ;;  %v3639_v41 = vrot.slane %v16359_v15, 4  ;;  %v16474_v15 = vld [vmem:[#allocation57_spill] sm:$0xff] }
 0x1fc   : > { %v11906_v32 = vpop.f32.mrb[56].mxu1  ;;  %v11902_v16 = vadd.f32 %v14565_v20, %v14553_v42  ;;  %v11793_v3 = vadd.f32 %v14596_v10, %v14588_v35  ;;  %v16446_v12 = vrot.slane %v14563_v34, 5  ;;  %v3627_v37 = vsel %vm13492_vm14, %v3625_v40, %v3626_v29  ;;  %v16449_v29 = vld [vmem:[#allocation22_spill] sm:$0xff]  ;;  %v16450_v40 = vld [vmem:[#allocation23_spill] sm:$0xff] }
 0x1fd   : > { %12663 = vmatmul.mubr.bf16.gmra.mrb[136].mxu0 %v11034_v59  ;;  %v14637_v59 = vld [vmem:[#allocation2 + $0xb0] sm:$0x1]  ;;  %v11907_v6 = vpop.f32.mrb[57].mxu1  ;;  %v14687_v63 = vrot.slane %v16358_v39, 4  ;;  %v11038_v34 = vcombine.low %v3617_v50, %v3620_v52  ;;  %v14699_v62 = vadd.f32 %v16450_v40, %v16449_v29  ;;  %v3497_v50 = vld [vmem:[#allocation2 + $0xc0] sm:$0xe] }
 0x1fe   : > { %12666 = vmatprep.mubr.bf16.mxu0 %v11035_v23  ;;  %v11036_v23 = vcombine.low %v3603_v53, %v3606_v60  ;;  %v3632_v53 = vrot.slane %v3630_v14, 4  ;;  %v11794_v60 = vpop.f32.mrb[56].mxu0  ;;  %v11909_v7 = vpop.f32.mrb[58].mxu1  ;;  %v3640_v33 = vrot.slane %v14637_v59, 5  ;;  %v11905_v59 = vadd.f32 %v14580_v13, %v14574_v46  ;;  %v16465_v40 = vld [vmem:[#allocation40_spill] sm:$0xff] }
 0x1ff   : > { %v11795_v57 = vpop.f32.mrb[57].mxu0  ;;  %v11910_v5 = vpop.f32.mrb[59].mxu1  ;;  %v3624_v24 = vsel %vm13492_vm14, %v11023_v22, %v16446_v12  ;;  %v14689_v35 = vadd.f32 %v11902_v16, %v11790_v31  ;;  %v11908_v13 = vadd.f32 %v11907_v6, %v11906_v32  ;;  %v16448_v22 = vld [vmem:[#allocation21_spill] sm:$0xff]  ;;  %v16454_v16 = vld [vmem:[#allocation26_spill] sm:$0xff]  ;;  %v16455_v32 = vld [vmem:[#allocation27_spill] sm:$0xff] }
 0x200   : > { %v11797_v27 = vpop.f32.mrb[58].mxu0  ;;  %v11796_v42 = vadd.f32 %v11795_v57, %v11794_v60  ;;  %v14691_v46 = vadd.f32 %v11905_v59, %v11793_v3  ;;  %v14695_v12 = vadd.f32 %v16448_v22, %v16447_v30  ;;  %v11039_v39 = vcombine.low %v3624_v24, %v3627_v37  ;;  %v16453_v31 = vld [vmem:[#allocation25_spill] sm:$0xff]  ;;  %v16459_v3 = vld [vmem:[#allocation30_spill] sm:$0xff]  ;;  %v16460_v59 = vld [vmem:[#allocation31_spill] sm:$0xff] }
 0x201   : > { %v11798_v20 = vpop.f32.mrb[59].mxu0  ;;  %v14709_v6 = vadd.f32 %v16455_v32, %v16454_v16  ;;  %v16458_v30 = vld [vmem:[#allocation29_spill] sm:$0xff]  ;;  %v16462_v37 = vld [vmem:[#allocation34_spill] sm:$0xff]  ;;  %v16464_v22 = vld [vmem:[#allocation36_spill] sm:$0xff]  ;;  %v3641_v17 = vsel %vm13492_vm14, %v3639_v41, %v3640_v33 }
 0x202   : > { %v11799_v10 = vadd.f32 %v11798_v20, %v11797_v27  ;;  %v14701_v60 = vadd.f32 %v11908_v13, %v11796_v42  ;;  %v14719_v27 = vadd.f32 %v16460_v59, %v16459_v3  ;;  %v16461_v24 = vld [vmem:[#allocation33_spill] sm:$0xff]  ;;  %v16463_v13 = vld [vmem:[#allocation35_spill] sm:$0xff]  ;;  %v16469_v32 = vld [vmem:[#allocation50_spill] sm:$0xff] }
 0x203   : > { %v14723_v42 = vadd.f32 %v16462_v37, %v16461_v24  ;;  %v3498_v20 = vld [vmem:[#allocation2 + $0xc4] sm:$0xf]  ;;  %v14727_v29 = vadd.f32 %v16464_v22, %v16463_v13  ;;  %v3499_v3 = vld [vmem:[#allocation2 + $0xc8] sm:$0x1]  ;;  %v16471_v59 = vld [vmem:[#allocation52_spill] sm:$0xff] }
 0x204   : > { %16451 = vst [vmem:[#allocation37_spill] sm:$0xff] %v14701_v60  ;;  %v16472_v24 = vld [vmem:[#allocation53_spill] sm:$0xff]  ;;  %v16473_v13 = vld [vmem:[#allocation56_spill] sm:$0xff] }
 0x205   : > { %12667 = vmatmul.mubr.bf16.gmra.mrb[140].mxu0 %v11036_v23  ;;  %v11911_v23 = vadd.f32 %v11910_v5, %v11909_v7  ;;  %v16457_v7 = vld [vmem:[#allocation28_spill] sm:$0xff]  ;;  %v14743_v37 = vadd.f32 %v16472_v24, %v16471_v59  ;;  %v14747_v22 = vadd.f32 %v16473_v13, %v14434_v47  ;;  %v3631_v47 = vsel %vm13492_vm14, %v11024_v2, %v3630_v14  ;;  %v3502_v14 = vld [vmem:[#allocation2 + $0xd4] sm:$0x1] }
 0x206   : > { %12670 = vmatprep.mubr.bf16.mxu0 %v11037_v48  ;;  %v16452_v48 = vld [vmem:[#allocation24_spill] sm:$0xff]  ;;  %v14715_v5 = vadd.f32 %v16458_v30, %v16457_v7  ;;  %v16470_v7 = vld [vmem:[#allocation51_spill] sm:$0xff]  ;;  %v3661_v33 = vrot.slane %v3502_v14, 5 }
 0x207   : > { %v14705_v57 = vadd.f32 %v16453_v31, %v16452_v48  ;;  %v14711_v52 = vadd.f32 %v11911_v23, %v11799_v10  ;;  %v16466_v10 = vld [vmem:[#allocation41_spill] sm:$0xff]  ;;  %v16467_v48 = vld [vmem:[#allocation42_spill] sm:$0xff]  ;;  %v14739_v30 = vadd.f32 %v16470_v7, %v16469_v32  ;;  %v3501_v32 = vld [vmem:[#allocation2 + $0xd0] sm:$0xf]  ;;  %v3654_v7 = vrot.slane %v3499_v3, 5 }
 0x208   : > { %v14731_v23 = vadd.f32 %v16466_v10, %v16465_v40  ;;  %v16468_v31 = vld [vmem:[#allocation45_spill] sm:$0xff]  ;;  %v16475_v40 = vld [vmem:[#allocation32_spill] sm:$0xff]  ;;  %v12934_v3 = vld [vmem:[#allocation10 + $0x60] sm:$0xff]  }
 0x209   : > { %16456 = vst [vmem:[#allocation38_spill] sm:$0xff] %v14711_v52  ;;  %v14735_v16 = vadd.f32 %v16468_v31, %v16467_v48  ;;  %v14751_v10 = vadd.f32 %v16475_v40, %v16474_v15  ;;  %v14755_v48 = vadd.f32 %v14485_v36, %v14481_v26  ;;  %v14759_v31 = vadd.f32 %v14508_v19, %v14504_v25  ;;  %v11912_v15 = vpop.f32.mrb[60].mxu1 }
 0x20a   : > { %v3634_v26 = vsel %vm13492_vm14, %v3632_v53, %v3633_v21  ;;  %v11027_v36 = vrot.slane %v3497_v50, 9  ;;  %v16476_v25 = vrot.slane %v14618_v28, 5  ;;  %v3658_v50 = vrot.slane %v3501_v32, 5  ;;  %12174 = vmatprep.subr.bf16.mxu1 %v12934_v3 }
 0x20b   : > { %v11040_v59 = vcombine.low %v3631_v47, %v3634_v26  ;;  %v11800_v24 = vpop.f32.mrb[60].mxu0  ;;  %v16477_v47 = vrot.slane %v14624_v43, 5  ;;  %v16478_v26 = vrot.slane %v14639_v49, 9 }
 0x20c   : > { %v3638_v19 = vsel %vm13492_vm14, %v11025_v38, %v16476_v25  ;;  %v11801_v13 = vpop.f32.mrb[61].mxu0  ;;  %v11028_v25 = vrot.slane %v3500_v45, 9  ;;  %v12935_v45 = vld [vmem:[#allocation10 + $0x20] sm:$0xff]  }
 0x20d   : > { %12671 = vmatmul.mubr.bf16.gmra.mrb[144].mxu0 %v11038_v34  ;;  %v11913_v34 = vpop.f32.mrb[61].mxu1  ;;  %v11041_v53 = vcombine.low %v3638_v19, %v3641_v17  ;;  %v11802_v52 = vadd.f32 %v11801_v13, %v11800_v24  ;;  %v11803_v38 = vpop.f32.mrb[62].mxu0  ;;  %v3645_v32 = vsel %vm13492_vm14, %v16478_v26, %v16477_v47  ;;  %v3660_v17 = vrot.slane %v3658_v50, 4  ;;  %12175 = vmatpush3.bf16.msra.mxu1 %v12935_v45 }
 0x20e   : > { %12674 = vmatprep.mubr.bf16.mxu0 %v11039_v39  ;;  %v3651_v39 = vrot.slane %v3498_v20, 5  ;;  %v11914_v2 = vadd.f32 %v11913_v34, %v11912_v15  ;;  %v11915_v1 = vpop.f32.mrb[62].mxu1  ;;  %v11804_v60 = vpop.f32.mrb[63].mxu0  ;;  %v16479_v15 = vrot.slane %v14641_v4, 5 }
 0x20f   : > { %v11916_v21 = vpop.f32.mrb[63].mxu1  ;;  %v11805_v20 = vadd.f32 %v11804_v60, %v11803_v38 }
 0x210   : > { %v11917_v28 = vadd.f32 %v11916_v21, %v11915_v1  ;;  %v3653_v40 = vrot.slane %v3651_v39, 4  ;;  %v14777_v41 = vadd.f32 %v11914_v2, %v11802_v52  ;;  %v3648_v19 = vsel %vm13492_vm14, %v14687_v63, %v16479_v15 }
 0x211   : > { %v3652_v60 = vsel %vm13492_vm14, %v11027_v36, %v3651_v39  ;;  %v11042_v49 = vcombine.low %v3645_v32, %v3648_v19  ;;  %v12046_v14 = vpop.f32.mrb[64].mxu1 }
 0x212   : > { %v3655_v52 = vsel %vm13492_vm14, %v3653_v40, %v3654_v7  ;;  %v14794_v43 = vadd.f32 %v11917_v28, %v11805_v20  ;;  %v12047_v1 = vpop.f32.mrb[65].mxu1  ;;  %v3659_v28 = vsel %vm13492_vm14, %v11028_v25, %v3658_v50  ;;  %v3662_v40 = vsel %vm13492_vm14, %v3660_v17, %v3661_v33 }
 0x213   : > { %v11934_v34 = vpop.f32.mrb[64].mxu0  ;;  %v11043_v4 = vcombine.low %v3652_v60, %v3655_v52  ;;  %v12048_v24 = vadd.f32 %v12047_v1, %v12046_v14  ;;  %v12049_v21 = vpop.f32.mrb[66].mxu1  ;;  %v11044_v3 = vcombine.low %v3659_v28, %v3662_v40 }
 0x214   : > { %v11935_v2 = vpop.f32.mrb[65].mxu0  ;;  %v12050_v13 = vpop.f32.mrb[67].mxu1 }
 0x215   : > { %12675 = vmatmul.mubr.bf16.gmra.mrb[148].mxu0 %v11040_v59  ;;  %v11936_v59 = vadd.f32 %v11935_v2, %v11934_v34  ;;  %v11937_v63 = vpop.f32.mrb[66].mxu0  ;;  %v12051_v7 = vadd.f32 %v12050_v13, %v12049_v21 }
 0x216   : > { %12678 = vmatprep.mubr.bf16.mxu0 %v11041_v53  ;;  %v11938_v53 = vpop.f32.mrb[67].mxu0 }
 0x217   : > { %v4820_v36 = vadd.f32 %v11936_v59, %v14695_v12  ;;  %v11939_v39 = vadd.f32 %v11938_v53, %v11937_v63 }
 0x219   : > { %v4823_v38 = vadd.f32 %v11939_v39, %v14699_v62  ;;  %v14802_v20 = vadd.f32 %v12048_v24, %v4820_v36  ;;  %v12936_v24 = vld [vmem:[#allocation10 + $0x68] sm:$0xff]  }
 0x21a   : > { %12176 = vmatprep.subr.bf16.mxu1 %v12936_v24 }
 0x21b   : > { %v11940_v47 = vpop.f32.mrb[68].mxu0  ;;  %v14804_v26 = vadd.f32 %v12051_v7, %v4823_v38  ;;  %v12052_v19 = vpop.f32.mrb[68].mxu1 }
 0x21c   : > { %v11941_v32 = vpop.f32.mrb[69].mxu0  ;;  %v12053_v60 = vpop.f32.mrb[69].mxu1 }
 0x21d   : > { %12679 = vmatmul.mubr.bf16.gmra.mrb[152].mxu0 %v11042_v49  ;;  %v11942_v15 = vadd.f32 %v11941_v32, %v11940_v47  ;;  %v11943_v12 = vpop.f32.mrb[70].mxu0  ;;  %v12054_v52 = vadd.f32 %v12053_v60, %v12052_v19  ;;  %v12055_v33 = vpop.f32.mrb[70].mxu1 }
 0x21e   : > { %12682 = vmatprep.mubr.bf16.mxu0 %v11043_v4  ;;  %v11944_v45 = vpop.f32.mrb[71].mxu0  ;;  %v12056_v17 = vpop.f32.mrb[71].mxu1 }
 0x21f   : > { %v4828_v50 = vadd.f32 %v11942_v15, %v14705_v57  ;;  %v11945_v25 = vadd.f32 %v11944_v45, %v11943_v12  ;;  %v12057_v49 = vadd.f32 %v12056_v17, %v12055_v33 }
 0x221   : > { %v4831_v62 = vadd.f32 %v11945_v25, %v14709_v6  ;;  %v14808_v34 = vadd.f32 %v12054_v52, %v4828_v50 }
 0x223   : > { %v11946_v14 = vpop.f32.mrb[72].mxu0  ;;  %v14810_v4 = vadd.f32 %v12057_v49, %v4831_v62 }
 0x224   : > { %v11947_v2 = vpop.f32.mrb[73].mxu0 }
 0x225   : > { %12683 = vmatmul.mubr.bf16.gmra.mrb[156].mxu0 %v11044_v3  ;;  %v11948_v1 = vadd.f32 %v11947_v2, %v11946_v14  ;;  %v11949_v59 = vpop.f32.mrb[74].mxu0 }
 0x226   : > { %v11950_v63 = vpop.f32.mrb[75].mxu0  ;;  %v12058_v53 = vpop.f32.mrb[72].mxu1 }
 0x227   : > { %v4836_v21 = vadd.f32 %v11948_v1, %v14715_v5  ;;  %v11951_v57 = vadd.f32 %v11950_v63, %v11949_v59  ;;  %v12059_v36 = vpop.f32.mrb[73].mxu1 }
 0x228   : > { %v12060_v6 = vadd.f32 %v12059_v36, %v12058_v53  ;;  %v12061_v39 = vpop.f32.mrb[74].mxu1 }
 0x229   : > { %v4839_v13 = vadd.f32 %v11951_v57, %v14719_v27  ;;  %v12062_v7 = vpop.f32.mrb[75].mxu1  ;;  %v12937_v27 = vld [vmem:[#allocation10 + $0x28] sm:$0xff]  }
 0x22a   : > { %v12063_v28 = vadd.f32 %v12062_v7, %v12061_v39  ;;  %v14814_v40 = vadd.f32 %v12060_v6, %v4836_v21  ;;  %12177 = vmatpush3.bf16.msra.mxu1 %v12937_v27 }
 0x22c   : > { %v14816_v3 = vadd.f32 %v12063_v28, %v4839_v13  ;;  %v5389_v28 = vld [vmem:[#allocation3 + $0x18] sm:$0x1] }
 0x22d   : > { %v11952_v38 = vpop.f32.mrb[76].mxu0 }
 0x22e   : > { %v11953_v47 = vpop.f32.mrb[77].mxu0 }
 0x22f   : > { %v11954_v32 = vadd.f32 %v11953_v47, %v11952_v38  ;;  %v11955_v15 = vpop.f32.mrb[78].mxu0 }
 0x230   : > { %v11956_v12 = vpop.f32.mrb[79].mxu0  ;;  %v12064_v19 = vpop.f32.mrb[76].mxu1 }
 0x231   : > { %v4844_v5 = vadd.f32 %v11954_v32, %v14723_v42  ;;  %v11957_v45 = vadd.f32 %v11956_v12, %v11955_v15  ;;  %v12065_v60 = vpop.f32.mrb[77].mxu1  ;;  %v5390_v32 = vsel %vm13456_vm3, 0, %v5389_v28  ;;  %v12942_v28 = vld [vmem:[#allocation10 + $0xc8] sm:$0xff]  }
 0x232   : > { %v12066_v25 = vadd.f32 %v12065_v60, %v12064_v19  ;;  %v12067_v52 = vpop.f32.mrb[78].mxu1  ;;  %5391 = vst [vmem:[#allocation3 + $0x18] sm:$0x1] %v5390_v32  ;;  %v5395_v32 = vld [vmem:[#allocation3 + $0x30] sm:$0x1] }
 0x233   : > { %v4847_v50 = vadd.f32 %v11957_v45, %v14727_v29  ;;  %v12068_v33 = vpop.f32.mrb[79].mxu1 }
 0x234   : > { %v12069_v17 = vadd.f32 %v12068_v33, %v12067_v52  ;;  %v14820_v62 = vadd.f32 %v12066_v25, %v4844_v5 }
 0x236   : > { %v14822_v49 = vadd.f32 %v12069_v17, %v4847_v50 }
 0x237   : > { %v11958_v14 = vpop.f32.mrb[80].mxu0 }
 0x238   : > { %v11959_v2 = vpop.f32.mrb[81].mxu0 }
 0x239   : > { %v11960_v1 = vadd.f32 %v11959_v2, %v11958_v14  ;;  %v11961_v59 = vpop.f32.mrb[82].mxu0  ;;  %v12938_v2 = vld [vmem:[#allocation10 + $0xc0] sm:$0xff]  }
 0x23a   : > { %v12070_v42 = vpop.f32.mrb[80].mxu1  ;;  %v11962_v63 = vpop.f32.mrb[83].mxu0  ;;  %12278 = vmatprep.subr.bf16.mxu0 %v12938_v2  ;;  %v5443_v2 = vld [vmem:[#allocation3 + $0x38] sm:$0x1] }
 0x23b   : > { %v4852_v24 = vadd.f32 %v11960_v1, %v14731_v23  ;;  %v11963_v21 = vadd.f32 %v11962_v63, %v11961_v59  ;;  %v12071_v57 = vpop.f32.mrb[81].mxu1  ;;  %v5386_v1 = vld [vmem:[#allocation3 + $0xc] sm:$0x1] }
 0x23c   : > { %v12072_v29 = vadd.f32 %v12071_v57, %v12070_v42  ;;  %v12073_v53 = vpop.f32.mrb[82].mxu1  ;;  %v12939_v63 = vld [vmem:[#allocation10 + $0x70] sm:$0xff]  }
 0x23d   : > { %v4855_v13 = vadd.f32 %v11963_v21, %v14735_v16  ;;  %v12074_v36 = vpop.f32.mrb[83].mxu1  ;;  %v5437_v21 = vld [vmem:[#allocation3 + $0x20] sm:$0x1]  ;;  %12178 = vmatprep.subr.bf16.mxu1 %v12939_v63 }
 0x23e   : > { %v12075_v6 = vadd.f32 %v12074_v36, %v12073_v53  ;;  %v14826_v39 = vadd.f32 %v12072_v29, %v4852_v24  ;;  %v12940_v24 = vld [vmem:[#allocation10 + $0x80] sm:$0xff]   ;;  %v5438_v53 = vsel %vm13462_vm10, 0, %v5437_v21  ;;  %v5434_v36 = vld [vmem:[#allocation3 + $0x14] sm:$0x1] }
 0x23f   : > { %v11964_v7 = vpop.f32.mrb[84].mxu0  ;;  %12279 = vmatpush3.bf16.msra.mxu0 %v12940_v24  ;;  %5439 = vst [vmem:[#allocation3 + $0x20] sm:$0x1] %v5438_v53 }
 0x240   : > { %v11965_v38 = vpop.f32.mrb[85].mxu0  ;;  %v14830_v15 = vadd.f32 %v12075_v6, %v4855_v13  ;;  %v12941_v13 = vld [vmem:[#allocation10 + $0x30] sm:$0xff]   ;;  %12280 = vmatprep.subr.bf16.mxu0 %v12942_v28 }
 0x241   : > { %v11966_v12 = vadd.f32 %v11965_v38, %v11964_v7  ;;  %v11967_v23 = vpop.f32.mrb[86].mxu0  ;;  %v5435_v7 = vsel %vm13462_vm10, 0, %v5434_v36  ;;  %v12943_v38 = vld [vmem:[#allocation10 + $0x88] sm:$0xff]   ;;  %12179 = vmatpush3.bf16.msra.mxu1 %v12941_v13 }
 0x242   : > { %v11968_v5 = vpop.f32.mrb[87].mxu0  ;;  %5436 = vst [vmem:[#allocation3 + $0x14] sm:$0x1] %v5435_v7 }
 0x243   : > { %v4860_v19 = vadd.f32 %v11966_v12, %v14739_v30  ;;  %v11969_v45 = vadd.f32 %v11968_v5, %v11967_v23  ;;  %v5387_v30 = vsel %vm13456_vm3, 0, %v5386_v1  ;;  %v5396_v5 = vsel %vm13456_vm3, 0, %v5395_v32  ;;  %12281 = vmatpush3.bf16.msra.mxu0 %v12943_v38 }
 0x244   : > { %v12076_v16 = vpop.f32.mrb[84].mxu1  ;;  %5388 = vst [vmem:[#allocation3 + $0xc] sm:$0x1] %v5387_v30  ;;  %5397 = vst [vmem:[#allocation3 + $0x30] sm:$0x1] %v5396_v5 }
 0x245   : > { %v4863_v60 = vadd.f32 %v11969_v45, %v14743_v37  ;;  %v12077_v27 = vpop.f32.mrb[85].mxu1  ;;  %v5440_v5 = vld [vmem:[#allocation3 + $0x2c] sm:$0x1] }
 0x246   : > { %v12078_v50 = vadd.f32 %v12077_v27, %v12076_v16  ;;  %v12079_v25 = vpop.f32.mrb[86].mxu1 }
 0x247   : > { %v12080_v52 = vpop.f32.mrb[87].mxu1 }
 0x248   : > { %v12081_v33 = vadd.f32 %v12080_v52, %v12079_v25  ;;  %v14834_v17 = vadd.f32 %v12078_v50, %v4860_v19  ;;  %v12944_v25 = vld [vmem:[#allocation10 + $0xd0] sm:$0xff]   ;;  %v5392_v52 = vld [vmem:[#allocation3 + $0x24] sm:$0x1] }
 0x249   : > { %12282 = vmatprep.subr.bf16.mxu0 %v12944_v25 }
 0x24a   : > { %v11970_v14 = vpop.f32.mrb[88].mxu0  ;;  %v14836_v59 = vadd.f32 %v12081_v33, %v4863_v60 }
 0x24b   : > { %v11971_v42 = vpop.f32.mrb[89].mxu0 }
 0x24c   : > { %v11972_v37 = vadd.f32 %v11971_v42, %v11970_v14  ;;  %v11973_v57 = vpop.f32.mrb[90].mxu0  ;;  %v12945_v14 = vld [vmem:[#allocation10 + $0x90] sm:$0xff]  }
 0x24d   : > { %v11974_v6 = vpop.f32.mrb[91].mxu0  ;;  %12283 = vmatpush3.bf16.msra.mxu0 %v12945_v14 }
 0x24e   : > { %v4868_v12 = vadd.f32 %v11972_v37, %v14747_v22  ;;  %v11975_v23 = vadd.f32 %v11974_v6, %v11973_v57  ;;  %v5393_v22 = vsel %vm13456_vm3, 0, %v5392_v52 }
 0x24f   : > { %v12082_v19 = vpop.f32.mrb[88].mxu1  ;;  %5394 = vst [vmem:[#allocation3 + $0x24] sm:$0x1] %v5393_v22  ;;  %v12949_v22 = vld [vmem:[#allocation10 + $0x78] sm:$0xff]  }
 0x250   : > { %v4871_v45 = vadd.f32 %v11975_v23, %v14751_v10  ;;  %v12083_v16 = vpop.f32.mrb[89].mxu1  ;;  %v5444_v10 = vsel %vm13462_vm10, 0, %v5443_v2  ;;  %12180 = vmatprep.subr.bf16.mxu1 %v12949_v22  ;;  %v5455_v22 = vld [vmem:[#allocation3 + $0x68] sm:$0x1] }
 0x251   : > { %v12084_v60 = vadd.f32 %v12083_v16, %v12082_v19  ;;  %v12085_v27 = vpop.f32.mrb[90].mxu1  ;;  %5445 = vst [vmem:[#allocation3 + $0x38] sm:$0x1] %v5444_v10  ;;  %v12946_v19 = vld [vmem:[#allocation10 + $0xd8] sm:$0xff]   ;;  %v5441_v16 = vsel %vm13462_vm10, 0, %v5440_v5 }
 0x252   : > { %v12086_v50 = vpop.f32.mrb[91].mxu1  ;;  %5442 = vst [vmem:[#allocation3 + $0x2c] sm:$0x1] %v5441_v16  ;;  %12284 = vmatprep.subr.bf16.mxu0 %v12946_v19  ;;  %v5449_v10 = vld [vmem:[#allocation3 + $0x50] sm:$0x1] }
 0x253   : > { %v12087_v33 = vadd.f32 %v12086_v50, %v12085_v27  ;;  %v14850_v1 = vadd.f32 %v12084_v60, %v4868_v12  ;;  %v12947_v60 = vld [vmem:[#allocation10 + $0x98] sm:$0xff]   ;;  %v12948_v27 = vld [vmem:[#allocation10 + $0xe0] sm:$0xff]  }
 0x254   : > { %v11976_v42 = vpop.f32.mrb[92].mxu0  ;;  %12285 = vmatpush3.bf16.msra.mxu0 %v12947_v60 }
 0x255   : > { %v11977_v30 = vpop.f32.mrb[93].mxu0  ;;  %v14854_v63 = vadd.f32 %v12087_v33, %v4871_v45  ;;  %v5398_v33 = vld [vmem:[#allocation3 + $0x3c] sm:$0x1]  ;;  %12286 = vmatprep.subr.bf16.mxu0 %v12948_v27  ;;  %v5404_v27 = vld [vmem:[#allocation3 + $0x54] sm:$0x1] }
 0x256   : > { %v11978_v24 = vadd.f32 %v11977_v30, %v11976_v42  ;;  %v11979_v21 = vpop.f32.mrb[94].mxu0  ;;  %v5399_v2 = vsel %vm13456_vm3, 0, %v5398_v33  ;;  %v12950_v42 = vld [vmem:[#allocation10 + $0xa0] sm:$0xff]   ;;  %v12955_v33 = vld [vmem:[#allocation10 + $0xb0] sm:$0xff]  }
 0x257   : > { %v11980_v37 = vpop.f32.mrb[95].mxu0  ;;  %5400 = vst [vmem:[#allocation3 + $0x3c] sm:$0x1] %v5399_v2  ;;  %v5456_v2 = vsel %vm13462_vm10, 0, %v5455_v22 }
 0x258   : > { %v4876_v57 = vadd.f32 %v11978_v24, %v14755_v48  ;;  %v11981_v53 = vadd.f32 %v11980_v37, %v11979_v21  ;;  %v5401_v48 = vld [vmem:[#allocation3 + $0x48] sm:$0x1]  ;;  %v5450_v21 = vsel %vm13462_vm10, 0, %v5449_v10  ;;  %12287 = vmatpush3.bf16.msra.mxu0 %v12950_v42  ;;  %5457 = vst [vmem:[#allocation3 + $0x68] sm:$0x1] %v5456_v2 }
 0x259   : > { %v12088_v13 = vpop.f32.mrb[92].mxu1  ;;  %v5402_v52 = vsel %vm13456_vm3, 0, %v5401_v48  ;;  %5451 = vst [vmem:[#allocation3 + $0x50] sm:$0x1] %v5450_v21  ;;  %v12954_v48 = vld [vmem:[#allocation10 + $0xf0] sm:$0xff]  }
 0x25a   : > { %v4879_v36 = vadd.f32 %v11981_v53, %v14759_v31  ;;  %v12089_v6 = vpop.f32.mrb[93].mxu1  ;;  %5403 = vst [vmem:[#allocation3 + $0x48] sm:$0x1] %v5402_v52  ;;  %v5405_v52 = vsel %vm13456_vm3, 0, %v5404_v27 }
 0x25b   : > { %v12090_v7 = vadd.f32 %v12089_v6, %v12088_v13  ;;  %v12091_v28 = vpop.f32.mrb[94].mxu1  ;;  %v12951_v6 = vld [vmem:[#allocation10 + $0x38] sm:$0xff]   ;;  %5406 = vst [vmem:[#allocation3 + $0x54] sm:$0x1] %v5405_v52 }
 0x25c   : > { %v12092_v38 = vpop.f32.mrb[95].mxu1  ;;  %12181 = vmatpush3.bf16.msra.mxu1 %v12951_v6  ;;  %v5452_v6 = vld [vmem:[#allocation3 + $0x5c] sm:$0x1] }
 0x25d   : > { %v12093_v32 = vadd.f32 %v12092_v38, %v12091_v28  ;;  %v14858_v12 = vadd.f32 %v12090_v7, %v4876_v57  ;;  %v5446_v7 = vld [vmem:[#allocation3 + $0x44] sm:$0x1] }
 0x25e   : > { %v11982_v23 = vpop.f32.mrb[96].mxu0  ;;  %v12952_v38 = vld [vmem:[#allocation10 + $0xe8] sm:$0xff]  }
 0x25f   : > { %v11983_v45 = vpop.f32.mrb[97].mxu0  ;;  %v14862_v50 = vadd.f32 %v12093_v32, %v4879_v36  ;;  %v12953_v32 = vld [vmem:[#allocation10 + $0xa8] sm:$0xff]   ;;  %12288 = vmatprep.subr.bf16.mxu0 %v12952_v38 }
 0x260   : > { %v11984_v31 = vadd.f32 %v11983_v45, %v11982_v23  ;;  %v11985_v25 = vpop.f32.mrb[98].mxu0  ;;  %v5407_v23 = vld [vmem:[#allocation3 + $0x60] sm:$0x1]  ;;  %12289 = vmatpush3.bf16.msra.mxu0 %v12953_v32 }
 0x261   : > { %v11986_v14 = vpop.f32.mrb[99].mxu0  ;;  %v5408_v19 = vsel %vm13456_vm3, 0, %v5407_v23  ;;  %12290 = vmatprep.subr.bf16.mxu0 %v12954_v48  ;;  %v6154_v23 = vld [vmem:[#allocation3] sm:$0xf] }
 0x262   : > { %v4884_v30 = vadd.f32 %v11984_v31, %v14526_v61  ;;  %v11987_v24 = vadd.f32 %v11986_v14, %v11985_v25  ;;  %v5447_v61 = vsel %vm13462_vm10, 0, %v5446_v7  ;;  %5409 = vst [vmem:[#allocation3 + $0x60] sm:$0x1] %v5408_v19  ;;  %v6155_v19 = vld [vmem:[#allocation3 + $0x4] sm:$0xf]  ;;  %v6206_v27 = vshll.u32 %v6154_v23, 16 }
 0x263   : > { %v12094_v37 = vpop.f32.mrb[96].mxu1  ;;  %5448 = vst [vmem:[#allocation3 + $0x44] sm:$0x1] %v5447_v61  ;;  %v12956_v61 = vld [vmem:[#allocation10 + $0xf8] sm:$0xff]  }
 0x264   : > { %v4887_v57 = vadd.f32 %v11987_v24, %v14532_v18  ;;  %v12095_v53 = vpop.f32.mrb[97].mxu1  ;;  %12291 = vmatpush3.bf16.msra.mxu0 %v12955_v33  ;;  %v12961_v33 = vld [vmem:[#allocation10 + $0x140] sm:$0xff]  }
 0x265   : > { %v12096_v13 = vadd.f32 %v12095_v53, %v12094_v37  ;;  %v12097_v36 = vpop.f32.mrb[98].mxu1  ;;  %12292 = vmatprep.subr.bf16.mxu0 %v12956_v61  ;;  %12390 = vmatprep.subr.bf16.mxu1 %v12961_v33  ;;  %v12958_v33 = vld [vmem:[#allocation3] sm:$0xff]  }
 0x266   : > { %v12098_v28 = vpop.f32.mrb[99].mxu1 }
 0x267   : > { %v12099_v5 = vadd.f32 %v12098_v28, %v12097_v36  ;;  %v14876_v18 = vadd.f32 %v12096_v13, %v4884_v30  ;;  %v5453_v28 = vsel %vm13462_vm10, 0, %v5452_v6 }
 0x268   : > { %5454 = vst [vmem:[#allocation3 + $0x5c] sm:$0x1] %v5453_v28 }
 0x269   : > { %v11988_v45 = vpop.f32.mrb[100].mxu0  ;;  %v14878_v16 = vadd.f32 %v12099_v5, %v4887_v57 }
 0x26a   : > { %v11989_v60 = vpop.f32.mrb[101].mxu0 }
 0x26b   : > { %v11990_v31 = vadd.f32 %v11989_v60, %v11988_v45  ;;  %v11991_v25 = vpop.f32.mrb[102].mxu0  ;;  %v6156_v45 = vld [vmem:[#allocation3 + $0x8] sm:$0x1]  ;;  %v6203_v60 = vshrl.u32 %v6154_v23, 16 }
 0x26c   : > { %v11992_v14 = vpop.f32.mrb[103].mxu0  ;;  %v6222_v52 = vshll.u32 %v6156_v45, 16  ;;  %v5458_v45 = vld [vmem:[#allocation3 + $0x74] sm:$0x1] }
 0x26d   : > { %v4892_v42 = vadd.f32 %v11990_v31, %v14549_v0  ;;  %v12100_v10 = vpop.f32.mrb[100].mxu1  ;;  %v11993_v30 = vadd.f32 %v11992_v14, %v11991_v25  ;;  %v12957_v0 = vld [vmem:[#allocation10 + $0xb8] sm:$0xff]   ;;  %v6212_v31 = vshll.u32 %v6155_v19, 16  ;;  %v6216_v25 = vshrl.u32 %v6155_v19, 16 }
 0x26e   : > { %v12101_v24 = vpop.f32.mrb[101].mxu1  ;;  %12293 = vmatpush3.bf16.msra.mxu0 %v12957_v0  ;;  %v6205_v2 = vrot.slane %v6203_v60, 4  ;;  %v6224_v61 = vrot.slane %v6222_v52, 5  ;;  %v5461_v0 = vld [vmem:[#allocation3 + $0x80] sm:$0x1]  ;;  %v5459_v60 = vsel %vm13462_vm10, 0, %v5458_v45 }
 0x26f   : > { %v4895_v21 = vadd.f32 %v11993_v30, %v14551_v54  ;;  %v12102_v37 = vadd.f32 %v12101_v24, %v12100_v10  ;;  %v12103_v57 = vpop.f32.mrb[102].mxu1  ;;  %v6208_v30 = vrot.slane %v6206_v27, 5  ;;  %v6214_v24 = vrot.slane %v6212_v31, 5  ;;  %5460 = vst [vmem:[#allocation3 + $0x74] sm:$0x1] %v5459_v60 }
 0x270   : > { %v12104_v53 = vpop.f32.mrb[103].mxu1 }
 0x271   : > { %v12105_v13 = vadd.f32 %v12104_v53, %v12103_v57  ;;  %v14886_v36 = vadd.f32 %v12102_v37, %v4892_v42  ;;  %v5413_v42 = vld [vmem:[#allocation3 + $0x78] sm:$0x1] }
 0x272   : > { %v5414_v53 = vsel %vm13456_vm3, 0, %v5413_v42 }
 0x273   : > { %v11994_v7 = vpop.f32.mrb[104].mxu0  ;;  %v14890_v38 = vadd.f32 %v12105_v13, %v4895_v21  ;;  %v6218_v21 = vrot.slane %v6216_v25, 4  ;;  %5415 = vst [vmem:[#allocation3 + $0x78] sm:$0x1] %v5414_v53 }
 0x274   : > { %v11995_v32 = vpop.f32.mrb[105].mxu0 }
 0x275   : > { %v11996_v5 = vadd.f32 %v11995_v32, %v11994_v7  ;;  %v11997_v54 = vpop.f32.mrb[106].mxu0  ;;  %v6209_v7 = vor.u32 %v6208_v30, %v6205_v2  ;;  %v6219_v28 = vor.u32 %v6218_v21, %v6214_v24  ;;  %v12962_v30 = vld [vmem:[#allocation10 + $0x100] sm:$0xff]  }
 0x276   : > { %v11998_v48 = vpop.f32.mrb[107].mxu0 }
 0x277   : > { %v4900_v22 = vadd.f32 %v11996_v5, %v14586_v55  ;;  %v11999_v14 = vadd.f32 %v11998_v48, %v11997_v54  ;;  %v12106_v10 = vpop.f32.mrb[104].mxu1  ;;  %v5410_v55 = vld [vmem:[#allocation3 + $0x6c] sm:$0x1]  ;;  %v6210_v54 = vrot.slane %v6209_v7, 4  ;;  %v6220_v19 = vrot.slane %v6219_v28, 4 }
 0x278   : > { %v12107_v57 = vpop.f32.mrb[105].mxu1  ;;  %v5411_v23 = vsel %vm13456_vm3, 0, %v5410_v55  ;;  %v5419_v48 = vld [vmem:[#allocation3 + $0x90] sm:$0x1]  ;;  %v5416_v28 = vld [vmem:[#allocation3 + $0x84] sm:$0x1] }
 0x279   : > { %v4903_v37 = vadd.f32 %v11999_v14, %v14590_v9  ;;  %v12108_v13 = vadd.f32 %v12107_v57, %v12106_v10  ;;  %v12109_v6 = vpop.f32.mrb[106].mxu1  ;;  %5412 = vst [vmem:[#allocation3 + $0x6c] sm:$0x1] %v5411_v23  ;;  %v5462_v9 = vsel %vm13462_vm10, 0, %v5461_v0  ;;  %v6215_v25 = vsel %vm13474_vm11, %v6210_v54, %v6214_v24 }
 0x27a   : > { %v12110_v32 = vpop.f32.mrb[107].mxu1  ;;  %5463 = vst [vmem:[#allocation3 + $0x80] sm:$0x1] %v5462_v9  ;;  %v6225_v52 = vsel %vm13474_vm11, %v6220_v19, %v6224_v61  ;;  %v5420_v14 = vsel %vm13456_vm3, 0, %v5419_v48  ;;  %v5417_v55 = vsel %vm13456_vm3, 0, %v5416_v28 }
 0x27b   : > { %v12111_v5 = vadd.f32 %v12110_v32, %v12109_v6  ;;  %v14902_v27 = vadd.f32 %v12108_v13, %v4900_v22  ;;  %v11167_v10 = vcombine.low %v6215_v25, %v6225_v52  ;;  %5421 = vst [vmem:[#allocation3 + $0x90] sm:$0x1] %v5420_v14  ;;  %5418 = vst [vmem:[#allocation3 + $0x84] sm:$0x1] %v5417_v55  ;;  %v5467_v52 = vld [vmem:[#allocation3 + $0x98] sm:$0x1] }
 0x27d   : > { %v14910_v2 = vadd.f32 %v12111_v5, %v4903_v37  ;;  %9595 = vmatprep.mubr.bf16.mxu1 %v11167_v10  ;;  %v5464_v10 = vld [vmem:[#allocation3 + $0x8c] sm:$0x1] }
 0x27e   : > { %v12000_v31 = vpop.f32.mrb[108].mxu0  ;;  %9596 = vmatmul.mubr.bf16.vlgmr.msra.gmra.mrb[128].mxu1 %v12958_v33 }
 0x27f   : > { %v12001_v42 = vpop.f32.mrb[109].mxu0  ;;  %12391 = vmatpush3.bf16.msra.mxu1 %v12962_v30 }
 0x280   : > { %v12002_v22 = vadd.f32 %v12001_v42, %v12000_v31  ;;  %v12003_v21 = vpop.f32.mrb[110].mxu0  ;;  %v5468_v42 = vsel %vm13462_vm10, 0, %v5467_v52 }
 0x281   : > { %v12004_v57 = vpop.f32.mrb[111].mxu0  ;;  %5469 = vst [vmem:[#allocation3 + $0x98] sm:$0x1] %v5468_v42 }
 0x282   : > { %v4908_v24 = vadd.f32 %v12002_v22, %v14620_v58  ;;  %v12005_v53 = vadd.f32 %v12004_v57, %v12003_v21  ;;  %v12112_v13 = vpop.f32.mrb[108].mxu1  ;;  %v5465_v22 = vsel %vm13462_vm10, 0, %v5464_v10 }
 0x283   : > { %v12113_v7 = vpop.f32.mrb[109].mxu1  ;;  %5466 = vst [vmem:[#allocation3 + $0x8c] sm:$0x1] %v5465_v22 }
 0x284   : > { %v4911_v6 = vadd.f32 %v12005_v53, %v14622_v44  ;;  %v12114_v37 = vadd.f32 %v12113_v7, %v12112_v13  ;;  %v12115_v61 = vpop.f32.mrb[110].mxu1 }
 0x285   : > { %v12116_v0 = vpop.f32.mrb[111].mxu1 }
 0x286   : > { %v12117_v32 = vadd.f32 %v12116_v0, %v12115_v61  ;;  %v14916_v23 = vadd.f32 %v12114_v37, %v4908_v24  ;;  %v5425_v24 = vld [vmem:[#allocation3 + $0xa8] sm:$0x1] }
 0x287   : > { %v5426_v13 = vsel %vm13456_vm3, 0, %v5425_v24 }
 0x288   : > { %v14918_v58 = vadd.f32 %v12117_v32, %v4911_v6  ;;  %v5422_v6 = vld [vmem:[#allocation3 + $0x9c] sm:$0x1]  ;;  %5427 = vst [vmem:[#allocation3 + $0xa8] sm:$0x1] %v5426_v13 }
 0x289   : > { %v12006_v5 = vpop.f32.mrb[112].mxu0  ;;  %v5423_v37 = vsel %vm13456_vm3, 0, %v5422_v6  ;;  %v5431_v6 = vld [vmem:[#allocation3 + $0xc0] sm:$0x1] }
 0x28a   : > { %v12007_v54 = vpop.f32.mrb[113].mxu0  ;;  %5424 = vst [vmem:[#allocation3 + $0x9c] sm:$0x1] %v5423_v37 }
 0x28b   : > { %v12008_v19 = vadd.f32 %v12007_v54, %v12006_v5  ;;  %v12009_v9 = vpop.f32.mrb[114].mxu0 }
 0x28c   : > { %v12010_v45 = vpop.f32.mrb[115].mxu0 }
 0x28d   : > { %v4916_v44 = vadd.f32 %v12008_v19, %v14657_v51  ;;  %v12011_v60 = vadd.f32 %v12010_v45, %v12009_v9  ;;  %v12118_v48 = vpop.f32.mrb[112].mxu1 }
 0x28e   : > { %v12119_v25 = vpop.f32.mrb[113].mxu1 }
 0x28f   : > { %v4919_v31 = vadd.f32 %v12011_v60, %v14664_v8  ;;  %v12120_v33 = vadd.f32 %v12119_v25, %v12118_v48  ;;  %v12121_v14 = vpop.f32.mrb[114].mxu1  ;;  %v12967_v48 = vld [vmem:[#allocation10 + $0x148] sm:$0xff]   ;;  %v5473_v25 = vld [vmem:[#allocation3 + $0xb0] sm:$0x1] }
 0x290   : > { %v12122_v30 = vpop.f32.mrb[115].mxu1  ;;  %12392 = vmatprep.subr.bf16.mxu1 %v12967_v48 }
 0x291   : > { %v12123_v21 = vadd.f32 %v12122_v30, %v12121_v14  ;;  %v14926_v51 = vadd.f32 %v12120_v33, %v4916_v44  ;;  %v5474_v33 = vsel %vm13462_vm10, 0, %v5473_v25  ;;  %v5470_v14 = vld [vmem:[#allocation3 + $0xa4] sm:$0x1] }
 0x292   : > { %5475 = vst [vmem:[#allocation3 + $0xb0] sm:$0x1] %v5474_v33 }
 0x293   : > { %v14928_v57 = vadd.f32 %v12123_v21, %v4919_v31  ;;  %v16482_v21 = vld [vmem:[#allocation37_spill] sm:$0xff] }
 0x294   : > { %v12012_v8 = vpop.f32.mrb[116].mxu0 }
 0x295   : > { %v12013_v53 = vpop.f32.mrb[117].mxu0 }
 0x296   : > { %v12014_v7 = vadd.f32 %v12013_v53, %v12012_v8  ;;  %v12015_v28 = vpop.f32.mrb[118].mxu0  ;;  %v16483_v53 = vld [vmem:[#allocation38_spill] sm:$0xff] }
 0x297   : > { %v12016_v61 = vpop.f32.mrb[119].mxu0 }
 0x298   : > { %v4924_v55 = vadd.f32 %v12014_v7, %v14689_v35  ;;  %v12017_v32 = vadd.f32 %v12016_v61, %v12015_v28  ;;  %v12968_v35 = vld [vmem:[#allocation10 + $0x108] sm:$0xff]   ;;  %v5432_v7 = vsel %vm13456_vm3, 0, %v5431_v6  ;;  %v5428_v28 = vld [vmem:[#allocation3 + $0xb4] sm:$0x1]  ;;  %v5479_v61 = vld [vmem:[#allocation3 + $0xc8] sm:$0x1] }
 0x299   : > { %v12124_v0 = vpop.f32.mrb[116].mxu1  ;;  %12393 = vmatpush3.bf16.msra.mxu1 %v12968_v35  ;;  %5433 = vst [vmem:[#allocation3 + $0xc0] sm:$0x1] %v5432_v7  ;;  %v5429_v37 = vsel %vm13456_vm3, 0, %v5428_v28  ;;  %v14963_v6 = vld [vmem:[%s16340_s3] ss:$0 sm:$0xff] }
 0x29a   : > { %v12125_v5 = vpop.f32.mrb[117].mxu1  ;;  %v4927_v54 = vadd.f32 %v12017_v32, %v14691_v46  ;;  %v5471_v46 = vsel %vm13462_vm10, 0, %v5470_v14  ;;  %5430 = vst [vmem:[#allocation3 + $0xb4] sm:$0x1] %v5429_v37 }
 0x29b   : > { %v12126_v19 = vadd.f32 %v12125_v5, %v12124_v0  ;;  %v12127_v9 = vpop.f32.mrb[118].mxu1  ;;  %5472 = vst [vmem:[#allocation3 + $0xa4] sm:$0x1] %v5471_v46  ;;  %v5480_v0 = vsel %vm13462_vm10, 0, %v5479_v61 }
 0x29c   : > { %v12128_v45 = vpop.f32.mrb[119].mxu1  ;;  %5481 = vst [vmem:[#allocation3 + $0xc8] sm:$0x1] %v5480_v0  ;;  %v12973_v0 = vld [vmem:[#allocation10 + $0x150] sm:$0xff]  }
 0x29d   : > { %v12129_v44 = vadd.f32 %v12128_v45, %v12127_v9  ;;  %v14936_v60 = vadd.f32 %v12126_v19, %v4924_v55  ;;  %12394 = vmatprep.subr.bf16.mxu1 %v12973_v0 }
 0x29f   : > { %v14938_v31 = vadd.f32 %v12129_v44, %v4927_v54  ;;  %v5476_v54 = vld [vmem:[#allocation3 + $0xbc] sm:$0x1] }
 0x2a0   : > { %v12018_v52 = vpop.f32.mrb[120].mxu0  ;;  %v5477_v44 = vsel %vm13462_vm10, 0, %v5476_v54 }
 0x2a1   : > { %v12019_v42 = vpop.f32.mrb[121].mxu0  ;;  %5478 = vst [vmem:[#allocation3 + $0xbc] sm:$0x1] %v5477_v44 }
 0x2a2   : > { %v12020_v10 = vadd.f32 %v12019_v42, %v12018_v52  ;;  %v12021_v30 = vpop.f32.mrb[122].mxu0  ;;  %v6667_v42 = vld [vmem:[#allocation3 + $0x4] sm:$0xf] }
 0x2a3   : > { %v12022_v22 = vpop.f32.mrb[123].mxu0 }
 0x2a4   : > { %v4932_v8 = vadd.f32 %v12020_v10, %v16482_v21  ;;  %v12023_v24 = vadd.f32 %v12022_v22, %v12021_v30  ;;  %v6666_v22 = vld [vmem:[#allocation3] sm:$0xe]  ;;  %v6668_v21 = vld [vmem:[#allocation3 + $0x8] sm:$0x1] }
 0x2a5   : > { %v11183_v61 = vrot.slane %v6666_v22, 9 }
 0x2a6   : > { %v4935_v13 = vadd.f32 %v12023_v24, %v16483_v53  ;;  %v6764_v24 = vrot.slane %v6667_v42, 5 }
 0x2b6   : > { %v12130_v32 = vpop.f32.mrb[120].mxu1 }
 0x2b7   : > { %v12131_v19 = vpop.f32.mrb[121].mxu1 }
 0x2b8   : > { %v12024_v55 = vpop.f32.mrb[124].mxu0  ;;  %v12132_v48 = vadd.f32 %v12131_v19, %v12130_v32  ;;  %v12133_v25 = vpop.f32.mrb[122].mxu1 }
 0x2b9   : > { %v12025_v5 = vpop.f32.mrb[125].mxu0  ;;  %v12134_v33 = vpop.f32.mrb[123].mxu1 }
 0x2ba   : > { %v12026_v9 = vadd.f32 %v12025_v5, %v12024_v55  ;;  %v12027_v45 = vpop.f32.mrb[126].mxu0  ;;  %v12135_v46 = vadd.f32 %v12134_v33, %v12133_v25  ;;  %v14955_v10 = vadd.f32 %v12132_v48, %v4932_v8  ;;  %v14969_v8 = vld [vmem:[%s16341_s4] ss:$0 sm:$0xff]  ;;  %v6767_v55 = vrot.slane %v6668_v21, 5 }
 0x2bb   : > { %v12028_v52 = vpop.f32.mrb[127].mxu0  ;;  %v12974_v25 = vld [vmem:[#allocation10 + $0x110] sm:$0xff]  }
 0x2bc   : > { %v4940_v35 = vadd.f32 %v12026_v9, %v14777_v41  ;;  %v12029_v14 = vadd.f32 %v12028_v52, %v12027_v45  ;;  %v14958_v53 = vadd.f32 %v12135_v46, %v4935_v13  ;;  %v6766_v9 = vrot.slane %v6764_v24, 4  ;;  %12395 = vmatpush3.bf16.msra.mxu1 %v12974_v25  ;;  %v5905_v25 = vld [vmem:[#allocation3 + $0x18] sm:$0xf] }
 0x2bd   : > { %v14984_v46 = vsel %vm13492_vm14, %v11183_v61, %v6764_v24 }
 0x2be   : > { %v4943_v30 = vadd.f32 %v12029_v14, %v14794_v43  ;;  %16484 = vst [vmem:[#allocation39_spill] sm:$0xff] %v14958_v53  ;;  %v12136_v7 = vpop.f32.mrb[124].mxu1  ;;  %v14989_v21 = vsel %vm13492_vm14, %v6766_v9, %v6767_v55 }
 0x2bf   : > { %v12137_v28 = vpop.f32.mrb[125].mxu1 }
 0x2c0   : > { %v12656_v29 = vpop.f32.mrb[128].mxu0  ;;  %v12138_v32 = vadd.f32 %v12137_v28, %v12136_v7  ;;  %v12139_v5 = vpop.f32.mrb[126].mxu1 }
 0x2c1   : > { %v5150_v41 = vadd.f32 %v12656_v29, %v14808_v34  ;;  %v5141_v43 = vpop.f32.mrb[129].mxu0  ;;  %v12140_v45 = vpop.f32.mrb[127].mxu1 }
 0x2c2   : > { %v5142_v37 = vadd.f32 %v5141_v43, %v14802_v20  ;;  %v12657_v13 = vpop.f32.mrb[130].mxu0  ;;  %v12141_v20 = vadd.f32 %v12140_v45, %v12139_v5  ;;  %v14978_v14 = vadd.f32 %v12138_v32, %v4940_v35 }
 0x2c3   : > { %v5277_v54 = vmul.f32 %v14963_v6, %v5150_v41  ;;  %v5153_v19 = vadd.f32 %v12657_v13, %v14810_v4  ;;  %v5144_v34 = vpop.f32.mrb[131].mxu0 }
 0x2c4   : > { %v5275_v44 = vmul.f32 %v14963_v6, %v5142_v37  ;;  %v5145_v48 = vadd.f32 %v5144_v34, %v14804_v26  ;;  %v14991_v29 = vadd.f32 %v12141_v20, %v4943_v30 }
 0x2c5   : > { %v5316_v52 = vadd.f32 %v14969_v8, %v5277_v54  ;;  %v5278_v33 = vmul.f32 %v14963_v6, %v5153_v19 }
 0x2c6   : > { %v5314_v42 = vadd.f32 %v14969_v8, %v5275_v44  ;;  %v5276_v4 = vmul.f32 %v14963_v6, %v5145_v48  ;;  %16485 = vst [vmem:[#allocation44_spill] sm:$0xff] %v14991_v29 }
 0x2c7   : > { %v5348_v22 = vmax.f32 %v5316_v52, 0.0  ;;  %v5317_v26 = vadd.f32 %v14969_v8, %v5278_v33  ;;  %v12979_v33 = vld [vmem:[#allocation10 + $0x158] sm:$0xff]  }
 0x2c8   : > { %v5346_v35 = vmax.f32 %v5314_v42, 0.0  ;;  %v5315_v7 = vadd.f32 %v14969_v8, %v5276_v4  ;;  %v12660_v41 = vpop.f32.mrb[132].mxu0  ;;  %v5898_v4 = vld [vmem:[#allocation3 + $0xc] sm:$0xf]  ;;  %12396 = vmatprep.subr.bf16.mxu1 %v12979_v33 }
 0x2c9   : > { %v11457_v43 = vpack.c.bf16 %v5348_v22, %v5348_v22  ;;  %v5349_v28 = vmax.f32 %v5317_v26, 0.0  ;;  %v5166_v37 = vadd.f32 %v12660_v41, %v14820_v62  ;;  %v5157_v24 = vpop.f32.mrb[133].mxu0 }
 0x2ca   : > { %v11455_v13 = vpack.c.bf16 %v5346_v35, %v5346_v35  ;;  %v5347_v61 = vmax.f32 %v5315_v7, 0.0  ;;  %v5158_v0 = vadd.f32 %v5157_v24, %v14814_v40  ;;  %v12661_v32 = vpop.f32.mrb[134].mxu0 }
 0x2cb   : > { %v5596_v5 = vshrl.u32 %v11457_v43, 16  ;;  %v5599_v30 = vshll.u32 %v11457_v43, 16  ;;  %v11458_v54 = vpack.c.bf16 %v5349_v28, %v5349_v28  ;;  %v5281_v19 = vmul.f32 %v14963_v6, %v5166_v37  ;;  %v5160_v34 = vpop.f32.mrb[135].mxu0  ;;  %v5909_v28 = vld [vmem:[#allocation3 + $0x20] sm:$0x1] }
 0x2cc   : > { %v5579_v9 = vshrl.u32 %v11455_v13, 16  ;;  %v5582_v45 = vshll.u32 %v11455_v13, 16  ;;  %v11456_v44 = vpack.c.bf16 %v5347_v61, %v5347_v61  ;;  %v5279_v62 = vmul.f32 %v14963_v6, %v5158_v0 }
 0x2cd   : > { %v5598_v48 = vrot.slane %v5596_v5, 7  ;;  %v5604_v20 = vshrl.u32 %v11458_v54, 16  ;;  %v5607_v52 = vshll.u32 %v11458_v54, 16  ;;  %v5320_v40 = vadd.f32 %v14969_v8, %v5281_v19  ;;  %v12980_v54 = vld [vmem:[#allocation10 + $0x118] sm:$0xff]  }
 0x2ce   : > { %v5581_v42 = vrot.slane %v5579_v9, 7  ;;  %v5587_v22 = vshrl.u32 %v11456_v44, 16  ;;  %v5590_v26 = vshll.u32 %v11456_v44, 16  ;;  %v5318_v35 = vadd.f32 %v14969_v8, %v5279_v62  ;;  %v5902_v44 = vld [vmem:[#allocation3 + $0x14] sm:$0x1]  ;;  %12397 = vmatpush3.bf16.msra.mxu1 %v12980_v54 }
 0x2cf   : > { %v5601_v7 = vor.u32 %v5599_v30, %v5598_v48  ;;  %v5602_v41 = vrot.slane %v5598_v48, 4  ;;  %v5606_v43 = vrot.slane %v5604_v20, 7  ;;  %v5352_v37 = vmax.f32 %v5320_v40, 0.0 }
 0x2d0   : > { %v5584_v24 = vor.u32 %v5582_v45, %v5581_v42  ;;  %v5585_v13 = vrot.slane %v5581_v42, 4  ;;  %v5589_v61 = vrot.slane %v5587_v22, 7  ;;  %v5350_v0 = vmax.f32 %v5318_v35, 0.0  ;;  %v12664_v5 = vpop.f32.mrb[136].mxu0 }
 0x2d1   : > { %v5906_v9 = vsel %vm13486_vm13, %v5601_v7, %v5905_v25  ;;  %v5609_v55 = vor.u32 %v5607_v52, %v5606_v43  ;;  %v5611_v53 = vrot.slane %v5606_v43, 4  ;;  %v11461_v29 = vpack.c.bf16 %v5352_v37, %v5352_v37  ;;  %v5173_v62 = vpop.f32.mrb[137].mxu0 }
 0x2d2   : > { %5907 = vst [vmem:[#allocation3 + $0x18] sm:$0xf] %v5906_v9  ;;  %v5899_v30 = vsel %vm13486_vm13, %v5584_v24, %v5898_v4  ;;  %v5592_v48 = vor.u32 %v5590_v26, %v5589_v61  ;;  %v5594_v20 = vrot.slane %v5589_v61, 4  ;;  %v11459_v45 = vpack.c.bf16 %v5350_v0, %v5350_v0  ;;  %v12665_v40 = vpop.f32.mrb[138].mxu0  ;;  %v12983_v0 = vld [vmem:[#allocation10 + $0x1c0] sm:$0xff]  }
 0x2d3   : > { %5900 = vst [vmem:[#allocation3 + $0xc] sm:$0xf] %v5899_v30  ;;  %v5610_v42 = vsel %vm13480_vm12, %v5602_v41, %v5609_v55  ;;  %v5910_v25 = vsel %vm13456_vm3, %v5611_v53, %v5909_v28  ;;  %v5630_v52 = vshrl.u32 %v11461_v29, 16  ;;  %v5633_v22 = vshll.u32 %v11461_v29, 16  ;;  %v5176_v35 = vpop.f32.mrb[139].mxu0  ;;  %12502 = vmatprep.subr.bf16.mxu0 %v12983_v0 }
 0x2d4   : > { %5908 = vst [vmem:[#allocation3 + $0x1c] sm:$0xf] %v5610_v42  ;;  %5911 = vst [vmem:[#allocation3 + $0x20] sm:$0x1] %v5910_v25  ;;  %v5593_v4 = vsel %vm13480_vm12, %v5585_v13, %v5592_v48  ;;  %v5903_v26 = vsel %vm13456_vm3, %v5594_v20, %v5902_v44  ;;  %v5613_v7 = vshrl.u32 %v11459_v45, 16  ;;  %v5616_v43 = vshll.u32 %v11459_v45, 16 }
 0x2d5   : > { %5901 = vst [vmem:[#allocation3 + $0x10] sm:$0xf] %v5593_v4  ;;  %5904 = vst [vmem:[#allocation3 + $0x14] sm:$0x1] %v5903_v26  ;;  %v15014_v37 = vrot.slane %v5630_v52, 7  ;;  %v5169_v55 = vadd.f32 %v12661_v32, %v14822_v49  ;;  %v5161_v53 = vadd.f32 %v5160_v34, %v14816_v3  ;;  %v5182_v29 = vadd.f32 %v12664_v5, %v14834_v17 }
 0x2d6   : > { %v5919_v41 = vld [vmem:[#allocation3 + $0x30] sm:$0xf]  ;;  %v15019_v28 = vrot.slane %v5613_v7, 7  ;;  %v5174_v24 = vadd.f32 %v5173_v62, %v14826_v39  ;;  %v5185_v13 = vadd.f32 %v12665_v40, %v14836_v59  ;;  %v5177_v61 = vadd.f32 %v5176_v35, %v14830_v15  ;;  %v5912_v44 = vld [vmem:[#allocation3 + $0x24] sm:$0xf] }
 0x2d7   : > { %v5635_v54 = vor.u32 %v5633_v22, %v15014_v37  ;;  %v5636_v9 = vrot.slane %v15014_v37, 4  ;;  %v5282_v49 = vmul.f32 %v14963_v6, %v5169_v55  ;;  %v5280_v3 = vmul.f32 %v14963_v6, %v5161_v53 }
 0x2d8   : > { %v5618_v17 = vor.u32 %v5616_v43, %v15019_v28  ;;  %v5619_v32 = vrot.slane %v15019_v28, 4  ;;  %v5285_v39 = vmul.f32 %v14963_v6, %v5182_v29  ;;  %v5283_v59 = vmul.f32 %v14963_v6, %v5174_v24  ;;  %v12668_v34 = vpop.f32.mrb[140].mxu0 }
 0x2d9   : > { %v5920_v15 = vsel %vm13486_vm13, %v5635_v54, %v5919_v41  ;;  %v5321_v5 = vadd.f32 %v14969_v8, %v5282_v49  ;;  %v5319_v62 = vadd.f32 %v14969_v8, %v5280_v3  ;;  %v5286_v30 = vmul.f32 %v14963_v6, %v5185_v13  ;;  %v5189_v48 = vpop.f32.mrb[141].mxu0  ;;  %v12984_v41 = vld [vmem:[#allocation10 + $0x180] sm:$0xff]  }
 0x2da   : > { %5921 = vst [vmem:[#allocation3 + $0x30] sm:$0xf] %v5920_v15  ;;  %v5913_v20 = vsel %vm13486_vm13, %v5618_v17, %v5912_v44  ;;  %v5324_v45 = vadd.f32 %v14969_v8, %v5285_v39  ;;  %v5322_v40 = vadd.f32 %v14969_v8, %v5283_v59  ;;  %v5284_v42 = vmul.f32 %v14963_v6, %v5177_v61  ;;  %v15042_v25 = vpop.f32.mrb[142].mxu0  ;;  %v12987_v17 = vld [vmem:[#allocation10 + $0x160] sm:$0xff]  }
 0x2db   : > { %5914 = vst [vmem:[#allocation3 + $0x24] sm:$0xf] %v5913_v20  ;;  %v5353_v52 = vmax.f32 %v5321_v5, 0.0  ;;  %v5351_v22 = vmax.f32 %v5319_v62, 0.0  ;;  %v5325_v35 = vadd.f32 %v14969_v8, %v5286_v30  ;;  %v5198_v4 = vadd.f32 %v12668_v34, %v14858_v12  ;;  %v15046_v26 = vpop.f32.mrb[143].mxu0  ;;  %v12960_v3 = vld [vmem:[#allocation3 + $0x18] sm:$0xff]   ;;  %12398 = vmatprep.subr.bf16.mxu1 %v12987_v17 }
 0x2dc   : > { %v5356_v7 = vmax.f32 %v5324_v45, 0.0  ;;  %v5354_v43 = vmax.f32 %v5322_v40, 0.0  ;;  %v5323_v55 = vadd.f32 %v14969_v8, %v5284_v42  ;;  %v5190_v53 = vadd.f32 %v5189_v48, %v14850_v1  ;;  %v12959_v29 = vld [vmem:[#allocation3 + $0xc] sm:$0xff]   ;;  %v5923_v5 = vld [vmem:[#allocation3 + $0x38] sm:$0x1] }
 0x2dd   : > { %v11462_v24 = vpack.c.bf16 %v5353_v52, %v5353_v52  ;;  %v11460_v13 = vpack.c.bf16 %v5351_v22, %v5351_v22  ;;  %v5357_v61 = vmax.f32 %v5325_v35, 0.0  ;;  %v5289_v0 = vmul.f32 %v14963_v6, %v5198_v4  ;;  %9756 = vmatprep.mubr.bf16.mxu0 %v12959_v29  ;;  %v5916_v62 = vld [vmem:[#allocation3 + $0x2c] sm:$0x1]  ;;  %v12988_v42 = vld [vmem:[#allocation10 + $0x120] sm:$0xff]   ;;  %v5933_v35 = vld [vmem:[#allocation3 + $0x48] sm:$0xf] }
 0x2de   : > { %v11465_v54 = vpack.c.bf16 %v5356_v7, %v5356_v7  ;;  %v11463_v44 = vpack.c.bf16 %v5354_v43, %v5354_v43  ;;  %v5355_v49 = vmax.f32 %v5323_v55, 0.0  ;;  %v5287_v12 = vmul.f32 %v14963_v6, %v5190_v53  ;;  %v5926_v4 = vld [vmem:[#allocation3 + $0x3c] sm:$0xf]  ;;  %12399 = vmatpush3.bf16.msra.mxu1 %v12988_v42 }
 0x2df   : > { %v5638_v39 = vshrl.u32 %v11462_v24, 16  ;;  %v5641_v59 = vshll.u32 %v11462_v24, 16  ;;  %v5621_v34 = vshrl.u32 %v11460_v13, 16  ;;  %v5624_v15 = vshll.u32 %v11460_v13, 16 }
 0x2e0   : > { %v16488_v1 = vcombine.low %v14984_v46, %v14989_v21  ;;  %v5664_v30 = vshrl.u32 %v11465_v54, 16  ;;  %v5667_v48 = vshll.u32 %v11465_v54, 16  ;;  %v5647_v20 = vshrl.u32 %v11463_v44, 16  ;;  %v12672_v40 = vpop.f32.mrb[144].mxu0 }
 0x2e1   : > { %v5650_v45 = vshll.u32 %v11463_v44, 16  ;;  %v5640_v52 = vrot.slane %v5638_v39, 7  ;;  %v5623_v22 = vrot.slane %v5621_v34, 7  ;;  %v11466_v7 = vpack.c.bf16 %v5357_v61, %v5357_v61  ;;  %v5205_v55 = vpop.f32.mrb[145].mxu0 }
 0x2e2   : > { %9757 = vmatmul.mubr.bf16.vlgmr.msra.gmra.mrb[160].mxu0 %v16488_v1  ;;  %v11464_v43 = vpack.c.bf16 %v5355_v49, %v5355_v49  ;;  %v5666_v46 = vrot.slane %v5664_v30, 7  ;;  %v15055_v21 = vrot.slane %v5647_v20, 7  ;;  %v5328_v53 = vadd.f32 %v14969_v8, %v5289_v0  ;;  %v15059_v24 = vpop.f32.mrb[146].mxu0 }
 0x2e3   : > { %9764 = vmatprep.mubr.bf16.mxu0 %v12960_v3  ;;  %12503 = vmatpush3.bf16.msra.mxu0 %v12984_v41  ;;  %v5326_v29 = vadd.f32 %v14969_v8, %v5287_v12  ;;  %v5643_v41 = vor.u32 %v5641_v59, %v5640_v52  ;;  %v5645_v13 = vrot.slane %v5640_v52, 4  ;;  %v5626_v54 = vor.u32 %v5624_v15, %v5623_v22  ;;  %v15061_v3 = vpop.f32.mrb[147].mxu0  ;;  %v5937_v52 = vld [vmem:[#allocation3 + $0x50] sm:$0x1] }
 0x2e4   : > { %v5628_v44 = vrot.slane %v5623_v22, 4  ;;  %v5669_v61 = vor.u32 %v5667_v48, %v5666_v46  ;;  %v5670_v49 = vrot.slane %v5666_v46, 4  ;;  %v5652_v17 = vor.u32 %v5650_v45, %v15055_v21 }
 0x2e5   : > { %v5653_v39 = vrot.slane %v15055_v21, 4  ;;  %v5644_v0 = vsel %vm13480_vm12, %v5636_v9, %v5643_v41  ;;  %v5924_v12 = vsel %vm13456_vm3, %v5645_v13, %v5923_v5  ;;  %v5627_v59 = vsel %vm13480_vm12, %v5619_v32, %v5626_v54  ;;  %v12991_v13 = vld [vmem:[#allocation10 + $0x1c8] sm:$0xff]  }
 0x2e6   : > { %v5917_v34 = vsel %vm13456_vm3, %v5628_v44, %v5916_v62  ;;  %5922 = vst [vmem:[#allocation3 + $0x34] sm:$0xf] %v5644_v0  ;;  %5925 = vst [vmem:[#allocation3 + $0x38] sm:$0x1] %v5924_v12  ;;  %v5934_v37 = vsel %vm13486_vm13, %v5669_v61, %v5933_v35  ;;  %v5927_v9 = vsel %vm13486_vm13, %v5652_v17, %v5926_v4  ;;  %v5672_v15 = vshrl.u32 %v11466_v7, 16  ;;  %v12992_v54 = vld [vmem:[#allocation10 + $0x188] sm:$0xff]  }
 0x2e7   : > { %5915 = vst [vmem:[#allocation3 + $0x28] sm:$0xf] %v5627_v59  ;;  %5918 = vst [vmem:[#allocation3 + $0x2c] sm:$0x1] %v5917_v34  ;;  %v5675_v1 = vshll.u32 %v11466_v7, 16  ;;  %v5655_v28 = vshrl.u32 %v11464_v43, 16  ;;  %v5201_v62 = vadd.f32 %v15042_v25, %v14862_v50  ;;  %v5193_v20 = vadd.f32 %v15046_v26, %v14854_v63  ;;  %12504 = vmatprep.subr.bf16.mxu0 %v12991_v13 }
 0x2e8   : > { %5935 = vst [vmem:[#allocation3 + $0x48] sm:$0xf] %v5934_v37  ;;  %5928 = vst [vmem:[#allocation3 + $0x3c] sm:$0xf] %v5927_v9  ;;  %v5658_v5 = vshll.u32 %v11464_v43, 16  ;;  %v5360_v32 = vmax.f32 %v5328_v53, 0.0  ;;  %v5214_v45 = vadd.f32 %v12672_v40, %v14886_v36  ;;  %v5206_v7 = vadd.f32 %v5205_v55, %v14876_v18  ;;  %12505 = vmatpush3.bf16.msra.mxu0 %v12992_v54 }
 0x2e9   : > { %v5358_v30 = vmax.f32 %v5326_v29, 0.0  ;;  %v5674_v48 = vrot.slane %v5672_v15, 7  ;;  %v15086_v42 = vpop.f32.mrb[148].mxu0  ;;  %v5657_v22 = vrot.slane %v5655_v28, 7  ;;  %v5930_v53 = vld [vmem:[#allocation3 + $0x44] sm:$0x1]  ;;  %v5290_v50 = vmul.f32 %v14963_v6, %v5201_v62 }
 0x2ea   : > { %v11469_v35 = vpack.c.bf16 %v5360_v32, %v5360_v32  ;;  %v15089_v43 = vpop.f32.mrb[149].mxu0  ;;  %v5288_v25 = vmul.f32 %v14963_v6, %v5193_v20  ;;  %v5293_v9 = vmul.f32 %v14963_v6, %v5214_v45  ;;  %v5291_v15 = vmul.f32 %v14963_v6, %v5206_v7  ;;  %v5940_v28 = vld [vmem:[#allocation3 + $0x54] sm:$0xf] }
 0x2eb   : > { %v11467_v4 = vpack.c.bf16 %v5358_v30, %v5358_v30  ;;  %v5677_v46 = vor.u32 %v5675_v1, %v5674_v48  ;;  %v5679_v21 = vrot.slane %v5674_v48, 4  ;;  %v15093_v63 = vpop.f32.mrb[150].mxu0  ;;  %v5660_v36 = vor.u32 %v5658_v5, %v5657_v22 }
 0x2ec   : > { %v5662_v26 = vrot.slane %v5657_v22, 4  ;;  %v5698_v40 = vshrl.u32 %v11469_v35, 16  ;;  %v5701_v29 = vshll.u32 %v11469_v35, 16  ;;  %v15095_v41 = vpop.f32.mrb[151].mxu0  ;;  %v5329_v59 = vadd.f32 %v14969_v8, %v5290_v50 }
 0x2ed   : > { %v5678_v18 = vsel %vm13480_vm12, %v5670_v49, %v5677_v46  ;;  %v5938_v55 = vsel %vm13456_vm3, %v5679_v21, %v5937_v52  ;;  %v5681_v44 = vshrl.u32 %v11467_v4, 16  ;;  %v5684_v61 = vshll.u32 %v11467_v4, 16  ;;  %v5947_v49 = vld [vmem:[#allocation3 + $0x60] sm:$0xf] }
 0x2ee   : > { %5936 = vst [vmem:[#allocation3 + $0x4c] sm:$0xf] %v5678_v18  ;;  %5939 = vst [vmem:[#allocation3 + $0x50] sm:$0x1] %v5938_v55  ;;  %v5661_v17 = vsel %vm13480_vm12, %v5653_v39, %v5660_v36  ;;  %v5931_v0 = vsel %vm13456_vm3, %v5662_v26, %v5930_v53  ;;  %v15105_v12 = vrot.slane %v5698_v40, 7  ;;  %v5327_v37 = vadd.f32 %v14969_v8, %v5288_v25 }
 0x2ef   : > { %5929 = vst [vmem:[#allocation3 + $0x40] sm:$0xf] %v5661_v17  ;;  %5932 = vst [vmem:[#allocation3 + $0x44] sm:$0x1] %v5931_v0  ;;  %v15108_v34 = vrot.slane %v5681_v44, 7  ;;  %v5361_v5 = vmax.f32 %v5329_v59, 0.0  ;;  %v5217_v32 = vadd.f32 %v15059_v24, %v14890_v38  ;;  %v5332_v20 = vadd.f32 %v14969_v8, %v5293_v9 }
 0x2f0   : > { %v5703_v39 = vor.u32 %v5701_v29, %v15105_v12  ;;  %v5704_v1 = vrot.slane %v15105_v12, 4  ;;  %v5359_v62 = vmax.f32 %v5327_v37, 0.0  ;;  %v15120_v45 = vpop.f32.mrb[152].mxu0  ;;  %v5330_v35 = vadd.f32 %v14969_v8, %v5291_v15  ;;  %v5951_v44 = vld [vmem:[#allocation3 + $0x68] sm:$0x1] }
 0x2f1   : > { %v5686_v30 = vor.u32 %v5684_v61, %v15108_v34  ;;  %v5687_v48 = vrot.slane %v15108_v34, 4  ;;  %v11470_v22 = vpack.c.bf16 %v5361_v5, %v5361_v5  ;;  %v5294_v4 = vmul.f32 %v14963_v6, %v5217_v32  ;;  %v15126_v7 = vpop.f32.mrb[153].mxu0  ;;  %v5944_v37 = vld [vmem:[#allocation3 + $0x5c] sm:$0x1]  ;;  %v5961_v32 = vld [vmem:[#allocation3 + $0x78] sm:$0xf] }
 0x2f2   : > { %v5948_v52 = vsel %vm13486_vm13, %v5703_v39, %v5947_v49  ;;  %v11468_v24 = vpack.c.bf16 %v5359_v62, %v5359_v62  ;;  %v5364_v46 = vmax.f32 %v5332_v20, 0.0  ;;  %v5209_v21 = vadd.f32 %v15061_v3, %v14878_v16  ;;  %v15132_v53 = vpop.f32.mrb[154].mxu0  ;;  %v12995_v20 = vld [vmem:[#allocation10 + $0x168] sm:$0xff]  }
 0x2f3   : > { %5949 = vst [vmem:[#allocation3 + $0x60] sm:$0xf] %v5948_v52  ;;  %v5941_v38 = vsel %vm13486_vm13, %v5686_v30, %v5940_v28  ;;  %v5706_v50 = vshrl.u32 %v11470_v22, 16  ;;  %v5709_v25 = vshll.u32 %v11470_v22, 16  ;;  %v5362_v36 = vmax.f32 %v5330_v35, 0.0  ;;  %v15135_v40 = vpop.f32.mrb[155].mxu0  ;;  %12400 = vmatprep.subr.bf16.mxu1 %v12995_v20 }
 0x2f4   : > { %5942 = vst [vmem:[#allocation3 + $0x54] sm:$0xf] %v5941_v38  ;;  %v5333_v26 = vadd.f32 %v14969_v8, %v5294_v4  ;;  %v5689_v29 = vshrl.u32 %v11468_v24, 16  ;;  %v5692_v13 = vshll.u32 %v11468_v24, 16  ;;  %v11473_v54 = vpack.c.bf16 %v5364_v46, %v5364_v46  ;;  %v6157_v35 = vld [vmem:[#allocation3 + $0xc] sm:$0xf] }
 0x2f5   : > { %v5292_v18 = vmul.f32 %v14963_v6, %v5209_v21  ;;  %v5708_v55 = vrot.slane %v5706_v50, 7  ;;  %v11471_v61 = vpack.c.bf16 %v5362_v36, %v5362_v36  ;;  %v5230_v16 = vadd.f32 %v15086_v42, %v14916_v23  ;;  %v12996_v38 = vld [vmem:[#allocation10 + $0x128] sm:$0xff]   ;;  %v5954_v50 = vld [vmem:[#allocation3 + $0x6c] sm:$0xf] }
 0x2f6   : > { %v5365_v17 = vmax.f32 %v5333_v26, 0.0  ;;  %v5691_v3 = vrot.slane %v5689_v29, 7  ;;  %v5732_v0 = vshrl.u32 %v11473_v54, 16  ;;  %v5735_v12 = vshll.u32 %v11473_v54, 16  ;;  %v6159_v54 = vld [vmem:[#allocation3 + $0x14] sm:$0x1]  ;;  %12401 = vmatpush3.bf16.msra.mxu1 %v12996_v38 }
 0x2f7   : > { %v5331_v59 = vadd.f32 %v14969_v8, %v5292_v18  ;;  %v5711_v49 = vor.u32 %v5709_v25, %v5708_v55  ;;  %v5713_v34 = vrot.slane %v5708_v55, 4  ;;  %v5715_v9 = vshrl.u32 %v11471_v61, 16  ;;  %v6158_v25 = vld [vmem:[#allocation3 + $0x10] sm:$0xf] }
 0x2f8   : > { %v5718_v15 = vshll.u32 %v11471_v61, 16  ;;  %v5694_v39 = vor.u32 %v5692_v13, %v5691_v3  ;;  %v5696_v28 = vrot.slane %v5691_v3, 4  ;;  %v15141_v5 = vrot.slane %v5732_v0, 7  ;;  %v15143_v62 = vpop.f32.mrb[156].mxu0  ;;  %v12999_v0 = vld [vmem:[#allocation10 + $0x1d0] sm:$0xff]  }
 0x2f9   : > { %v11474_v30 = vpack.c.bf16 %v5365_v17, %v5365_v17  ;;  %v5712_v23 = vsel %vm13480_vm12, %v5704_v1, %v5711_v49  ;;  %v5952_v42 = vsel %vm13456_vm3, %v5713_v34, %v5951_v44  ;;  %v15149_v52 = vrot.slane %v5715_v9, 7  ;;  %v15151_v4 = vpop.f32.mrb[157].mxu0  ;;  %v5965_v44 = vld [vmem:[#allocation3 + $0x80] sm:$0x1]  ;;  %12506 = vmatprep.subr.bf16.mxu0 %v12999_v0 }
 0x2fa   : > { %v5363_v22 = vmax.f32 %v5331_v59, 0.0  ;;  %5950 = vst [vmem:[#allocation3 + $0x64] sm:$0xf] %v5712_v23  ;;  %5953 = vst [vmem:[#allocation3 + $0x68] sm:$0x1] %v5952_v42  ;;  %v5695_v24 = vsel %vm13480_vm12, %v5687_v48, %v5694_v39  ;;  %v5945_v46 = vsel %vm13456_vm3, %v5696_v28, %v5944_v37  ;;  %v5737_v1 = vor.u32 %v5735_v12, %v15141_v5  ;;  %v15159_v36 = vpop.f32.mrb[158].mxu0 }
 0x2fb   : > { %v5738_v21 = vrot.slane %v15141_v5, 4  ;;  %5943 = vst [vmem:[#allocation3 + $0x58] sm:$0xf] %v5695_v24  ;;  %5946 = vst [vmem:[#allocation3 + $0x5c] sm:$0x1] %v5945_v46  ;;  %v5720_v26 = vor.u32 %v5718_v15, %v15149_v52  ;;  %v5721_v29 = vrot.slane %v15149_v52, 4  ;;  %v5297_v17 = vmul.f32 %v14963_v6, %v5230_v16 }
 0x2fc   : > { %v5740_v13 = vshrl.u32 %v11474_v30, 16  ;;  %v5743_v48 = vshll.u32 %v11474_v30, 16  ;;  %v15163_v18 = vpop.f32.mrb[159].mxu0  ;;  %v5962_v55 = vsel %vm13486_vm13, %v5737_v1, %v5961_v32  ;;  %v11472_v61 = vpack.c.bf16 %v5363_v22, %v5363_v22  ;;  %v13000_v37 = vld [vmem:[#allocation10 + $0x190] sm:$0xff]   ;;  %v6670_v42 = vld [vmem:[#allocation3 + $0x10] sm:$0xf] }
 0x2fd   : > { %v6227_v3 = vshrl.u32 %v6157_v35, 16  ;;  %5963 = vst [vmem:[#allocation3 + $0x78] sm:$0xf] %v5962_v55  ;;  %v5955_v12 = vsel %vm13486_vm13, %v5720_v26, %v5954_v50  ;;  %v6230_v49 = vshll.u32 %v6157_v35, 16  ;;  %v6236_v34 = vshll.u32 %v6158_v25, 16  ;;  %v13003_v32 = vld [vmem:[#allocation10 + $0x170] sm:$0xff]   ;;  %12507 = vmatpush3.bf16.msra.mxu0 %v13000_v37 }
 0x2fe   : > { %v5742_v59 = vrot.slane %v5740_v13, 7  ;;  %5956 = vst [vmem:[#allocation3 + $0x6c] sm:$0xf] %v5955_v12  ;;  %v5723_v9 = vshrl.u32 %v11472_v61, 16  ;;  %v5726_v15 = vshll.u32 %v11472_v61, 16  ;;  %v5336_v39 = vadd.f32 %v14969_v8, %v5297_v17  ;;  %v13004_v52 = vld [vmem:[#allocation10 + $0x130] sm:$0xff]   ;;  %12402 = vmatprep.subr.bf16.mxu1 %v13003_v32 }
 0x2ff   : > { %v6229_v28 = vrot.slane %v6227_v3, 4  ;;  %v6669_v5 = vld [vmem:[#allocation3 + $0xc] sm:$0xe]  ;;  %v6232_v20 = vrot.slane %v6230_v49, 5  ;;  %v15171_v23 = vrot.slane %v6236_v34, 5  ;;  %v6240_v38 = vshrl.u32 %v6158_v25, 16  ;;  %12403 = vmatpush3.bf16.msra.mxu1 %v13004_v52 }
 0x300   : > { %v5745_v16 = vor.u32 %v5743_v48, %v5742_v59  ;;  %v5747_v30 = vrot.slane %v5742_v59, 4  ;;  %v5725_v22 = vrot.slane %v5723_v9, 7  ;;  %v5368_v35 = vmax.f32 %v5336_v39, 0.0  ;;  %v6671_v46 = vld [vmem:[#allocation3 + $0x14] sm:$0x1] }
 0x301   : > { %v6246_v24 = vshll.u32 %v6159_v54, 16  ;;  %v5958_v26 = vld [vmem:[#allocation3 + $0x74] sm:$0x1]  ;;  %v6233_v13 = vor.u32 %v6232_v20, %v6229_v28  ;;  %v11184_v48 = vrot.slane %v6669_v5, 9  ;;  %v6242_v3 = vrot.slane %v6240_v38, 4 }
 0x302   : > { %v5746_v1 = vsel %vm13480_vm12, %v5738_v21, %v5745_v16  ;;  %v5966_v50 = vsel %vm13456_vm3, %v5747_v30, %v5965_v44  ;;  %v5728_v55 = vor.u32 %v5726_v15, %v5725_v22  ;;  %v5730_v61 = vrot.slane %v5725_v22, 4  ;;  %v6160_v25 = vld [vmem:[#allocation3 + $0x18] sm:$0xf]  ;;  %v6161_v49 = vld [vmem:[#allocation3 + $0x1c] sm:$0xf]  ;;  %v13007_v22 = vld [vmem:[#allocation10 + $0x1d8] sm:$0xff]  }
 0x303   : > { %5964 = vst [vmem:[#allocation3 + $0x7c] sm:$0xf] %v5746_v1  ;;  %5967 = vst [vmem:[#allocation3 + $0x80] sm:$0x1] %v5966_v50  ;;  %v11477_v17 = vpack.c.bf16 %v5368_v35, %v5368_v35  ;;  %v6234_v54 = vrot.slane %v6233_v13, 4  ;;  %v6248_v0 = vrot.slane %v6246_v24, 5  ;;  %v6243_v15 = vor.u32 %v6242_v3, %v15171_v23  ;;  %12508 = vmatprep.subr.bf16.mxu0 %v13007_v22 }
 0x304   : > { %v6771_v12 = vrot.slane %v6670_v42, 5  ;;  %v6774_v59 = vrot.slane %v6671_v46, 5  ;;  %v5729_v21 = vsel %vm13480_vm12, %v5721_v29, %v5728_v55  ;;  %v5959_v44 = vsel %vm13456_vm3, %v5730_v61, %v5958_v26  ;;  %v5975_v30 = vld [vmem:[#allocation3 + $0x90] sm:$0xf] }
 0x305   : > { %v5766_v34 = vshrl.u32 %v11477_v17, 16  ;;  %v5769_v37 = vshll.u32 %v11477_v17, 16  ;;  %5957 = vst [vmem:[#allocation3 + $0x70] sm:$0xf] %v5729_v21  ;;  %5960 = vst [vmem:[#allocation3 + $0x74] sm:$0x1] %v5959_v44  ;;  %v6239_v9 = vsel %vm13474_vm11, %v6234_v54, %v15171_v23  ;;  %v5222_v29 = vadd.f32 %v15089_v43, %v14902_v27 }
 0x306   : > { %v6772_v39 = vsel %vm13492_vm14, %v11184_v48, %v6771_v12  ;;  %v6773_v28 = vrot.slane %v6771_v12, 4  ;;  %v5233_v32 = vadd.f32 %v15093_v63, %v14918_v58  ;;  %v6251_v16 = vshrl.u32 %v6160_v25, 16  ;;  %v6162_v27 = vld [vmem:[#allocation3 + $0x20] sm:$0x1]  ;;  %v6672_v43 = vld [vmem:[#allocation3 + $0x18] sm:$0xe] }
 0x307   : > { %v15187_v5 = vrot.slane %v5766_v34, 7  ;;  %v6244_v20 = vrot.slane %v6243_v15, 4  ;;  %v6254_v52 = vshll.u32 %v6160_v25, 16  ;;  %v6260_v23 = vshll.u32 %v6161_v49, 16  ;;  %v13008_v1 = vld [vmem:[#allocation10 + $0x198] sm:$0xff]   ;;  %v12964_v63 = vld [vmem:[#allocation3 + $0x24] sm:$0xff]  }
 0x308   : > { %v6775_v42 = vsel %vm13492_vm14, %v6773_v28, %v6774_v59  ;;  %v5295_v46 = vmul.f32 %v14963_v6, %v5222_v29  ;;  %v5298_v50 = vmul.f32 %v14963_v6, %v5233_v32  ;;  %v6253_v26 = vrot.slane %v6251_v16, 4  ;;  %v12963_v3 = vld [vmem:[#allocation3 + $0xc] sm:$0xff]   ;;  %v6673_v59 = vld [vmem:[#allocation3 + $0x1c] sm:$0xf]  ;;  %12509 = vmatpush3.bf16.msra.mxu0 %v13008_v1 }
 0x309   : > { %v5771_v35 = vor.u32 %v5769_v37, %v15187_v5  ;;  %v5772_v38 = vrot.slane %v15187_v5, 4  ;;  %v11200_v24 = vcombine.low %v6772_v39, %v6775_v42  ;;  %v6249_v58 = vsel %vm13474_vm11, %v6244_v20, %v6248_v0  ;;  %v6674_v37 = vld [vmem:[#allocation3 + $0x20] sm:$0x1]  ;;  %v15240_v5 = vld [vmem:[%s16340_s3] ss:$0 sm:$0xff] }
 0x30a   : > { %v6256_v13 = vrot.slane %v6254_v52, 5  ;;  %v11168_v55 = vcombine.low %v6239_v9, %v6249_v58  ;;  %v5334_v61 = vadd.f32 %v14969_v8, %v5295_v46  ;;  %v6262_v17 = vrot.slane %v6260_v23, 5 }
 0x30b   : > { %v5976_v48 = vsel %vm13486_vm13, %v5771_v35, %v5975_v30  ;;  %9765 = vmatmul.mubr.bf16.gmra.mrb[164].mxu0 %v11200_v24  ;;  %v5337_v25 = vadd.f32 %v14969_v8, %v5298_v50  ;;  %v6264_v0 = vshrl.u32 %v6161_v49, 16  ;;  %v6270_v12 = vshll.u32 %v6162_v27, 16  ;;  %v13012_v27 = vld [vmem:[#allocation10 + $0x178] sm:$0xff]   ;;  %v5968_v50 = vld [vmem:[#allocation3 + $0x84] sm:$0xf] }
 0x30c   : > { %5977 = vst [vmem:[#allocation3 + $0x90] sm:$0xf] %v5976_v48  ;;  %9772 = vmatprep.mubr.bf16.mxu0 %v12964_v63  ;;  %v6257_v54 = vor.u32 %v6256_v13, %v6253_v26  ;;  %9603 = vmatprep.mubr.bf16.mxu1 %v11168_v55  ;;  %v5366_v21 = vmax.f32 %v5334_v61, 0.0  ;;  %v5225_v44 = vadd.f32 %v15095_v41, %v14910_v2  ;;  %v11185_v9 = vrot.slane %v6672_v43, 9  ;;  %v13013_v55 = vld [vmem:[#allocation10 + $0x1a0] sm:$0xff]  }
 0x30d   : > { %v5246_v34 = vadd.f32 %v15120_v45, %v14936_v60  ;;  %9604 = vmatmul.mubr.bf16.gmra.mrb[132].mxu1 %v12963_v3  ;;  %v5369_v15 = vmax.f32 %v5337_v25, 0.0  ;;  %v6266_v28 = vrot.slane %v6264_v0, 4  ;;  %v6272_v29 = vrot.slane %v6270_v12, 5  ;;  %v13009_v60 = vld [vmem:[#allocation10 + $0x1e0] sm:$0xff]   ;;  %12404 = vmatprep.subr.bf16.mxu1 %v13012_v27  ;;  %v13014_v12 = vld [vmem:[#allocation10 + $0x138] sm:$0xff]   ;;  %v13016_v27 = vld [vmem:[#allocation10 + $0x1a8] sm:$0xff]  }
 0x30e   : > { %v6258_v39 = vrot.slane %v6257_v54, 4  ;;  %v11475_v32 = vpack.c.bf16 %v5366_v21, %v5366_v21  ;;  %v5296_v49 = vmul.f32 %v14963_v6, %v5225_v44  ;;  %v6778_v30 = vrot.slane %v6673_v59, 5  ;;  %12510 = vmatprep.subr.bf16.mxu0 %v13009_v60  ;;  %v5979_v3 = vld [vmem:[#allocation3 + $0x98] sm:$0x1]  ;;  %12405 = vmatpush3.bf16.msra.mxu1 %v13014_v12  ;;  %v6165_v60 = vld [vmem:[#allocation3 + $0x2c] sm:$0x1] }
 0x30f   : > { %v5301_v16 = vmul.f32 %v14963_v6, %v5246_v34  ;;  %v11478_v20 = vpack.c.bf16 %v5369_v15, %v5369_v15  ;;  %v6267_v41 = vor.u32 %v6266_v28, %v6262_v17  ;;  %v6781_v42 = vrot.slane %v6674_v37, 5  ;;  %v12965_v0 = vld [vmem:[#allocation3 + $0x18] sm:$0xff]   ;;  %12511 = vmatpush3.bf16.msra.mxu0 %v13013_v55  ;;  %v6164_v15 = vld [vmem:[#allocation3 + $0x28] sm:$0xf]  ;;  %v6675_v55 = vld [vmem:[#allocation3 + $0x24] sm:$0xe] }
 0x310   : > { %v6263_v2 = vsel %vm13474_vm11, %v6258_v39, %v6262_v17  ;;  %v5749_v45 = vshrl.u32 %v11475_v32, 16  ;;  %v5752_v52 = vshll.u32 %v11475_v32, 16  ;;  %v5335_v23 = vadd.f32 %v14969_v8, %v5296_v49  ;;  %v12966_v49 = vld [vmem:[#allocation3 + $0x30] sm:$0xff]  }
 0x311   : > { %v5340_v22 = vadd.f32 %v14969_v8, %v5301_v16  ;;  %v5774_v35 = vshrl.u32 %v11478_v20, 16  ;;  %v5777_v24 = vshll.u32 %v11478_v20, 16  ;;  %v6268_v46 = vrot.slane %v6267_v41, 4  ;;  %v5989_v20 = vld [vmem:[#allocation3 + $0xa8] sm:$0xf]  ;;  %v13020_v12 = vld [vmem:[#allocation10 + $0x1f8] sm:$0xff]  }
 0x312   : > { %v6779_v6 = vsel %vm13492_vm14, %v11185_v9, %v6778_v30  ;;  %v15217_v43 = vrot.slane %v5749_v45, 7  ;;  %v5367_v1 = vmax.f32 %v5335_v23, 0.0  ;;  %v6780_v63 = vrot.slane %v6778_v30, 4  ;;  %v5972_v30 = vld [vmem:[#allocation3 + $0x8c] sm:$0x1] }
 0x313   : > { %v5372_v58 = vmax.f32 %v5340_v22, 0.0  ;;  %v5776_v26 = vrot.slane %v5774_v35, 7  ;;  %v6273_v13 = vsel %vm13474_vm11, %v6268_v46, %v6272_v29  ;;  %v5238_v8 = vadd.f32 %v15126_v7, %v14926_v51  ;;  %v6163_v7 = vld [vmem:[#allocation3 + $0x24] sm:$0xf] }
 0x314   : > { %v5249_v48 = vadd.f32 %v15132_v53, %v14938_v31  ;;  %v5754_v61 = vor.u32 %v5752_v52, %v15217_v43  ;;  %v5755_v17 = vrot.slane %v15217_v43, 4  ;;  %v11169_v25 = vcombine.low %v6263_v2, %v6273_v13  ;;  %v13015_v31 = vld [vmem:[#allocation10 + $0x1e8] sm:$0xff]  }
 0x315   : > { %v11476_v54 = vpack.c.bf16 %v5367_v1, %v5367_v1  ;;  %v5779_v59 = vor.u32 %v5777_v24, %v5776_v26  ;;  %v5781_v21 = vrot.slane %v5776_v26, 4  ;;  %v11481_v44 = vpack.c.bf16 %v5372_v58, %v5372_v58  ;;  %12512 = vmatprep.subr.bf16.mxu0 %v13015_v31  ;;  %v15249_v24 = vld [vmem:[%s16341_s4] ss:$0 sm:$0xff] }
 0x316   : > { %v6782_v51 = vsel %vm13492_vm14, %v6780_v63, %v6781_v42  ;;  %v5969_v53 = vsel %vm13486_vm13, %v5754_v61, %v5968_v50  ;;  %9611 = vmatprep.mubr.bf16.mxu1 %v11169_v25  ;;  %v5302_v2 = vmul.f32 %v15240_v5, %v5249_v48  ;;  %v6275_v41 = vshrl.u32 %v6163_v7, 16  ;;  %v13017_v50 = vld [vmem:[#allocation10 + $0x1f0] sm:$0xff]   ;;  %12513 = vmatpush3.bf16.msra.mxu0 %v13016_v27 }
 0x317   : > { %v5757_v34 = vshrl.u32 %v11476_v54, 16  ;;  %v5760_v37 = vshll.u32 %v11476_v54, 16  ;;  %v11201_v9 = vcombine.low %v6779_v6, %v6782_v51  ;;  %5970 = vst [vmem:[#allocation3 + $0x84] sm:$0xf] %v5969_v53  ;;  %v5780_v39 = vsel %vm13480_vm12, %v5772_v38, %v5779_v59  ;;  %9612 = vmatmul.mubr.bf16.gmra.mrb[136].mxu1 %v12965_v0  ;;  %12514 = vmatprep.subr.bf16.mxu0 %v13017_v50  ;;  %v13019_v0 = vld [vmem:[#allocation10 + $0x1b0] sm:$0xff]  }
 0x318   : > { %v5980_v28 = vsel %vm13456_vm3, %v5781_v21, %v5979_v3  ;;  %v5800_v29 = vshrl.u32 %v11481_v44, 16  ;;  %v5803_v32 = vshll.u32 %v11481_v44, 16  ;;  %5978 = vst [vmem:[#allocation3 + $0x94] sm:$0xf] %v5780_v39  ;;  %v5299_v38 = vmul.f32 %v15240_v5, %v5238_v8  ;;  %v6676_v51 = vld [vmem:[#allocation3 + $0x28] sm:$0xf] }
 0x319   : > { %5981 = vst [vmem:[#allocation3 + $0x98] sm:$0x1] %v5980_v28  ;;  %v5759_v16 = vrot.slane %v5757_v34, 7  ;;  %9773 = vmatmul.mubr.bf16.gmra.mrb[168].mxu0 %v11201_v9  ;;  %v6278_v45 = vshll.u32 %v6163_v7, 16  ;;  %v6284_v52 = vshll.u32 %v6164_v15, 16  ;;  %v6288_v23 = vshrl.u32 %v6164_v15, 16 }
 0x31a   : > { %v15244_v42 = vrot.slane %v5800_v29, 7  ;;  %9780 = vmatprep.mubr.bf16.mxu0 %v12966_v49  ;;  %v5338_v46 = vadd.f32 %v15249_v24, %v5299_v38  ;;  %v5341_v6 = vadd.f32 %v15249_v24, %v5302_v2  ;;  %v6277_v58 = vrot.slane %v6275_v41, 4  ;;  %v6677_v34 = vld [vmem:[#allocation3 + $0x2c] sm:$0x1]  ;;  %12515 = vmatpush3.bf16.msra.mxu0 %v13019_v0  ;;  %v13021_v29 = vld [vmem:[#allocation10 + $0x1b8] sm:$0xff]  }
 0x31b   : > { %v5762_v22 = vor.u32 %v5760_v37, %v5759_v16  ;;  %v5764_v35 = vrot.slane %v5759_v16, 4  ;;  %v6280_v63 = vrot.slane %v6278_v45, 5  ;;  %v6286_v25 = vrot.slane %v6284_v52, 5  ;;  %12516 = vmatprep.subr.bf16.mxu0 %v13020_v12  ;;  %v5993_v38 = vld [vmem:[#allocation3 + $0xb0] sm:$0x1]  ;;  %v13023_v52 = vld [vmem:[#allocation10 + $0x200] sm:$0xff]  }
 0x31c   : > { %v5805_v43 = vor.u32 %v5803_v32, %v15244_v42  ;;  %v5806_v1 = vrot.slane %v15244_v42, 4  ;;  %v5370_v8 = vmax.f32 %v5338_v46, 0.0  ;;  %v5373_v48 = vmax.f32 %v5341_v6, 0.0  ;;  %v6167_v50 = vld [vmem:[#allocation3 + $0x34] sm:$0xf]  ;;  %12686 = vmatprep.subr.bf16.mxu1 %v13023_v52 }
 0x31d   : > { %v5763_v26 = vsel %vm13480_vm12, %v5755_v17, %v5762_v22  ;;  %v5973_v13 = vsel %vm13456_vm3, %v5764_v35, %v5972_v30  ;;  %v6281_v3 = vor.u32 %v6280_v63, %v6277_v58  ;;  %v6290_v54 = vrot.slane %v6288_v23, 4  ;;  %v6166_v63 = vld [vmem:[#allocation3 + $0x30] sm:$0xf] }
 0x31e   : > { %5971 = vst [vmem:[#allocation3 + $0x88] sm:$0xf] %v5763_v26  ;;  %5974 = vst [vmem:[#allocation3 + $0x8c] sm:$0x1] %v5973_v13  ;;  %v5990_v61 = vsel %vm13486_vm13, %v5805_v43, %v5989_v20  ;;  %v11479_v17 = vpack.c.bf16 %v5370_v8, %v5370_v8  ;;  %v11482_v59 = vpack.c.bf16 %v5373_v48, %v5373_v48  ;;  %v6294_v21 = vshll.u32 %v6165_v60, 16  ;;  %v12969_v8 = vld [vmem:[#allocation3 + $0x24] sm:$0xff]  }
 0x31f   : > { %5991 = vst [vmem:[#allocation3 + $0xa8] sm:$0xf] %v5990_v61  ;;  %v5241_v44 = vadd.f32 %v15135_v40, %v14928_v57  ;;  %v6282_v7 = vrot.slane %v6281_v3, 4  ;;  %v6291_v31 = vor.u32 %v6290_v54, %v6286_v25  ;;  %v5262_v53 = vadd.f32 %v15143_v62, %v14978_v14  ;;  %v5982_v20 = vld [vmem:[#allocation3 + $0x9c] sm:$0xf]  ;;  %12517 = vmatpush3.bf16.msra.mxu0 %v13021_v29  ;;  %v16489_v3 = vld [vmem:[#allocation44_spill] sm:$0xff] }
 0x320   : > { %v11186_v37 = vrot.slane %v6675_v55, 9  ;;  %v5783_v9 = vshrl.u32 %v11479_v17, 16  ;;  %v5786_v15 = vshll.u32 %v11479_v17, 16  ;;  %v5808_v39 = vshrl.u32 %v11482_v59, 16 }
 0x321   : > { %v5811_v28 = vshll.u32 %v11482_v59, 16  ;;  %v6287_v32 = vsel %vm13474_vm11, %v6282_v7, %v6286_v25  ;;  %v6292_v49 = vrot.slane %v6291_v31, 4  ;;  %v6296_v16 = vrot.slane %v6294_v21, 5  ;;  %v12970_v7 = vld [vmem:[#allocation3 + $0x3c] sm:$0xff]  }
 0x322   : > { %v5300_v57 = vmul.f32 %v15240_v5, %v5241_v44  ;;  %v15268_v40 = vrot.slane %v5783_v9, 7  ;;  %v5810_v30 = vrot.slane %v5808_v39, 7  ;;  %v5305_v14 = vmul.f32 %v15240_v5, %v5262_v53  ;;  %v6168_v44 = vld [vmem:[#allocation3 + $0x38] sm:$0x1]  ;;  %v5986_v39 = vld [vmem:[#allocation3 + $0xa4] sm:$0x1] }
 0x323   : > { %v6785_v62 = vrot.slane %v6676_v51, 5  ;;  %v6297_v2 = vsel %vm13474_vm11, %v6292_v49, %v6296_v16  ;;  %v6788_v60 = vrot.slane %v6677_v34, 5  ;;  %v5254_v45 = vadd.f32 %v15151_v4, %v14955_v10 }
 0x324   : > { %v5339_v41 = vadd.f32 %v15249_v24, %v5300_v57  ;;  %v5788_v23 = vor.u32 %v5786_v15, %v15268_v40  ;;  %v5789_v22 = vrot.slane %v15268_v40, 4  ;;  %v5813_v35 = vor.u32 %v5811_v28, %v5810_v30  ;;  %v6003_v28 = vld [vmem:[#allocation3 + $0xc0] sm:$0xf] }
 0x325   : > { %v5815_v46 = vrot.slane %v5810_v30, 4  ;;  %v11170_v6 = vcombine.low %v6287_v32, %v6297_v2  ;;  %v5344_v43 = vadd.f32 %v15249_v24, %v5305_v14  ;;  %v6786_v58 = vsel %vm13492_vm14, %v11186_v37, %v6785_v62 }
 0x326   : > { %v5371_v27 = vmax.f32 %v5339_v41, 0.0  ;;  %v5983_v10 = vsel %vm13486_vm13, %v5788_v23, %v5982_v20  ;;  %v5814_v4 = vsel %vm13480_vm12, %v5806_v1, %v5813_v35  ;;  %v6787_v13 = vrot.slane %v6785_v62, 4  ;;  %v6678_v62 = vld [vmem:[#allocation3 + $0x30] sm:$0xe]  ;;  %v6679_v35 = vld [vmem:[#allocation3 + $0x34] sm:$0xf] }
 0x327   : > { %v5994_v26 = vsel %vm13456_vm3, %v5815_v46, %v5993_v38  ;;  %5984 = vst [vmem:[#allocation3 + $0x9c] sm:$0xf] %v5983_v10  ;;  %5992 = vst [vmem:[#allocation3 + $0xac] sm:$0xf] %v5814_v4  ;;  %9619 = vmatprep.mubr.bf16.mxu1 %v11170_v6  ;;  %v5376_v55 = vmax.f32 %v5344_v43, 0.0  ;;  %v5303_v61 = vmul.f32 %v15240_v5, %v5254_v45  ;;  %v6299_v1 = vshrl.u32 %v6166_v63, 16 }
 0x328   : > { %5995 = vst [vmem:[#allocation3 + $0xb0] sm:$0x1] %v5994_v26  ;;  %v11480_v48 = vpack.c.bf16 %v5371_v27, %v5371_v27  ;;  %v5265_v25 = vadd.f32 %v15159_v36, %v16489_v3  ;;  %v6789_v42 = vsel %vm13492_vm14, %v6787_v13, %v6788_v60  ;;  %9620 = vmatmul.mubr.bf16.gmra.mrb[140].mxu1 %v12969_v8  ;;  %v6302_v54 = vshll.u32 %v6166_v63, 16  ;;  %v16490_v10 = vld [vmem:[#allocation39_spill] sm:$0xff]  ;;  %v5996_v8 = vld [vmem:[#allocation3 + $0xb4] sm:$0xf] }
 0x329   : > { %v6308_v0 = vshll.u32 %v6167_v50, 16  ;;  %v11485_v59 = vpack.c.bf16 %v5376_v55, %v5376_v55  ;;  %v11202_v21 = vcombine.low %v6786_v58, %v6789_v42  ;;  %v5342_v51 = vadd.f32 %v15249_v24, %v5303_v61  ;;  %v6680_v58 = vld [vmem:[#allocation3 + $0x38] sm:$0x1]  ;;  %v6169_v26 = vld [vmem:[#allocation3 + $0x3c] sm:$0xf] }
 0x32a   : > { %v5791_v12 = vshrl.u32 %v11480_v48, 16  ;;  %v5794_v17 = vshll.u32 %v11480_v48, 16  ;;  %v5306_v31 = vmul.f32 %v15240_v5, %v5265_v25  ;;  %v6301_v53 = vrot.slane %v6299_v1, 4  ;;  %v6007_v3 = vld [vmem:[#allocation3 + $0xc8] sm:$0x1] }
 0x32b   : > { %v6304_v34 = vrot.slane %v6302_v54, 5  ;;  %v5834_v37 = vshrl.u32 %v11485_v59, 16  ;;  %v5837_v9 = vshll.u32 %v11485_v59, 16  ;;  %9781 = vmatmul.mubr.bf16.gmra.mrb[172].mxu0 %v11202_v21  ;;  %v6310_v15 = vrot.slane %v6308_v0, 5  ;;  %v6170_v0 = vld [vmem:[#allocation3 + $0x40] sm:$0xf] }
 0x32c   : > { %v5793_v36 = vrot.slane %v5791_v12, 7  ;;  %v5374_v29 = vmax.f32 %v5342_v51, 0.0  ;;  %9788 = vmatprep.mubr.bf16.mxu0 %v12970_v7  ;;  %v5345_v32 = vadd.f32 %v15249_v24, %v5306_v31  ;;  %v6312_v16 = vshrl.u32 %v6167_v50, 16  ;;  %v6171_v59 = vld [vmem:[#allocation3 + $0x44] sm:$0x1] }
 0x32d   : > { %v6305_v49 = vor.u32 %v6304_v34, %v6301_v53  ;;  %v5836_v30 = vrot.slane %v5834_v37, 7  ;;  %v6318_v14 = vshll.u32 %v6168_v44, 16  ;;  %v5257_v4 = vadd.f32 %v15163_v18, %v16490_v10 }
 0x32e   : > { %v5796_v57 = vor.u32 %v5794_v17, %v5793_v36  ;;  %v5798_v40 = vrot.slane %v5793_v36, 4  ;;  %v11483_v20 = vpack.c.bf16 %v5374_v29, %v5374_v29  ;;  %v5377_v38 = vmax.f32 %v5345_v32, 0.0  ;;  %v12971_v29 = vld [vmem:[#allocation3 + $0x30] sm:$0xff]  }
 0x32f   : > { %v6306_v2 = vrot.slane %v6305_v49, 4  ;;  %v6314_v41 = vrot.slane %v6312_v16, 4  ;;  %v5839_v52 = vor.u32 %v5837_v9, %v5836_v30  ;;  %v5840_v23 = vrot.slane %v5836_v30, 4  ;;  %v6682_v9 = vld [vmem:[#allocation3 + $0x40] sm:$0xf]  ;;  %v12972_v30 = vld [vmem:[#allocation3 + $0x48] sm:$0xff]  }
 0x330   : > { %v5797_v60 = vsel %vm13480_vm12, %v5789_v22, %v5796_v57  ;;  %v5987_v45 = vsel %vm13456_vm3, %v5798_v40, %v5986_v39  ;;  %v5817_v46 = vshrl.u32 %v11483_v20, 16  ;;  %v5820_v6 = vshll.u32 %v11483_v20, 16 }
 0x331   : > { %5985 = vst [vmem:[#allocation3 + $0xa0] sm:$0xf] %v5797_v60  ;;  %5988 = vst [vmem:[#allocation3 + $0xa4] sm:$0x1] %v5987_v45  ;;  %v11486_v27 = vpack.c.bf16 %v5377_v38, %v5377_v38  ;;  %v6311_v43 = vsel %vm13474_vm11, %v6306_v2, %v6310_v15  ;;  %v6004_v63 = vsel %vm13486_vm13, %v5839_v52, %v6003_v28  ;;  %v6320_v22 = vrot.slane %v6318_v14, 5 }
 0x332   : > { %v6315_v50 = vor.u32 %v6314_v41, %v6310_v15  ;;  %6005 = vst [vmem:[#allocation3 + $0xc0] sm:$0xf] %v6004_v63  ;;  %v15307_v13 = vrot.slane %v5817_v46, 7  ;;  %v11187_v61 = vrot.slane %v6678_v62, 9  ;;  %v5304_v42 = vmul.f32 %v15240_v5, %v5257_v4  ;;  %v6681_v5 = vld [vmem:[#allocation3 + $0x3c] sm:$0xe] }
 0x333   : > { %v5842_v48 = vshrl.u32 %v11486_v27, 16  ;;  %v5845_v55 = vshll.u32 %v11486_v27, 16  ;;  %v6792_v1 = vrot.slane %v6679_v35, 5  ;;  %v6795_v54 = vrot.slane %v6680_v58, 5  ;;  %v6683_v15 = vld [vmem:[#allocation3 + $0x44] sm:$0x1] }
 0x334   : > { %v6316_v25 = vrot.slane %v6315_v50, 4  ;;  %v5822_v12 = vor.u32 %v5820_v6, %v15307_v13  ;;  %v5823_v17 = vrot.slane %v15307_v13, 4  ;;  %v6323_v21 = vshrl.u32 %v6169_v26, 16  ;;  %v6172_v38 = vld [vmem:[#allocation3 + $0x48] sm:$0xf] }
 0x335   : > { %v5844_v18 = vrot.slane %v5842_v48, 7  ;;  %v5343_v51 = vadd.f32 %v15249_v24, %v5304_v42  ;;  %v6793_v7 = vsel %vm13492_vm14, %v11187_v61, %v6792_v1  ;;  %v6794_v31 = vrot.slane %v6792_v1, 4  ;;  %v6173_v52 = vld [vmem:[#allocation3 + $0x4c] sm:$0xf]  ;;  %v6000_v27 = vld [vmem:[#allocation3 + $0xbc] sm:$0x1] }
 0x336   : > { %v6321_v44 = vsel %vm13474_vm11, %v6316_v25, %v6320_v22  ;;  %v5997_v53 = vsel %vm13486_vm13, %v5822_v12, %v5996_v8  ;;  %v6325_v24 = vrot.slane %v6323_v21, 4  ;;  %v6326_v32 = vshll.u32 %v6169_v26, 16  ;;  %v6174_v50 = vld [vmem:[#allocation3 + $0x50] sm:$0x1]  ;;  %v6684_v48 = vld [vmem:[#allocation3 + $0x48] sm:$0xe] }
 0x337   : > { %v5847_v34 = vor.u32 %v5845_v55, %v5844_v18  ;;  %v5849_v36 = vrot.slane %v5844_v18, 4  ;;  %v11171_v37 = vcombine.low %v6311_v43, %v6321_v44  ;;  %5998 = vst [vmem:[#allocation3 + $0xb4] sm:$0xf] %v5997_v53  ;;  %v5375_v39 = vmax.f32 %v5343_v51, 0.0  ;;  %v6685_v42 = vld [vmem:[#allocation3 + $0x4c] sm:$0xf] }
 0x338   : > { %v6796_v28 = vsel %vm13492_vm14, %v6794_v31, %v6795_v54  ;;  %v6332_v57 = vshll.u32 %v6170_v0, 16  ;;  %v6328_v14 = vrot.slane %v6326_v32, 5  ;;  %v6336_v62 = vshrl.u32 %v6170_v0, 16  ;;  %v6686_v18 = vld [vmem:[#allocation3 + $0x50] sm:$0x1] }
 0x339   : > { %v5848_v49 = vsel %vm13480_vm12, %v5840_v23, %v5847_v34  ;;  %v6008_v19 = vsel %vm13456_vm3, %v5849_v36, %v6007_v3  ;;  %9627 = vmatprep.mubr.bf16.mxu1 %v11171_v37  ;;  %v11203_v16 = vcombine.low %v6793_v7, %v6796_v28  ;;  %v11484_v40 = vpack.c.bf16 %v5375_v39, %v5375_v39  ;;  %v12976_v34 = vld [vmem:[#allocation3 + $0x54] sm:$0xff]  }
 0x33a   : > { %6006 = vst [vmem:[#allocation3 + $0xc4] sm:$0xf] %v5848_v49  ;;  %6009 = vst [vmem:[#allocation3 + $0xc8] sm:$0x1] %v6008_v19  ;;  %9628 = vmatmul.mubr.bf16.gmra.mrb[144].mxu1 %v12971_v29  ;;  %v6342_v20 = vshll.u32 %v6171_v59, 16  ;;  %v6334_v2 = vrot.slane %v6332_v57, 5  ;;  %v6329_v46 = vor.u32 %v6328_v14, %v6325_v24 }
 0x33b   : > { %9789 = vmatmul.mubr.bf16.gmra.mrb[176].mxu0 %v11203_v16  ;;  %v11188_v41 = vrot.slane %v6681_v5, 9  ;;  %v6799_v60 = vrot.slane %v6682_v9, 5  ;;  %v6802_v45 = vrot.slane %v6683_v15, 5  ;;  %v5825_v23 = vshrl.u32 %v11484_v40, 16  ;;  %v6175_v59 = vld [vmem:[#allocation3 + $0x54] sm:$0xf] }
 0x33c   : > { %v5828_v35 = vshll.u32 %v11484_v40, 16  ;;  %9796 = vmatprep.mubr.bf16.mxu0 %v12972_v30  ;;  %v6338_v6 = vrot.slane %v6336_v62, 4  ;;  %v6344_v43 = vrot.slane %v6342_v20, 5  ;;  %v6347_v22 = vshrl.u32 %v6172_v38, 16  ;;  %v6176_v37 = vld [vmem:[#allocation3 + $0x58] sm:$0xf] }
 0x33d   : > { %v6800_v58 = vsel %vm13492_vm14, %v11188_v41, %v6799_v60  ;;  %v6801_v63 = vrot.slane %v6799_v60, 4  ;;  %v5827_v10 = vrot.slane %v5825_v23, 7  ;;  %v6330_v4 = vrot.slane %v6329_v46, 4  ;;  %v12975_v15 = vld [vmem:[#allocation3 + $0x3c] sm:$0xff]   ;;  %v6687_v32 = vld [vmem:[#allocation3 + $0x54] sm:$0xe] }
 0x33e   : > { %v6339_v26 = vor.u32 %v6338_v6, %v6334_v2  ;;  %v6350_v8 = vshll.u32 %v6172_v38, 16  ;;  %v6349_v61 = vrot.slane %v6347_v22, 4  ;;  %v6356_v3 = vshll.u32 %v6173_v52, 16  ;;  %v6177_v29 = vld [vmem:[#allocation3 + $0x5c] sm:$0x1] }
 0x33f   : > { %v6803_v55 = vsel %vm13492_vm14, %v6801_v63, %v6802_v45  ;;  %v6360_v25 = vshrl.u32 %v6173_v52, 16  ;;  %v5830_v1 = vor.u32 %v5828_v35, %v5827_v10  ;;  %v5832_v54 = vrot.slane %v5827_v10, 4  ;;  %v6688_v49 = vld [vmem:[#allocation3 + $0x58] sm:$0xf]  ;;  %v6689_v30 = vld [vmem:[#allocation3 + $0x5c] sm:$0x1] }
 0x340   : > { %v6335_v0 = vsel %vm13474_vm11, %v6330_v4, %v6334_v2  ;;  %v6340_v12 = vrot.slane %v6339_v26, 4  ;;  %v11204_v21 = vcombine.low %v6800_v58, %v6803_v55  ;;  %v6352_v44 = vrot.slane %v6350_v8, 5  ;;  %v6178_v52 = vld [vmem:[#allocation3 + $0x60] sm:$0xf]  ;;  %v6180_v22 = vld [vmem:[#allocation3 + $0x68] sm:$0x1] }
 0x341   : > { %v6358_v51 = vrot.slane %v6356_v3, 5  ;;  %v6362_v7 = vrot.slane %v6360_v25, 4  ;;  %v5831_v31 = vsel %vm13480_vm12, %v5823_v17, %v5830_v1  ;;  %v6001_v5 = vsel %vm13456_vm3, %v5832_v54, %v6000_v27  ;;  %v12978_v10 = vld [vmem:[#allocation3 + $0x60] sm:$0xff]   ;;  %v12977_v55 = vld [vmem:[#allocation3 + $0x48] sm:$0xff]  }
 0x342   : > { %v6345_v53 = vsel %vm13474_vm11, %v6340_v12, %v6344_v43  ;;  %v6366_v36 = vshll.u32 %v6174_v50, 16  ;;  %5999 = vst [vmem:[#allocation3 + $0xb8] sm:$0xf] %v5831_v31  ;;  %6002 = vst [vmem:[#allocation3 + $0xbc] sm:$0x1] %v6001_v5  ;;  %v6353_v39 = vor.u32 %v6352_v44, %v6349_v61  ;;  %v11189_v13 = vrot.slane %v6684_v48, 9 }
 0x343   : > { %v11172_v9 = vcombine.low %v6335_v0, %v6345_v53  ;;  %9797 = vmatmul.mubr.bf16.gmra.mrb[180].mxu0 %v11204_v21  ;;  %v6363_v28 = vor.u32 %v6362_v7, %v6358_v51  ;;  %v6806_v17 = vrot.slane %v6685_v42, 5  ;;  %v6809_v47 = vrot.slane %v6686_v18, 5  ;;  %v6179_v50 = vld [vmem:[#allocation3 + $0x64] sm:$0xf]  ;;  %v6690_v1 = vld [vmem:[#allocation3 + $0x60] sm:$0xe] }
 0x344   : > { %9804 = vmatprep.mubr.bf16.mxu0 %v12976_v34  ;;  %v6368_v33 = vrot.slane %v6366_v36, 5  ;;  %v6371_v24 = vshrl.u32 %v6175_v59, 16  ;;  %v6354_v19 = vrot.slane %v6353_v39, 4  ;;  %v6374_v57 = vshll.u32 %v6175_v59, 16  ;;  %v6691_v59 = vld [vmem:[#allocation3 + $0x64] sm:$0xf] }
 0x345   : > { %9635 = vmatprep.mubr.bf16.mxu1 %v11172_v9  ;;  %v6364_v16 = vrot.slane %v6363_v28, 4  ;;  %v6380_v40 = vshll.u32 %v6176_v37, 16  ;;  %v6807_v14 = vsel %vm13492_vm14, %v11189_v13, %v6806_v17  ;;  %v6808_v62 = vrot.slane %v6806_v17, 4  ;;  %v6692_v31 = vld [vmem:[#allocation3 + $0x68] sm:$0x1] }
 0x346   : > { %9636 = vmatmul.mubr.bf16.gmra.mrb[148].mxu1 %v12975_v15  ;;  %v6373_v20 = vrot.slane %v6371_v24, 4  ;;  %v6384_v38 = vshrl.u32 %v6176_v37, 16  ;;  %v6359_v2 = vsel %vm13474_vm11, %v6354_v19, %v6358_v51  ;;  %v6376_v60 = vrot.slane %v6374_v57, 5  ;;  %v6181_v5 = vld [vmem:[#allocation3 + $0x6c] sm:$0xf] }
 0x347   : > { %v6369_v41 = vsel %vm13474_vm11, %v6364_v16, %v6368_v33  ;;  %v6382_v45 = vrot.slane %v6380_v40, 5  ;;  %v6810_v35 = vsel %vm13492_vm14, %v6808_v62, %v6809_v47  ;;  %v6390_v6 = vshll.u32 %v6177_v29, 16  ;;  %v6182_v9 = vld [vmem:[#allocation3 + $0x70] sm:$0xf]  ;;  %v6183_v29 = vld [vmem:[#allocation3 + $0x74] sm:$0x1] }
 0x348   : > { %v11173_v23 = vcombine.low %v6359_v2, %v6369_v41  ;;  %v6386_v46 = vrot.slane %v6384_v38, 4  ;;  %v11205_v27 = vcombine.low %v6807_v14, %v6810_v35  ;;  %v6377_v43 = vor.u32 %v6376_v60, %v6373_v20  ;;  %v6694_v40 = vld [vmem:[#allocation3 + $0x70] sm:$0xf]  ;;  %v12981_v35 = vld [vmem:[#allocation3 + $0x54] sm:$0xff]  }
 0x349   : > { %v11190_v58 = vrot.slane %v6687_v32, 9  ;;  %v6813_v63 = vrot.slane %v6688_v49, 5  ;;  %v6392_v26 = vrot.slane %v6390_v6, 5  ;;  %v6816_v8 = vrot.slane %v6689_v30, 5  ;;  %v6693_v32 = vld [vmem:[#allocation3 + $0x6c] sm:$0xe] }
 0x34a   : > { %9643 = vmatprep.mubr.bf16.mxu1 %v11173_v23  ;;  %v6387_v4 = vor.u32 %v6386_v46, %v6382_v45  ;;  %v6395_v48 = vshrl.u32 %v6178_v52, 16  ;;  %v6378_v61 = vrot.slane %v6377_v43, 4  ;;  %v6398_v42 = vshll.u32 %v6178_v52, 16  ;;  %v6695_v30 = vld [vmem:[#allocation3 + $0x74] sm:$0x1]  ;;  %v12982_v14 = vld [vmem:[#allocation3 + $0x6c] sm:$0xff]  }
 0x34b   : > { %9805 = vmatmul.mubr.bf16.gmra.mrb[184].mxu0 %v11205_v27  ;;  %v6814_v3 = vsel %vm13492_vm14, %v11190_v58, %v6813_v63  ;;  %v6815_v25 = vrot.slane %v6813_v63, 4  ;;  %v6404_v12 = vshll.u32 %v6179_v50, 16  ;;  %v6408_v18 = vshrl.u32 %v6179_v50, 16  ;;  %v6184_v23 = vld [vmem:[#allocation3 + $0x78] sm:$0xf] }
 0x34c   : > { %9812 = vmatprep.mubr.bf16.mxu0 %v12978_v10  ;;  %v6388_v54 = vrot.slane %v6387_v4, 4  ;;  %v6397_v0 = vrot.slane %v6395_v48, 4  ;;  %v6383_v21 = vsel %vm13474_vm11, %v6378_v61, %v6382_v45  ;;  %v6400_v51 = vrot.slane %v6398_v42, 5  ;;  %v6185_v58 = vld [vmem:[#allocation3 + $0x7c] sm:$0xf] }
 0x34d   : > { %v6817_v44 = vsel %vm13492_vm14, %v6815_v25, %v6816_v8  ;;  %v6414_v7 = vshll.u32 %v6180_v22, 16  ;;  %v6406_v36 = vrot.slane %v6404_v12, 5  ;;  %v6410_v37 = vrot.slane %v6408_v18, 4  ;;  %v6186_v4 = vld [vmem:[#allocation3 + $0x80] sm:$0x1] }
 0x34e   : > { %9644 = vmatmul.mubr.bf16.gmra.mrb[152].mxu1 %v12977_v55  ;;  %v6393_v53 = vsel %vm13474_vm11, %v6388_v54, %v6392_v26  ;;  %v11206_v34 = vcombine.low %v6814_v3, %v6817_v44  ;;  %v6401_v39 = vor.u32 %v6400_v51, %v6397_v0  ;;  %v11191_v13 = vrot.slane %v6690_v1, 9  ;;  %v6696_v61 = vld [vmem:[#allocation3 + $0x78] sm:$0xe]  ;;  %v6697_v3 = vld [vmem:[#allocation3 + $0x7c] sm:$0xf] }
 0x34f   : > { %v11174_v15 = vcombine.low %v6383_v21, %v6393_v53  ;;  %v6416_v28 = vrot.slane %v6414_v7, 5  ;;  %v6411_v33 = vor.u32 %v6410_v37, %v6406_v36  ;;  %v6820_v17 = vrot.slane %v6691_v59, 5  ;;  %v6698_v0 = vld [vmem:[#allocation3 + $0x80] sm:$0x1]  ;;  %v6187_v44 = vld [vmem:[#allocation3 + $0x84] sm:$0xf] }
 0x350   : > { %v6823_v47 = vrot.slane %v6692_v31, 5  ;;  %v6419_v24 = vshrl.u32 %v6181_v5, 16  ;;  %v6402_v49 = vrot.slane %v6401_v39, 4  ;;  %v6422_v19 = vshll.u32 %v6181_v5, 16  ;;  %v12986_v53 = vld [vmem:[#allocation3 + $0x78] sm:$0xff]  }
 0x351   : > { %9651 = vmatprep.mubr.bf16.mxu1 %v11174_v15  ;;  %v6428_v16 = vshll.u32 %v6182_v9, 16  ;;  %v6432_v57 = vshrl.u32 %v6182_v9, 16  ;;  %v6412_v62 = vrot.slane %v6411_v33, 4  ;;  %v6821_v20 = vsel %vm13492_vm14, %v11191_v13, %v6820_v17  ;;  %v12985_v33 = vld [vmem:[#allocation3 + $0x60] sm:$0xff]  }
 0x352   : > { %v6822_v38 = vrot.slane %v6820_v17, 4  ;;  %v6421_v2 = vrot.slane %v6419_v24, 4  ;;  %v6407_v41 = vsel %vm13474_vm11, %v6402_v49, %v6406_v36  ;;  %v6424_v60 = vrot.slane %v6422_v19, 5 }
 0x353   : > { %9813 = vmatmul.mubr.bf16.gmra.mrb[188].mxu0 %v11206_v34  ;;  %v6430_v45 = vrot.slane %v6428_v16, 5  ;;  %v6434_v52 = vrot.slane %v6432_v57, 4  ;;  %v6417_v46 = vsel %vm13474_vm11, %v6412_v62, %v6416_v28  ;;  %v6438_v27 = vshll.u32 %v6183_v29, 16  ;;  %v6188_v29 = vld [vmem:[#allocation3 + $0x88] sm:$0xf] }
 0x354   : > { %9820 = vmatprep.mubr.bf16.mxu0 %v12982_v14  ;;  %v6824_v6 = vsel %vm13492_vm14, %v6822_v38, %v6823_v47  ;;  %v11192_v43 = vrot.slane %v6693_v32, 9  ;;  %v11175_v63 = vcombine.low %v6407_v41, %v6417_v46  ;;  %v6425_v22 = vor.u32 %v6424_v60, %v6421_v2  ;;  %v6189_v32 = vld [vmem:[#allocation3 + $0x8c] sm:$0x1]  ;;  %v6190_v14 = vld [vmem:[#allocation3 + $0x90] sm:$0xf] }
 0x355   : > { %v11207_v50 = vcombine.low %v6821_v20, %v6824_v6  ;;  %v6435_v10 = vor.u32 %v6434_v52, %v6430_v45  ;;  %v6440_v26 = vrot.slane %v6438_v27, 5  ;;  %v6827_v8 = vrot.slane %v6694_v40, 5  ;;  %v6191_v41 = vld [vmem:[#allocation3 + $0x94] sm:$0xf]  ;;  %v6701_v46 = vld [vmem:[#allocation3 + $0x8c] sm:$0x1] }
 0x356   : > { %9652 = vmatmul.mubr.bf16.gmra.mrb[156].mxu1 %v12981_v35  ;;  %v6830_v48 = vrot.slane %v6695_v30, 5  ;;  %v6443_v55 = vshrl.u32 %v6184_v23, 16  ;;  %v6426_v25 = vrot.slane %v6425_v22, 4  ;;  %v6446_v1 = vshll.u32 %v6184_v23, 16  ;;  %v6699_v30 = vld [vmem:[#allocation3 + $0x84] sm:$0xe] }
 0x357   : > { %9659 = vmatprep.mubr.bf16.mxu1 %v11175_v63  ;;  %v6436_v42 = vrot.slane %v6435_v10, 4  ;;  %v6452_v54 = vshll.u32 %v6185_v58, 16  ;;  %v6828_v12 = vsel %vm13492_vm14, %v11192_v43, %v6827_v8  ;;  %v6829_v18 = vrot.slane %v6827_v8, 4  ;;  %v6700_v35 = vld [vmem:[#allocation3 + $0x88] sm:$0xf] }
 0x358   : > { %v6445_v59 = vrot.slane %v6443_v55, 4  ;;  %v6456_v21 = vshrl.u32 %v6185_v58, 16  ;;  %v6431_v51 = vsel %vm13474_vm11, %v6426_v25, %v6430_v45  ;;  %v6448_v31 = vrot.slane %v6446_v1, 5 }
 0x359   : > { %v6441_v7 = vsel %vm13474_vm11, %v6436_v42, %v6440_v26  ;;  %v6454_v5 = vrot.slane %v6452_v54, 5  ;;  %v6831_v36 = vsel %vm13492_vm14, %v6829_v18, %v6830_v48  ;;  %v6462_v9 = vshll.u32 %v6186_v4, 16  ;;  %v6702_v4 = vld [vmem:[#allocation3 + $0x90] sm:$0xe]  ;;  %v12990_v26 = vld [vmem:[#allocation3 + $0x84] sm:$0xff]  }
 0x35a   : > { %v11176_v34 = vcombine.low %v6431_v51, %v6441_v7  ;;  %v6458_v37 = vrot.slane %v6456_v21, 4  ;;  %v11208_v15 = vcombine.low %v6828_v12, %v6831_v36  ;;  %v6449_v39 = vor.u32 %v6448_v31, %v6445_v59  ;;  %v12989_v12 = vld [vmem:[#allocation3 + $0x6c] sm:$0xff]   ;;  %v6704_v51 = vld [vmem:[#allocation3 + $0x98] sm:$0x1] }
 0x35b   : > { %9821 = vmatmul.mubr.bf16.gmra.mrb[192].mxu0 %v11207_v50  ;;  %v11193_v28 = vrot.slane %v6696_v61, 9  ;;  %v6834_v13 = vrot.slane %v6697_v3, 5  ;;  %v6464_v47 = vrot.slane %v6462_v9, 5  ;;  %v6837_v24 = vrot.slane %v6698_v0, 5  ;;  %v6192_v61 = vld [vmem:[#allocation3 + $0x98] sm:$0x1] }
 0x35c   : > { %9828 = vmatprep.mubr.bf16.mxu0 %v12986_v53  ;;  %v6459_v17 = vor.u32 %v6458_v37, %v6454_v5  ;;  %v6467_v49 = vshrl.u32 %v6187_v44, 16  ;;  %v6450_v19 = vrot.slane %v6449_v39, 4  ;;  %v6470_v40 = vshll.u32 %v6187_v44, 16  ;;  %v6703_v0 = vld [vmem:[#allocation3 + $0x94] sm:$0xf] }
 0x35d   : > { %v15373_v16 = vsel %vm13492_vm14, %v11193_v28, %v6834_v13  ;;  %v6836_v57 = vrot.slane %v6834_v13, 4  ;;  %v6476_v38 = vshll.u32 %v6188_v29, 16  ;;  %v6480_v2 = vshrl.u32 %v6188_v29, 16  ;;  %v6194_v39 = vld [vmem:[#allocation3 + $0xa0] sm:$0xf] }
 0x35e   : > { %9660 = vmatmul.mubr.bf16.gmra.mrb[160].mxu1 %v12985_v33  ;;  %v6460_v62 = vrot.slane %v6459_v17, 4  ;;  %v6469_v20 = vrot.slane %v6467_v49, 4  ;;  %v6455_v60 = vsel %vm13474_vm11, %v6450_v19, %v6454_v5  ;;  %v6472_v52 = vrot.slane %v6470_v40, 5  ;;  %v6705_v49 = vld [vmem:[#allocation3 + $0x9c] sm:$0xe] }
 0x35f   : > { %9667 = vmatprep.mubr.bf16.mxu1 %v11176_v34  ;;  %v15379_v45 = vsel %vm13492_vm14, %v6836_v57, %v6837_v24  ;;  %v6486_v23 = vshll.u32 %v6189_v32, 16  ;;  %v6478_v43 = vrot.slane %v6476_v38, 5  ;;  %v6482_v58 = vrot.slane %v6480_v2, 4  ;;  %v6193_v34 = vld [vmem:[#allocation3 + $0x9c] sm:$0xf] }
 0x360   : > { %v6465_v6 = vsel %vm13474_vm11, %v6460_v62, %v6464_v47  ;;  %v11209_v27 = vcombine.low %v15373_v16, %v15379_v45  ;;  %v6473_v50 = vor.u32 %v6472_v52, %v6469_v20  ;;  %v11194_v10 = vrot.slane %v6699_v30, 9  ;;  %v6195_v57 = vld [vmem:[#allocation3 + $0xa4] sm:$0x1] }
 0x361   : > { %v11177_v63 = vcombine.low %v6455_v60, %v6465_v6  ;;  %v6488_v22 = vrot.slane %v6486_v23, 5  ;;  %v6483_v8 = vor.u32 %v6482_v58, %v6478_v43  ;;  %v6841_v48 = vrot.slane %v6700_v35, 5  ;;  %v6707_v35 = vld [vmem:[#allocation3 + $0xa4] sm:$0x1]  ;;  %v12993_v6 = vld [vmem:[#allocation3 + $0x78] sm:$0xff]  }
 0x362   : > { %v6844_v55 = vrot.slane %v6701_v46, 5  ;;  %v6491_v3 = vshrl.u32 %v6190_v14, 16  ;;  %v6474_v25 = vrot.slane %v6473_v50, 4  ;;  %v6494_v42 = vshll.u32 %v6190_v14, 16  ;;  %v12994_v14 = vld [vmem:[#allocation3 + $0x90] sm:$0xff]  }
 0x363   : > { %9829 = vmatmul.mubr.bf16.gmra.mrb[196].mxu0 %v11208_v15  ;;  %v6500_v1 = vshll.u32 %v6191_v41, 16  ;;  %v6504_v54 = vshrl.u32 %v6191_v41, 16  ;;  %v6484_v18 = vrot.slane %v6483_v8, 4  ;;  %v15387_v59 = vsel %vm13492_vm14, %v11194_v10, %v6841_v48  ;;  %v6706_v41 = vld [vmem:[#allocation3 + $0xa0] sm:$0xf] }
 0x364   : > { %9836 = vmatprep.mubr.bf16.mxu0 %v12990_v26  ;;  %v6843_v21 = vrot.slane %v6841_v48, 4  ;;  %v6493_v44 = vrot.slane %v6491_v3, 4  ;;  %v6479_v7 = vsel %vm13474_vm11, %v6474_v25, %v6478_v43  ;;  %v6496_v31 = vrot.slane %v6494_v42, 5  ;;  %v6196_v46 = vld [vmem:[#allocation3 + $0xa8] sm:$0xf] }
 0x365   : > { %v6502_v5 = vrot.slane %v6500_v1, 5  ;;  %v6506_v53 = vrot.slane %v6504_v54, 4  ;;  %v6489_v36 = vsel %vm13474_vm11, %v6484_v18, %v6488_v22  ;;  %v6510_v9 = vshll.u32 %v6192_v61, 16  ;;  %v6197_v26 = vld [vmem:[#allocation3 + $0xac] sm:$0xf] }
 0x366   : > { %9668 = vmatmul.mubr.bf16.gmra.mrb[164].mxu1 %v12989_v12  ;;  %v15395_v37 = vsel %vm13492_vm14, %v6843_v21, %v6844_v55  ;;  %v11195_v15 = vrot.slane %v6702_v4, 9  ;;  %v11178_v28 = vcombine.low %v6479_v7, %v6489_v36  ;;  %v6497_v29 = vor.u32 %v6496_v31, %v6493_v44  ;;  %v6198_v8 = vld [vmem:[#allocation3 + $0xb0] sm:$0x1]  ;;  %v6708_v25 = vld [vmem:[#allocation3 + $0xa8] sm:$0xe] }
 0x367   : > { %9675 = vmatprep.mubr.bf16.mxu1 %v11177_v63  ;;  %v11210_v13 = vcombine.low %v15387_v59, %v15395_v37  ;;  %v6507_v33 = vor.u32 %v6506_v53, %v6502_v5  ;;  %v6512_v17 = vrot.slane %v6510_v9, 5  ;;  %v6848_v47 = vrot.slane %v6703_v0, 5  ;;  %v6199_v36 = vld [vmem:[#allocation3 + $0xb4] sm:$0xf]  ;;  %v12998_v9 = vld [vmem:[#allocation3 + $0x9c] sm:$0xff]  }
 0x368   : > { %v6851_v24 = vrot.slane %v6704_v51, 5  ;;  %v6515_v32 = vshrl.u32 %v6193_v34, 16  ;;  %v6498_v19 = vrot.slane %v6497_v29, 4  ;;  %v6518_v40 = vshll.u32 %v6193_v34, 16  ;;  %v6709_v51 = vld [vmem:[#allocation3 + $0xac] sm:$0xf] }
 0x369   : > { %v6508_v16 = vrot.slane %v6507_v33, 4  ;;  %v6524_v30 = vshll.u32 %v6194_v39, 16  ;;  %v15401_v62 = vsel %vm13492_vm14, %v11195_v15, %v6848_v47  ;;  %v6850_v20 = vrot.slane %v6848_v47, 4  ;;  %v6710_v34 = vld [vmem:[#allocation3 + $0xb0] sm:$0x1] }
 0x36a   : > { %v6517_v38 = vrot.slane %v6515_v32, 4  ;;  %v6528_v2 = vshrl.u32 %v6194_v39, 16  ;;  %v6503_v60 = vsel %vm13474_vm11, %v6498_v19, %v6502_v5  ;;  %v6520_v52 = vrot.slane %v6518_v40, 5  ;;  %v6200_v33 = vld [vmem:[#allocation3 + $0xb8] sm:$0xf]  ;;  %v12997_v19 = vld [vmem:[#allocation3 + $0x84] sm:$0xff]  }
 0x36b   : > { %9837 = vmatmul.mubr.bf16.gmra.mrb[200].mxu0 %v11209_v27  ;;  %v6513_v45 = vsel %vm13474_vm11, %v6508_v16, %v6512_v17  ;;  %v6526_v23 = vrot.slane %v6524_v30, 5  ;;  %v15409_v58 = vsel %vm13492_vm14, %v6850_v20, %v6851_v24  ;;  %v6534_v50 = vshll.u32 %v6195_v57, 16  ;;  %v6201_v30 = vld [vmem:[#allocation3 + $0xbc] sm:$0x1]  ;;  %v8043_v37 = vld [vmem:[#allocation3 + $0x18] sm:$0xf] }
 0x36c   : > { %9844 = vmatprep.mubr.bf16.mxu0 %v12994_v14  ;;  %v11179_v43 = vcombine.low %v6503_v60, %v6513_v45  ;;  %v6530_v63 = vrot.slane %v6528_v2, 4  ;;  %v11211_v27 = vcombine.low %v15401_v62, %v15409_v58  ;;  %v6521_v22 = vor.u32 %v6520_v52, %v6517_v38  ;;  %v6712_v60 = vld [vmem:[#allocation3 + $0xb8] sm:$0xf]  ;;  %v6713_v59 = vld [vmem:[#allocation3 + $0xbc] sm:$0x1] }
 0x36d   : > { %v11196_v10 = vrot.slane %v6705_v49, 9  ;;  %v6855_v4 = vrot.slane %v6706_v41, 5  ;;  %v6536_v55 = vrot.slane %v6534_v50, 5  ;;  %v6858_v61 = vrot.slane %v6707_v35, 5  ;;  %v6711_v49 = vld [vmem:[#allocation3 + $0xb4] sm:$0xe] }
 0x36e   : > { %9676 = vmatmul.mubr.bf16.gmra.mrb[168].mxu1 %v12993_v6  ;;  %v6531_v48 = vor.u32 %v6530_v63, %v6526_v23  ;;  %v6539_v3 = vshrl.u32 %v6196_v46, 16  ;;  %v6522_v42 = vrot.slane %v6521_v22, 4  ;;  %v6542_v0 = vshll.u32 %v6196_v46, 16 }
 0x36f   : > { %9683 = vmatprep.mubr.bf16.mxu1 %v11178_v28  ;;  %v15415_v1 = vsel %vm13492_vm14, %v11196_v10, %v6855_v4  ;;  %v6857_v54 = vrot.slane %v6855_v4, 4  ;;  %v6548_v21 = vshll.u32 %v6197_v26, 16  ;;  %v6552_v44 = vshrl.u32 %v6197_v26, 16  ;;  %v8044_v26 = vld [vmem:[#allocation3 + $0x1c] sm:$0xf] }
 0x370   : > { %v6532_v12 = vrot.slane %v6531_v48, 4  ;;  %v6541_v18 = vrot.slane %v6539_v3, 4  ;;  %v6527_v7 = vsel %vm13474_vm11, %v6522_v42, %v6526_v23  ;;  %v6544_v5 = vrot.slane %v6542_v0, 5  ;;  %v13002_v3 = vld [vmem:[#allocation3 + $0xa8] sm:$0xff]  }
 0x371   : > { %v15421_v31 = vsel %vm13492_vm14, %v6857_v54, %v6858_v61  ;;  %v6558_v53 = vshll.u32 %v6198_v8, 16  ;;  %v6550_v28 = vrot.slane %v6548_v21, 5  ;;  %v6554_v29 = vrot.slane %v6552_v44, 4  ;;  %v8045_v61 = vld [vmem:[#allocation3 + $0x20] sm:$0x1] }
 0x372   : > { %v6537_v15 = vsel %vm13474_vm11, %v6532_v12, %v6536_v55  ;;  %v11212_v39 = vcombine.low %v15415_v1, %v15421_v31  ;;  %v6545_v47 = vor.u32 %v6544_v5, %v6541_v18  ;;  %v11197_v32 = vrot.slane %v6708_v25, 9  ;;  %v7610_v12 = vld [vmem:[#allocation3 + $0xc] sm:$0xe]  ;;  %v13001_v5 = vld [vmem:[#allocation3 + $0x90] sm:$0xff]  }
 0x373   : > { %9845 = vmatmul.mubr.bf16.gmra.mrb[204].mxu0 %v11210_v13  ;;  %v15430_v17 = vcombine.low %v6527_v7, %v6537_v15  ;;  %v6560_v24 = vrot.slane %v6558_v53, 5  ;;  %v6555_v16 = vor.u32 %v6554_v29, %v6550_v28  ;;  %v6862_v57 = vrot.slane %v6709_v51, 5  ;;  %v7611_v7 = vld [vmem:[#allocation3 + $0x10] sm:$0xf]  ;;  %v7612_v15 = vld [vmem:[#allocation3 + $0x14] sm:$0x1] }
 0x374   : > { %9852 = vmatprep.mubr.bf16.mxu0 %v12998_v9  ;;  %v6865_v40 = vrot.slane %v6710_v34, 5  ;;  %v6563_v14 = vshrl.u32 %v6199_v36, 16  ;;  %v6546_v20 = vrot.slane %v6545_v47, 4  ;;  %v6566_v38 = vshll.u32 %v6199_v36, 16  ;;  %v7098_v29 = vld [vmem:[#allocation3 + $0xc] sm:$0xf] }
 0x375   : > { %v6572_v2 = vshll.u32 %v6200_v33, 16  ;;  %v6576_v41 = vshrl.u32 %v6200_v33, 16  ;;  %v6556_v13 = vrot.slane %v6555_v16, 4  ;;  %v15434_v45 = vsel %vm13492_vm14, %v11197_v32, %v6862_v57 }
 0x376   : > { %9684 = vmatmul.mubr.bf16.gmra.mrb[172].mxu1 %v12997_v19  ;;  %v6864_v52 = vrot.slane %v6862_v57, 4  ;;  %v6565_v23 = vrot.slane %v6563_v14, 4  ;;  %v6551_v35 = vsel %vm13474_vm11, %v6546_v20, %v6550_v28  ;;  %v6568_v46 = vrot.slane %v6566_v38, 5  ;;  %v7100_v38 = vld [vmem:[#allocation3 + $0x14] sm:$0x1] }
 0x377   : > { %9691 = vmatprep.mubr.bf16.mxu1 %v11179_v43  ;;  %v6574_v6 = vrot.slane %v6572_v2, 5  ;;  %v6578_v63 = vrot.slane %v6576_v41, 4  ;;  %v6561_v50 = vsel %vm13474_vm11, %v6556_v13, %v6560_v24  ;;  %v6582_v10 = vshll.u32 %v6201_v30, 16  ;;  %v15468_v41 = vpop.f32.mrb[128].mxu1  ;;  %v8046_v13 = vld [vmem:[#allocation3 + $0x24] sm:$0xf] }
 0x378   : > { %v15442_v22 = vsel %vm13492_vm14, %v6864_v52, %v6865_v40  ;;  %v11198_v4 = vrot.slane %v6711_v49, 9  ;;  %v15444_v8 = vcombine.low %v6551_v35, %v6561_v50  ;;  %v6569_v48 = vor.u32 %v6568_v46, %v6565_v23  ;;  %v7099_v40 = vld [vmem:[#allocation3 + $0x10] sm:$0xf]  ;;  %v15474_v52 = vpop.f32.mrb[129].mxu1  ;;  %v13005_v23 = vld [vmem:[#allocation3 + $0x9c] sm:$0xff]   ;;  %v13006_v35 = vld [vmem:[#allocation3 + $0xb4] sm:$0xff]  }
 0x379   : > { %v11213_v43 = vcombine.low %v15434_v45, %v15442_v22  ;;  %v6579_v55 = vor.u32 %v6578_v63, %v6574_v6  ;;  %v6584_v25 = vrot.slane %v6582_v10, 5  ;;  %v6869_v42 = vrot.slane %v6712_v60, 5 }
 0x37a   : > { %v6872_v54 = vrot.slane %v6713_v59, 5  ;;  %v8092_v0 = vshrl.u32 %v8043_v37, 16  ;;  %v6570_v18 = vrot.slane %v6569_v48, 4  ;;  %v8095_v44 = vshll.u32 %v8043_v37, 16 }
 0x37b   : > { %9853 = vmatmul.mubr.bf16.gmra.mrb[208].mxu0 %v11211_v27  ;;  %v6580_v21 = vrot.slane %v6579_v55, 4  ;;  %v8101_v51 = vshll.u32 %v8044_v26, 16  ;;  %v15453_v53 = vsel %vm13492_vm14, %v11198_v4, %v6869_v42  ;;  %v6871_v34 = vrot.slane %v6869_v42, 4  ;;  %v8047_v55 = vld [vmem:[#allocation3 + $0x28] sm:$0xf] }
 0x37c   : > { %9860 = vmatprep.mubr.bf16.mxu0 %v13002_v3  ;;  %v8094_v36 = vrot.slane %v8092_v0, 4  ;;  %v8105_v9 = vshrl.u32 %v8044_v26, 16  ;;  %v6575_v28 = vsel %vm13474_vm11, %v6570_v18, %v6574_v6  ;;  %v8097_v58 = vrot.slane %v8095_v44, 5  ;;  %v7614_v18 = vld [vmem:[#allocation3 + $0x1c] sm:$0xf] }
 0x37d   : > { %v6585_v62 = vsel %vm13474_vm11, %v6580_v21, %v6584_v25  ;;  %v8103_v27 = vrot.slane %v8101_v51, 5  ;;  %v15463_v47 = vsel %vm13492_vm14, %v6871_v34, %v6872_v54  ;;  %v8111_v32 = vshll.u32 %v8045_v61, 16  ;;  %v8048_v61 = vld [vmem:[#allocation3 + $0x2c] sm:$0x1]  ;;  %v15491_v34 = vpop.f32.mrb[130].mxu1 }
 0x37e   : > { %9692 = vmatmul.mubr.bf16.gmra.mrb[176].mxu1 %v13001_v5  ;;  %v15459_v33 = vcombine.low %v6575_v28, %v6585_v62  ;;  %v8107_v24 = vrot.slane %v8105_v9, 4  ;;  %v11214_v49 = vcombine.low %v15453_v53, %v15463_v47  ;;  %v8098_v19 = vor.u32 %v8097_v58, %v8094_v36  ;;  %v7615_v5 = vld [vmem:[#allocation3 + $0x20] sm:$0x1]  ;;  %v7101_v62 = vld [vmem:[#allocation3 + $0x18] sm:$0xf] }
 0x37f   : > { %9699 = vmatprep.mubr.bf16.mxu1 %v15430_v17  ;;  %v11247_v16 = vrot.slane %v7610_v12, 9  ;;  %v7708_v57 = vrot.slane %v7611_v7, 5  ;;  %v8113_v14 = vrot.slane %v8111_v32, 5  ;;  %v7711_v20 = vrot.slane %v7612_v15, 5 }
 0x380   : > { %v8108_v30 = vor.u32 %v8107_v24, %v8103_v27  ;;  %v7147_v2 = vshrl.u32 %v7098_v29, 16  ;;  %v8099_v60 = vrot.slane %v8098_v19, 4  ;;  %v7150_v37 = vshll.u32 %v7098_v29, 16 }
 0x381   : > { %v15472_v59 = vsel %vm13492_vm14, %v11247_v16, %v7708_v57  ;;  %v7710_v17 = vrot.slane %v7708_v57, 4  ;;  %v7156_v63 = vshll.u32 %v7099_v40, 16  ;;  %v7160_v50 = vshrl.u32 %v7099_v40, 16  ;;  %v7102_v40 = vld [vmem:[#allocation3 + $0x1c] sm:$0xf] }
 0x382   : > { %v8109_v46 = vrot.slane %v8108_v30, 4  ;;  %v7149_v6 = vrot.slane %v7147_v2, 4  ;;  %v8104_v10 = vsel %vm13474_vm11, %v8099_v60, %v8103_v27  ;;  %v7152_v26 = vrot.slane %v7150_v37, 5  ;;  %v15496_v30 = vpop.f32.mrb[131].mxu1  ;;  %v7103_v60 = vld [vmem:[#allocation3 + $0x20] sm:$0x1] }
 0x383   : > { %9861 = vmatmul.mubr.bf16.gmra.mrb[212].mxu0 %v11212_v39  ;;  %v15483_v4 = vsel %vm13492_vm14, %v7710_v17, %v7711_v20  ;;  %v7166_v48 = vshll.u32 %v7100_v38, 16  ;;  %v7158_v1 = vrot.slane %v7156_v63, 5  ;;  %v7162_v31 = vrot.slane %v7160_v50, 4  ;;  %v7613_v39 = vld [vmem:[#allocation3 + $0x18] sm:$0xe] }
 0x384   : > { %9868 = vmatprep.mubr.bf16.mxu0 %v13006_v35  ;;  %v8114_v3 = vsel %vm13474_vm11, %v8109_v46, %v8113_v14  ;;  %v11263_v25 = vcombine.low %v15472_v59, %v15483_v4  ;;  %v7153_v54 = vor.u32 %v7152_v26, %v7149_v6  ;;  %v8116_v12 = vshrl.u32 %v8046_v13, 16  ;;  %v13010_v14 = vld [vmem:[#allocation3 + $0xa8] sm:$0xff]   ;;  %v8049_v46 = vld [vmem:[#allocation3 + $0x30] sm:$0xf]  ;;  %v8050_v6 = vld [vmem:[#allocation3 + $0x34] sm:$0xf] }
 0x385   : > { %v15489_v42 = vcombine.low %v8104_v10, %v8114_v3  ;;  %v7168_v0 = vrot.slane %v7166_v48, 5  ;;  %v7163_v21 = vor.u32 %v7162_v31, %v7158_v1  ;;  %v8119_v44 = vshll.u32 %v8046_v13, 16  ;;  %v8051_v31 = vld [vmem:[#allocation3 + $0x38] sm:$0x1]  ;;  %v8054_v4 = vld [vmem:[#allocation3 + $0x44] sm:$0x1] }
 0x386   : > { %9700 = vmatmul.mubr.bf16.gmra.mrb[180].mxu1 %v13005_v23  ;;  %v8125_v51 = vshll.u32 %v8047_v55, 16  ;;  %v8129_v7 = vshrl.u32 %v8047_v55, 16  ;;  %v7154_v36 = vrot.slane %v7153_v54, 4  ;;  %v8118_v9 = vrot.slane %v8116_v12, 4 }
 0x387   : > { %9707 = vmatprep.mubr.bf16.mxu1 %v15444_v8  ;;  %v8135_v15 = vshll.u32 %v8048_v61, 16  ;;  %v11248_v28 = vrot.slane %v7613_v39, 9  ;;  %v7164_v58 = vrot.slane %v7163_v21, 4  ;;  %v8121_v27 = vrot.slane %v8119_v44, 5  ;;  %v13011_v8 = vld [vmem:[#allocation3 + $0xc0] sm:$0xff]  }
 0x388   : > { %v8127_v29 = vrot.slane %v8125_v51, 5  ;;  %v8131_v24 = vrot.slane %v8129_v7, 4  ;;  %v7159_v32 = vsel %vm13474_vm11, %v7154_v36, %v7158_v1  ;;  %v7715_v16 = vrot.slane %v7614_v18, 5  ;;  %v7616_v39 = vld [vmem:[#allocation3 + $0x24] sm:$0xe] }
 0x389   : > { %v8137_v19 = vrot.slane %v8135_v15, 5  ;;  %v7718_v57 = vrot.slane %v7615_v5, 5  ;;  %v7169_v20 = vsel %vm13474_vm11, %v7164_v58, %v7168_v0  ;;  %v8122_v38 = vor.u32 %v8121_v27, %v8118_v9  ;;  %v7617_v21 = vld [vmem:[#allocation3 + $0x28] sm:$0xf]  ;;  %v7618_v36 = vld [vmem:[#allocation3 + $0x2c] sm:$0x1] }
 0x38a   : > { %v8132_v2 = vor.u32 %v8131_v24, %v8127_v29  ;;  %v7171_v17 = vshrl.u32 %v7101_v62, 16  ;;  %v15503_v37 = vcombine.low %v7159_v32, %v7169_v20  ;;  %v15507_v13 = vsel %vm13492_vm14, %v11248_v28, %v7715_v16  ;;  %v7104_v58 = vld [vmem:[#allocation3 + $0x24] sm:$0xf]  ;;  %v13018_v32 = vld [vmem:[#allocation3 + $0xb4] sm:$0xff]  }
 0x38b   : > { %9869 = vmatmul.mubr.bf16.gmra.mrb[216].mxu0 %v11213_v43  ;;  %v7717_v23 = vrot.slane %v7715_v16, 4  ;;  %v7174_v35 = vshll.u32 %v7101_v62, 16  ;;  %v8123_v63 = vrot.slane %v8122_v38, 4  ;;  %v7180_v26 = vshll.u32 %v7102_v40, 16  ;;  %v7105_v38 = vld [vmem:[#allocation3 + $0x28] sm:$0xf] }
 0x38c   : > { %9876 = vmatprep.mubr.bf16.mxu0 %v13011_v8  ;;  %v8133_v50 = vrot.slane %v8132_v2, 4  ;;  %v7173_v10 = vrot.slane %v7171_v17, 4  ;;  %v7184_v22 = vshrl.u32 %v7102_v40, 16  ;;  %v7190_v43 = vshll.u32 %v7103_v60, 16 }
 0x38d   : > { %v15511_v48 = vsel %vm13492_vm14, %v7717_v23, %v7718_v57  ;;  %v7176_v45 = vrot.slane %v7174_v35, 5  ;;  %v8128_v55 = vsel %vm13474_vm11, %v8123_v63, %v8127_v29  ;;  %v7182_v1 = vrot.slane %v7180_v26, 5 }
 0x38e   : > { %9708 = vmatmul.mubr.bf16.gmra.mrb[184].mxu1 %v13010_v14  ;;  %v8138_v61 = vsel %vm13474_vm11, %v8133_v50, %v8137_v19  ;;  %v11264_v3 = vcombine.low %v15507_v13, %v15511_v48  ;;  %v7186_v12 = vrot.slane %v7184_v22, 4  ;;  %v7192_v18 = vrot.slane %v7190_v43, 5  ;;  %v13022_v22 = vld [vmem:[#allocation3 + $0x18] sm:$0xff]   ;;  %v8055_v48 = vld [vmem:[#allocation3 + $0x48] sm:$0xf] }
 0x38f   : > { %9715 = vmatprep.mubr.bf16.mxu1 %v15459_v33  ;;  %v15520_v54 = vcombine.low %v8128_v55, %v8138_v61  ;;  %v7177_v0 = vor.u32 %v7176_v45, %v7173_v10  ;;  %v8140_v44 = vshrl.u32 %v8049_v46, 16  ;;  %v8143_v51 = vshll.u32 %v8049_v46, 16  ;;  %v8053_v45 = vld [vmem:[#allocation3 + $0x40] sm:$0xf] }
 0x390   : > { %v8149_v7 = vshll.u32 %v8050_v6, 16  ;;  %v8153_v5 = vshrl.u32 %v8050_v6, 16  ;;  %v7187_v15 = vor.u32 %v7186_v12, %v7182_v1  ;;  %v8159_v28 = vshll.u32 %v8051_v31, 16  ;;  %v8052_v6 = vld [vmem:[#allocation3 + $0x3c] sm:$0xf] }
 0x391   : > { %v7178_v9 = vrot.slane %v7177_v0, 4  ;;  %v11249_v62 = vrot.slane %v7616_v39, 9  ;;  %v8142_v27 = vrot.slane %v8140_v44, 4  ;;  %v8145_v29 = vrot.slane %v8143_v51, 5  ;;  %v7620_v12 = vld [vmem:[#allocation3 + $0x34] sm:$0xf] }
 0x392   : > { %v8151_v24 = vrot.slane %v8149_v7, 5  ;;  %v8155_v33 = vrot.slane %v8153_v5, 4  ;;  %v7188_v16 = vrot.slane %v7187_v15, 4  ;;  %v8161_v57 = vrot.slane %v8159_v28, 5  ;;  %v7107_v5 = vld [vmem:[#allocation3 + $0x30] sm:$0xf] }
 0x393   : > { %9877 = vmatmul.mubr.bf16.gmra.mrb[220].mxu0 %v11214_v49  ;;  %v7183_v19 = vsel %vm13474_vm11, %v7178_v9, %v7182_v1  ;;  %v7722_v40 = vrot.slane %v7617_v21, 5  ;;  %v8146_v14 = vor.u32 %v8145_v29, %v8142_v27  ;;  %v7725_v20 = vrot.slane %v7618_v36, 5  ;;  %v7106_v49 = vld [vmem:[#allocation3 + $0x2c] sm:$0x1] }
 0x394   : > { %10078 = vmatprep.mubr.bf16.mxu0 %v15489_v42  ;;  %v8156_v8 = vor.u32 %v8155_v33, %v8151_v24  ;;  %v7195_v2 = vshrl.u32 %v7104_v58, 16  ;;  %v7193_v60 = vsel %vm13474_vm11, %v7188_v16, %v7192_v18  ;;  %v7198_v17 = vshll.u32 %v7104_v58, 16  ;;  %v7621_v18 = vld [vmem:[#allocation3 + $0x38] sm:$0x1]  ;;  %v7108_v58 = vld [vmem:[#allocation3 + $0x34] sm:$0xf] }
 0x395   : > { %v15532_v53 = vsel %vm13492_vm14, %v11249_v62, %v7722_v40  ;;  %v7724_v47 = vrot.slane %v7722_v40, 4  ;;  %v15534_v23 = vcombine.low %v7183_v19, %v7193_v60  ;;  %v8147_v35 = vrot.slane %v8146_v14, 4  ;;  %v13026_v62 = vld [vmem:[#allocation10 + $0x208] sm:$0xff]   ;;  %v7109_v60 = vld [vmem:[#allocation3 + $0x38] sm:$0x1] }
 0x396   : > { %9716 = vmatmul.mubr.bf16.gmra.mrb[188].mxu1 %v13018_v32  ;;  %v8157_v42 = vrot.slane %v8156_v8, 4  ;;  %v7197_v46 = vrot.slane %v7195_v2, 4  ;;  %v7200_v50 = vrot.slane %v7198_v17, 5  ;;  %v7204_v10 = vshll.u32 %v7105_v38, 16  ;;  %v13024_v17 = vld [vmem:[#allocation3 + $0x24] sm:$0xff]  }
 0x397   : > { %9917 = vmatprep.mubr.bf16.mxu1 %v11263_v25  ;;  %v15541_v63 = vsel %vm13492_vm14, %v7724_v47, %v7725_v20  ;;  %v7208_v26 = vshrl.u32 %v7105_v38, 16  ;;  %v8152_v43 = vsel %vm13474_vm11, %v8147_v35, %v8151_v24  ;;  %v7214_v59 = vshll.u32 %v7106_v49, 16  ;;  %v7619_v25 = vld [vmem:[#allocation3 + $0x30] sm:$0xe] }
 0x398   : > { %v8162_v55 = vsel %vm13474_vm11, %v8157_v42, %v8161_v57  ;;  %v11265_v61 = vcombine.low %v15532_v53, %v15541_v63  ;;  %v7201_v31 = vor.u32 %v7200_v50, %v7197_v46  ;;  %v7206_v39 = vrot.slane %v7204_v10, 5 }
 0x399   : > { %v15549_v1 = vcombine.low %v8152_v43, %v8162_v55  ;;  %v7210_v0 = vrot.slane %v7208_v26, 4  ;;  %v7216_v21 = vrot.slane %v7214_v59, 5  ;;  %v8164_v44 = vshrl.u32 %v8052_v6, 16  ;;  %v8056_v26 = vld [vmem:[#allocation3 + $0x4c] sm:$0xf] }
 0x39a   : > { %v8167_v51 = vshll.u32 %v8052_v6, 16  ;;  %v8173_v7 = vshll.u32 %v8053_v45, 16  ;;  %v7202_v36 = vrot.slane %v7201_v31, 4  ;;  %v8177_v15 = vshrl.u32 %v8053_v45, 16  ;;  %v8057_v59 = vld [vmem:[#allocation3 + $0x50] sm:$0x1] }
 0x39b   : > { %10079 = vmatmul.mubr.bf16.vlgmr.msra.gmra.mrb[224].mxu0 %v13022_v22  ;;  %v7211_v9 = vor.u32 %v7210_v0, %v7206_v39  ;;  %v8183_v28 = vshll.u32 %v8054_v4, 16  ;;  %v8166_v27 = vrot.slane %v8164_v44, 4  ;;  %v11250_v33 = vrot.slane %v7619_v25, 9  ;;  %v7622_v4 = vld [vmem:[#allocation3 + $0x3c] sm:$0xe] }
 0x39c   : > { %10086 = vmatprep.mubr.bf16.mxu0 %v15520_v54  ;;  %v8169_v29 = vrot.slane %v8167_v51, 5  ;;  %v8175_v24 = vrot.slane %v8173_v7, 5  ;;  %v7207_v32 = vsel %vm13474_vm11, %v7202_v36, %v7206_v39  ;;  %v8179_v16 = vrot.slane %v8177_v15, 4  ;;  %v13049_v54 = vld [vmem:[#allocation10 + $0x200] sm:$0xff]   ;;  %v13032_v7 = vld [vmem:[#allocation10 + $0x218] sm:$0xff]  }
 0x39d   : > { %v7212_v19 = vrot.slane %v7211_v9, 4  ;;  %v8185_v57 = vrot.slane %v8183_v28, 5  ;;  %v7729_v14 = vrot.slane %v7620_v12, 5  ;;  %v7732_v8 = vrot.slane %v7621_v18, 5  ;;  %v7623_v12 = vld [vmem:[#allocation3 + $0x40] sm:$0xf] }
 0x39e   : > { %9918 = vmatmul.mubr.bf16.vlgmr.msra.gmra.mrb[192].mxu1 %v15503_v37  ;;  %v8170_v40 = vor.u32 %v8169_v29, %v8166_v27  ;;  %v7219_v20 = vshrl.u32 %v7107_v5, 16  ;;  %v8180_v2 = vor.u32 %v8179_v16, %v8175_v24  ;;  %v7222_v47 = vshll.u32 %v7107_v5, 16  ;;  %v7624_v28 = vld [vmem:[#allocation3 + $0x44] sm:$0x1]  ;;  %v7111_v16 = vld [vmem:[#allocation3 + $0x40] sm:$0xf] }
 0x39f   : > { %9925 = vmatprep.mubr.bf16.mxu1 %v11264_v3  ;;  %12687 = vmatpush3.bf16.msra.mxu1 %v13049_v54  ;;  %v7217_v38 = vsel %vm13474_vm11, %v7212_v19, %v7216_v21  ;;  %v7228_v49 = vshll.u32 %v7108_v58, 16  ;;  %v15564_v42 = vsel %vm13492_vm14, %v11250_v33, %v7729_v14  ;;  %v7731_v13 = vrot.slane %v7729_v14, 4  ;;  %v13029_v3 = vld [vmem:[#allocation10 + $0x210] sm:$0xff]  }
 0x3a0   : > { %v15560_v35 = vcombine.low %v7207_v32, %v7217_v38  ;;  %v8171_v37 = vrot.slane %v8170_v40, 4  ;;  %12688 = vmatprep.subr.bf16.mxu1 %v13026_v62  ;;  %v8181_v46 = vrot.slane %v8180_v2, 4  ;;  %v7221_v6 = vrot.slane %v7219_v20, 4  ;;  %v13035_v20 = vld [vmem:[#allocation10 + $0x220] sm:$0xff]   ;;  %v8058_v2 = vld [vmem:[#allocation3 + $0x54] sm:$0xf] }
 0x3a1   : > { %v7224_v50 = vrot.slane %v7222_v47, 5  ;;  %v7230_v10 = vrot.slane %v7228_v49, 5  ;;  %v15570_v22 = vsel %vm13492_vm14, %v7731_v13, %v7732_v8  ;;  %v7232_v43 = vshrl.u32 %v7108_v58, 16 }
 0x3a2   : > { %v8176_v45 = vsel %vm13474_vm11, %v8171_v37, %v8175_v24  ;;  %v7238_v55 = vshll.u32 %v7109_v60, 16  ;;  %v8186_v25 = vsel %vm13474_vm11, %v8181_v46, %v8185_v57  ;;  %v11266_v31 = vcombine.low %v15564_v42, %v15570_v22  ;;  %v7110_v24 = vld [vmem:[#allocation3 + $0x3c] sm:$0xf]  ;;  %v13025_v57 = vld [vmem:[#allocation3 + $0x30] sm:$0xff]   ;;  %v8059_v37 = vld [vmem:[#allocation3 + $0x58] sm:$0xf] }
 0x3a3   : > { %10087 = vmatmul.mubr.bf16.gmra.mrb[228].mxu0 %v13024_v17  ;;  %12689 = vmatpush3.bf16.msra.mxu1 %v13026_v62  ;;  %v7225_v39 = vor.u32 %v7224_v50, %v7221_v6  ;;  %v8188_v0 = vshrl.u32 %v8055_v48, 16  ;;  %v11298_v18 = vcombine.low %v8176_v45, %v8186_v25  ;;  %v7234_v21 = vrot.slane %v7232_v43, 4  ;;  %v8060_v6 = vld [vmem:[#allocation3 + $0x5c] sm:$0x1]  ;;  %v13038_v50 = vld [vmem:[#allocation10 + $0x228] sm:$0xff]  }
 0x3a4   : > { %10094 = vmatprep.mubr.bf16.mxu0 %v15549_v1  ;;  %v7240_v44 = vrot.slane %v7238_v55, 5  ;;  %v8191_v51 = vshll.u32 %v8055_v48, 16  ;;  %12690 = vmatprep.subr.bf16.mxu1 %v13029_v3  ;;  %v8197_v9 = vshll.u32 %v8056_v26, 16  ;;  %v8201_v15 = vshrl.u32 %v8056_v26, 16 }
 0x3a5   : > { %v7226_v5 = vrot.slane %v7225_v39, 4  ;;  %v8190_v36 = vrot.slane %v8188_v0, 4  ;;  %v7235_v58 = vor.u32 %v7234_v21, %v7230_v10  ;;  %v8207_v27 = vshll.u32 %v8057_v59, 16  ;;  %v7625_v39 = vld [vmem:[#allocation3 + $0x48] sm:$0xe] }
 0x3a6   : > { %9926 = vmatmul.mubr.bf16.gmra.mrb[196].mxu1 %v15534_v23  ;;  %v8193_v62 = vrot.slane %v8191_v51, 5  ;;  %v11251_v29 = vrot.slane %v7622_v4, 9  ;;  %v8199_v33 = vrot.slane %v8197_v9, 5  ;;  %v8203_v32 = vrot.slane %v8201_v15, 4  ;;  %v7627_v51 = vld [vmem:[#allocation3 + $0x50] sm:$0x1] }
 0x3a7   : > { %9933 = vmatprep.mubr.bf16.mxu1 %v11265_v61  ;;  %v7231_v1 = vsel %vm13474_vm11, %v7226_v5, %v7230_v10  ;;  %v7736_v19 = vrot.slane %v7623_v12, 5  ;;  %12691 = vmatpush3.bf16.msra.mxu1 %v13029_v3  ;;  %v7236_v40 = vrot.slane %v7235_v58, 4  ;;  %v8209_v14 = vrot.slane %v8207_v27, 5  ;;  %v7112_v61 = vld [vmem:[#allocation3 + $0x44] sm:$0x1]  ;;  %v13041_v27 = vld [vmem:[#allocation10 + $0x230] sm:$0xff]  }
 0x3a8   : > { %v8194_v23 = vor.u32 %v8193_v62, %v8190_v36  ;;  %v7739_v8 = vrot.slane %v7624_v28, 5  ;;  %12692 = vmatprep.subr.bf16.mxu1 %v13032_v7  ;;  %v8204_v54 = vor.u32 %v8203_v32, %v8199_v33  ;;  %v7243_v38 = vshrl.u32 %v7110_v24, 16  ;;  %v7113_v15 = vld [vmem:[#allocation3 + $0x48] sm:$0xf] }
 0x3a9   : > { %v15585_v53 = vsel %vm13492_vm14, %v11251_v29, %v7736_v19  ;;  %v7738_v63 = vrot.slane %v7736_v19, 4  ;;  %v7241_v60 = vsel %vm13474_vm11, %v7236_v40, %v7240_v44  ;;  %v7246_v49 = vshll.u32 %v7110_v24, 16  ;;  %v7626_v44 = vld [vmem:[#allocation3 + $0x4c] sm:$0xf]  ;;  %v13027_v29 = vld [vmem:[#allocation3 + $0x3c] sm:$0xff]  }
 0x3aa   : > { %v8195_v47 = vrot.slane %v8194_v23, 4  ;;  %v7252_v17 = vshll.u32 %v7111_v16, 16  ;;  %v15589_v13 = vcombine.low %v7231_v1, %v7241_v60  ;;  %v8205_v48 = vrot.slane %v8204_v54, 4  ;;  %v7114_v19 = vld [vmem:[#allocation3 + $0x4c] sm:$0xf]  ;;  %v13044_v60 = vld [vmem:[#allocation10 + $0x238] sm:$0xff]  }
 0x3ab   : > { %10095 = vmatmul.mubr.bf16.gmra.mrb[232].mxu0 %v13025_v57  ;;  %v15593_v3 = vsel %vm13492_vm14, %v7738_v63, %v7739_v8  ;;  %v7245_v46 = vrot.slane %v7243_v38, 4  ;;  %12693 = vmatpush3.bf16.msra.mxu1 %v13032_v7  ;;  %v7248_v45 = vrot.slane %v7246_v49, 5  ;;  %v7256_v59 = vshrl.u32 %v7111_v16, 16  ;;  %v7115_v8 = vld [vmem:[#allocation3 + $0x50] sm:$0x1] }
 0x3ac   : > { %10102 = vmatprep.mubr.bf16.mxu0 %v11298_v18  ;;  %v8200_v10 = vsel %vm13474_vm11, %v8195_v47, %v8199_v33  ;;  %v11267_v26 = vcombine.low %v15585_v53, %v15593_v3  ;;  %v7254_v43 = vrot.slane %v7252_v17, 5  ;;  %12694 = vmatprep.subr.bf16.mxu1 %v13035_v20  ;;  %v8210_v55 = vsel %vm13474_vm11, %v8205_v48, %v8209_v14  ;;  %v8061_v48 = vld [vmem:[#allocation3 + $0x60] sm:$0xf]  ;;  %v7628_v53 = vld [vmem:[#allocation3 + $0x54] sm:$0xe] }
 0x3ad   : > { %v7262_v4 = vshll.u32 %v7112_v61, 16  ;;  %v8212_v25 = vshrl.u32 %v8058_v2, 16  ;;  %v11299_v0 = vcombine.low %v8200_v10, %v8210_v55  ;;  %v7249_v12 = vor.u32 %v7248_v45, %v7245_v46  ;;  %v7629_v3 = vld [vmem:[#allocation3 + $0x58] sm:$0xf] }
 0x3ae   : > { %9934 = vmatmul.mubr.bf16.gmra.mrb[200].mxu1 %v15560_v35  ;;  %v8215_v18 = vshll.u32 %v8058_v2, 16  ;;  %v8221_v21 = vshll.u32 %v8059_v37, 16  ;;  %v7258_v7 = vrot.slane %v7256_v59, 4  ;;  %v8225_v9 = vshrl.u32 %v8059_v37, 16 }
 0x3af   : > { %9941 = vmatprep.mubr.bf16.mxu1 %v11266_v31  ;;  %v7264_v5 = vrot.slane %v7262_v4, 5  ;;  %v8214_v36 = vrot.slane %v8212_v25, 4  ;;  %12695 = vmatpush3.bf16.msra.mxu1 %v13035_v20  ;;  %v7250_v28 = vrot.slane %v7249_v12, 4  ;;  %v8231_v35 = vshll.u32 %v8060_v6, 16 }
 0x3b0   : > { %v8217_v58 = vrot.slane %v8215_v18, 5  ;;  %v8223_v62 = vrot.slane %v8221_v21, 5  ;;  %12696 = vmatprep.subr.bf16.mxu1 %v13038_v50  ;;  %v7259_v24 = vor.u32 %v7258_v7, %v7254_v43  ;;  %v8227_v1 = vrot.slane %v8225_v9, 4 }
 0x3b1   : > { %v11252_v33 = vrot.slane %v7625_v39, 9  ;;  %v7743_v32 = vrot.slane %v7626_v44, 5  ;;  %v7255_v42 = vsel %vm13474_vm11, %v7250_v28, %v7254_v43  ;;  %v8233_v31 = vrot.slane %v8231_v35, 5  ;;  %v8062_v43 = vld [vmem:[#allocation3 + $0x64] sm:$0xf] }
 0x3b2   : > { %v8218_v22 = vor.u32 %v8217_v58, %v8214_v36  ;;  %v7746_v16 = vrot.slane %v7627_v51, 5  ;;  %v7260_v57 = vrot.slane %v7259_v24, 4  ;;  %v8228_v40 = vor.u32 %v8227_v1, %v8223_v62  ;;  %v8063_v39 = vld [vmem:[#allocation3 + $0x68] sm:$0x1]  ;;  %v7630_v58 = vld [vmem:[#allocation3 + $0x5c] sm:$0x1] }
 0x3b3   : > { %10103 = vmatmul.mubr.bf16.gmra.mrb[236].mxu0 %v13027_v29  ;;  %v15609_v23 = vsel %vm13492_vm14, %v11252_v33, %v7743_v32  ;;  %v7745_v14 = vrot.slane %v7743_v32, 4  ;;  %12697 = vmatpush3.bf16.msra.mxu1 %v13038_v50  ;;  %v7267_v63 = vshrl.u32 %v7113_v15, 16  ;;  %v7270_v61 = vshll.u32 %v7113_v15, 16  ;;  %v7116_v24 = vld [vmem:[#allocation3 + $0x54] sm:$0xf] }
 0x3b4   : > { %10110 = vmatprep.mubr.bf16.mxu0 %v11299_v0  ;;  %v8219_v54 = vrot.slane %v8218_v22, 4  ;;  %v7276_v38 = vshll.u32 %v7114_v19, 16  ;;  %12698 = vmatprep.subr.bf16.mxu1 %v13041_v27  ;;  %v7265_v47 = vsel %vm13474_vm11, %v7260_v57, %v7264_v5  ;;  %v8229_v49 = vrot.slane %v8228_v40, 4  ;;  %v13028_v0 = vld [vmem:[#allocation3 + $0x48] sm:$0xff]   ;;  %v7118_v40 = vld [vmem:[#allocation3 + $0x5c] sm:$0x1] }
 0x3b5   : > { %v15611_v20 = vpop.f32.mrb[160].mxu0  ;;  %v7747_v17 = vsel %vm13492_vm14, %v7745_v14, %v7746_v16  ;;  %v7280_v37 = vshrl.u32 %v7114_v19, 16  ;;  %v11235_v6 = vcombine.low %v7255_v42, %v7265_v47  ;;  %v7269_v45 = vrot.slane %v7267_v63, 4  ;;  %v7117_v42 = vld [vmem:[#allocation3 + $0x58] sm:$0xf] }
 0x3b6   : > { %v15613_v2 = vpop.f32.mrb[161].mxu0  ;;  %9942 = vmatmul.mubr.bf16.gmra.mrb[204].mxu1 %v15589_v13  ;;  %v8224_v50 = vsel %vm13474_vm11, %v8219_v54, %v8223_v62  ;;  %v11268_v10 = vcombine.low %v15609_v23, %v7747_v17  ;;  %v8234_v59 = vsel %vm13474_vm11, %v8229_v49, %v8233_v31  ;;  %v7272_v4 = vrot.slane %v7270_v61, 5  ;;  %v13030_v63 = vld [vmem:[#allocation3 + $0x54] sm:$0xff]  }
 0x3b7   : > { %v15619_v46 = vpop.f32.mrb[162].mxu0  ;;  %9949 = vmatprep.mubr.bf16.mxu1 %v11267_v26  ;;  %v7278_v25 = vrot.slane %v7276_v38, 5  ;;  %v7282_v13 = vrot.slane %v7280_v37, 4  ;;  %12699 = vmatpush3.bf16.msra.mxu1 %v13041_v27  ;;  %v11300_v12 = vcombine.low %v8224_v50, %v8234_v59  ;;  %v7286_v18 = vshll.u32 %v7115_v8, 16  ;;  %v8065_v50 = vld [vmem:[#allocation3 + $0x70] sm:$0xf] }
 0x3b8   : > { %v15625_v55 = vpop.f32.mrb[163].mxu0  ;;  %v8236_v21 = vshrl.u32 %v8061_v48, 16  ;;  %v8239_v44 = vshll.u32 %v8061_v48, 16  ;;  %12700 = vmatprep.subr.bf16.mxu1 %v13044_v60  ;;  %v7273_v51 = vor.u32 %v7272_v4, %v7269_v45  ;;  %v8245_v5 = vshll.u32 %v8062_v43, 16  ;;  %v8066_v4 = vld [vmem:[#allocation3 + $0x74] sm:$0x1] }
 0x3b9   : > { %v7283_v7 = vor.u32 %v7282_v13, %v7278_v25  ;;  %v8249_v36 = vshrl.u32 %v8062_v43, 16  ;;  %v7288_v26 = vrot.slane %v7286_v18, 5  ;;  %v8255_v28 = vshll.u32 %v8063_v39, 16  ;;  %v7632_v18 = vld [vmem:[#allocation3 + $0x64] sm:$0xf] }
 0x3ba   : > { %v8238_v9 = vrot.slane %v8236_v21, 4  ;;  %v8241_v15 = vrot.slane %v8239_v44, 5  ;;  %v7274_v62 = vrot.slane %v7273_v51, 4  ;;  %v8247_v27 = vrot.slane %v8245_v5, 5  ;;  %v7633_v5 = vld [vmem:[#allocation3 + $0x68] sm:$0x1] }
 0x3bb   : > { %10111 = vmatmul.mubr.bf16.gmra.mrb[240].mxu0 %v13028_v0  ;;  %v7284_v35 = vrot.slane %v7283_v7, 4  ;;  %v8251_v29 = vrot.slane %v8249_v36, 4  ;;  %12701 = vmatpush3.bf16.msra.mxu1 %v13044_v60  ;;  %v8257_v33 = vrot.slane %v8255_v28, 5  ;;  %v11253_v32 = vrot.slane %v7628_v53, 9 }
 0x3bc   : > { %10118 = vmatprep.mubr.bf16.mxu0 %v11300_v12  ;;  %v8242_v1 = vor.u32 %v8241_v15, %v8238_v9  ;;  %v7750_v19 = vrot.slane %v7629_v3, 5  ;;  %v7279_v22 = vsel %vm13474_vm11, %v7274_v62, %v7278_v25  ;;  %v7753_v57 = vrot.slane %v7630_v58, 5  ;;  %v7631_v25 = vld [vmem:[#allocation3 + $0x60] sm:$0xe] }
 0x3bd   : > { %v7289_v31 = vsel %vm13474_vm11, %v7284_v35, %v7288_v26  ;;  %v8252_v16 = vor.u32 %v8251_v29, %v8247_v27  ;;  %v7291_v38 = vshrl.u32 %v7116_v24, 16  ;;  %v7294_v60 = vshll.u32 %v7116_v24, 16  ;;  %v7119_v9 = vld [vmem:[#allocation3 + $0x60] sm:$0xf] }
 0x3be   : > { %9950 = vmatmul.mubr.bf16.gmra.mrb[208].mxu1 %v11235_v6  ;;  %v11236_v23 = vcombine.low %v7279_v22, %v7289_v31  ;;  %v8243_v14 = vrot.slane %v8242_v1, 4  ;;  %v7751_v8 = vsel %vm13492_vm14, %v11253_v32, %v7750_v19  ;;  %v7752_v54 = vrot.slane %v7750_v19, 4  ;;  %v8064_v6 = vld [vmem:[#allocation3 + $0x6c] sm:$0xf]  ;;  %v7120_v19 = vld [vmem:[#allocation3 + $0x64] sm:$0xf] }
 0x3bf   : > { %9957 = vmatprep.mubr.bf16.mxu1 %v11268_v10  ;;  %v8253_v61 = vrot.slane %v8252_v16, 4  ;;  %v7300_v47 = vshll.u32 %v7117_v42, 16  ;;  %v7304_v37 = vshrl.u32 %v7117_v42, 16  ;;  %v7310_v48 = vshll.u32 %v7118_v40, 16  ;;  %v7121_v40 = vld [vmem:[#allocation3 + $0x68] sm:$0x1] }
 0x3c0   : > { %v8248_v49 = vsel %vm13474_vm11, %v8243_v14, %v8247_v27  ;;  %v7754_v17 = vsel %vm13492_vm14, %v7752_v54, %v7753_v57  ;;  %v7293_v10 = vrot.slane %v7291_v38, 4  ;;  %v7296_v59 = vrot.slane %v7294_v60, 5 }
 0x3c1   : > { %v8258_v45 = vsel %vm13474_vm11, %v8253_v61, %v8257_v33  ;;  %v11269_v43 = vcombine.low %v7751_v8, %v7754_v17  ;;  %v7302_v39 = vrot.slane %v7300_v47, 5  ;;  %v7306_v0 = vrot.slane %v7304_v37, 4  ;;  %v8067_v61 = vld [vmem:[#allocation3 + $0x78] sm:$0xf] }
 0x3c2   : > { %v11301_v13 = vcombine.low %v8248_v49, %v8258_v45  ;;  %v7312_v12 = vrot.slane %v7310_v48, 5  ;;  %v7297_v21 = vor.u32 %v7296_v59, %v7293_v10  ;;  %v8260_v44 = vshrl.u32 %v8064_v6, 16  ;;  %v8069_v45 = vld [vmem:[#allocation3 + $0x80] sm:$0x1] }
 0x3c3   : > { %10119 = vmatmul.mubr.bf16.gmra.mrb[244].mxu0 %v13030_v63  ;;  %v8263_v51 = vshll.u32 %v8064_v6, 16  ;;  %v8269_v7 = vshll.u32 %v8065_v50, 16  ;;  %v7307_v36 = vor.u32 %v7306_v0, %v7302_v39  ;;  %v8273_v53 = vshrl.u32 %v8065_v50, 16  ;;  %v8068_v50 = vld [vmem:[#allocation3 + $0x7c] sm:$0xf] }
 0x3c4   : > { %10126 = vmatprep.mubr.bf16.mxu0 %v11301_v13  ;;  %v8279_v3 = vshll.u32 %v8066_v4, 16  ;;  %v11254_v26 = vrot.slane %v7631_v25, 9  ;;  %v7298_v15 = vrot.slane %v7297_v21, 4  ;;  %v8262_v28 = vrot.slane %v8260_v44, 4  ;;  %v7634_v25 = vld [vmem:[#allocation3 + $0x6c] sm:$0xe] }
 0x3c5   : > { %v8265_v58 = vrot.slane %v8263_v51, 5  ;;  %v8271_v62 = vrot.slane %v8269_v7, 5  ;;  %v7308_v35 = vrot.slane %v7307_v36, 4  ;;  %v8275_v27 = vrot.slane %v8273_v53, 4 }
 0x3c6   : > { %9958 = vmatmul.mubr.bf16.gmra.mrb[212].mxu1 %v11236_v23  ;;  %v8281_v29 = vrot.slane %v8279_v3, 5  ;;  %v7757_v24 = vrot.slane %v7632_v18, 5  ;;  %v7303_v1 = vsel %vm13474_vm11, %v7298_v15, %v7302_v39  ;;  %v7760_v32 = vrot.slane %v7633_v5, 5  ;;  %v13031_v23 = vld [vmem:[#allocation3 + $0x60] sm:$0xff]   ;;  %v7635_v18 = vld [vmem:[#allocation3 + $0x70] sm:$0xf] }
 0x3c7   : > { %9965 = vmatprep.mubr.bf16.mxu1 %v11269_v43  ;;  %v8266_v33 = vor.u32 %v8265_v58, %v8262_v28  ;;  %v7315_v42 = vshrl.u32 %v7119_v9, 16  ;;  %v7313_v22 = vsel %vm13474_vm11, %v7308_v35, %v7312_v12  ;;  %v8276_v31 = vor.u32 %v8275_v27, %v8271_v62  ;;  %v7636_v5 = vld [vmem:[#allocation3 + $0x74] sm:$0x1]  ;;  %v13033_v35 = vld [vmem:[#allocation3 + $0x6c] sm:$0xff]  }
 0x3c8   : > { %v7758_v16 = vsel %vm13492_vm14, %v11254_v26, %v7757_v24  ;;  %v7759_v57 = vrot.slane %v7757_v24, 4  ;;  %v11237_v14 = vcombine.low %v7303_v1, %v7313_v22  ;;  %v7318_v63 = vshll.u32 %v7119_v9, 16 }
 0x3c9   : > { %v8267_v8 = vrot.slane %v8266_v33, 4  ;;  %v7317_v54 = vrot.slane %v7315_v42, 4  ;;  %v8277_v38 = vrot.slane %v8276_v31, 4  ;;  %v7324_v47 = vshll.u32 %v7120_v19, 16  ;;  %v7123_v33 = vld [vmem:[#allocation3 + $0x70] sm:$0xf] }
 0x3ca   : > { %v7761_v60 = vsel %vm13492_vm14, %v7759_v57, %v7760_v32  ;;  %v7328_v49 = vshrl.u32 %v7120_v19, 16  ;;  %v7320_v48 = vrot.slane %v7318_v63, 5  ;;  %v7334_v6 = vshll.u32 %v7121_v40, 16  ;;  %v7124_v57 = vld [vmem:[#allocation3 + $0x74] sm:$0x1] }
 0x3cb   : > { %10127 = vmatmul.mubr.bf16.gmra.mrb[248].mxu0 %v13031_v23  ;;  %v8272_v17 = vsel %vm13474_vm11, %v8267_v8, %v8271_v62  ;;  %v11270_v37 = vcombine.low %v7758_v16, %v7761_v60  ;;  %v8282_v43 = vsel %vm13474_vm11, %v8277_v38, %v8281_v29  ;;  %v7326_v10 = vrot.slane %v7324_v47, 5  ;;  %v7122_v62 = vld [vmem:[#allocation3 + $0x6c] sm:$0xf] }
 0x3cc   : > { %v7330_v59 = vrot.slane %v7328_v49, 4  ;;  %v8284_v4 = vshrl.u32 %v8067_v61, 16  ;;  %v11302_v13 = vcombine.low %v8272_v17, %v8282_v43  ;;  %v7321_v39 = vor.u32 %v7320_v48, %v7317_v54  ;;  %v8071_v17 = vld [vmem:[#allocation3 + $0x88] sm:$0xf] }
 0x3cd   : > { %v7336_v0 = vrot.slane %v7334_v6, 5  ;;  %v8287_v12 = vshll.u32 %v8067_v61, 16  ;;  %v8293_v51 = vshll.u32 %v8068_v50, 16  ;;  %v8297_v7 = vshrl.u32 %v8068_v50, 16  ;;  %v8070_v61 = vld [vmem:[#allocation3 + $0x84] sm:$0xf] }
 0x3ce   : > { %9966 = vmatmul.mubr.bf16.gmra.mrb[216].mxu1 %v11237_v14  ;;  %v7331_v21 = vor.u32 %v7330_v59, %v7326_v10  ;;  %v8286_v44 = vrot.slane %v8284_v4, 4  ;;  %10134 = vmatprep.mubr.bf16.mxu0 %v11302_v13  ;;  %v7322_v36 = vrot.slane %v7321_v39, 4  ;;  %v8303_v3 = vshll.u32 %v8069_v45, 16  ;;  %v8072_v45 = vld [vmem:[#allocation3 + $0x8c] sm:$0x1]  ;;  %v13034_v39 = vld [vmem:[#allocation3 + $0x78] sm:$0xff]  }
 0x3cf   : > { %9973 = vmatprep.mubr.bf16.mxu1 %v11270_v37  ;;  %v8289_v53 = vrot.slane %v8287_v12, 5  ;;  %v11255_v26 = vrot.slane %v7634_v25, 9  ;;  %v8295_v15 = vrot.slane %v8293_v51, 5  ;;  %v8299_v28 = vrot.slane %v8297_v7, 4  ;;  %v7637_v25 = vld [vmem:[#allocation3 + $0x78] sm:$0xe] }
 0x3d0   : > { %v7332_v9 = vrot.slane %v7331_v21, 4  ;;  %v7764_v58 = vrot.slane %v7635_v18, 5  ;;  %v7327_v27 = vsel %vm13474_vm11, %v7322_v36, %v7326_v10  ;;  %v8305_v24 = vrot.slane %v8303_v3, 5  ;;  %v7638_v13 = vld [vmem:[#allocation3 + $0x7c] sm:$0xf] }
 0x3d1   : > { %v8290_v29 = vor.u32 %v8289_v53, %v8286_v44  ;;  %v7767_v1 = vrot.slane %v7636_v5, 5  ;;  %v8300_v19 = vor.u32 %v8299_v28, %v8295_v15  ;;  %v7339_v40 = vshrl.u32 %v7122_v62, 16  ;;  %v7639_v44 = vld [vmem:[#allocation3 + $0x80] sm:$0x1]  ;;  %v7125_v53 = vld [vmem:[#allocation3 + $0x78] sm:$0xf] }
 0x3d2   : > { %v7337_v32 = vsel %vm13474_vm11, %v7332_v9, %v7336_v0  ;;  %v7765_v42 = vsel %vm13492_vm14, %v11255_v26, %v7764_v58  ;;  %v7766_v22 = vrot.slane %v7764_v58, 4  ;;  %v7342_v23 = vshll.u32 %v7122_v62, 16 }
 0x3d3   : > { %10135 = vmatmul.mubr.bf16.gmra.mrb[252].mxu0 %v13033_v35  ;;  %v11238_v31 = vcombine.low %v7327_v27, %v7337_v32  ;;  %v8291_v16 = vrot.slane %v8290_v29, 4  ;;  %v8301_v14 = vrot.slane %v8300_v19, 4  ;;  %v7348_v54 = vshll.u32 %v7123_v33, 16  ;;  %v7126_v27 = vld [vmem:[#allocation3 + $0x7c] sm:$0xf] }
 0x3d4   : > { %v7768_v8 = vsel %vm13492_vm14, %v7766_v22, %v7767_v1  ;;  %v7352_v63 = vshrl.u32 %v7123_v33, 16  ;;  %v7341_v47 = vrot.slane %v7339_v40, 4  ;;  %v7344_v49 = vrot.slane %v7342_v23, 5  ;;  %v7127_v33 = vld [vmem:[#allocation3 + $0x80] sm:$0x1] }
 0x3d5   : > { %v8296_v38 = vsel %vm13474_vm11, %v8291_v16, %v8295_v15  ;;  %v11271_v60 = vcombine.low %v7765_v42, %v7768_v8  ;;  %v8306_v37 = vsel %vm13474_vm11, %v8301_v14, %v8305_v24  ;;  %v7350_v48 = vrot.slane %v7348_v54, 5  ;;  %v8073_v16 = vld [vmem:[#allocation3 + $0x90] sm:$0xf]  ;;  %v8075_v54 = vld [vmem:[#allocation3 + $0x98] sm:$0x1] }
 0x3d6   : > { %9974 = vmatmul.mubr.bf16.gmra.mrb[220].mxu1 %v11238_v31  ;;  %v7354_v6 = vrot.slane %v7352_v63, 4  ;;  %v7358_v50 = vshll.u32 %v7124_v57, 16  ;;  %v11303_v43 = vcombine.low %v8296_v38, %v8306_v37  ;;  %v7345_v10 = vor.u32 %v7344_v49, %v7341_v47  ;;  %v8074_v57 = vld [vmem:[#allocation3 + $0x94] sm:$0xf]  ;;  %v7640_v49 = vld [vmem:[#allocation3 + $0x84] sm:$0xe] }
 0x3d7   : > { %9981 = vmatprep.mubr.bf16.mxu1 %v11271_v60  ;;  %v8308_v59 = vshrl.u32 %v8070_v61, 16  ;;  %v8311_v4 = vshll.u32 %v8070_v61, 16  ;;  %v8317_v18 = vshll.u32 %v8071_v17, 16  ;;  %v8321_v21 = vshrl.u32 %v8071_v17, 16 }
 0x3d8   : > { %v7355_v0 = vor.u32 %v7354_v6, %v7350_v48  ;;  %v7360_v12 = vrot.slane %v7358_v50, 5  ;;  %10142 = vmatprep.mubr.bf16.mxu0 %v11303_v43  ;;  %v7346_v51 = vrot.slane %v7345_v10, 4  ;;  %v8327_v36 = vshll.u32 %v8072_v45, 16  ;;  %v7641_v45 = vld [vmem:[#allocation3 + $0x88] sm:$0xf] }
 0x3d9   : > { %v8310_v7 = vrot.slane %v8308_v59, 4  ;;  %v8313_v5 = vrot.slane %v8311_v4, 5  ;;  %v8319_v26 = vrot.slane %v8317_v18, 5  ;;  %v8323_v9 = vrot.slane %v8321_v21, 4  ;;  %v13036_v59 = vld [vmem:[#allocation3 + $0x84] sm:$0xff]  }
 0x3da   : > { %v7356_v3 = vrot.slane %v7355_v0, 4  ;;  %v11256_v15 = vrot.slane %v7637_v25, 9  ;;  %v7351_v28 = vsel %vm13474_vm11, %v7346_v51, %v7350_v48  ;;  %v8329_v62 = vrot.slane %v8327_v36, 5  ;;  %v7642_v51 = vld [vmem:[#allocation3 + $0x8c] sm:$0x1] }
 0x3db   : > { %10143 = vmatmul.mubr.bf16.gmra.mrb[0].mxu0 %v13034_v39  ;;  %v8314_v58 = vor.u32 %v8313_v5, %v8310_v7  ;;  %v7771_v35 = vrot.slane %v7638_v13, 5  ;;  %v8324_v24 = vor.u32 %v8323_v9, %v8319_v26  ;;  %v7774_v1 = vrot.slane %v7639_v44, 5 }
 0x3dc   : > { %v7361_v29 = vsel %vm13474_vm11, %v7356_v3, %v7360_v12  ;;  %v7363_v32 = vshrl.u32 %v7125_v53, 16  ;;  %v7366_v14 = vshll.u32 %v7125_v53, 16  ;;  %v7372_v8 = vshll.u32 %v7126_v27, 16 }
 0x3dd   : > { %v11239_v19 = vcombine.low %v7351_v28, %v7361_v29  ;;  %v8315_v42 = vrot.slane %v8314_v58, 4  ;;  %v7772_v22 = vsel %vm13492_vm14, %v11256_v15, %v7771_v35  ;;  %v7773_v31 = vrot.slane %v7771_v35, 4 }
 0x3de   : > { %v8325_v40 = vrot.slane %v8324_v24, 4  ;;  %v7365_v23 = vrot.slane %v7363_v32, 4  ;;  %v15674_v63 = vpop.f32.mrb[164].mxu0  ;;  %v7376_v60 = vshrl.u32 %v7126_v27, 16  ;;  %v7382_v47 = vshll.u32 %v7127_v33, 16 }
 0x3df   : > { %9982 = vmatmul.mubr.bf16.gmra.mrb[224].mxu1 %v11239_v19  ;;  %v8320_v61 = vsel %vm13474_vm11, %v8315_v42, %v8319_v26  ;;  %v7775_v38 = vsel %vm13492_vm14, %v7773_v31, %v7774_v1  ;;  %v15680_v17 = vpop.f32.mrb[165].mxu0  ;;  %v7368_v6 = vrot.slane %v7366_v14, 5  ;;  %v7374_v50 = vrot.slane %v7372_v8, 5  ;;  %v7128_v26 = vld [vmem:[#allocation3 + $0x84] sm:$0xf] }
 0x3e0   : > { %v8330_v37 = vsel %vm13474_vm11, %v8325_v40, %v8329_v62  ;;  %v11272_v48 = vcombine.low %v7772_v22, %v7775_v38  ;;  %v15684_v43 = vpop.f32.mrb[166].mxu0  ;;  %v7378_v4 = vrot.slane %v7376_v60, 4  ;;  %v7384_v25 = vrot.slane %v7382_v47, 5  ;;  %v15686_v39 = vpop.f32.mrb[132].mxu1  ;;  %v7129_v42 = vld [vmem:[#allocation3 + $0x88] sm:$0xf] }
 0x3e1   : > { %v11304_v10 = vcombine.low %v8320_v61, %v8330_v37  ;;  %v8332_v13 = vshrl.u32 %v8073_v16, 16  ;;  %v15688_v0 = vpop.f32.mrb[167].mxu0  ;;  %v7369_v12 = vor.u32 %v7368_v6, %v7365_v23  ;;  %v8335_v18 = vshll.u32 %v8073_v16, 16  ;;  %v15690_v7 = vpop.f32.mrb[133].mxu1  ;;  %v7130_v40 = vld [vmem:[#allocation3 + $0x8c] sm:$0x1] }
 0x3e2   : > { %9989 = vmatprep.mubr.bf16.mxu1 %v11272_v48  ;;  %v8341_v21 = vshll.u32 %v8074_v57, 16  ;;  %v8345_v44 = vshrl.u32 %v8074_v57, 16  ;;  %v7379_v5 = vor.u32 %v7378_v4, %v7374_v50  ;;  %v8351_v53 = vshll.u32 %v8075_v54, 16  ;;  %v15692_v9 = vpop.f32.mrb[134].mxu1  ;;  %v8076_v38 = vld [vmem:[#allocation3 + $0x9c] sm:$0xf] }
 0x3e3   : > { %10150 = vmatprep.mubr.bf16.mxu0 %v11304_v10  ;;  %v8334_v36 = vrot.slane %v8332_v13, 4  ;;  %v11257_v3 = vrot.slane %v7640_v49, 9  ;;  %v7370_v15 = vrot.slane %v7369_v12, 4  ;;  %v8337_v28 = vrot.slane %v8335_v18, 5  ;;  %v15694_v35 = vpop.f32.mrb[135].mxu1  ;;  %v13037_v13 = vld [vmem:[#allocation3 + $0x90] sm:$0xff]  }
 0x3e4   : > { %10151 = vmatmul.mubr.bf16.gmra.mrb[4].mxu0 %v13036_v59  ;;  %v8343_v58 = vrot.slane %v8341_v21, 5  ;;  %v8347_v62 = vrot.slane %v8345_v44, 4  ;;  %v7380_v27 = vrot.slane %v7379_v5, 4  ;;  %v8353_v29 = vrot.slane %v8351_v53, 5  ;;  %v8077_v48 = vld [vmem:[#allocation3 + $0xa0] sm:$0xf] }
 0x3e5   : > { %v7778_v24 = vrot.slane %v7641_v45, 5  ;;  %v7781_v1 = vrot.slane %v7642_v51, 5  ;;  %v7375_v33 = vsel %vm13474_vm11, %v7370_v15, %v7374_v50  ;;  %v8338_v32 = vor.u32 %v8337_v28, %v8334_v36  ;;  %v8078_v59 = vld [vmem:[#allocation3 + $0xa4] sm:$0x1]  ;;  %v7643_v4 = vld [vmem:[#allocation3 + $0x90] sm:$0xe] }
 0x3e6   : > { %v8348_v19 = vor.u32 %v8347_v62, %v8343_v58  ;;  %v7387_v22 = vshrl.u32 %v7128_v26, 16  ;;  %v7385_v31 = vsel %vm13474_vm11, %v7380_v27, %v7384_v25  ;;  %v7390_v23 = vshll.u32 %v7128_v26, 16  ;;  %v7644_v44 = vld [vmem:[#allocation3 + $0x94] sm:$0xf]  ;;  %v7645_v51 = vld [vmem:[#allocation3 + $0x98] sm:$0x1] }
 0x3e7   : > { %v7779_v16 = vsel %vm13492_vm14, %v11257_v3, %v7778_v24  ;;  %v7780_v57 = vrot.slane %v7778_v24, 4  ;;  %v11240_v14 = vcombine.low %v7375_v33, %v7385_v31  ;;  %v8339_v8 = vrot.slane %v8338_v32, 4 }
 0x3e8   : > { %v8349_v54 = vrot.slane %v8348_v19, 4  ;;  %v7389_v61 = vrot.slane %v7387_v22, 4  ;;  %v7392_v47 = vrot.slane %v7390_v23, 5  ;;  %v7396_v49 = vshll.u32 %v7129_v42, 16 }
 0x3e9   : > { %v7782_v60 = vsel %vm13492_vm14, %v7780_v57, %v7781_v1  ;;  %v7400_v37 = vshrl.u32 %v7129_v42, 16  ;;  %9990 = vmatmul.mubr.bf16.gmra.mrb[228].mxu1 %v11240_v14  ;;  %v8344_v6 = vsel %vm13474_vm11, %v8339_v8, %v8343_v58  ;;  %v7406_v10 = vshll.u32 %v7130_v40, 16 }
 0x3ea   : > { %v8354_v50 = vsel %vm13474_vm11, %v8349_v54, %v8353_v29  ;;  %v11273_v45 = vcombine.low %v7779_v16, %v7782_v60  ;;  %v7393_v12 = vor.u32 %v7392_v47, %v7389_v61  ;;  %v7398_v18 = vrot.slane %v7396_v49, 5  ;;  %v15708_v5 = vpop.f32.mrb[136].mxu1  ;;  %v7131_v60 = vld [vmem:[#allocation3 + $0x90] sm:$0xf] }
 0x3eb   : > { %v11305_v25 = vcombine.low %v8344_v6, %v8354_v50  ;;  %v7402_v21 = vrot.slane %v7400_v37, 4  ;;  %v7408_v36 = vrot.slane %v7406_v10, 5  ;;  %v8356_v53 = vshrl.u32 %v8076_v38, 16  ;;  %v15712_v28 = vpop.f32.mrb[137].mxu1  ;;  %v7132_v6 = vld [vmem:[#allocation3 + $0x94] sm:$0xf] }
 0x3ec   : > { %9997 = vmatprep.mubr.bf16.mxu1 %v11273_v45  ;;  %v8359_v3 = vshll.u32 %v8076_v38, 16  ;;  %v8365_v26 = vshll.u32 %v8077_v48, 16  ;;  %v15710_v15 = vpop.f32.mrb[168].mxu0  ;;  %v7394_v58 = vrot.slane %v7393_v12, 4  ;;  %v8369_v27 = vshrl.u32 %v8077_v48, 16  ;;  %v15716_v1 = vpop.f32.mrb[138].mxu1 }
 0x3ed   : > { %10158 = vmatprep.mubr.bf16.mxu0 %v11305_v25  ;;  %v7403_v62 = vor.u32 %v7402_v21, %v7398_v18  ;;  %v8375_v29 = vshll.u32 %v8078_v59, 16  ;;  %v15714_v24 = vpop.f32.mrb[169].mxu0  ;;  %v8358_v33 = vrot.slane %v8356_v53, 4  ;;  %v11258_v42 = vrot.slane %v7643_v4, 9  ;;  %v15720_v31 = vpop.f32.mrb[139].mxu1  ;;  %v13039_v53 = vld [vmem:[#allocation3 + $0x9c] sm:$0xff]  }
 0x3ee   : > { %10159 = vmatmul.mubr.bf16.gmra.mrb[8].mxu0 %v13037_v13  ;;  %v8361_v32 = vrot.slane %v8359_v3, 5  ;;  %v8367_v19 = vrot.slane %v8365_v26, 5  ;;  %v15718_v22 = vpop.f32.mrb[170].mxu0  ;;  %v7399_v16 = vsel %vm13474_vm11, %v7394_v58, %v7398_v18  ;;  %v8371_v40 = vrot.slane %v8369_v27, 4  ;;  %v7133_v25 = vld [vmem:[#allocation3 + $0x98] sm:$0x1] }
 0x3ef   : > { %v7404_v57 = vrot.slane %v7403_v62, 4  ;;  %v8377_v23 = vrot.slane %v8375_v29, 5  ;;  %v15724_v14 = vpop.f32.mrb[171].mxu0  ;;  %v7785_v54 = vrot.slane %v7644_v44, 5  ;;  %v7788_v61 = vrot.slane %v7645_v51, 5 }
 0x3f0   : > { %v8362_v8 = vor.u32 %v8361_v32, %v8358_v33  ;;  %v12184_v38 = vadd.f32 %v15474_v52, %v15468_v41  ;;  %v8372_v49 = vor.u32 %v8371_v40, %v8367_v19  ;;  %v12296_v37 = vadd.f32 %v15613_v2, %v15611_v20  ;;  %v8079_v12 = vld [vmem:[#allocation3 + $0xa8] sm:$0xf]  ;;  %v8080_v18 = vld [vmem:[#allocation3 + $0xac] sm:$0xf]  ;;  %v7646_v62 = vld [vmem:[#allocation3 + $0x9c] sm:$0xe] }
 0x3f1   : > { %v7409_v47 = vsel %vm13474_vm11, %v7404_v57, %v7408_v36  ;;  %v12187_v48 = vadd.f32 %v15496_v30, %v15491_v34  ;;  %v7786_v10 = vsel %vm13492_vm14, %v11258_v42, %v7785_v54  ;;  %v7787_v59 = vrot.slane %v7785_v54, 4 }
 0x3f2   : > { %v11241_v50 = vcombine.low %v7399_v16, %v7409_v47  ;;  %v8363_v45 = vrot.slane %v8362_v8, 4  ;;  %v8373_v4 = vrot.slane %v8372_v49, 4  ;;  %v15736_v41 = vadd.f32 %v12296_v37, %v12184_v38 }
 0x3f3   : > { %v12299_v52 = vadd.f32 %v15625_v55, %v15619_v46  ;;  %v7411_v13 = vshrl.u32 %v7131_v60, 16  ;;  %v7789_v34 = vsel %vm13492_vm14, %v7787_v59, %v7788_v61  ;;  %v7414_v30 = vshll.u32 %v7131_v60, 16  ;;  %v8081_v55 = vld [vmem:[#allocation3 + $0xb0] sm:$0x1] }
 0x3f4   : > { %9998 = vmatmul.mubr.bf16.gmra.mrb[232].mxu1 %v11241_v50  ;;  %v8368_v20 = vsel %vm13474_vm11, %v8363_v45, %v8367_v19  ;;  %v7420_v2 = vshll.u32 %v7132_v6, 16  ;;  %v8378_v21 = vsel %vm13474_vm11, %v8373_v4, %v8377_v23  ;;  %v11274_v44 = vcombine.low %v7786_v10, %v7789_v34  ;;  %v7647_v19 = vld [vmem:[#allocation3 + $0xa0] sm:$0xf]  ;;  %v7648_v23 = vld [vmem:[#allocation3 + $0xa4] sm:$0x1] }
 0x3f5   : > { %v15746_v51 = vadd.f32 %v12299_v52, %v12187_v48  ;;  %v7413_v46 = vrot.slane %v7411_v13, 4  ;;  %v11306_v36 = vcombine.low %v8368_v20, %v8378_v21  ;;  %v7416_v3 = vrot.slane %v7414_v30, 5 }
 0x3f6   : > { %v7422_v26 = vrot.slane %v7420_v2, 5  ;;  %v7424_v58 = vshrl.u32 %v7132_v6, 16  ;;  %10005 = vmatprep.mubr.bf16.mxu1 %v11274_v44  ;;  %v7430_v27 = vshll.u32 %v7133_v25, 16  ;;  %v8380_v29 = vshrl.u32 %v8079_v12, 16  ;;  %v7134_v2 = vld [vmem:[#allocation3 + $0x9c] sm:$0xf] }
 0x3f7   : > { %v8383_v33 = vshll.u32 %v8079_v12, 16  ;;  %v8389_v32 = vshll.u32 %v8080_v18, 16  ;;  %10166 = vmatprep.mubr.bf16.mxu0 %v11306_v36  ;;  %v7417_v42 = vor.u32 %v7416_v3, %v7413_v46  ;;  %v8393_v57 = vshrl.u32 %v8080_v18, 16  ;;  %v7135_v44 = vld [vmem:[#allocation3 + $0xa0] sm:$0xf] }
 0x3f8   : > { %v7426_v16 = vrot.slane %v7424_v58, 4  ;;  %v8399_v40 = vshll.u32 %v8081_v55, 16  ;;  %10167 = vmatmul.mubr.bf16.gmra.mrb[12].mxu0 %v13039_v53  ;;  %v7432_v8 = vrot.slane %v7430_v27, 5  ;;  %v8382_v54 = vrot.slane %v8380_v29, 4  ;;  %v7136_v53 = vld [vmem:[#allocation3 + $0xa4] sm:$0x1] }
 0x3f9   : > { %v8385_v61 = vrot.slane %v8383_v33, 5  ;;  %v8391_v38 = vrot.slane %v8389_v32, 5  ;;  %v7418_v60 = vrot.slane %v7417_v42, 4  ;;  %v8395_v49 = vrot.slane %v8393_v57, 4  ;;  %v8082_v3 = vld [vmem:[#allocation3 + $0xb4] sm:$0xf] }
 0x3fa   : > { %v7427_v47 = vor.u32 %v7426_v16, %v7422_v26  ;;  %v8401_v37 = vrot.slane %v8399_v40, 5  ;;  %v11259_v6 = vrot.slane %v7646_v62, 9  ;;  %v7792_v50 = vrot.slane %v7647_v19, 5  ;;  %v8083_v62 = vld [vmem:[#allocation3 + $0xb8] sm:$0xf]  ;;  %v13040_v40 = vld [vmem:[#allocation3 + $0xa8] sm:$0xff]  }
 0x3fb   : > { %v8386_v48 = vor.u32 %v8385_v61, %v8382_v54  ;;  %v7795_v45 = vrot.slane %v7648_v23, 5  ;;  %v7423_v10 = vsel %vm13474_vm11, %v7418_v60, %v7422_v26  ;;  %v8396_v4 = vor.u32 %v8395_v49, %v8391_v38  ;;  %v15752_v25 = vpop.f32.mrb[140].mxu1  ;;  %v8084_v27 = vld [vmem:[#allocation3 + $0xbc] sm:$0x1]  ;;  %v7649_v16 = vld [vmem:[#allocation3 + $0xa8] sm:$0xe] }
 0x3fc   : > { %v7428_v59 = vrot.slane %v7427_v47, 4  ;;  %v12302_v52 = vadd.f32 %v15680_v17, %v15674_v63  ;;  %v7793_v20 = vsel %vm13492_vm14, %v11259_v6, %v7792_v50  ;;  %v7794_v34 = vrot.slane %v7792_v50, 4  ;;  %v15758_v12 = vpop.f32.mrb[141].mxu1 }
 0x3fd   : > { %v8387_v13 = vrot.slane %v8386_v48, 4  ;;  %v12190_v30 = vadd.f32 %v15690_v7, %v15686_v39  ;;  %v8397_v21 = vrot.slane %v8396_v4, 4  ;;  %v12305_v63 = vadd.f32 %v15688_v0, %v15684_v43  ;;  %v15766_v46 = vpop.f32.mrb[142].mxu1  ;;  %v7650_v48 = vld [vmem:[#allocation3 + $0xac] sm:$0xf] }
 0x3fe   : > { %v7433_v18 = vsel %vm13474_vm11, %v7428_v59, %v7432_v8  ;;  %v12193_v17 = vadd.f32 %v15694_v35, %v15692_v9  ;;  %v7796_v7 = vsel %vm13492_vm14, %v7794_v34, %v7795_v45  ;;  %v15774_v26 = vpop.f32.mrb[172].mxu0  ;;  %v15776_v43 = vpop.f32.mrb[143].mxu1  ;;  %v7435_v58 = vshrl.u32 %v7134_v2, 16  ;;  %v7651_v59 = vld [vmem:[#allocation3 + $0xb0] sm:$0x1] }
 0x3ff   : > { %v11242_v55 = vcombine.low %v7423_v10, %v7433_v18  ;;  %v8392_v39 = vsel %vm13474_vm11, %v8387_v13, %v8391_v38  ;;  %v15772_v36 = vadd.f32 %v12302_v52, %v12190_v30  ;;  %v8402_v0 = vsel %vm13474_vm11, %v8397_v21, %v8401_v37  ;;  %v15782_v29 = vpop.f32.mrb[173].mxu0 }
 0x400   : > { %v11275_v9 = vcombine.low %v7793_v20, %v7796_v7  ;;  %v15780_v35 = vadd.f32 %v12305_v63, %v12193_v17  ;;  %v11307_v33 = vcombine.low %v8392_v39, %v8402_v0  ;;  %v7438_v32 = vshll.u32 %v7134_v2, 16  ;;  %v15784_v57 = vpop.f32.mrb[174].mxu0 }
 0x401   : > { %10006 = vmatmul.mubr.bf16.gmra.mrb[236].mxu1 %v11242_v55  ;;  %v7444_v19 = vshll.u32 %v7135_v44, 16  ;;  %v7448_v42 = vshrl.u32 %v7135_v44, 16  ;;  %v7437_v23 = vrot.slane %v7435_v58, 4  ;;  %v7454_v8 = vshll.u32 %v7136_v53, 16  ;;  %v15786_v38 = vpop.f32.mrb[175].mxu0 }
 0x402   : > { %10013 = vmatprep.mubr.bf16.mxu1 %v11275_v9  ;;  %v8404_v54 = vshrl.u32 %v8082_v3, 16  ;;  %v8407_v61 = vshll.u32 %v8082_v3, 16  ;;  %10174 = vmatprep.mubr.bf16.mxu0 %v11307_v33  ;;  %v7440_v60 = vrot.slane %v7438_v32, 5  ;;  %v8413_v37 = vshll.u32 %v8083_v62, 16 }
 0x403   : > { %v7446_v47 = vrot.slane %v7444_v19, 5  ;;  %v7450_v49 = vrot.slane %v7448_v42, 4  ;;  %10175 = vmatmul.mubr.bf16.gmra.mrb[16].mxu0 %v13040_v40  ;;  %v7456_v6 = vrot.slane %v7454_v8, 5  ;;  %v8417_v10 = vshrl.u32 %v8083_v62, 16  ;;  %v7137_v62 = vld [vmem:[#allocation3 + $0xa8] sm:$0xf] }
 0x404   : > { %v8406_v50 = vrot.slane %v8404_v54, 4  ;;  %v8409_v45 = vrot.slane %v8407_v61, 5  ;;  %v7441_v4 = vor.u32 %v7440_v60, %v7437_v23  ;;  %v8415_v13 = vrot.slane %v8413_v37, 5  ;;  %v8087_v8 = vld [vmem:[#allocation3 + $0xc8] sm:$0x1] }
 0x405   : > { %v7451_v52 = vor.u32 %v7450_v49, %v7446_v47  ;;  %v8423_v20 = vshll.u32 %v8084_v27, 16  ;;  %v8419_v30 = vrot.slane %v8417_v10, 4  ;;  %v11260_v2 = vrot.slane %v7649_v16, 9  ;;  %v7138_v27 = vld [vmem:[#allocation3 + $0xac] sm:$0xf] }
 0x406   : > { %v8410_v34 = vor.u32 %v8409_v45, %v8406_v50  ;;  %v7799_v18 = vrot.slane %v7650_v48, 5  ;;  %v7442_v21 = vrot.slane %v7441_v4, 4  ;;  %v7802_v44 = vrot.slane %v7651_v59, 5  ;;  %v7139_v16 = vld [vmem:[#allocation3 + $0xb0] sm:$0x1] }
 0x407   : > { %v7452_v63 = vrot.slane %v7451_v52, 4  ;;  %v8425_v17 = vrot.slane %v8423_v20, 5  ;;  %v8420_v39 = vor.u32 %v8419_v30, %v8415_v13  ;;  %v12308_v9 = vadd.f32 %v15714_v24, %v15710_v15  ;;  %v8086_v24 = vld [vmem:[#allocation3 + $0xc4] sm:$0xf]  ;;  %v7652_v49 = vld [vmem:[#allocation3 + $0xb4] sm:$0xe] }
 0x408   : > { %v8411_v55 = vrot.slane %v8410_v34, 4  ;;  %v7800_v7 = vsel %vm13492_vm14, %v11260_v2, %v7799_v18  ;;  %v7801_v53 = vrot.slane %v7799_v18, 4  ;;  %v7447_v3 = vsel %vm13474_vm11, %v7442_v21, %v7446_v47  ;;  %v7653_v50 = vld [vmem:[#allocation3 + $0xb8] sm:$0xf]  ;;  %v7654_v4 = vld [vmem:[#allocation3 + $0xbc] sm:$0x1] }
 0x409   : > { %v7457_v0 = vsel %vm13474_vm11, %v7452_v63, %v7456_v6  ;;  %v12196_v58 = vadd.f32 %v15712_v28, %v15708_v5  ;;  %v8421_v19 = vrot.slane %v8420_v39, 4  ;;  %v12311_v15 = vadd.f32 %v15724_v14, %v15718_v22  ;;  %v8085_v28 = vld [vmem:[#allocation3 + $0xc0] sm:$0xf]  ;;  %v13042_v6 = vld [vmem:[#allocation3 + $0xb4] sm:$0xff]  }
 0x40a   : > { %v11243_v33 = vcombine.low %v7447_v3, %v7457_v0  ;;  %v8416_v32 = vsel %vm13474_vm11, %v8411_v55, %v8415_v13  ;;  %v7803_v42 = vsel %vm13492_vm14, %v7801_v53, %v7802_v44  ;;  %v12199_v5 = vadd.f32 %v15720_v31, %v15716_v1 }
 0x40b   : > { %v11276_v40 = vcombine.low %v7800_v7, %v7803_v42  ;;  %v15802_v23 = vadd.f32 %v12308_v9, %v12196_v58  ;;  %v8426_v54 = vsel %vm13474_vm11, %v8421_v19, %v8425_v17  ;;  %v7459_v61 = vshrl.u32 %v7137_v62, 16 }
 0x40c   : > { %10014 = vmatmul.mubr.bf16.gmra.mrb[240].mxu1 %v11243_v33  ;;  %v7462_v60 = vshll.u32 %v7137_v62, 16  ;;  %v7468_v47 = vshll.u32 %v7138_v27, 16  ;;  %v11308_v37 = vcombine.low %v8416_v32, %v8426_v54  ;;  %v15810_v48 = vadd.f32 %v12311_v15, %v12199_v5 }
 0x40d   : > { %10021 = vmatprep.mubr.bf16.mxu1 %v11276_v40  ;;  %v7472_v22 = vshrl.u32 %v7138_v27, 16  ;;  %v7478_v14 = vshll.u32 %v7139_v16, 16  ;;  %v15812_v1 = vpop.f32.mrb[144].mxu1  ;;  %v7461_v31 = vrot.slane %v7459_v61, 4  ;;  %v8428_v59 = vshrl.u32 %v8085_v28, 16 }
 0x40e   : > { %v7464_v45 = vrot.slane %v7462_v60, 5  ;;  %v7470_v10 = vrot.slane %v7468_v47, 5  ;;  %v15814_v52 = vpop.f32.mrb[176].mxu0  ;;  %v15816_v13 = vpop.f32.mrb[145].mxu1  ;;  %10182 = vmatprep.mubr.bf16.mxu0 %v11308_v37  ;;  %v8431_v30 = vshll.u32 %v8085_v28, 16  ;;  %v8437_v2 = vshll.u32 %v8086_v24, 16 }
 0x40f   : > { %v7474_v20 = vrot.slane %v7472_v22, 4  ;;  %v7480_v34 = vrot.slane %v7478_v14, 5  ;;  %v15818_v18 = vpop.f32.mrb[177].mxu0  ;;  %v15820_v21 = vpop.f32.mrb[146].mxu1  ;;  %10183 = vmatmul.mubr.bf16.gmra.mrb[20].mxu0 %v13042_v6  ;;  %v8430_v17 = vrot.slane %v8428_v59, 4  ;;  %v8441_v44 = vshrl.u32 %v8086_v24, 16 }
 0x410   : > { %v7465_v63 = vor.u32 %v7464_v45, %v7461_v31  ;;  %v8447_v55 = vshll.u32 %v8087_v8, 16  ;;  %v15822_v39 = vpop.f32.mrb[178].mxu0  ;;  %v15824_v7 = vpop.f32.mrb[147].mxu1  ;;  %v8433_v3 = vrot.slane %v8431_v30, 5  ;;  %v8439_v0 = vrot.slane %v8437_v2, 5  ;;  %v13043_v30 = vld [vmem:[#allocation3 + $0xc0] sm:$0xff]  }
 0x411   : > { %v7475_v53 = vor.u32 %v7474_v20, %v7470_v10  ;;  %v11261_v9 = vrot.slane %v7652_v49, 9  ;;  %v15826_v58 = vpop.f32.mrb[179].mxu0  ;;  %v8443_v27 = vrot.slane %v8441_v44, 4  ;;  %v7806_v32 = vrot.slane %v7653_v50, 5  ;;  %v7140_v8 = vld [vmem:[#allocation3 + $0xb4] sm:$0xf] }
 0x412   : > { %v7466_v62 = vrot.slane %v7465_v63, 4  ;;  %v8449_v33 = vrot.slane %v8447_v55, 5  ;;  %v8434_v42 = vor.u32 %v8433_v3, %v8430_v17  ;;  %v7809_v16 = vrot.slane %v7654_v4, 5  ;;  %v7142_v22 = vld [vmem:[#allocation3 + $0xbc] sm:$0x1] }
 0x413   : > { %v7476_v19 = vrot.slane %v7475_v53, 4  ;;  %v12314_v40 = vadd.f32 %v15782_v29, %v15774_v26  ;;  %v8444_v5 = vor.u32 %v8443_v27, %v8439_v0  ;;  %v7807_v28 = vsel %vm13492_vm14, %v11261_v9, %v7806_v32  ;;  %v7141_v26 = vld [vmem:[#allocation3 + $0xb8] sm:$0xf]  ;;  %v7657_v4 = vld [vmem:[#allocation3 + $0xc8] sm:$0x1] }
 0x414   : > { %v7471_v15 = vsel %vm13474_vm11, %v7466_v62, %v7470_v10  ;;  %v7808_v24 = vrot.slane %v7806_v32, 4  ;;  %v8435_v61 = vrot.slane %v8434_v42, 4  ;;  %v12202_v60 = vadd.f32 %v15758_v12, %v15752_v25  ;;  %v7143_v9 = vld [vmem:[#allocation3 + $0xc0] sm:$0xf] }
 0x415   : > { %v7481_v54 = vsel %vm13474_vm11, %v7476_v19, %v7480_v34  ;;  %v12317_v47 = vadd.f32 %v15786_v38, %v15784_v57  ;;  %v8445_v49 = vrot.slane %v8444_v5, 4  ;;  %v12205_v6 = vadd.f32 %v15776_v43, %v15766_v46  ;;  %v7655_v57 = vld [vmem:[#allocation3 + $0xc0] sm:$0xe]  ;;  %v7656_v38 = vld [vmem:[#allocation3 + $0xc4] sm:$0xf] }
 0x416   : > { %v11244_v29 = vcombine.low %v7471_v15, %v7481_v54  ;;  %v7810_v37 = vsel %vm13492_vm14, %v7808_v24, %v7809_v16  ;;  %v15844_v14 = vpop.f32.mrb[180].mxu0  ;;  %v8440_v50 = vsel %vm13474_vm11, %v8435_v61, %v8439_v0  ;;  %v15848_v25 = vadd.f32 %v12314_v40, %v12202_v60  ;;  %v7144_v61 = vld [vmem:[#allocation3 + $0xc4] sm:$0xf] }
 0x417   : > { %v11277_v31 = vcombine.low %v7807_v28, %v7810_v37  ;;  %v7483_v12 = vshrl.u32 %v7140_v8, 16  ;;  %v15850_v45 = vpop.f32.mrb[181].mxu0  ;;  %v8450_v10 = vsel %vm13474_vm11, %v8445_v49, %v8449_v33  ;;  %v15854_v59 = vadd.f32 %v12317_v47, %v12205_v6 }
 0x418   : > { %10022 = vmatmul.mubr.bf16.gmra.mrb[244].mxu1 %v11244_v29  ;;  %v7486_v46 = vshll.u32 %v7140_v8, 16  ;;  %v7492_v43 = vshll.u32 %v7141_v26, 16  ;;  %v15856_v20 = vpop.f32.mrb[182].mxu0  ;;  %v11309_v34 = vcombine.low %v8440_v50, %v8450_v10  ;;  %v7496_v63 = vshrl.u32 %v7141_v26, 16 }
 0x419   : > { %10029 = vmatprep.mubr.bf16.mxu1 %v11277_v31  ;;  %v7485_v2 = vrot.slane %v7483_v12, 4  ;;  %v7502_v17 = vshll.u32 %v7142_v22, 16  ;;  %v15858_v44 = vpop.f32.mrb[148].mxu1  ;;  %v15860_v55 = vpop.f32.mrb[183].mxu0  ;;  %v7813_v0 = vrot.slane %v7656_v38, 5  ;;  %v11262_v32 = vrot.slane %v7655_v57, 9 }
 0x41a   : > { %v7488_v53 = vrot.slane %v7486_v46, 5  ;;  %v7494_v3 = vrot.slane %v7492_v43, 5  ;;  %v15862_v62 = vpop.f32.mrb[149].mxu1  ;;  %10190 = vmatprep.mubr.bf16.mxu0 %v11309_v34  ;;  %v7498_v27 = vrot.slane %v7496_v63, 4  ;;  %v12320_v19 = vadd.f32 %v15818_v18, %v15814_v52  ;;  %v7145_v52 = vld [vmem:[#allocation3 + $0xc8] sm:$0x1] }
 0x41b   : > { %v7504_v33 = vrot.slane %v7502_v17, 5  ;;  %v15866_v42 = vpop.f32.mrb[150].mxu1  ;;  %10191 = vmatmul.mubr.bf16.gmra.mrb[24].mxu0 %v13043_v30  ;;  %v7815_v40 = vrot.slane %v7813_v0, 4  ;;  %v7816_v15 = vrot.slane %v7657_v4, 5  ;;  %v12208_v5 = vadd.f32 %v15816_v13, %v15812_v1  ;;  %v8088_v1 = vld [vmem:[#allocation3 + $0xcc] sm:$0xf] }
 0x41c   : > { %v7489_v16 = vor.u32 %v7488_v53, %v7485_v2  ;;  %v15870_v28 = vpop.f32.mrb[151].mxu1  ;;  %v7499_v24 = vor.u32 %v7498_v27, %v7494_v3  ;;  %v12323_v8 = vadd.f32 %v15826_v58, %v15822_v39  ;;  %v12211_v54 = vadd.f32 %v15824_v7, %v15820_v21  ;;  %v8089_v7 = vld [vmem:[#allocation3 + $0xd0] sm:$0xf]  ;;  %v8090_v12 = vld [vmem:[#allocation3 + $0xd4] sm:$0x1] }
 0x41d   : > { %v7507_v18 = vshrl.u32 %v7143_v9, 16  ;;  %v7814_v47 = vsel %vm13492_vm14, %v11262_v32, %v7813_v0  ;;  %v15878_v26 = vadd.f32 %v12320_v19, %v12208_v5  ;;  %v7510_v29 = vshll.u32 %v7143_v9, 16  ;;  %v8556_v53 = vld [vmem:[#allocation3 + $0x1c] sm:$0xf]  ;;  %v8555_v19 = vld [vmem:[#allocation3 + $0x18] sm:$0xe] }
 0x41e   : > { %v7490_v60 = vrot.slane %v7489_v16, 4  ;;  %v15880_v13 = vpop.f32.mrb[184].mxu0  ;;  %v7500_v49 = vrot.slane %v7499_v24, 4  ;;  %v7817_v39 = vsel %vm13492_vm14, %v7815_v40, %v7816_v15  ;;  %v15884_v58 = vadd.f32 %v12323_v8, %v12211_v54  ;;  %v8557_v24 = vld [vmem:[#allocation3 + $0x20] sm:$0x1] }
 0x41f   : > { %v7509_v21 = vrot.slane %v7507_v18, 4  ;;  %v15886_v37 = vpop.f32.mrb[185].mxu0  ;;  %v7512_v22 = vrot.slane %v7510_v29, 5  ;;  %v7516_v50 = vshll.u32 %v7144_v61, 16  ;;  %v7520_v31 = vshrl.u32 %v7144_v61, 16 }
 0x420   : > { %v7495_v6 = vsel %vm13474_vm11, %v7490_v60, %v7494_v3  ;;  %v15890_v57 = vpop.f32.mrb[186].mxu0  ;;  %v7505_v38 = vsel %vm13474_vm11, %v7500_v49, %v7504_v33  ;;  %v7526_v10 = vshll.u32 %v7145_v52, 16  ;;  %v8452_v46 = vshrl.u32 %v8088_v1, 16 }
 0x421   : > { %v8455_v43 = vshll.u32 %v8088_v1, 16  ;;  %v15894_v4 = vpop.f32.mrb[152].mxu1  ;;  %v15896_v34 = vpop.f32.mrb[187].mxu0  ;;  %v11245_v30 = vcombine.low %v7495_v6, %v7505_v38  ;;  %v7513_v2 = vor.u32 %v7512_v22, %v7509_v21  ;;  %v7518_v63 = vrot.slane %v7516_v50, 5 }
 0x422   : > { %v7522_v17 = vrot.slane %v7520_v31, 4  ;;  %v15898_v3 = vpop.f32.mrb[153].mxu1  ;;  %v11278_v0 = vcombine.low %v7814_v47, %v7817_v39  ;;  %v8454_v9 = vrot.slane %v8452_v46, 4  ;;  %v8461_v32 = vshll.u32 %v8089_v7, 16 }
 0x423   : > { %v8457_v27 = vrot.slane %v8455_v43, 5  ;;  %v15900_v33 = vpop.f32.mrb[154].mxu1  ;;  %10030 = vmatmul.mubr.bf16.gmra.mrb[248].mxu1 %v11245_v30  ;;  %v7514_v16 = vrot.slane %v7513_v2, 4  ;;  %v8465_v15 = vshrl.u32 %v8089_v7, 16  ;;  %v8471_v5 = vshll.u32 %v8090_v12, 16 }
 0x424   : > { %v7523_v40 = vor.u32 %v7522_v17, %v7518_v63  ;;  %v12222_v8 = vpop.f32.mrb[155].mxu1  ;;  %10037 = vmatprep.mubr.bf16.mxu1 %v11278_v0  ;;  %v7528_v54 = vrot.slane %v7526_v10, 5  ;;  %v8463_v52 = vrot.slane %v8461_v32, 5  ;;  %v8653_v18 = vrot.slane %v8556_v53, 5  ;;  %v8559_v10 = vld [vmem:[#allocation3 + $0x28] sm:$0xf] }
 0x425   : > { %v8458_v61 = vor.u32 %v8457_v27, %v8454_v9  ;;  %v7519_v60 = vsel %vm13474_vm11, %v7514_v16, %v7518_v63  ;;  %v8467_v29 = vrot.slane %v8465_v15, 4  ;;  %v11311_v1 = vrot.slane %v8555_v19, 9  ;;  %v8558_v17 = vld [vmem:[#allocation3 + $0x24] sm:$0xe]  ;;  %v8562_v53 = vld [vmem:[#allocation3 + $0x34] sm:$0xf] }
 0x426   : > { %v7524_v47 = vrot.slane %v7523_v40, 4  ;;  %v15904_v49 = vpop.f32.mrb[188].mxu0  ;;  %v8473_v21 = vrot.slane %v8471_v5, 5  ;;  %v8655_v6 = vrot.slane %v8653_v18, 4  ;;  %v8656_v7 = vrot.slane %v8557_v24, 5  ;;  %v13045_v5 = vld [vmem:[#allocation3 + $0xcc] sm:$0xff]  }
 0x427   : > { %v8459_v39 = vrot.slane %v8458_v61, 4  ;;  %v15906_v22 = vpop.f32.mrb[189].mxu0  ;;  %v8468_v31 = vor.u32 %v8467_v29, %v8463_v52  ;;  %v12326_v12 = vadd.f32 %v15850_v45, %v15844_v14  ;;  %v12214_v38 = vadd.f32 %v15862_v62, %v15858_v44  ;;  %v8560_v27 = vld [vmem:[#allocation3 + $0x2c] sm:$0x1]  ;;  %v8561_v40 = vld [vmem:[#allocation3 + $0x30] sm:$0xe] }
 0x428   : > { %v7529_v50 = vsel %vm13474_vm11, %v7524_v47, %v7528_v54  ;;  %v15914_v46 = vpop.f32.mrb[190].mxu0  ;;  %v8654_v30 = vsel %vm13492_vm14, %v11311_v1, %v8653_v18  ;;  %v8657_v2 = vsel %vm13492_vm14, %v8655_v6, %v8656_v7  ;;  %v12329_v63 = vadd.f32 %v15860_v55, %v15856_v20  ;;  %v8563_v15 = vld [vmem:[#allocation3 + $0x38] sm:$0x1] }
 0x429   : > { %v11246_v43 = vcombine.low %v7519_v60, %v7529_v50  ;;  %v12224_v0 = vpop.f32.mrb[156].mxu1  ;;  %v12340_v14 = vpop.f32.mrb[191].mxu0  ;;  %v8464_v45 = vsel %vm13474_vm11, %v8459_v39, %v8463_v52  ;;  %v8469_v44 = vrot.slane %v8468_v31, 4  ;;  %v15924_v62 = vadd.f32 %v12326_v12, %v12214_v38  ;;  %v15932_v52 = vld [vmem:[#allocation3 + $0x40] sm:$0xf] }
 0x42a   : > { %v12217_v9 = vadd.f32 %v15870_v28, %v15866_v42  ;;  %v12225_v32 = vpop.f32.mrb[157].mxu1  ;;  %v11327_v19 = vcombine.low %v8654_v30, %v8657_v2  ;;  %v8660_v16 = vrot.slane %v8559_v10, 5  ;;  %v11312_v54 = vrot.slane %v8558_v17, 9  ;;  %v8568_v12 = vld [vmem:[#allocation3 + $0x4c] sm:$0xf] }
 0x42b   : > { %v12227_v20 = vpop.f32.mrb[158].mxu1  ;;  %10038 = vmatmul.mubr.bf16.gmra.mrb[252].mxu1 %v11246_v43  ;;  %v8474_v55 = vsel %vm13474_vm11, %v8469_v44, %v8473_v21  ;;  %v8667_v61 = vrot.slane %v8562_v53, 5  ;;  %v8663_v60 = vrot.slane %v8560_v27, 5  ;;  %v12332_v47 = vadd.f32 %v15886_v37, %v15880_v13  ;;  %v8566_v30 = vld [vmem:[#allocation3 + $0x44] sm:$0x1] }
 0x42c   : > { %v15930_v24 = vadd.f32 %v12329_v63, %v12217_v9  ;;  %v12228_v18 = vpop.f32.mrb[159].mxu1  ;;  %v11310_v42 = vcombine.low %v8464_v45, %v8474_v55  ;;  %12702 = vmatprep.mubr.bf16.mxu1 %v11327_v19  ;;  %v8662_v28 = vrot.slane %v8660_v16, 4  ;;  %v8670_v1 = vrot.slane %v8563_v15, 5  ;;  %v8564_v53 = vld [vmem:[#allocation3 + $0x3c] sm:$0xe] }
 0x42d   : > { %v8669_v29 = vrot.slane %v8667_v61, 4  ;;  %v12220_v56 = vadd.f32 %v15898_v3, %v15894_v4  ;;  %v12335_v39 = vadd.f32 %v15896_v34, %v15890_v57  ;;  %v11313_v7 = vrot.slane %v8561_v40, 9  ;;  %v8569_v44 = vld [vmem:[#allocation3 + $0x50] sm:$0x1]  ;;  %v8567_v40 = vld [vmem:[#allocation3 + $0x48] sm:$0xe] }
 0x42e   : > { %v12342_v21 = vpop.f32.mrb[192].mxu0  ;;  %10198 = vmatprep.mubr.bf16.mxu0 %v11310_v42  ;;  %v8664_v6 = vsel %vm13492_vm14, %v8662_v28, %v8663_v60  ;;  %v12223_v50 = vadd.f32 %v12222_v8, %v15900_v33  ;;  %v8674_v31 = vrot.slane %v15932_v52, 5  ;;  %v8661_v57 = vsel %vm13492_vm14, %v11312_v54, %v8660_v16  ;;  %v8571_v55 = vld [vmem:[#allocation3 + $0x58] sm:$0xf] }
 0x42f   : > { %v12343_v13 = vpop.f32.mrb[193].mxu0  ;;  %10199 = vmatmul.mubr.bf16.gmra.mrb[28].mxu0 %v13045_v5  ;;  %v8671_v37 = vsel %vm13492_vm14, %v8669_v29, %v8670_v1  ;;  %v15946_v4 = vadd.f32 %v12332_v47, %v12220_v56  ;;  %v8668_v34 = vsel %vm13492_vm14, %v11313_v7, %v8667_v61  ;;  %v11328_v10 = vcombine.low %v8661_v57, %v8664_v6 }
 0x430   : > { %v12345_v3 = vpop.f32.mrb[194].mxu0  ;;  %v15952_v38 = vadd.f32 %v12335_v39, %v12223_v50  ;;  %v11329_v43 = vcombine.low %v8668_v34, %v8671_v37  ;;  %v8681_v2 = vrot.slane %v8568_v12, 5  ;;  %v12338_v63 = vadd.f32 %v15906_v22, %v15904_v49  ;;  %v8574_v49 = vld [vmem:[#allocation3 + $0x64] sm:$0xf]  ;;  %v8572_v37 = vld [vmem:[#allocation3 + $0x5c] sm:$0x1] }
 0x431   : > { %v12230_v33 = vpop.f32.mrb[160].mxu1  ;;  %v12346_v8 = vpop.f32.mrb[195].mxu0  ;;  %v8676_v45 = vrot.slane %v8674_v31, 4  ;;  %v12226_v9 = vadd.f32 %v12225_v32, %v12224_v0  ;;  %v12341_v27 = vadd.f32 %v12340_v14, %v15914_v46  ;;  %v12229_v19 = vadd.f32 %v12228_v18, %v12227_v20  ;;  %v8570_v34 = vld [vmem:[#allocation3 + $0x54] sm:$0xe] }
 0x432   : > { %v12231_v17 = vpop.f32.mrb[161].mxu1  ;;  %v8683_v15 = vrot.slane %v8681_v2, 4  ;;  %v8677_v54 = vrot.slane %v8566_v30, 5  ;;  %v11314_v22 = vrot.slane %v8564_v53, 9  ;;  %v8684_v42 = vrot.slane %v8569_v44, 5 }
 0x433   : > { %v12233_v16 = vpop.f32.mrb[162].mxu1  ;;  %12703 = vmatmul.mubr.bf16.vlgmr.msra.gmra.mrb[0].mxu1 %v11328_v10  ;;  %v15957_v61 = vadd.f32 %v12338_v63, %v12226_v9  ;;  %v15959_v52 = vadd.f32 %v12341_v27, %v12229_v19  ;;  %v11315_v0 = vrot.slane %v8567_v40, 9  ;;  %v8688_v14 = vrot.slane %v8571_v55, 5  ;;  %v8573_v53 = vld [vmem:[#allocation3 + $0x60] sm:$0xe] }
 0x434   : > { %v12234_v5 = vpop.f32.mrb[163].mxu1  ;;  %12706 = vmatprep.mubr.bf16.mxu1 %v11329_v43  ;;  %v8678_v46 = vsel %vm13492_vm14, %v8676_v45, %v8677_v54  ;;  %v12344_v32 = vadd.f32 %v12343_v13, %v12342_v21  ;;  %v8685_v18 = vsel %vm13492_vm14, %v8683_v15, %v8684_v42  ;;  %v8695_v60 = vrot.slane %v8574_v49, 5  ;;  %v8577_v43 = vld [vmem:[#allocation3 + $0x70] sm:$0xf] }
 0x435   : > { %v12232_v47 = vadd.f32 %v12231_v17, %v12230_v33  ;;  %v12347_v29 = vadd.f32 %v12346_v8, %v12345_v3  ;;  %v8675_v56 = vsel %vm13492_vm14, %v11314_v22, %v8674_v31  ;;  %v12235_v39 = vadd.f32 %v12234_v5, %v12233_v16  ;;  %v8575_v33 = vld [vmem:[#allocation3 + $0x68] sm:$0x1] }
 0x436   : > { %v12348_v28 = vpop.f32.mrb[196].mxu0  ;;  %v11330_v50 = vcombine.low %v8675_v56, %v8678_v46  ;;  %v8682_v12 = vsel %vm13492_vm14, %v11315_v0, %v8681_v2  ;;  %v8690_v10 = vrot.slane %v8688_v14, 4  ;;  %v8697_v31 = vrot.slane %v8695_v60, 4  ;;  %v8580_v2 = vld [vmem:[#allocation3 + $0x7c] sm:$0xf] }
 0x437   : > { %v12349_v20 = vpop.f32.mrb[197].mxu0  ;;  %v15969_v21 = vadd.f32 %v12344_v32, %v12232_v47  ;;  %v11331_v57 = vcombine.low %v8682_v12, %v8685_v18  ;;  %v15971_v3 = vadd.f32 %v12347_v29, %v12235_v39  ;;  %v8691_v17 = vrot.slane %v8572_v37, 5  ;;  %v8578_v29 = vld [vmem:[#allocation3 + $0x74] sm:$0x1]  ;;  %v8576_v37 = vld [vmem:[#allocation3 + $0x6c] sm:$0xe] }
 0x438   : > { %v12351_v1 = vpop.f32.mrb[198].mxu0  ;;  %v12350_v30 = vadd.f32 %v12349_v20, %v12348_v28  ;;  %v11316_v27 = vrot.slane %v8570_v34, 9  ;;  %v8698_v19 = vrot.slane %v8575_v33, 5  ;;  %v8702_v15 = vrot.slane %v8577_v43, 5  ;;  %v8586_v33 = vld [vmem:[#allocation3 + $0x94] sm:$0xf] }
 0x439   : > { %v12236_v6 = vpop.f32.mrb[164].mxu1  ;;  %v12352_v7 = vpop.f32.mrb[199].mxu0  ;;  %v8692_v40 = vsel %vm13492_vm14, %v8690_v10, %v8691_v17  ;;  %v11317_v49 = vrot.slane %v8573_v53, 9  ;;  %v8709_v42 = vrot.slane %v8580_v2, 5  ;;  %v8705_v34 = vrot.slane %v8578_v29, 5 }
 0x43a   : > { %v12237_v13 = vpop.f32.mrb[165].mxu1  ;;  %v12353_v44 = vadd.f32 %v12352_v7, %v12351_v1  ;;  %v8699_v22 = vsel %vm13492_vm14, %v8697_v31, %v8698_v19  ;;  %v8689_v46 = vsel %vm13492_vm14, %v11316_v27, %v8688_v14  ;;  %v8581_v7 = vld [vmem:[#allocation3 + $0x80] sm:$0x1]  ;;  %v8579_v10 = vld [vmem:[#allocation3 + $0x78] sm:$0xe] }
 0x43b   : > { %v12239_v8 = vpop.f32.mrb[166].mxu1  ;;  %12707 = vmatmul.mubr.bf16.gmra.mrb[4].mxu1 %v11330_v50  ;;  %v12238_v45 = vadd.f32 %v12237_v13, %v12236_v6  ;;  %v11332_v18 = vcombine.low %v8689_v46, %v8692_v40  ;;  %v8696_v47 = vsel %vm13492_vm14, %v11317_v49, %v8695_v60  ;;  %v8704_v6 = vrot.slane %v8702_v15, 4 }
 0x43c   : > { %v12240_v63 = vpop.f32.mrb[167].mxu1  ;;  %12710 = vmatprep.mubr.bf16.mxu1 %v11331_v57  ;;  %v11333_v39 = vcombine.low %v8696_v47, %v8699_v22  ;;  %v8711_v13 = vrot.slane %v8709_v42, 4  ;;  %v8583_v57 = vld [vmem:[#allocation3 + $0x88] sm:$0xf]  ;;  %v8712_v31 = vrot.slane %v8581_v7, 5 }
 0x43d   : > { %v12241_v9 = vadd.f32 %v12240_v63, %v12239_v8  ;;  %v15975_v55 = vadd.f32 %v12350_v30, %v12238_v45  ;;  %v11318_v30 = vrot.slane %v8576_v37, 9  ;;  %v8706_v63 = vsel %vm13492_vm14, %v8704_v6, %v8705_v34  ;;  %v8585_v7 = vld [vmem:[#allocation3 + $0x90] sm:$0xe] }
 0x43e   : > { %v12354_v16 = vpop.f32.mrb[200].mxu0  ;;  %v8716_v17 = vrot.slane %v8583_v57, 5  ;;  %v11319_v45 = vrot.slane %v8579_v10, 9 }
 0x43f   : > { %v15977_v5 = vadd.f32 %v12353_v44, %v12241_v9  ;;  %v12355_v54 = vpop.f32.mrb[201].mxu0  ;;  %v8713_v44 = vsel %vm13492_vm14, %v8711_v13, %v8712_v31  ;;  %v8723_v9 = vrot.slane %v8586_v33, 5 }
 0x440   : > { %v12357_v28 = vpop.f32.mrb[202].mxu0  ;;  %v12356_v32 = vadd.f32 %v12355_v54, %v12354_v16  ;;  %v8703_v16 = vsel %vm13492_vm14, %v11318_v30, %v8702_v15  ;;  %v8710_v22 = vsel %vm13492_vm14, %v11319_v45, %v8709_v42 }
 0x441   : > { %v12242_v0 = vpop.f32.mrb[168].mxu1  ;;  %v12358_v20 = vpop.f32.mrb[203].mxu0  ;;  %v11334_v49 = vcombine.low %v8703_v16, %v8706_v63  ;;  %v8590_v16 = vld [vmem:[#allocation3 + $0xa4] sm:$0x1] }
 0x442   : > { %v12243_v1 = vpop.f32.mrb[169].mxu1  ;;  %v12359_v56 = vadd.f32 %v12358_v20, %v12357_v28  ;;  %v8584_v28 = vld [vmem:[#allocation3 + $0x8c] sm:$0x1]  ;;  %v8718_v20 = vrot.slane %v8716_v17, 4 }
 0x443   : > { %v12244_v50 = vadd.f32 %v12243_v1, %v12242_v0  ;;  %v12245_v12 = vpop.f32.mrb[170].mxu1  ;;  %12711 = vmatmul.mubr.bf16.gmra.mrb[8].mxu1 %v11332_v18  ;;  %v8587_v18 = vld [vmem:[#allocation3 + $0x98] sm:$0x1]  ;;  %v8582_v1 = vld [vmem:[#allocation3 + $0x84] sm:$0xe]  ;;  %v8719_v15 = vrot.slane %v8584_v28, 5 }
 0x444   : > { %v12246_v14 = vpop.f32.mrb[171].mxu1  ;;  %12714 = vmatprep.mubr.bf16.mxu1 %v11333_v39  ;;  %v8589_v39 = vld [vmem:[#allocation3 + $0xa0] sm:$0xf]  ;;  %v8726_v37 = vrot.slane %v8587_v18, 5  ;;  %v11320_v57 = vrot.slane %v8582_v1, 9 }
 0x445   : > { %v15985_v8 = vadd.f32 %v12356_v32, %v12244_v50  ;;  %v12247_v60 = vadd.f32 %v12246_v14, %v12245_v12  ;;  %v11335_v32 = vcombine.low %v8710_v22, %v8713_v44  ;;  %v8592_v50 = vld [vmem:[#allocation3 + $0xac] sm:$0xf]  ;;  %v8720_v14 = vsel %vm13492_vm14, %v8718_v20, %v8719_v15  ;;  %v8593_v28 = vld [vmem:[#allocation3 + $0xb0] sm:$0x1]  ;;  %v8595_v18 = vld [vmem:[#allocation3 + $0xb8] sm:$0xf] }
 0x446   : > { %v12360_v43 = vpop.f32.mrb[204].mxu0  ;;  %v8730_v34 = vrot.slane %v8589_v39, 5  ;;  %v8598_v1 = vld [vmem:[#allocation3 + $0xc4] sm:$0xf]  ;;  %v8740_v39 = vrot.slane %v8593_v28, 5 }
 0x447   : > { %v15989_v53 = vadd.f32 %v12359_v56, %v12247_v60  ;;  %v12361_v2 = vpop.f32.mrb[205].mxu0  ;;  %v8725_v56 = vrot.slane %v8723_v9, 4  ;;  %v11321_v60 = vrot.slane %v8585_v7, 9 }
 0x448   : > { %v12362_v27 = vadd.f32 %v12361_v2, %v12360_v43  ;;  %v12363_v19 = vpop.f32.mrb[206].mxu0  ;;  %v8737_v43 = vrot.slane %v8592_v50, 5  ;;  %v8717_v2 = vsel %vm13492_vm14, %v11320_v57, %v8716_v17  ;;  %v8732_v22 = vrot.slane %v8730_v34, 4 }
 0x449   : > { %v12248_v40 = vpop.f32.mrb[172].mxu1  ;;  %v12364_v54 = vpop.f32.mrb[207].mxu0  ;;  %v8727_v31 = vsel %vm13492_vm14, %v8725_v56, %v8726_v37  ;;  %v8733_v17 = vrot.slane %v8590_v16, 5  ;;  %v8744_v50 = vrot.slane %v8595_v18, 5 }
 0x44a   : > { %v12249_v46 = vpop.f32.mrb[173].mxu1  ;;  %v12365_v0 = vadd.f32 %v12364_v54, %v12363_v19  ;;  %v8724_v19 = vsel %vm13492_vm14, %v11321_v60, %v8723_v9  ;;  %v8739_v20 = vrot.slane %v8737_v43, 4 }
 0x44b   : > { %v12250_v47 = vadd.f32 %v12249_v46, %v12248_v40  ;;  %v12251_v29 = vpop.f32.mrb[174].mxu1  ;;  %12715 = vmatmul.mubr.bf16.gmra.mrb[12].mxu1 %v11334_v49  ;;  %v11337_v49 = vcombine.low %v8724_v19, %v8727_v31  ;;  %v8734_v7 = vsel %vm13492_vm14, %v8732_v22, %v8733_v17 }
 0x44c   : > { %v12252_v6 = vpop.f32.mrb[175].mxu1  ;;  %12718 = vmatprep.mubr.bf16.mxu1 %v11335_v32  ;;  %v8588_v32 = vld [vmem:[#allocation3 + $0x9c] sm:$0xe]  ;;  %v8741_v57 = vsel %vm13492_vm14, %v8739_v20, %v8740_v39  ;;  %v8597_v20 = vld [vmem:[#allocation3 + $0xc0] sm:$0xe] }
 0x44d   : > { %v15997_v12 = vadd.f32 %v12362_v27, %v12250_v47  ;;  %v12253_v42 = vadd.f32 %v12252_v6, %v12251_v29  ;;  %v11336_v27 = vcombine.low %v8717_v2, %v8720_v14  ;;  %v8591_v29 = vld [vmem:[#allocation3 + $0xa8] sm:$0xe]  ;;  %v11322_v15 = vrot.slane %v8588_v32, 9 }
 0x44e   : > { %v12366_v13 = vpop.f32.mrb[208].mxu0  ;;  %v8751_v14 = vrot.slane %v8598_v1, 5  ;;  %v8602_v1 = vld [vmem:[#allocation3 + $0xd4] sm:$0x1] }
 0x44f   : > { %v16001_v10 = vadd.f32 %v12365_v0, %v12253_v42  ;;  %v12367_v33 = vpop.f32.mrb[209].mxu0  ;;  %v8731_v31 = vsel %vm13492_vm14, %v11322_v15, %v8730_v34 }
 0x450   : > { %v12368_v30 = vadd.f32 %v12367_v33, %v12366_v13  ;;  %v12369_v63 = vpop.f32.mrb[210].mxu0  ;;  %v11323_v13 = vrot.slane %v8591_v29, 9  ;;  %v11338_v2 = vcombine.low %v8731_v31, %v8734_v7  ;;  %v8600_v29 = vld [vmem:[#allocation3 + $0xcc] sm:$0xe] }
 0x451   : > { %v12254_v45 = vpop.f32.mrb[176].mxu1  ;;  %v12370_v44 = vpop.f32.mrb[211].mxu0  ;;  %v11326_v31 = vrot.slane %v8600_v29, 9 }
 0x452   : > { %v12255_v40 = vpop.f32.mrb[177].mxu1  ;;  %v12371_v54 = vadd.f32 %v12370_v44, %v12369_v63  ;;  %v8596_v44 = vld [vmem:[#allocation3 + $0xbc] sm:$0x1] }
 0x453   : > { %v12256_v46 = vadd.f32 %v12255_v40, %v12254_v45  ;;  %v12257_v0 = vpop.f32.mrb[178].mxu1  ;;  %12719 = vmatmul.mubr.bf16.gmra.mrb[16].mxu1 %v11336_v27  ;;  %v8738_v45 = vsel %vm13492_vm14, %v11323_v13, %v8737_v43  ;;  %v8601_v27 = vld [vmem:[#allocation3 + $0xd0] sm:$0xf]  ;;  %v8747_v34 = vrot.slane %v8596_v44, 5 }
 0x454   : > { %v12258_v47 = vpop.f32.mrb[179].mxu1  ;;  %12722 = vmatprep.mubr.bf16.mxu1 %v11337_v49  ;;  %v11339_v40 = vcombine.low %v8738_v45, %v8741_v57  ;;  %v8599_v49 = vld [vmem:[#allocation3 + $0xc8] sm:$0x1]  ;;  %v8758_v18 = vrot.slane %v8601_v27, 5 }
 0x455   : > { %v16009_v56 = vadd.f32 %v12368_v30, %v12256_v46  ;;  %v12259_v9 = vadd.f32 %v12258_v47, %v12257_v0  ;;  %v8594_v46 = vld [vmem:[#allocation3 + $0xb4] sm:$0xe]  ;;  %v8753_v0 = vrot.slane %v8751_v14, 4  ;;  %v8754_v17 = vrot.slane %v8599_v49, 5 }
 0x456   : > { %v12372_v6 = vpop.f32.mrb[212].mxu0  ;;  %v11324_v39 = vrot.slane %v8594_v46, 9 }
 0x457   : > { %v16013_v42 = vadd.f32 %v12371_v54, %v12259_v9  ;;  %v12373_v37 = vpop.f32.mrb[213].mxu0  ;;  %v8746_v54 = vrot.slane %v8744_v50, 4  ;;  %v8755_v13 = vsel %vm13492_vm14, %v8753_v0, %v8754_v17 }
 0x458   : > { %v12374_v33 = vadd.f32 %v12373_v37, %v12372_v6  ;;  %v12375_v60 = vpop.f32.mrb[214].mxu0  ;;  %v11325_v37 = vrot.slane %v8597_v20, 9 }
 0x459   : > { %v12260_v30 = vpop.f32.mrb[180].mxu1  ;;  %v12376_v63 = vpop.f32.mrb[215].mxu0  ;;  %v8748_v6 = vsel %vm13492_vm14, %v8746_v54, %v8747_v34 }
 0x45a   : > { %v12261_v19 = vpop.f32.mrb[181].mxu1  ;;  %v12377_v16 = vadd.f32 %v12376_v63, %v12375_v60  ;;  %v8761_v63 = vrot.slane %v8602_v1, 5  ;;  %v8752_v27 = vsel %vm13492_vm14, %v11325_v37, %v8751_v14 }
 0x45b   : > { %v12262_v22 = vadd.f32 %v12261_v19, %v12260_v30  ;;  %v12263_v28 = vpop.f32.mrb[182].mxu1  ;;  %12723 = vmatmul.mubr.bf16.gmra.mrb[20].mxu1 %v11338_v2  ;;  %v8760_v30 = vrot.slane %v8758_v18, 4 }
 0x45c   : > { %v12264_v32 = vpop.f32.mrb[183].mxu1  ;;  %12726 = vmatprep.mubr.bf16.mxu1 %v11339_v40  ;;  %v11341_v40 = vcombine.low %v8752_v27, %v8755_v13 }
 0x45d   : > { %v16021_v47 = vadd.f32 %v12374_v33, %v12262_v22  ;;  %v12265_v43 = vadd.f32 %v12264_v32, %v12263_v28  ;;  %v8745_v33 = vsel %vm13492_vm14, %v11324_v39, %v8744_v50  ;;  %v8759_v50 = vsel %vm13492_vm14, %v11326_v31, %v8758_v18 }
 0x45e   : > { %v12378_v9 = vpop.f32.mrb[216].mxu0  ;;  %v11340_v44 = vcombine.low %v8745_v33, %v8748_v6  ;;  %v8762_v28 = vsel %vm13492_vm14, %v8760_v30, %v8761_v63 }
 0x45f   : > { %v16025_v15 = vadd.f32 %v12377_v16, %v12265_v43  ;;  %v12379_v7 = vpop.f32.mrb[217].mxu0  ;;  %v11342_v20 = vcombine.low %v8759_v50, %v8762_v28 }
 0x460   : > { %v12380_v57 = vadd.f32 %v12379_v7, %v12378_v9  ;;  %v12381_v60 = vpop.f32.mrb[218].mxu0 }
 0x461   : > { %v12266_v2 = vpop.f32.mrb[184].mxu1  ;;  %v12382_v45 = vpop.f32.mrb[219].mxu0 }
 0x462   : > { %v12267_v19 = vpop.f32.mrb[185].mxu1  ;;  %v12383_v16 = vadd.f32 %v12382_v45, %v12381_v60 }
 0x463   : > { %v12268_v54 = vadd.f32 %v12267_v19, %v12266_v2  ;;  %v12269_v49 = vpop.f32.mrb[186].mxu1  ;;  %12727 = vmatmul.mubr.bf16.gmra.mrb[24].mxu1 %v11340_v44 }
 0x464   : > { %v12270_v22 = vpop.f32.mrb[187].mxu1  ;;  %12730 = vmatprep.mubr.bf16.mxu1 %v11341_v40 }
 0x465   : > { %v16037_v46 = vadd.f32 %v12380_v57, %v12268_v54  ;;  %v12271_v0 = vadd.f32 %v12270_v22, %v12269_v49 }
 0x466   : > { %v12384_v32 = vpop.f32.mrb[220].mxu0 }
 0x467   : > { %v16039_v34 = vadd.f32 %v12383_v16, %v12271_v0  ;;  %v12385_v14 = vpop.f32.mrb[221].mxu0 }
 0x468   : > { %v12386_v43 = vadd.f32 %v12385_v14, %v12384_v32  ;;  %v12387_v17 = vpop.f32.mrb[222].mxu0 }
 0x469   : > { %v12272_v29 = vpop.f32.mrb[188].mxu1  ;;  %v12388_v1 = vpop.f32.mrb[223].mxu0 }
 0x46a   : > { %v12273_v9 = vpop.f32.mrb[189].mxu1  ;;  %v12389_v39 = vadd.f32 %v12388_v1, %v12387_v17 }
 0x46b   : > { %v12274_v6 = vadd.f32 %v12273_v9, %v12272_v29  ;;  %v12275_v7 = vpop.f32.mrb[190].mxu1  ;;  %12731 = vmatmul.mubr.bf16.gmra.mrb[28].mxu1 %v11342_v20 }
 0x46c   : > { %v12276_v18 = vpop.f32.mrb[191].mxu1 }
 0x46d   : > { %v16041_v11 = vadd.f32 %v12386_v43, %v12274_v6  ;;  %v12277_v37 = vadd.f32 %v12276_v18, %v12275_v7 }
 0x46e   : > { %v12518_v13 = vpop.f32.mrb[224].mxu0 }
 0x46f   : > { %v16043_v57 = vadd.f32 %v12389_v39, %v12277_v37  ;;  %v12519_v60 = vpop.f32.mrb[225].mxu0 }
 0x470   : > { %v12520_v33 = vadd.f32 %v12519_v60, %v12518_v13  ;;  %v12521_v31 = vpop.f32.mrb[226].mxu0 }
 0x471   : > { %v12406_v30 = vpop.f32.mrb[192].mxu1  ;;  %v12522_v63 = vpop.f32.mrb[227].mxu0 }
 0x472   : > { %v12407_v2 = vpop.f32.mrb[193].mxu1  ;;  %v16045_v45 = vadd.f32 %v12522_v63, %v12521_v31 }
 0x473   : > { %v12408_v44 = vadd.f32 %v12407_v2, %v12406_v30  ;;  %v12409_v27 = vpop.f32.mrb[194].mxu1 }
 0x474   : > { %v12410_v19 = vpop.f32.mrb[195].mxu1 }
 0x475   : > { %v9920_v16 = vadd.f32 %v12408_v44, %v15736_v41  ;;  %v12411_v40 = vadd.f32 %v12410_v19, %v12409_v27 }
 0x476   : > { %v12524_v54 = vpop.f32.mrb[228].mxu0 }
 0x477   : > { %v9923_v49 = vadd.f32 %v12411_v40, %v15746_v51  ;;  %v12525_v22 = vpop.f32.mrb[229].mxu0 }
 0x478   : > { %v12526_v50 = vadd.f32 %v12525_v22, %v12524_v54  ;;  %v12527_v28 = vpop.f32.mrb[230].mxu0 }
 0x479   : > { %v12412_v0 = vpop.f32.mrb[196].mxu1  ;;  %v12528_v32 = vpop.f32.mrb[231].mxu0 }
 0x47a   : > { %v12413_v14 = vpop.f32.mrb[197].mxu1  ;;  %v12529_v20 = vadd.f32 %v12528_v32, %v12527_v28 }
 0x47b   : > { %v12414_v43 = vadd.f32 %v12413_v14, %v12412_v0  ;;  %v12415_v17 = vpop.f32.mrb[198].mxu1 }
 0x47c   : > { %v12416_v29 = vpop.f32.mrb[199].mxu1 }
 0x47d   : > { %v9928_v1 = vadd.f32 %v12414_v43, %v15772_v36  ;;  %v12417_v9 = vadd.f32 %v12416_v29, %v12415_v17 }
 0x47e   : > { %v12530_v39 = vpop.f32.mrb[232].mxu0 }
 0x47f   : > { %v9931_v41 = vadd.f32 %v12417_v9, %v15780_v35  ;;  %v12531_v6 = vpop.f32.mrb[233].mxu0  ;;  %v16053_v40 = vadd.f32 %v12526_v50, %v9928_v1  ;;  %v16057_v50 = vadd.f32 %v12520_v33, %v9920_v16 }
 0x480   : > { %v12532_v7 = vadd.f32 %v12531_v6, %v12530_v39  ;;  %v12533_v18 = vpop.f32.mrb[234].mxu0 }
 0x481   : > { %v12418_v51 = vpop.f32.mrb[200].mxu1  ;;  %v12534_v37 = vpop.f32.mrb[235].mxu0 }
 0x482   : > { %v12419_v13 = vpop.f32.mrb[201].mxu1  ;;  %v12535_v60 = vadd.f32 %v12534_v37, %v12533_v18  ;;  %v16059_v37 = vadd.f32 %v12529_v20, %v9931_v41 }
 0x483   : > { %v12420_v31 = vadd.f32 %v12419_v13, %v12418_v51  ;;  %v12421_v30 = vpop.f32.mrb[202].mxu1 }
 0x484   : > { %v12422_v63 = vpop.f32.mrb[203].mxu1 }
 0x485   : > { %v9936_v2 = vadd.f32 %v12420_v31, %v15802_v23  ;;  %v12423_v44 = vadd.f32 %v12422_v63, %v12421_v30 }
 0x486   : > { %v12536_v27 = vpop.f32.mrb[236].mxu0 }
 0x487   : > { %v9939_v36 = vadd.f32 %v12423_v44, %v15810_v48  ;;  %v12537_v19 = vpop.f32.mrb[237].mxu0  ;;  %v16068_v41 = vadd.f32 %v12532_v7, %v9936_v2 }
 0x488   : > { %v12538_v35 = vadd.f32 %v12537_v19, %v12536_v27  ;;  %v12539_v54 = vpop.f32.mrb[238].mxu0 }
 0x489   : > { %v12424_v22 = vpop.f32.mrb[204].mxu1  ;;  %v12540_v28 = vpop.f32.mrb[239].mxu0 }
 0x48a   : > { %v12425_v0 = vpop.f32.mrb[205].mxu1  ;;  %v12541_v32 = vadd.f32 %v12540_v28, %v12539_v54 }
 0x48b   : > { %v12426_v14 = vadd.f32 %v12425_v0, %v12424_v22  ;;  %v12427_v43 = vpop.f32.mrb[206].mxu1 }
 0x48c   : > { %v12428_v17 = vpop.f32.mrb[207].mxu1 }
 0x48d   : > { %v9944_v29 = vadd.f32 %v12426_v14, %v15848_v25  ;;  %v12429_v9 = vadd.f32 %v12428_v17, %v12427_v43 }
 0x48e   : > { %v12542_v23 = vpop.f32.mrb[240].mxu0 }
 0x48f   : > { %v9947_v39 = vadd.f32 %v12429_v9, %v15854_v59  ;;  %v12543_v6 = vpop.f32.mrb[241].mxu0  ;;  %v16063_v59 = vadd.f32 %v16045_v45, %v9923_v49  ;;  %v16066_v16 = vadd.f32 %v12538_v35, %v9944_v29 }
 0x490   : > { %v12544_v48 = vadd.f32 %v12543_v6, %v12542_v23  ;;  %v12545_v18 = vpop.f32.mrb[242].mxu0  ;;  %v16073_v6 = vadd.f32 %v12535_v60, %v9939_v36 }
 0x491   : > { %v12430_v1 = vpop.f32.mrb[208].mxu1  ;;  %v12546_v51 = vpop.f32.mrb[243].mxu0  ;;  %v16070_v14 = vadd.f32 %v12541_v32, %v9947_v39 }
 0x492   : > { %v12431_v13 = vpop.f32.mrb[209].mxu1  ;;  %v12547_v31 = vadd.f32 %v12546_v51, %v12545_v18 }
 0x493   : > { %v12432_v30 = vadd.f32 %v12431_v13, %v12430_v1  ;;  %v12433_v63 = vpop.f32.mrb[210].mxu1 }
 0x494   : > { %v12434_v44 = vpop.f32.mrb[211].mxu1 }
 0x495   : > { %v9952_v25 = vadd.f32 %v12432_v30, %v15878_v26  ;;  %v12435_v27 = vadd.f32 %v12434_v44, %v12433_v63 }
 0x496   : > { %v12548_v19 = vpop.f32.mrb[244].mxu0 }
 0x497   : > { %v9955_v54 = vadd.f32 %v12435_v27, %v15884_v58  ;;  %v12549_v33 = vpop.f32.mrb[245].mxu0  ;;  %v16078_v32 = vadd.f32 %v12544_v48, %v9952_v25 }
 0x498   : > { %v12550_v22 = vadd.f32 %v12549_v33, %v12548_v19  ;;  %v12551_v20 = vpop.f32.mrb[246].mxu0 }
 0x499   : > { %v12436_v28 = vpop.f32.mrb[212].mxu1  ;;  %v12552_v0 = vpop.f32.mrb[247].mxu0  ;;  %v16083_v27 = vadd.f32 %v12547_v31, %v9955_v54 }
 0x49a   : > { %v12437_v43 = vpop.f32.mrb[213].mxu1  ;;  %v12553_v26 = vadd.f32 %v12552_v0, %v12551_v20 }
 0x49b   : > { %v12438_v17 = vadd.f32 %v12437_v43, %v12436_v28  ;;  %v12439_v9 = vpop.f32.mrb[214].mxu1 }
 0x49c   : > { %v12440_v23 = vpop.f32.mrb[215].mxu1 }
 0x49d   : > { %v9960_v45 = vadd.f32 %v12438_v17, %v15924_v62  ;;  %v12441_v49 = vadd.f32 %v12440_v23, %v12439_v9 }
 0x49e   : > { %v12554_v58 = vpop.f32.mrb[248].mxu0 }
 0x49f   : > { %v9963_v35 = vadd.f32 %v12441_v49, %v15930_v24  ;;  %v12555_v29 = vpop.f32.mrb[249].mxu0  ;;  %v16076_v7 = vadd.f32 %v12550_v22, %v9960_v45 }
 0x4a0   : > { %v12556_v2 = vadd.f32 %v12555_v29, %v12554_v58  ;;  %v12557_v18 = vpop.f32.mrb[250].mxu0 }
 0x4a1   : > { %v12442_v39 = vpop.f32.mrb[216].mxu1  ;;  %v12558_v1 = vpop.f32.mrb[251].mxu0  ;;  %v16080_v51 = vadd.f32 %v12553_v26, %v9963_v35 }
 0x4a2   : > { %v12443_v13 = vpop.f32.mrb[217].mxu1  ;;  %v12559_v30 = vadd.f32 %v12558_v1, %v12557_v18 }
 0x4a3   : > { %v12444_v62 = vadd.f32 %v12443_v13, %v12442_v39  ;;  %v12445_v63 = vpop.f32.mrb[218].mxu1 }
 0x4a4   : > { %v12446_v44 = vpop.f32.mrb[219].mxu1 }
 0x4a5   : > { %v9968_v60 = vadd.f32 %v12444_v62, %v15946_v4  ;;  %v12447_v36 = vadd.f32 %v12446_v44, %v12445_v63 }
 0x4a6   : > { %v12560_v24 = vpop.f32.mrb[252].mxu0 }
 0x4a7   : > { %v9971_v19 = vadd.f32 %v12447_v36, %v15952_v38  ;;  %v12561_v33 = vpop.f32.mrb[253].mxu0  ;;  %v16086_v22 = vadd.f32 %v12556_v2, %v9968_v60 }
 0x4a8   : > { %v12562_v48 = vadd.f32 %v12561_v33, %v12560_v24  ;;  %v12563_v25 = vpop.f32.mrb[254].mxu0 }
 0x4a9   : > { %v12448_v20 = vpop.f32.mrb[220].mxu1  ;;  %v12564_v28 = vpop.f32.mrb[255].mxu0  ;;  %v16089_v31 = vadd.f32 %v12559_v30, %v9971_v19 }
 0x4aa   : > { %v12449_v0 = vpop.f32.mrb[221].mxu1  ;;  %v12565_v43 = vadd.f32 %v12564_v28, %v12563_v25 }
 0x4ab   : > { %v12450_v26 = vadd.f32 %v12449_v0, %v12448_v20  ;;  %v12451_v17 = vpop.f32.mrb[222].mxu1 }
 0x4ac   : > { %v12452_v9 = vpop.f32.mrb[223].mxu1 }
 0x4ad   : > { %v9976_v4 = vadd.f32 %v12450_v26, %v15957_v61  ;;  %v12453_v23 = vadd.f32 %v12452_v9, %v12451_v17 }
 0x4ae   : > { %v12566_v45 = vpop.f32.mrb[0].mxu0 }
 0x4af   : > { %v9979_v38 = vadd.f32 %v12453_v23, %v15959_v52  ;;  %v12567_v54 = vpop.f32.mrb[1].mxu0  ;;  %v16092_v49 = vadd.f32 %v12562_v48, %v9976_v4 }
 0x4b0   : > { %v12568_v58 = vadd.f32 %v12567_v54, %v12566_v45  ;;  %v12569_v35 = vpop.f32.mrb[2].mxu0 }
 0x4b1   : > { %v12570_v29 = vpop.f32.mrb[3].mxu0  ;;  %v16094_v2 = vadd.f32 %v12565_v43, %v9979_v38 }
 0x4b2   : > { %v12454_v18 = vpop.f32.mrb[224].mxu1  ;;  %v12571_v39 = vadd.f32 %v12570_v29, %v12569_v35 }
 0x4b3   : > { %v12455_v1 = vpop.f32.mrb[225].mxu1 }
 0x4b4   : > { %v12456_v13 = vadd.f32 %v12455_v1, %v12454_v18  ;;  %v12457_v62 = vpop.f32.mrb[226].mxu1 }
 0x4b5   : > { %v12458_v61 = vpop.f32.mrb[227].mxu1 }
 0x4b6   : > { %v9984_v63 = vadd.f32 %v12456_v13, %v15969_v21  ;;  %v12459_v30 = vadd.f32 %v12458_v61, %v12457_v62 }
 0x4b7   : > { %v12572_v44 = vpop.f32.mrb[4].mxu0 }
 0x4b8   : > { %v9987_v52 = vadd.f32 %v12459_v30, %v15971_v3  ;;  %v12573_v60 = vpop.f32.mrb[5].mxu0  ;;  %v16098_v36 = vadd.f32 %v12568_v58, %v9984_v63 }
 0x4b9   : > { %v12574_v24 = vadd.f32 %v12573_v60, %v12572_v44  ;;  %v12575_v19 = vpop.f32.mrb[6].mxu0 }
 0x4ba   : > { %v12576_v33 = vpop.f32.mrb[7].mxu0  ;;  %v16100_v48 = vadd.f32 %v12571_v39, %v9987_v52 }
 0x4bb   : > { %v12577_v25 = vadd.f32 %v12576_v33, %v12575_v19 }
 0x4bc   : > { %v12460_v20 = vpop.f32.mrb[228].mxu1 }
 0x4bd   : > { %v12461_v28 = vpop.f32.mrb[229].mxu1 }
 0x4be   : > { %v12462_v0 = vadd.f32 %v12461_v28, %v12460_v20  ;;  %v12463_v43 = vpop.f32.mrb[230].mxu1 }
 0x4bf   : > { %v12464_v26 = vpop.f32.mrb[231].mxu1 }
 0x4c0   : > { %v9992_v21 = vadd.f32 %v12462_v0, %v15975_v55  ;;  %v12465_v17 = vadd.f32 %v12464_v26, %v12463_v43 }
 0x4c1   : > { %v12578_v9 = vpop.f32.mrb[8].mxu0 }
 0x4c2   : > { %v12579_v4 = vpop.f32.mrb[9].mxu0  ;;  %v9995_v3 = vadd.f32 %v12465_v17, %v15977_v5  ;;  %v16104_v38 = vadd.f32 %v12574_v24, %v9992_v21 }
 0x4c3   : > { %v12580_v23 = vadd.f32 %v12579_v4, %v12578_v9  ;;  %v12581_v45 = vpop.f32.mrb[10].mxu0 }
 0x4c4   : > { %v12582_v54 = vpop.f32.mrb[11].mxu0  ;;  %v16106_v35 = vadd.f32 %v12577_v25, %v9995_v3 }
 0x4c5   : > { %v12583_v58 = vadd.f32 %v12582_v54, %v12581_v45 }
 0x4c7   : > { %v12466_v29 = vpop.f32.mrb[232].mxu1 }
 0x4c8   : > { %v12467_v18 = vpop.f32.mrb[233].mxu1 }
 0x4c9   : > { %v12468_v39 = vadd.f32 %v12467_v18, %v12466_v29  ;;  %v12469_v1 = vpop.f32.mrb[234].mxu1 }
 0x4ca   : > { %v12470_v13 = vpop.f32.mrb[235].mxu1 }
 0x4cb   : > { %v10000_v55 = vadd.f32 %v12468_v39, %v15985_v8  ;;  %v12471_v62 = vadd.f32 %v12470_v13, %v12469_v1  ;;  %v12584_v61 = vpop.f32.mrb[12].mxu0 }
 0x4cc   : > { %v12585_v5 = vpop.f32.mrb[13].mxu0 }
 0x4cd   : > { %v10003_v63 = vadd.f32 %v12471_v62, %v15989_v53  ;;  %v16110_v30 = vadd.f32 %v12580_v23, %v10000_v55  ;;  %v12586_v44 = vadd.f32 %v12585_v5, %v12584_v61  ;;  %v12587_v52 = vpop.f32.mrb[14].mxu0 }
 0x4ce   : > { %v12588_v60 = vpop.f32.mrb[15].mxu0 }
 0x4cf   : > { %v16112_v24 = vadd.f32 %v12583_v58, %v10003_v63  ;;  %v12589_v19 = vadd.f32 %v12588_v60, %v12587_v52 }
 0x4d4   : > { %v12472_v33 = vpop.f32.mrb[236].mxu1 }
 0x4d5   : > { %v12473_v25 = vpop.f32.mrb[237].mxu1 }
 0x4d6   : > { %v12474_v20 = vadd.f32 %v12473_v25, %v12472_v33  ;;  %v12475_v28 = vpop.f32.mrb[238].mxu1  ;;  %v12590_v43 = vpop.f32.mrb[16].mxu0 }
 0x4d7   : > { %v12476_v0 = vpop.f32.mrb[239].mxu1  ;;  %v12591_v21 = vpop.f32.mrb[17].mxu0 }
 0x4d8   : > { %v10008_v8 = vadd.f32 %v12474_v20, %v15997_v12  ;;  %v12477_v26 = vadd.f32 %v12476_v0, %v12475_v28  ;;  %v12592_v53 = vadd.f32 %v12591_v21, %v12590_v43  ;;  %v12593_v17 = vpop.f32.mrb[18].mxu0 }
 0x4d9   : > { %v12594_v4 = vpop.f32.mrb[19].mxu0 }
 0x4da   : > { %v10011_v9 = vadd.f32 %v12477_v26, %v16001_v10  ;;  %v16116_v3 = vadd.f32 %v12586_v44, %v10008_v8  ;;  %v12595_v23 = vadd.f32 %v12594_v4, %v12593_v17 }
 0x4dc   : > { %v16118_v45 = vadd.f32 %v12589_v19, %v10011_v9 }
 0x4df   : > { %v12478_v54 = vpop.f32.mrb[240].mxu1 }
 0x4e0   : > { %v12479_v58 = vpop.f32.mrb[241].mxu1 }
 0x4e1   : > { %v12480_v29 = vadd.f32 %v12479_v58, %v12478_v54  ;;  %v12481_v18 = vpop.f32.mrb[242].mxu1 }
 0x4e2   : > { %v12482_v39 = vpop.f32.mrb[243].mxu1  ;;  %v12596_v13 = vpop.f32.mrb[20].mxu0 }
 0x4e3   : > { %v10016_v1 = vadd.f32 %v12480_v29, %v16009_v56  ;;  %v12483_v12 = vadd.f32 %v12482_v39, %v12481_v18  ;;  %v12597_v55 = vpop.f32.mrb[21].mxu0 }
 0x4e4   : > { %v12598_v61 = vadd.f32 %v12597_v55, %v12596_v13  ;;  %v12599_v10 = vpop.f32.mrb[22].mxu0 }
 0x4e5   : > { %v10019_v62 = vadd.f32 %v12483_v12, %v16013_v42  ;;  %v16122_v63 = vadd.f32 %v12592_v53, %v10016_v1  ;;  %v12600_v5 = vpop.f32.mrb[23].mxu0 }
 0x4e6   : > { %v12601_v44 = vadd.f32 %v12600_v5, %v12599_v10 }
 0x4e7   : > { %v16124_v52 = vadd.f32 %v12595_v23, %v10019_v62 }
 0x4eb   : > { %v12484_v60 = vpop.f32.mrb[244].mxu1 }
 0x4ec   : > { %v12485_v19 = vpop.f32.mrb[245].mxu1 }
 0x4ed   : > { %v12486_v33 = vadd.f32 %v12485_v19, %v12484_v60  ;;  %v12487_v25 = vpop.f32.mrb[246].mxu1 }
 0x4ee   : > { %v12488_v20 = vpop.f32.mrb[247].mxu1  ;;  %v12602_v0 = vpop.f32.mrb[24].mxu0 }
 0x4ef   : > { %v10024_v56 = vadd.f32 %v12486_v33, %v16021_v47  ;;  %v12489_v28 = vadd.f32 %v12488_v20, %v12487_v25  ;;  %v12603_v43 = vpop.f32.mrb[25].mxu0 }
 0x4f0   : > { %v12604_v8 = vadd.f32 %v12603_v43, %v12602_v0  ;;  %v12605_v26 = vpop.f32.mrb[26].mxu0 }
 0x4f1   : > { %v10027_v42 = vadd.f32 %v12489_v28, %v16025_v15  ;;  %v16128_v21 = vadd.f32 %v12598_v61, %v10024_v56  ;;  %v12606_v53 = vpop.f32.mrb[27].mxu0  ;;  %v16143_v56 = vld [vmem:[%s16342_s5] ss:$0 sm:$0xff]  ;;  %v11664_v28 = vld [vmem:[%s13444_s13 + $0x8] sm:$0xff]  }
 0x4f2   : > { %v12607_v17 = vadd.f32 %v12606_v53, %v12605_v26 }
 0x4f3   : > { %v16130_v9 = vadd.f32 %v12601_v44, %v10027_v42  ;;  %v11521_v42 = vld [vmem:[%s13444_s13] sm:$0xff]  }
 0x4f6   : > { %v12490_v4 = vpop.f32.mrb[248].mxu1 }
 0x4f7   : > { %v12491_v23 = vpop.f32.mrb[249].mxu1 }
 0x4f8   : > { %v12492_v54 = vadd.f32 %v12491_v23, %v12490_v4  ;;  %v12493_v58 = vpop.f32.mrb[250].mxu1  ;;  %v11526_v4 = vunpack.c.l.bf16 %v11664_v28 }
 0x4f9   : > { %v12494_v29 = vpop.f32.mrb[251].mxu1 }
 0x4fa   : > { %v10032_v47 = vadd.f32 %v12492_v54, %v16037_v46  ;;  %v12495_v18 = vadd.f32 %v12494_v29, %v12493_v58  ;;  %v11522_v58 = vunpack.c.l.bf16 %v11521_v42 }
 0x4fc   : > { %v10035_v39 = vadd.f32 %v12495_v18, %v16039_v34  ;;  %v16134_v1 = vadd.f32 %v12604_v8, %v10032_v47  ;;  %v11527_v18 = vunpack.c.h.bf16 %v11664_v28 }
 0x4fe   : > { %v12496_v15 = vpop.f32.mrb[252].mxu1  ;;  %v16136_v12 = vadd.f32 %v12607_v17, %v10035_v39 }
 0x4ff   : > { %v12497_v13 = vpop.f32.mrb[253].mxu1 }
 0x500   : > { %v12498_v55 = vadd.f32 %v12497_v13, %v12496_v15  ;;  %v12499_v62 = vpop.f32.mrb[254].mxu1  ;;  %v11523_v13 = vunpack.c.h.bf16 %v11521_v42 }
 0x501   : > { %v12500_v61 = vpop.f32.mrb[255].mxu1 }
 0x502   : > { %v10040_v10 = vadd.f32 %v12498_v55, %v16041_v11  ;;  %v12608_v5 = vpop.f32.mrb[28].mxu0  ;;  %v12501_v44 = vadd.f32 %v12500_v61, %v12499_v62  ;;  %v11665_v61 = vld [vmem:[%s13444_s13 + $0x10] sm:$0xff]  }
 0x503   : > { %v12609_v60 = vpop.f32.mrb[29].mxu0 }
 0x504   : > { %v10043_v46 = vadd.f32 %v12501_v44, %v16043_v57  ;;  %v12610_v19 = vadd.f32 %v12609_v60, %v12608_v5  ;;  %v12611_v34 = vpop.f32.mrb[30].mxu0  ;;  %v16153_v57 = vld [vmem:[%s16343_s6] ss:$0 sm:$0xff] }
 0x505   : > { %v12612_v33 = vpop.f32.mrb[31].mxu0 }
 0x506   : > { %v12613_v25 = vadd.f32 %v12612_v33, %v12611_v34  ;;  %v12704_v20 = vpop.f32.mrb[0].mxu1  ;;  %v16146_v0 = vadd.f32 %v12610_v19, %v10040_v10 }
 0x507   : > { %v10250_v11 = vadd.f32 %v12704_v20, %v16053_v40  ;;  %v10241_v43 = vpop.f32.mrb[1].mxu1 }
 0x508   : > { %v10242_v8 = vadd.f32 %v10241_v43, %v16057_v50  ;;  %v12705_v26 = vpop.f32.mrb[2].mxu1  ;;  %v16156_v53 = vadd.f32 %v12613_v25, %v10043_v46  ;;  %v11530_v25 = vunpack.c.l.bf16 %v11665_v61 }
 0x509   : > { %v10377_v17 = vmul.f32 %v16143_v56, %v10250_v11  ;;  %v10253_v23 = vadd.f32 %v12705_v26, %v16059_v37  ;;  %v10244_v40 = vpop.f32.mrb[3].mxu1  ;;  %v11666_v37 = vld [vmem:[%s13444_s13 + $0x18] sm:$0xff]  }
 0x50a   : > { %v10375_v54 = vmul.f32 %v16143_v56, %v10242_v8  ;;  %v10245_v29 = vadd.f32 %v10244_v40, %v16063_v59  ;;  %v11534_v34 = vunpack.c.l.bf16 %v11666_v37 }
 0x50b   : > { %v10416_v47 = vadd.f32 %v16153_v57, %v10377_v17  ;;  %v10378_v50 = vmul.f32 %v16143_v56, %v10253_v23 }
 0x50c   : > { %v10414_v39 = vadd.f32 %v16153_v57, %v10375_v54  ;;  %v10376_v15 = vmul.f32 %v16143_v56, %v10245_v29  ;;  %v11535_v54 = vunpack.c.h.bf16 %v11666_v37 }
 0x50d   : > { %v10512_v55 = vadd.f32 %v11526_v4, %v10416_v47  ;;  %v10417_v62 = vadd.f32 %v16153_v57, %v10378_v50  ;;  %v11531_v47 = vunpack.c.h.bf16 %v11665_v61 }
 0x50e   : > { %v10510_v10 = vadd.f32 %v11522_v58, %v10414_v39  ;;  %v10415_v5 = vadd.f32 %v16153_v57, %v10376_v15  ;;  %v12708_v44 = vpop.f32.mrb[4].mxu1  ;;  %v11667_v39 = vld [vmem:[%s13444_s13 + $0x20] sm:$0xff]  }
 0x50f   : > { %v10513_v59 = vadd.f32 %v11527_v18, %v10417_v62  ;;  %v10266_v60 = vadd.f32 %v12708_v44, %v16066_v16  ;;  %v10257_v46 = vpop.f32.mrb[5].mxu1  ;;  %v10544_v28 = vmax.f32 %v10512_v55, 0.0  ;;  %v11668_v18 = vld [vmem:[%s13444_s13 + $0x28] sm:$0xff]  }
 0x510   : > { %v10511_v19 = vadd.f32 %v11523_v13, %v10415_v5  ;;  %v10258_v33 = vadd.f32 %v10257_v46, %v16068_v41  ;;  %v12709_v20 = vpop.f32.mrb[6].mxu1  ;;  %v10542_v26 = vmax.f32 %v10510_v10, 0.0  ;;  %v11542_v5 = vunpack.c.l.bf16 %v11668_v18 }
 0x511   : > { %v10545_v11 = vmax.f32 %v10513_v59, 0.0  ;;  %v10381_v43 = vmul.f32 %v16143_v56, %v10266_v60  ;;  %v10269_v42 = vadd.f32 %v12709_v20, %v16070_v14  ;;  %v10260_v8 = vpop.f32.mrb[7].mxu1  ;;  %v11538_v59 = vunpack.c.l.bf16 %v11667_v39 }
 0x512   : > { %v10543_v17 = vmax.f32 %v10511_v19, 0.0  ;;  %v10379_v16 = vmul.f32 %v16143_v56, %v10258_v33  ;;  %v10261_v4 = vadd.f32 %v10260_v8, %v16073_v6  ;;  %v11543_v8 = vunpack.c.h.bf16 %v11668_v18 }
 0x513   : > { %v11592_v23 = vpack.c.bf16 %v10545_v11, %v10544_v28  ;;  %v10420_v41 = vadd.f32 %v16153_v57, %v10381_v43  ;;  %v10382_v40 = vmul.f32 %v16143_v56, %v10269_v42 }
 0x514   : > { %v11587_v58 = vpack.c.bf16 %v10543_v17, %v10542_v26  ;;  %v10418_v29 = vadd.f32 %v16153_v57, %v10379_v16  ;;  %v10380_v14 = vmul.f32 %v16143_v56, %v10261_v4  ;;  %v11539_v16 = vunpack.c.h.bf16 %v11667_v39 }
 0x515   : > { %11679 = vst [vmem:[%s16182_s9 + $0x8] sm:$0xff] %v11592_v23   ;;  %v10516_v50 = vadd.f32 %v11534_v34, %v10420_v41  ;;  %v10421_v6 = vadd.f32 %v16153_v57, %v10382_v40  ;;  %v11670_v41 = vld [vmem:[%s13444_s13 + $0x38] sm:$0xff]   ;;  %v11669_v40 = vld [vmem:[%s13444_s13 + $0x30] sm:$0xff]  }
 0x516   : > { %11588 = vst [vmem:[%s16182_s9] sm:$0xff] %v11587_v58   ;;  %v10514_v15 = vadd.f32 %v11530_v25, %v10418_v29  ;;  %v10419_v13 = vadd.f32 %v16153_v57, %v10380_v14  ;;  %v12712_v55 = vpop.f32.mrb[8].mxu1  ;;  %v11546_v39 = vunpack.c.l.bf16 %v11669_v40 }
 0x517   : > { %v10517_v62 = vadd.f32 %v11535_v54, %v10421_v6  ;;  %v10282_v37 = vadd.f32 %v12712_v55, %v16076_v7  ;;  %v10273_v61 = vpop.f32.mrb[9].mxu1  ;;  %v10548_v46 = vmax.f32 %v10516_v50, 0.0  ;;  %v11550_v6 = vunpack.c.l.bf16 %v11670_v41 }
 0x518   : > { %v10515_v10 = vadd.f32 %v11531_v47, %v10419_v13  ;;  %v10274_v44 = vadd.f32 %v10273_v61, %v16078_v32  ;;  %v12713_v60 = vpop.f32.mrb[10].mxu1  ;;  %v10546_v20 = vmax.f32 %v10514_v15, 0.0 }
 0x519   : > { %v10549_v19 = vmax.f32 %v10517_v62, 0.0  ;;  %v10385_v34 = vmul.f32 %v16143_v56, %v10282_v37  ;;  %v10285_v33 = vadd.f32 %v12713_v60, %v16080_v51  ;;  %v10276_v25 = vpop.f32.mrb[11].mxu1 }
 0x51a   : > { %v10547_v28 = vmax.f32 %v10515_v10, 0.0  ;;  %v10383_v7 = vmul.f32 %v16143_v56, %v10274_v44  ;;  %v10277_v11 = vadd.f32 %v10276_v25, %v16083_v27 }
 0x51b   : > { %v11602_v32 = vpack.c.bf16 %v10549_v19, %v10548_v46  ;;  %v10424_v43 = vadd.f32 %v16153_v57, %v10385_v34  ;;  %v10386_v42 = vmul.f32 %v16143_v56, %v10285_v33  ;;  %v11551_v46 = vunpack.c.h.bf16 %v11670_v41 }
 0x51c   : > { %v11597_v26 = vpack.c.bf16 %v10547_v28, %v10546_v20  ;;  %v10422_v17 = vadd.f32 %v16153_v57, %v10383_v7  ;;  %v10384_v51 = vmul.f32 %v16143_v56, %v10277_v11  ;;  %v11547_v33 = vunpack.c.h.bf16 %v11669_v40  ;;  %v11672_v28 = vld [vmem:[%s13444_s13 + $0x48] sm:$0xff]   ;;  %v11671_v7 = vld [vmem:[%s13444_s13 + $0x40] sm:$0xff]  }
 0x51d   : > { %11681 = vst [vmem:[%s16182_s9 + $0x18] sm:$0xff] %v11602_v32   ;;  %v10520_v4 = vadd.f32 %v11542_v5, %v10424_v43  ;;  %v10425_v23 = vadd.f32 %v16153_v57, %v10386_v42 }
 0x51e   : > { %11680 = vst [vmem:[%s16182_s9 + $0x10] sm:$0xff] %v11597_v26   ;;  %v10518_v27 = vadd.f32 %v11538_v59, %v10422_v17  ;;  %v10423_v54 = vadd.f32 %v16153_v57, %v10384_v51  ;;  %v12716_v58 = vpop.f32.mrb[12].mxu1  ;;  %v11558_v17 = vunpack.c.l.bf16 %v11672_v28 }
 0x51f   : > { %v10521_v29 = vadd.f32 %v11543_v8, %v10425_v23  ;;  %v10298_v14 = vadd.f32 %v12716_v58, %v16092_v49  ;;  %v10289_v47 = vpop.f32.mrb[13].mxu1  ;;  %v10552_v13 = vmax.f32 %v10520_v4, 0.0 }
 0x520   : > { %v10519_v50 = vadd.f32 %v11539_v16, %v10423_v54  ;;  %v10290_v18 = vadd.f32 %v10289_v47, %v16086_v22  ;;  %v12717_v15 = vpop.f32.mrb[14].mxu1  ;;  %v10550_v10 = vmax.f32 %v10518_v27, 0.0  ;;  %v11554_v16 = vunpack.c.l.bf16 %v11671_v7 }
 0x521   : > { %v10553_v55 = vmax.f32 %v10521_v29, 0.0  ;;  %v10389_v62 = vmul.f32 %v16143_v56, %v10298_v14  ;;  %v10301_v37 = vadd.f32 %v12717_v15, %v16094_v2  ;;  %v10292_v61 = vpop.f32.mrb[15].mxu1  ;;  %v11555_v15 = vunpack.c.h.bf16 %v11671_v7 }
 0x522   : > { %v10551_v5 = vmax.f32 %v10519_v50, 0.0  ;;  %v10387_v49 = vmul.f32 %v16143_v56, %v10290_v18  ;;  %v10293_v44 = vadd.f32 %v10292_v61, %v16089_v31 }
 0x523   : > { %v11612_v22 = vpack.c.bf16 %v10553_v55, %v10552_v13  ;;  %v10428_v59 = vadd.f32 %v16153_v57, %v10389_v62  ;;  %v10390_v60 = vmul.f32 %v16143_v56, %v10301_v37  ;;  %v11674_v62 = vld [vmem:[%s13444_s13 + $0x58] sm:$0xff]   ;;  %v11673_v37 = vld [vmem:[%s13444_s13 + $0x50] sm:$0xff]  }
 0x524   : > { %v11607_v19 = vpack.c.bf16 %v10551_v5, %v10550_v10  ;;  %v10426_v34 = vadd.f32 %v16153_v57, %v10387_v49  ;;  %v10388_v2 = vmul.f32 %v16143_v56, %v10293_v44 }
 0x525   : > { %11683 = vst [vmem:[%s16182_s9 + $0x28] sm:$0xff] %v11612_v22   ;;  %v10524_v25 = vadd.f32 %v11550_v6, %v10428_v59  ;;  %v10429_v20 = vadd.f32 %v16153_v57, %v10390_v60  ;;  %v11559_v6 = vunpack.c.h.bf16 %v11672_v28  ;;  %v11566_v59 = vunpack.c.l.bf16 %v11674_v62 }
 0x526   : > { %11682 = vst [vmem:[%s16182_s9 + $0x20] sm:$0xff] %v11607_v19   ;;  %v10522_v31 = vadd.f32 %v11546_v39, %v10426_v34  ;;  %v10427_v11 = vadd.f32 %v16153_v57, %v10388_v2  ;;  %v12720_v32 = vpop.f32.mrb[16].mxu1 }
 0x527   : > { %v10525_v43 = vadd.f32 %v11551_v46, %v10429_v20  ;;  %v10314_v42 = vadd.f32 %v12720_v32, %v16104_v38  ;;  %v10305_v8 = vpop.f32.mrb[17].mxu1  ;;  %v10556_v23 = vmax.f32 %v10524_v25, 0.0  ;;  %v11562_v46 = vunpack.c.l.bf16 %v11673_v37 }
 0x528   : > { %v10523_v26 = vadd.f32 %v11547_v33, %v10427_v11  ;;  %v10306_v51 = vadd.f32 %v10305_v8, %v16098_v36  ;;  %v12721_v4 = vpop.f32.mrb[18].mxu1  ;;  %v10554_v58 = vmax.f32 %v10522_v31, 0.0 }
 0x529   : > { %v10557_v41 = vmax.f32 %v10525_v43, 0.0  ;;  %v10393_v40 = vmul.f32 %v16143_v56, %v10314_v42  ;;  %v10317_v27 = vadd.f32 %v12721_v4, %v16106_v35  ;;  %v10308_v54 = vpop.f32.mrb[19].mxu1  ;;  %v11567_v43 = vunpack.c.h.bf16 %v11674_v62  ;;  %v11675_v4 = vld [vmem:[%s13444_s13 + $0x60] sm:$0xff]  }
 0x52a   : > { %v10555_v29 = vmax.f32 %v10523_v26, 0.0  ;;  %v10391_v38 = vmul.f32 %v16143_v56, %v10306_v51  ;;  %v10309_v14 = vadd.f32 %v10308_v54, %v16100_v48  ;;  %v11563_v26 = vunpack.c.h.bf16 %v11673_v37 }
 0x52b   : > { %v11622_v36 = vpack.c.bf16 %v10557_v41, %v10556_v23  ;;  %v10432_v47 = vadd.f32 %v16153_v57, %v10393_v40  ;;  %v10394_v50 = vmul.f32 %v16143_v56, %v10317_v27 }
 0x52c   : > { %v11617_v18 = vpack.c.bf16 %v10555_v29, %v10554_v58  ;;  %v10430_v39 = vadd.f32 %v16153_v57, %v10391_v38  ;;  %v10392_v35 = vmul.f32 %v16143_v56, %v10309_v14  ;;  %v11570_v14 = vunpack.c.l.bf16 %v11675_v4 }
 0x52d   : > { %11685 = vst [vmem:[%s16182_s9 + $0x38] sm:$0xff] %v11622_v36   ;;  %v10528_v13 = vadd.f32 %v11558_v17, %v10432_v47  ;;  %v10433_v55 = vadd.f32 %v16153_v57, %v10394_v50 }
 0x52e   : > { %11684 = vst [vmem:[%s16182_s9 + $0x30] sm:$0xff] %v11617_v18   ;;  %v10526_v48 = vadd.f32 %v11554_v16, %v10430_v39  ;;  %v10431_v61 = vadd.f32 %v16153_v57, %v10392_v35  ;;  %v12724_v10 = vpop.f32.mrb[20].mxu1  ;;  %v11676_v16 = vld [vmem:[%s13444_s13 + $0x68] sm:$0xff]  }
 0x52f   : > { %v10529_v5 = vadd.f32 %v11559_v6, %v10433_v55  ;;  %v10330_v49 = vadd.f32 %v12724_v10, %v16116_v3  ;;  %v10321_v44 = vpop.f32.mrb[21].mxu1  ;;  %v10560_v34 = vmax.f32 %v10528_v13, 0.0  ;;  %v11574_v29 = vunpack.c.l.bf16 %v11676_v16 }
 0x530   : > { %v10527_v22 = vadd.f32 %v11555_v15, %v10431_v61  ;;  %v10322_v60 = vadd.f32 %v10321_v44, %v16110_v30  ;;  %v12725_v19 = vpop.f32.mrb[22].mxu1  ;;  %v10558_v28 = vmax.f32 %v10526_v48, 0.0  ;;  %v11575_v37 = vunpack.c.h.bf16 %v11676_v16  ;;  %v11678_v44 = vld [vmem:[%s13444_s13 + $0x78] sm:$0xff]  }
 0x531   : > { %v10561_v2 = vmax.f32 %v10529_v5, 0.0  ;;  %v10397_v33 = vmul.f32 %v16143_v56, %v10330_v49  ;;  %v10333_v25 = vadd.f32 %v12725_v19, %v16118_v45  ;;  %v10324_v20 = vpop.f32.mrb[23].mxu1  ;;  %v11571_v10 = vunpack.c.h.bf16 %v11675_v4 }
 0x532   : > { %v10559_v7 = vmax.f32 %v10527_v22, 0.0  ;;  %v10395_v3 = vmul.f32 %v16143_v56, %v10322_v60  ;;  %v10325_v31 = vadd.f32 %v10324_v20, %v16112_v24  ;;  %v11677_v22 = vld [vmem:[%s13444_s13 + $0x70] sm:$0xff]   ;;  %s10748_s13 = sshll.u32 %s16182_s9, 4  ;;  %s16291_s13 = int_to_ptr.vmem [resolvable:$true] %s10748_s13 }
 0x533   : > { %v11632_v30 = vpack.c.bf16 %v10561_v2, %v10560_v34  ;;  %v10436_v11 = vadd.f32 %v16153_v57, %v10397_v33  ;;  %v10398_v32 = vmul.f32 %v16143_v56, %v10333_v25  ;;  %v11582_v33 = vunpack.c.l.bf16 %v11678_v44  ;;  %s13136_s15 = scalar_lea.vmem %s16291_s13, 2048  ;;  %p13143_p7 = scmp.lt.s32.totalorder %s16291_s13, %s13141_s14 }
 0x534   : > { %v11627_v42 = vpack.c.bf16 %v10559_v7, %v10558_v28  ;;  %v10434_v8 = vadd.f32 %v16153_v57, %v10395_v3  ;;  %v10396_v45 = vmul.f32 %v16143_v56, %v10325_v31  ;;  %v11578_v20 = vunpack.c.l.bf16 %v11677_v22  ;;  %p13137_p11 = scmp.ne.s32.totalorder %s16291_s13, %s13136_s15  ;;  %p13144_p9 = scmp.lt.s32.totalorder %s13142_s21, %s13136_s15 }
 0x535   : > { %11687 = vst [vmem:[%s16182_s9 + $0x48] sm:$0xff] %v11632_v30   ;;  %v10532_v17 = vadd.f32 %v11566_v59, %v10436_v11  ;;  %v10437_v51 = vadd.f32 %v16153_v57, %v10398_v32  ;;  %v11579_v16 = vunpack.c.h.bf16 %v11677_v22 }
 0x536   : > { %11686 = vst [vmem:[%s16182_s9 + $0x40] sm:$0xff] %v11627_v42   ;;  %v10530_v24 = vadd.f32 %v11562_v46, %v10434_v8  ;;  %v10435_v23 = vadd.f32 %v16153_v57, %v10396_v45  ;;  %v12728_v41 = vpop.f32.mrb[24].mxu1  ;;  %p13138_p2 = pnand %p13137_p11, %p16491_p0  ;;  %p13145_p12 = por %p13144_p9, %p13143_p7 }
 0x537   : > { %v10533_v40 = vadd.f32 %v11567_v43, %v10437_v51  ;;  %v10346_v27 = vadd.f32 %v12728_v41, %v16128_v21  ;;  %v10337_v54 = vpop.f32.mrb[25].mxu1  ;;  %v10564_v47 = vmax.f32 %v10532_v17, 0.0 }
 0x538   : > { %v10531_v58 = vadd.f32 %v11563_v26, %v10435_v23  ;;  %v10338_v38 = vadd.f32 %v10337_v54, %v16122_v63  ;;  %v12729_v36 = vpop.f32.mrb[26].mxu1  ;;  %v10562_v35 = vmax.f32 %v10530_v24, 0.0  ;;  %v11583_v26 = vunpack.c.h.bf16 %v11678_v44  ;;  %p13139_p3 = pneg %p13138_p2 }
 0x539   : > { %v10565_v50 = vmax.f32 %v10533_v40, 0.0  ;;  %v10401_v6 = vmul.f32 %v16143_v56, %v10346_v27  ;;  %v10349_v18 = vadd.f32 %v12729_v36, %v16130_v9  ;;  %v10340_v39 = vpop.f32.mrb[27].mxu1 }
 0x53a   : > { %v10563_v15 = vmax.f32 %v10531_v58, 0.0  ;;  %v10399_v21 = vmul.f32 %v16143_v56, %v10338_v38  ;;  %v10341_v13 = vadd.f32 %v10340_v39, %v16124_v52  ;;  %p13146_p1 = pnand %p13145_p12, %p13139_p3 }
 0x53b   : > { %v11642_v63 = vpack.c.bf16 %v10565_v50, %v10564_v47  ;;  %v10440_v55 = vadd.f32 %v16153_v57, %v10401_v6  ;;  %v10402_v62 = vmul.f32 %v16143_v56, %v10349_v18 }
 0x53c   : > { %v11637_v48 = vpack.c.bf16 %v10563_v15, %v10562_v35  ;;  %v10438_v61 = vadd.f32 %v16153_v57, %v10399_v21  ;;  %v10400_v9 = vmul.f32 %v16143_v56, %v10341_v13 }
 0x53d   : > { %11689 = vst [vmem:[%s16182_s9 + $0x58] sm:$0xff] %v11642_v63   ;;  %v10536_v5 = vadd.f32 %v11574_v29, %v10440_v55  ;;  %v10441_v49 = vadd.f32 %v16153_v57, %v10402_v62 }
 0x53e   : > { %11688 = vst [vmem:[%s16182_s9 + $0x50] sm:$0xff] %v11637_v48   ;;  %v10534_v52 = vadd.f32 %v11570_v14, %v10438_v61  ;;  %v10439_v59 = vadd.f32 %v16153_v57, %v10400_v9  ;;  %v12732_v60 = vpop.f32.mrb[28].mxu1 }
 0x53f   : > { %v10537_v46 = vadd.f32 %v11575_v37, %v10441_v49  ;;  %v10362_v19 = vadd.f32 %v12732_v60, %v16146_v0  ;;  %v10353_v34 = vpop.f32.mrb[29].mxu1  ;;  %v10568_v7 = vmax.f32 %v10536_v5, 0.0 }
 0x540   : > { %v10535_v2 = vadd.f32 %v11571_v10, %v10439_v59  ;;  %v10354_v25 = vadd.f32 %v10353_v34, %v16134_v1  ;;  %v12733_v28 = vpop.f32.mrb[30].mxu1  ;;  %v10566_v32 = vmax.f32 %v10534_v52, 0.0 }
 0x541   : > { %v10569_v3 = vmax.f32 %v10537_v46, 0.0  ;;  %v10405_v31 = vmul.f32 %v16143_v56, %v10362_v19  ;;  %v10365_v30 = vadd.f32 %v12733_v28, %v16156_v53  ;;  %v10356_v11 = vpop.f32.mrb[31].mxu1 }
 0x542   : > { %v10567_v43 = vmax.f32 %v10535_v2, 0.0  ;;  %v10403_v0 = vmul.f32 %v16143_v56, %v10354_v25  ;;  %v10357_v42 = vadd.f32 %v10356_v11, %v16136_v12 }
 0x543   : > { %v11652_v8 = vpack.c.bf16 %v10569_v3, %v10568_v7  ;;  %v10444_v1 = vadd.f32 %v16153_v57, %v10405_v31  ;;  %v10406_v45 = vmul.f32 %v16143_v56, %v10365_v30 }
 0x544   : > { %v11647_v17 = vpack.c.bf16 %v10567_v43, %v10566_v32  ;;  %v10442_v51 = vadd.f32 %v16153_v57, %v10403_v0  ;;  %v10404_v53 = vmul.f32 %v16143_v56, %v10357_v42 }
 0x545   : > { %11691 = vst [vmem:[%s16182_s9 + $0x68] sm:$0xff] %v11652_v8   ;;  %v10540_v4 = vadd.f32 %v11582_v33, %v10444_v1  ;;  %v10445_v24 = vadd.f32 %v16153_v57, %v10406_v45 }
 0x546   : > { %11690 = vst [vmem:[%s16182_s9 + $0x60] sm:$0xff] %v11647_v17   ;;  %v10538_v12 = vadd.f32 %v11578_v20, %v10442_v51  ;;  %v10443_v23 = vadd.f32 %v16153_v57, %v10404_v53 }
 0x547   : > { %v10541_v41 = vadd.f32 %v11583_v26, %v10445_v24  ;;  %v10572_v27 = vmax.f32 %v10540_v4, 0.0 }
 0x548   : > { %v10539_v40 = vadd.f32 %v11579_v16, %v10443_v23  ;;  %v10570_v56 = vmax.f32 %v10538_v12, 0.0 }
 0x549   : > { %v10573_v54 = vmax.f32 %v10541_v41, 0.0 }
 0x54a   : > { %v10571_v58 = vmax.f32 %v10539_v40, 0.0 }
 0x54b   : > { %v11662_v29 = vpack.c.bf16 %v10573_v54, %v10572_v27 }
 0x54c   : > { %v11657_v57 = vpack.c.bf16 %v10571_v58, %v10570_v56 }
 0x54d   : > { %11693 = vst [vmem:[%s16182_s9 + $0x78] sm:$0xff] %v11662_v29  }
 0x54e   : > { %11692 = vst [vmem:[%s16182_s9 + $0x70] sm:$0xff] %v11657_v57  }
 0x54f   : > { %13149 = shalt.err (!%p13146_p1)
}
 0x550   : > { %s13150_s23 = scalar_lea.hbm %s16289_s10, 2048  ;;  %s13154_s9 = scalar_lea.hbm %s16344_s7, 4096 }
 0x551   : > { %p13151_p13 = scmp.ne.s32.totalorder %s16289_s10, %s13150_s23  ;;  %p13155_p4 = scmp.lt.u32.totalorder %s16289_s10, %s16344_s7 }
 0x552   : > { %p13156_p5 = scmp.lt.u32.totalorder %s13154_s9, %s13150_s23  ;;  %p13158_p11 = scmp.lt.u32.totalorder %s13150_s23, %s16289_s10 }
 0x553   : > { %p13152_p6 = pnand %p13151_p13, %p16491_p0 }
 0x554   : > { %p13157_p8 = por %p13156_p5, %p13155_p4 }
 0x555   : > { %p13153_p10 = pneg %p13152_p6 }
 0x556   : > { %p13159_p2 = por %p13158_p11, %p13157_p8 }
 0x558   : > { %p13160_p3 = pnand %p13159_p2, %p13153_p10 }
 0x55a   : > { %13163 = shalt.err (!%p13160_p3)
}
 0x55b   : > { %s13215_s11 = smov 64   ;;  %s13216_s15 = smov 4  }
 0x55c   : > { %12744 = dma.vmem_to_hbm [thread:$0]  (%p16491_p0), %s16291_s13, 2048, %s16289_s10, %s10735_s28, %s13215_s11, %s13215_s11, %s13216_s15  }
 0x55d PF: > { %s10763_s19 = sand.u32 1, %s13194_s24   ;;  %p16492_p7 = scmp.ne.s32.totalorder %s16361_s8, 0 }
 0x55e   : > { %p16493_p9 = scmp.ge.s32.totalorder %s13206_s27, 2  ;;  %s10764_s14 = scalar_lea.sflag [#allocation7], %s10763_s19 }
 0x560   : > { %p12758_p12 = pnand %p16493_p9, %p16492_p7 }
 0x562   : > { %13189 = dma.done.wait (!%p12758_p12), %s10764_s14, 2048  }
 0x563   : > { %13191 = vsyncadd (!%p12758_p12), %s10764_s14, 4294965248  ;;  %p21_p1 = scmp.ge.s32.totalorder %s13373_s12, 4   ;;  %s16494_s24 = smov %s13198_s25 }
 0x564   : > { %s16495_s25 = smov %s13202_s26  ;;  %s16496_s26 = smov %s13389_s17 }
 0x565   : > { %s16497_s27 = smov %s13373_s12  ;;  %23 = sbr.rel (!%p21_p1) target bundleno = 6 (0x6), region = 107 }
 0x56c   :  { %10769 = vsyncpa [#allocation6], 1 }
 0x56d   :  { %10771 = vsyncpa [#allocation6 + $0x1], 1 }
 0x56e   :  { %10772 = vsyncpa [#allocation9], 1 }
 0x56f   :  { %10773 = vsyncpa [#allocation7], 1 }
 0x570   :  { %10775 = vsyncpa [#allocation7 + $0x1], 1 }

</bundles_post_ra>
